<compile_context>
chip_gen: v6e
topology: v6e:2x2x1
jax: 0.10.0
libtpu: 0.0.40
codegen_flags: <defaults>
</compile_context>

<pallas_src>
import functools

import jax
import jax.numpy as jnp
from jax.experimental import pallas as pl
from jax.experimental.pallas import tpu as pltpu

EPS = 1e-5  # nn.LayerNorm default


def _layernorm(x, gamma, beta):
    mu = jnp.mean(x, axis=-1, keepdims=True)
    var = jnp.mean((x - mu) ** 2, axis=-1, keepdims=True)
    return (x - mu) * jax.lax.rsqrt(var + EPS) * gamma + beta


# ----------------------------------------------------------------------------
# Kernel 1 (fused): all three modality projection heads (Linear -> ReLU -> Linear)
# in a single pallas_call. The big visual w1 stays in HBM and is manually copied
# into a VMEM scratch so its DMA overlaps the text/audio projection compute.
# ----------------------------------------------------------------------------
def _proj_kernel(xt_ref, wt1_ref, bt1_ref, wt2_ref, bt2_ref,
                 xa_ref, wa1_ref, ba1_ref, wa2_ref, ba2_ref,
                 xv_ref, wv1_hbm_ref, bv1_ref, wv2_ref, bv2_ref,
                 t_out_ref, a_out_ref, v_out_ref,
                 wv1_vmem, dma_sem):
    # Start the largest weight transfer first; it overlaps the text/audio MLPs below.
    cp = pltpu.make_async_copy(wv1_hbm_ref, wv1_vmem, dma_sem)
    cp.start()

    def mlp(x, w1, b1, w2, b2):
        h = jnp.dot(x.astype(jnp.bfloat16), w1,
                    preferred_element_type=jnp.float32) + b1
        h = jnp.maximum(h, 0.0)
        return jnp.dot(h.astype(jnp.bfloat16), w2,
                       preferred_element_type=jnp.float32) + b2

    t_out_ref[...] = mlp(xt_ref[...], wt1_ref[...], bt1_ref[...],
                         wt2_ref[...], bt2_ref[...])
    a_out_ref[...] = mlp(xa_ref[...], wa1_ref[...], ba1_ref[...],
                         wa2_ref[...], ba2_ref[...])
    cp.wait()
    v_out_ref[...] = mlp(xv_ref[...], wv1_vmem[...], bv1_ref[...],
                         wv2_ref[...], bv2_ref[...])


def fused_projections(text2d, audio2d, visual2d, pt, pa, pv):
    nt, na, nv = text2d.shape[0], audio2d.shape[0], visual2d.shape[0]
    D = pt["w2"].shape[1]

    args = (text2d, pt["w1"], pt["b1"].reshape(1, -1), pt["w2"], pt["b2"].reshape(1, -1),
            audio2d, pa["w1"], pa["b1"].reshape(1, -1), pa["w2"], pa["b2"].reshape(1, -1),
            visual2d, pv["w1"], pv["b1"].reshape(1, -1), pv["w2"], pv["b2"].reshape(1, -1))
    VISUAL_W1_IDX = 11  # stays in HBM; manually DMA'd in-kernel

    in_specs = []
    for idx, a in enumerate(args):
        if idx == VISUAL_W1_IDX:
            in_specs.append(pl.BlockSpec(memory_space=pl.ANY))
        else:
            in_specs.append(pl.BlockSpec(a.shape, lambda i: (0, 0)))

    out_specs = [pl.BlockSpec((nt, D), lambda i: (0, 0)),
                 pl.BlockSpec((na, D), lambda i: (0, 0)),
                 pl.BlockSpec((nv, D), lambda i: (0, 0))]
    out_shape = (jax.ShapeDtypeStruct((nt, D), jnp.float32),
                 jax.ShapeDtypeStruct((na, D), jnp.float32),
                 jax.ShapeDtypeStruct((nv, D), jnp.float32))

    return pl.pallas_call(
        _proj_kernel,
        grid=(1,),
        in_specs=in_specs,
        out_specs=out_specs,
        out_shape=out_shape,
        scratch_shapes=[pltpu.VMEM(pv["w1"].shape, pv["w1"].dtype),
                        pltpu.SemaphoreType.DMA(())],
        compiler_params=pltpu.CompilerParams(dimension_semantics=("arbitrary",)),
    )(*args)


# ----------------------------------------------------------------------------
# Kernel 2 (fused): ALL cross-modal transformer blocks in one pallas_call.
#   grid = (num_active_pairs,). The stacked modality tensor (3, B, Lmax, D) is DMA'd
#   once (constant index_map) and the q / kv modalities are selected per grid step
#   from the scalar-prefetched selectors. Heads are batched (B*H batch dim), all
#   MXU inputs are bf16 with f32 accumulation, and the out-projection is a single
#   K=128 matmul. Outputs: mean-pooled (P, B, D) and the scalar mean of the
#   head-averaged attention weights in a lane-dense (P, 8, 128) tile.
# ----------------------------------------------------------------------------
def _fused_cross_kernel(qs_ref, ks_ref, ql_ref, kl_ref,
                        modal_ref,
                        wq_ref, bq_ref, wk_ref, bk_ref, wv_ref, bv_ref,
                        wo_ref, bo_ref, g1_ref, be1_ref,
                        wf1_ref, bf1_ref, wf2_ref, bf2_ref, g2_ref, be2_ref,
                        pooled_ref, attn_ref, *, n_heads, needs_mask):
    p_idx = pl.program_id(0)

    q3 = modal_ref[qs_ref[p_idx]]      # (B, Lq, D) f32, dynamic leading-axis select
    kv3 = modal_ref[ks_ref[p_idx]]     # (B, Lk, D) f32
    B, Lq, D = q3.shape
    Lk = kv3.shape[1]
    H = n_heads
    dh = D // H
    scale = 1.0 / float(dh) ** 0.5

    q2 = q3.reshape(B * Lq, D)
    kv2 = kv3.reshape(B * Lk, D)

    def lin(x, w_ref, b_ref):
        return jnp.dot(x.astype(jnp.bfloat16), w_ref[0],
                       preferred_element_type=jnp.float32) + b_ref[0]

    def to_heads(x, L):                # (B*L, D) f32 -> (B*H, L, dh) bf16
        return (x.astype(jnp.bfloat16)
                 .reshape(B, L, H, dh)
                 .transpose(0, 2, 1, 3)
                 .reshape(B * H, L, dh))

    Qh = to_heads(lin(q2, wq_ref, bq_ref), Lq)
    Kh = to_heads(lin(kv2, wk_ref, bk_ref), Lk)
    Vh = to_heads(lin(kv2, wv_ref, bv_ref), Lk)

    # Batched-head attention scores: (B*H, Lq, Lk), bf16 inputs, f32 accumulation.
    s = jnp.einsum('bqd,bkd->bqk', Qh, Kh,
                   preferred_element_type=jnp.float32) * scale

    if needs_mask:
        qlen = ql_ref[p_idx]
        kvlen = kl_ref[p_idx]
        kv_valid = jax.lax.broadcasted_iota(jnp.int32, (B * H, Lq, Lk), 2) < kvlen
        s = jnp.where(kv_valid, s, -1e30)

    s = s - jnp.max(s, axis=-1, keepdims=True)
    e = jnp.exp(s)
    probs = e / jnp.sum(e, axis=-1, keepdims=True)        # exact softmax, f32

    ctx = jnp.einsum('bqk,bkd->bqd', probs.astype(jnp.bfloat16), Vh,
                     preferred_element_type=jnp.float32)  # (B*H, Lq, dh) f32
    ctx2 = (ctx.reshape(B, H, Lq, dh)
               .transpose(0, 2, 1, 3)
               .reshape(B * Lq, D))

    # Single K=128 output projection.
    attn_out = jnp.dot(ctx2.astype(jnp.bfloat16), wo_ref[0],
                       preferred_element_type=jnp.float32) + bo_ref[0]

    x = _layernorm(q2 + attn_out, g1_ref[0], be1_ref[0])
    hdn = jnp.maximum(
        jnp.dot(x.astype(jnp.bfloat16), wf1_ref[0],
                preferred_element_type=jnp.float32) + bf1_ref[0], 0.0)
    ffn = jnp.dot(hdn.astype(jnp.bfloat16), wf2_ref[0],
                  preferred_element_type=jnp.float32) + bf2_ref[0]
    out = _layernorm(x + ffn, g2_ref[0], be2_ref[0]).reshape(B, Lq, D)

    if needs_mask:
        qlen_f = qlen.astype(jnp.float32)
        kvlen_f = kvlen.astype(jnp.float32)
        q_valid = (jax.lax.broadcasted_iota(jnp.int32, (B, Lq, 1), 1)
                   < qlen).astype(jnp.float32)
        pooled_ref[0] = jnp.sum(out * q_valid, axis=1) / qlen_f

        qh_valid = (jax.lax.broadcasted_iota(jnp.int32, (B * H, Lq, 1), 1)
                    < qlen).astype(jnp.float32)
        masked = (probs * kv_valid.astype(jnp.float32) * qh_valid)
        row = jnp.sum(masked.reshape(B * H * Lq, Lk), axis=-1, keepdims=True)
        tot = jnp.sum(row, axis=0, keepdims=True)
        attn_mean = tot / (float(H * B) * qlen_f * kvlen_f)
    else:
        # All sequence lengths equal the padded length -> no mask work needed.
        pooled_ref[0] = jnp.sum(out, axis=1) * (1.0 / float(Lq))
        row = jnp.sum(probs.reshape(B * H * Lq, Lk), axis=-1, keepdims=True)
        tot = jnp.sum(row, axis=0, keepdims=True)
        attn_mean = tot * (1.0 / float(H * B * Lq * Lk))

    attn_ref[0] = jnp.broadcast_to(attn_mean, (8, 128))


def fused_cross_blocks(modal, q_sel, kv_sel, q_len, kv_len, sp, n_heads, needs_mask):
    n_mod, B, Lmax, D = modal.shape
    P = int(q_sel.shape[0])
    dff = sp["wf1"].shape[-1]

    def w_map(p, *_):
        return (p, 0, 0)

    def modal_map(p, *_):
        return (0, 0, 0, 0)      # constant: modality stack DMA'd once, stays resident

    in_specs = [
        pl.BlockSpec((n_mod, B, Lmax, D), modal_map),   # full modality stack
        pl.BlockSpec((1, D, D), w_map),                 # wq
        pl.BlockSpec((1, 1, D), w_map),                 # bq
        pl.BlockSpec((1, D, D), w_map),                 # wk
        pl.BlockSpec((1, 1, D), w_map),                 # bk
        pl.BlockSpec((1, D, D), w_map),                 # wv
        pl.BlockSpec((1, 1, D), w_map),                 # bv
        pl.BlockSpec((1, D, D), w_map),                 # wo
        pl.BlockSpec((1, 1, D), w_map),                 # bo
        pl.BlockSpec((1, 1, D), w_map),                 # g1
        pl.BlockSpec((1, 1, D), w_map),                 # be1
        pl.BlockSpec((1, D, dff), w_map),               # wf1
        pl.BlockSpec((1, 1, dff), w_map),               # bf1
        pl.BlockSpec((1, dff, D), w_map),               # wf2
        pl.BlockSpec((1, 1, D), w_map),                 # bf2
        pl.BlockSpec((1, 1, D), w_map),                 # g2
        pl.BlockSpec((1, 1, D), w_map),                 # be2
    ]
    out_specs = [
        pl.BlockSpec((1, B, D), w_map),                 # pooled (lane-dense, D=128)
        pl.BlockSpec((1, 8, 128), w_map),               # attention-mean scalar tile
    ]
    grid_spec = pltpu.PrefetchScalarGridSpec(
        num_scalar_prefetch=4,
        grid=(P,),
        in_specs=in_specs,
        out_specs=out_specs,
    )
    # TODO(synk): on v7x (2 TensorCores) consider pltpu.CORE_PARALLEL on the pair axis to
    # split the 6 pairs across cores; "parallel" is kept here for portability.
    pooled, attn_mean = pl.pallas_call(
        functools.partial(_fused_cross_kernel, n_heads=n_heads, needs_mask=needs_mask),
        grid_spec=grid_spec,
        out_shape=(jax.ShapeDtypeStruct((P, B, D), jnp.float32),
                   jax.ShapeDtypeStruct((P, 8, 128), jnp.float32)),
        compiler_params=pltpu.CompilerParams(dimension_semantics=("parallel",)),
    )(q_sel, kv_sel, q_len, kv_len, modal,
      sp["wq"], sp["bq"], sp["wk"], sp["bk"], sp["wv"], sp["bv"],
      sp["wo"], sp["bo"], sp["g1"], sp["be1"],
      sp["wf1"], sp["bf1"], sp["wf2"], sp["bf2"], sp["g2"], sp["be2"])
    return pooled, attn_mean


# ----------------------------------------------------------------------------
# Kernel 3: fusion LayerNorm + classifier head (Linear -> ReLU -> Linear)
# ----------------------------------------------------------------------------
def _fusion_kernel(x_ref, g_ref, b_ref, w1_ref, b1_ref, w2_ref, b2_ref, o_ref):
    x = _layernorm(x_ref[...], g_ref[...], b_ref[...])
    h = jnp.maximum(
        jnp.dot(x.astype(jnp.bfloat16), w1_ref[...],
                preferred_element_type=jnp.float32) + b1_ref[...], 0.0)
    o_ref[...] = jnp.dot(h.astype(jnp.bfloat16), w2_ref[...],
                         preferred_element_type=jnp.float32) + b2_ref[...]


def fusion_head(x, p):
    B = x.shape[0]
    ncls = p["w2"].shape[1]
    args = (x, p["g"].reshape(1, -1), p["b"].reshape(1, -1),
            p["w1"], p["b1"].reshape(1, -1), p["w2"], p["b2"].reshape(1, -1))
    return pl.pallas_call(
        _fusion_kernel,
        grid=(1,),
        in_specs=[pl.BlockSpec(a.shape, lambda i: (0, 0)) for a in args],
        out_specs=pl.BlockSpec((B, ncls), lambda i: (0, 0)),
        out_shape=jax.ShapeDtypeStruct((B, ncls), jnp.float32),
        compiler_params=pltpu.CompilerParams(dimension_semantics=("arbitrary",)),
    )(*args)


# ----------------------------------------------------------------------------
# Deterministic synthetic parameter initialization (shapes from __init__)
#   Linear weights stored in bf16 (f32 accumulation in-kernel); biases / LN params in f32.
# ----------------------------------------------------------------------------
def _lin(keys, din, dout):
    w = (jax.random.normal(next(keys), (din, dout), jnp.float32) * 0.02).astype(jnp.bfloat16)
    b = jax.random.normal(next(keys), (dout,), jnp.float32) * 0.01
    return w, b


def _proj_params(keys, din, dh, dout):
    w1, b1 = _lin(keys, din, dh)
    w2, b2 = _lin(keys, dh, dout)
    return dict(w1=w1, b1=b1, w2=w2, b2=b2)


def _block_params(keys, D):
    p = {}
    for wname, din, dout in [("wq", D, D), ("wk", D, D), ("wv", D, D), ("wo", D, D),
                             ("wf1", D, 4 * D), ("wf2", 4 * D, D)]:
        w, b = _lin(keys, din, dout)
        p[wname] = w
        p["b" + wname[1:]] = b
    p["g1"] = jnp.ones((D,), jnp.float32)
    p["be1"] = jnp.zeros((D,), jnp.float32)
    p["g2"] = jnp.ones((D,), jnp.float32)
    p["be2"] = jnp.zeros((D,), jnp.float32)
    return p


def init_params(key, dim_text=300, dim_audio=32, dim_visual=2048, dim_model=128):
    keys = iter(jax.random.split(key, 256))
    params = {
        "text_proj": _proj_params(keys, dim_text, 512, dim_model),
        "audio_proj": _proj_params(keys, dim_audio, 128, dim_model),
        "visual_proj": _proj_params(keys, dim_visual, 1024, dim_model),
        "blocks": {name: _block_params(keys, dim_model)
                   for name in ["text_audio", "text_visual", "audio_text",
                                "audio_visual", "visual_text", "visual_audio"]},
    }
    cw1, cb1 = _lin(keys, dim_model * 6, 256)
    cw2, cb2 = _lin(keys, 256, 7)
    params["fusion_cls"] = dict(
        g=jnp.ones((dim_model * 6,), jnp.float32),
        b=jnp.zeros((dim_model * 6,), jnp.float32),
        w1=cw1, b1=cb1, w2=cw2, b2=cb2,
    )
    return params


def _stack_block_params(blocks, names):
    mats = ["wq", "wk", "wv", "wo", "wf1", "wf2"]
    vecs = ["bq", "bk", "bv", "bo", "bf1", "bf2", "g1", "be1", "g2", "be2"]
    out = {}
    for k in mats:
        out[k] = jnp.stack([blocks[n][k] for n in names], axis=0)              # (P, din, dout)
    for k in vecs:
        out[k] = jnp.stack([blocks[n][k] for n in names], axis=0)[:, None, :]  # (P, 1, dout)
    return out


# ----------------------------------------------------------------------------
# Forward pass (mirrors CrossModalTransformer.forward; dropout = identity)
# ----------------------------------------------------------------------------
def cross_modal_transformer_forward(params, text, audio, visual, mask=None, n_heads=4):
    B = text.shape[0]
    Lt, La, Lv = text.shape[1], audio.shape[1], visual.shape[1]
    D = params["text_proj"]["w2"].shape[1]

    # all three projections in a single pallas_call (visual w1 DMA overlapped)
    t2, a2, v2 = fused_projections(
        text.reshape(B * Lt, -1), audio.reshape(B * La, -1), visual.reshape(B * Lv, -1),
        params["text_proj"], params["audio_proj"], params["visual_proj"])
    t = t2.reshape(B, Lt, D)
    a = a2.reshape(B, La, D)
    v = v2.reshape(B, Lv, D)

    if mask is None:
        mask = [1] * 6

    # modality stack (pad to common length; masking only if lengths actually differ)
    Ls = (Lt, La, Lv)
    Lmax = max(Ls)
    needs_mask = not (Lt == La == Lv)

    def pad(x):
        if x.shape[1] == Lmax:
            return x
        return jnp.pad(x, ((0, 0), (0, Lmax - x.shape[1]), (0, 0)))

    modal = jnp.stack([pad(t), pad(a), pad(v)], axis=0)   # (3, B, Lmax, D)

    pair_defs = [("text->audio", "text_audio", 0, 1),
                 ("text->visual", "text_visual", 0, 2),
                 ("audio->text", "audio_text", 1, 0),
                 ("audio->visual", "audio_visual", 1, 2),
                 ("visual->text", "visual_text", 2, 0),
                 ("visual->audio", "visual_audio", 2, 1)]
    active = [pd for m, pd in zip(mask, pair_defs) if m]
    if len(active) == 0:
        raise ValueError("At least one path must be active in the mask.")

    q_sel = jnp.array([q for _, _, q, _ in active], jnp.int32)
    kv_sel = jnp.array([k for _, _, _, k in active], jnp.int32)
    q_len = jnp.array([Ls[q] for _, _, q, _ in active], jnp.int32)
    kv_len = jnp.array([Ls[k] for _, _, _, k in active], jnp.int32)

    names = [n for _, n, _, _ in active]
    stacked = _stack_block_params(params["blocks"], names)

    pooled_arr, attn_arr = fused_cross_blocks(
        modal, q_sel, kv_sel, q_len, kv_len, stacked, n_heads, needs_mask)

    pooled = [pooled_arr[i] for i in range(len(active))]
    log = {logname: attn_arr[i, 0, 0] for i, (logname, _, _, _) in enumerate(active)}

    while len(pooled) < 6:
        pooled.append(jnp.zeros_like(pooled[0]))

    fusion = jnp.concatenate(pooled, axis=-1)            # (B, 6*dim_model)
    logits = fusion_head(fusion, params["fusion_cls"])   # (B, 7)
    return logits, log


if __name__ == "__main__":
    key = jax.random.PRNGKey(0)
    kp, kt, ka, kvis = jax.random.split(key, 4)

    params = init_params(kp)

    B, Lt, La, Lv = 2, 8, 8, 8
    text = jax.random.normal(kt, (B, Lt, 300), jnp.float32)
    audio = jax.random.normal(ka, (B, La, 32), jnp.float32)
    visual = jax.random.normal(kvis, (B, Lv, 2048), jnp.float32)

    logits, log = cross_modal_transformer_forward(params, text, audio, visual)
    logits = jax.block_until_ready(logits)
    log = {k: float(vv) for k, vv in log.items()}

    assert logits.shape == (B, 7) and logits.dtype == jnp.float32
    assert len(log) == 6
    print("KERNEL_OK")
</pallas_src>

<mosaic_0001>
module attributes {stable_mosaic.version = 11 : i64} {
  func.func @_proj_kernel(%arg0: i32, %arg1: memref<16x300xf32, #tpu.memory_space<vmem>>, %arg2: memref<300x512xbf16, #tpu.memory_space<vmem>>, %arg3: memref<1x512xf32, #tpu.memory_space<vmem>>, %arg4: memref<512x128xbf16, #tpu.memory_space<vmem>>, %arg5: memref<1x128xf32, #tpu.memory_space<vmem>>, %arg6: memref<16x32xf32, #tpu.memory_space<vmem>>, %arg7: memref<32x128xbf16, #tpu.memory_space<vmem>>, %arg8: memref<1x128xf32, #tpu.memory_space<vmem>>, %arg9: memref<128x128xbf16, #tpu.memory_space<vmem>>, %arg10: memref<1x128xf32, #tpu.memory_space<vmem>>, %arg11: memref<16x2048xf32, #tpu.memory_space<vmem>>, %arg12: memref<2048x1024xbf16, #tpu.memory_space<any>>, %arg13: memref<1x1024xf32, #tpu.memory_space<vmem>>, %arg14: memref<1024x128xbf16, #tpu.memory_space<vmem>>, %arg15: memref<1x128xf32, #tpu.memory_space<vmem>>, %arg16: memref<16x128xf32, #tpu.memory_space<vmem>>, %arg17: memref<16x128xf32, #tpu.memory_space<vmem>>, %arg18: memref<16x128xf32, #tpu.memory_space<vmem>>, %arg19: memref<2048x1024xbf16, #tpu.memory_space<vmem>>, %arg20: memref<!tpu.dma_semaphore, #tpu.memory_space<semaphore_mem>>) attributes {dimension_semantics = [#tpu.dimension_semantics<arbitrary>], iteration_bounds = array<i64: 1>, scalar_prefetch = 0 : i64, scratch_operands = 2 : i64, tpu.core_type = #tpu.core_type<tc>, window_params = [{pipeline_mode = #tpu.pipeline_mode<synchronous>, transform_indices = @transform_0, window_bounds = array<i64: 16, 300>}, {pipeline_mode = #tpu.pipeline_mode<synchronous>, transform_indices = @transform_1, window_bounds = array<i64: 300, 512>}, {pipeline_mode = #tpu.pipeline_mode<synchronous>, transform_indices = @transform_2, window_bounds = array<i64: 1, 512>}, {pipeline_mode = #tpu.pipeline_mode<synchronous>, transform_indices = @transform_3, window_bounds = array<i64: 512, 128>}, {pipeline_mode = #tpu.pipeline_mode<synchronous>, transform_indices = @transform_4, window_bounds = array<i64: 1, 128>}, {pipeline_mode = #tpu.pipeline_mode<synchronous>, transform_indices = @transform_5, window_bounds = array<i64: 16, 32>}, {pipeline_mode = #tpu.pipeline_mode<synchronous>, transform_indices = @transform_6, window_bounds = array<i64: 32, 128>}, {pipeline_mode = #tpu.pipeline_mode<synchronous>, transform_indices = @transform_7, window_bounds = array<i64: 1, 128>}, {pipeline_mode = #tpu.pipeline_mode<synchronous>, transform_indices = @transform_8, window_bounds = array<i64: 128, 128>}, {pipeline_mode = #tpu.pipeline_mode<synchronous>, transform_indices = @transform_9, window_bounds = array<i64: 1, 128>}, {pipeline_mode = #tpu.pipeline_mode<synchronous>, transform_indices = @transform_10, window_bounds = array<i64: 16, 2048>}, {}, {pipeline_mode = #tpu.pipeline_mode<synchronous>, transform_indices = @transform_12, window_bounds = array<i64: 1, 1024>}, {pipeline_mode = #tpu.pipeline_mode<synchronous>, transform_indices = @transform_13, window_bounds = array<i64: 1024, 128>}, {pipeline_mode = #tpu.pipeline_mode<synchronous>, transform_indices = @transform_14, window_bounds = array<i64: 1, 128>}, {pipeline_mode = #tpu.pipeline_mode<synchronous>, transform_indices = @transform_15, window_bounds = array<i64: 16, 128>}, {pipeline_mode = #tpu.pipeline_mode<synchronous>, transform_indices = @transform_16, window_bounds = array<i64: 16, 128>}, {pipeline_mode = #tpu.pipeline_mode<synchronous>, transform_indices = @transform_17, window_bounds = array<i64: 16, 128>}]} {
    tpu.enqueue_dma source(%arg12 : memref<2048x1024xbf16, #tpu.memory_space<any>>) target(%arg19 : memref<2048x1024xbf16, #tpu.memory_space<vmem>>) target_semaphore(%arg20 : memref<!tpu.dma_semaphore, #tpu.memory_space<semaphore_mem>>)
    %c0 = arith.constant 0 : index
    %c0_0 = arith.constant 0 : index
    %0 = vector.load %arg1[%c0, %c0_0] : memref<16x300xf32, #tpu.memory_space<vmem>>, vector<16x300xf32>
    %c0_1 = arith.constant 0 : index
    %c0_2 = arith.constant 0 : index
    %1 = vector.load %arg2[%c0_1, %c0_2] : memref<300x512xbf16, #tpu.memory_space<vmem>>, vector<300x512xbf16>
    %c0_3 = arith.constant 0 : index
    %c0_4 = arith.constant 0 : index
    %2 = vector.load %arg3[%c0_3, %c0_4] : memref<1x512xf32, #tpu.memory_space<vmem>>, vector<1x512xf32>
    %c0_5 = arith.constant 0 : index
    %c0_6 = arith.constant 0 : index
    %3 = vector.load %arg4[%c0_5, %c0_6] : memref<512x128xbf16, #tpu.memory_space<vmem>>, vector<512x128xbf16>
    %c0_7 = arith.constant 0 : index
    %c0_8 = arith.constant 0 : index
    %4 = vector.load %arg5[%c0_7, %c0_8] : memref<1x128xf32, #tpu.memory_space<vmem>>, vector<1x128xf32>
    %5 = arith.truncf %0 : vector<16x300xf32> to vector<16x300xbf16>
    %cst = arith.constant dense<0.000000e+00> : vector<16x512xf32>
    %6 = tpu.matmul %5, %1, %cst {dimension_numbers = #tpu.dot_dimension_numbers<[1], [0], [0], [1], [0, 0, 1, 1], [], []>} : vector<16x300xbf16>, vector<300x512xbf16>, vector<16x512xf32> -> vector<16x512xf32>
    %7 = vector.broadcast %2 : vector<1x512xf32> to vector<16x512xf32>
    %8 = arith.addf %6, %7 : vector<16x512xf32>
    %cst_9 = arith.constant 0.000000e+00 : f32
    %9 = vector.broadcast %cst_9 : f32 to vector<16x512xf32>
    %10 = arith.maximumf %8, %9 : vector<16x512xf32>
    %11 = arith.truncf %10 : vector<16x512xf32> to vector<16x512xbf16>
    %cst_10 = arith.constant dense<0.000000e+00> : vector<16x128xf32>
    %12 = tpu.matmul %11, %3, %cst_10 {dimension_numbers = #tpu.dot_dimension_numbers<[1], [0], [0], [1], [0, 0, 1, 1], [], []>} : vector<16x512xbf16>, vector<512x128xbf16>, vector<16x128xf32> -> vector<16x128xf32>
    %13 = vector.broadcast %4 : vector<1x128xf32> to vector<16x128xf32>
    %14 = arith.addf %12, %13 : vector<16x128xf32>
    %c0_11 = arith.constant 0 : index
    %c0_12 = arith.constant 0 : index
    %15 = vector.load %arg16[%c0_11, %c0_12] : memref<16x128xf32, #tpu.memory_space<vmem>>, vector<16x128xf32>
    tpu.vector_store %arg16[%c0_11, %c0_12], %14 {strides = array<i32>} : memref<16x128xf32, #tpu.memory_space<vmem>>, vector<16x128xf32>,
    %c0_13 = arith.constant 0 : index
    %c0_14 = arith.constant 0 : index
    %16 = vector.load %arg6[%c0_13, %c0_14] : memref<16x32xf32, #tpu.memory_space<vmem>>, vector<16x32xf32>
    %c0_15 = arith.constant 0 : index
    %c0_16 = arith.constant 0 : index
    %17 = vector.load %arg7[%c0_15, %c0_16] : memref<32x128xbf16, #tpu.memory_space<vmem>>, vector<32x128xbf16>
    %c0_17 = arith.constant 0 : index
    %c0_18 = arith.constant 0 : index
    %18 = vector.load %arg8[%c0_17, %c0_18] : memref<1x128xf32, #tpu.memory_space<vmem>>, vector<1x128xf32>
    %c0_19 = arith.constant 0 : index
    %c0_20 = arith.constant 0 : index
    %19 = vector.load %arg9[%c0_19, %c0_20] : memref<128x128xbf16, #tpu.memory_space<vmem>>, vector<128x128xbf16>
    %c0_21 = arith.constant 0 : index
    %c0_22 = arith.constant 0 : index
    %20 = vector.load %arg10[%c0_21, %c0_22] : memref<1x128xf32, #tpu.memory_space<vmem>>, vector<1x128xf32>
    %21 = arith.truncf %16 : vector<16x32xf32> to vector<16x32xbf16>
    %cst_23 = arith.constant dense<0.000000e+00> : vector<16x128xf32>
    %22 = tpu.matmul %21, %17, %cst_23 {dimension_numbers = #tpu.dot_dimension_numbers<[1], [0], [0], [1], [0, 0, 1, 1], [], []>} : vector<16x32xbf16>, vector<32x128xbf16>, vector<16x128xf32> -> vector<16x128xf32>
    %23 = vector.broadcast %18 : vector<1x128xf32> to vector<16x128xf32>
    %24 = arith.addf %22, %23 : vector<16x128xf32>
    %cst_24 = arith.constant 0.000000e+00 : f32
    %25 = vector.broadcast %cst_24 : f32 to vector<16x128xf32>
    %26 = arith.maximumf %24, %25 : vector<16x128xf32>
    %27 = arith.truncf %26 : vector<16x128xf32> to vector<16x128xbf16>
    %cst_25 = arith.constant dense<0.000000e+00> : vector<16x128xf32>
    %28 = tpu.matmul %27, %19, %cst_25 {dimension_numbers = #tpu.dot_dimension_numbers<[1], [0], [0], [1], [0, 0, 1, 1], [], []>} : vector<16x128xbf16>, vector<128x128xbf16>, vector<16x128xf32> -> vector<16x128xf32>
    %29 = vector.broadcast %20 : vector<1x128xf32> to vector<16x128xf32>
    %30 = arith.addf %28, %29 : vector<16x128xf32>
    %c0_26 = arith.constant 0 : index
    %c0_27 = arith.constant 0 : index
    %31 = vector.load %arg17[%c0_26, %c0_27] : memref<16x128xf32, #tpu.memory_space<vmem>>, vector<16x128xf32>
    tpu.vector_store %arg17[%c0_26, %c0_27], %30 {strides = array<i32>} : memref<16x128xf32, #tpu.memory_space<vmem>>, vector<16x128xf32>,
    tpu.wait_dma2 semaphore(%arg20 : memref<!tpu.dma_semaphore, #tpu.memory_space<semaphore_mem>>) src(%arg12 : memref<2048x1024xbf16, #tpu.memory_space<any>>) dst(%arg19 : memref<2048x1024xbf16, #tpu.memory_space<vmem>>)
    %c0_28 = arith.constant 0 : index
    %c0_29 = arith.constant 0 : index
    %32 = vector.load %arg11[%c0_28, %c0_29] : memref<16x2048xf32, #tpu.memory_space<vmem>>, vector<16x2048xf32>
    %c0_30 = arith.constant 0 : index
    %c0_31 = arith.constant 0 : index
    %33 = vector.load %arg19[%c0_30, %c0_31] : memref<2048x1024xbf16, #tpu.memory_space<vmem>>, vector<2048x1024xbf16>
    %c0_32 = arith.constant 0 : index
    %c0_33 = arith.constant 0 : index
    %34 = vector.load %arg13[%c0_32, %c0_33] : memref<1x1024xf32, #tpu.memory_space<vmem>>, vector<1x1024xf32>
    %c0_34 = arith.constant 0 : index
    %c0_35 = arith.constant 0 : index
    %35 = vector.load %arg14[%c0_34, %c0_35] : memref<1024x128xbf16, #tpu.memory_space<vmem>>, vector<1024x128xbf16>
    %c0_36 = arith.constant 0 : index
    %c0_37 = arith.constant 0 : index
    %36 = vector.load %arg15[%c0_36, %c0_37] : memref<1x128xf32, #tpu.memory_space<vmem>>, vector<1x128xf32>
    %37 = arith.truncf %32 : vector<16x2048xf32> to vector<16x2048xbf16>
    %cst_38 = arith.constant dense<0.000000e+00> : vector<16x1024xf32>
    %38 = tpu.matmul %37, %33, %cst_38 {dimension_numbers = #tpu.dot_dimension_numbers<[1], [0], [0], [1], [0, 0, 1, 1], [], []>} : vector<16x2048xbf16>, vector<2048x1024xbf16>, vector<16x1024xf32> -> vector<16x1024xf32>
    %39 = vector.broadcast %34 : vector<1x1024xf32> to vector<16x1024xf32>
    %40 = arith.addf %38, %39 : vector<16x1024xf32>
    %cst_39 = arith.constant 0.000000e+00 : f32
    %41 = vector.broadcast %cst_39 : f32 to vector<16x1024xf32>
    %42 = arith.maximumf %40, %41 : vector<16x1024xf32>
    %43 = arith.truncf %42 : vector<16x1024xf32> to vector<16x1024xbf16>
    %cst_40 = arith.constant dense<0.000000e+00> : vector<16x128xf32>
    %44 = tpu.matmul %43, %35, %cst_40 {dimension_numbers = #tpu.dot_dimension_numbers<[1], [0], [0], [1], [0, 0, 1, 1], [], []>} : vector<16x1024xbf16>, vector<1024x128xbf16>, vector<16x128xf32> -> vector<16x128xf32>
    %45 = vector.broadcast %36 : vector<1x128xf32> to vector<16x128xf32>
    %46 = arith.addf %44, %45 : vector<16x128xf32>
    %c0_41 = arith.constant 0 : index
    %c0_42 = arith.constant 0 : index
    %47 = vector.load %arg18[%c0_41, %c0_42] : memref<16x128xf32, #tpu.memory_space<vmem>>, vector<16x128xf32>
    tpu.vector_store %arg18[%c0_41, %c0_42], %46 {strides = array<i32>} : memref<16x128xf32, #tpu.memory_space<vmem>>, vector<16x128xf32>,
    return
  }
  func.func @transform_0(%arg0: i32) -> (i32, i32) {
    %c0_i32 = arith.constant 0 : i32
    %c0_i32_0 = arith.constant 0 : i32
    %c0_i32_1 = arith.constant 0 : i32
    return %c0_i32, %c0_i32_0 : i32, i32
  }
  func.func @transform_1(%arg0: i32) -> (i32, i32) {
    %c0_i32 = arith.constant 0 : i32
    %c0_i32_0 = arith.constant 0 : i32
    %c0_i32_1 = arith.constant 0 : i32
    return %c0_i32, %c0_i32_0 : i32, i32
  }
  func.func @transform_2(%arg0: i32) -> (i32, i32) {
    %c0_i32 = arith.constant 0 : i32
    %c0_i32_0 = arith.constant 0 : i32
    %c0_i32_1 = arith.constant 0 : i32
    return %c0_i32, %c0_i32_0 : i32, i32
  }
  func.func @transform_3(%arg0: i32) -> (i32, i32) {
    %c0_i32 = arith.constant 0 : i32
    %c0_i32_0 = arith.constant 0 : i32
    %c0_i32_1 = arith.constant 0 : i32
    return %c0_i32, %c0_i32_0 : i32, i32
  }
  func.func @transform_4(%arg0: i32) -> (i32, i32) {
    %c0_i32 = arith.constant 0 : i32
    %c0_i32_0 = arith.constant 0 : i32
    %c0_i32_1 = arith.constant 0 : i32
    return %c0_i32, %c0_i32_0 : i32, i32
  }
  func.func @transform_5(%arg0: i32) -> (i32, i32) {
    %c0_i32 = arith.constant 0 : i32
    %c0_i32_0 = arith.constant 0 : i32
    %c0_i32_1 = arith.constant 0 : i32
    return %c0_i32, %c0_i32_0 : i32, i32
  }
  func.func @transform_6(%arg0: i32) -> (i32, i32) {
    %c0_i32 = arith.constant 0 : i32
    %c0_i32_0 = arith.constant 0 : i32
    %c0_i32_1 = arith.constant 0 : i32
    return %c0_i32, %c0_i32_0 : i32, i32
  }
  func.func @transform_7(%arg0: i32) -> (i32, i32) {
    %c0_i32 = arith.constant 0 : i32
    %c0_i32_0 = arith.constant 0 : i32
    %c0_i32_1 = arith.constant 0 : i32
    return %c0_i32, %c0_i32_0 : i32, i32
  }
  func.func @transform_8(%arg0: i32) -> (i32, i32) {
    %c0_i32 = arith.constant 0 : i32
    %c0_i32_0 = arith.constant 0 : i32
    %c0_i32_1 = arith.constant 0 : i32
    return %c0_i32, %c0_i32_0 : i32, i32
  }
  func.func @transform_9(%arg0: i32) -> (i32, i32) {
    %c0_i32 = arith.constant 0 : i32
    %c0_i32_0 = arith.constant 0 : i32
    %c0_i32_1 = arith.constant 0 : i32
    return %c0_i32, %c0_i32_0 : i32, i32
  }
  func.func @transform_10(%arg0: i32) -> (i32, i32) {
    %c0_i32 = arith.constant 0 : i32
    %c0_i32_0 = arith.constant 0 : i32
    %c0_i32_1 = arith.constant 0 : i32
    return %c0_i32, %c0_i32_0 : i32, i32
  }
  func.func @transform_12(%arg0: i32) -> (i32, i32) {
    %c0_i32 = arith.constant 0 : i32
    %c0_i32_0 = arith.constant 0 : i32
    %c0_i32_1 = arith.constant 0 : i32
    return %c0_i32, %c0_i32_0 : i32, i32
  }
  func.func @transform_13(%arg0: i32) -> (i32, i32) {
    %c0_i32 = arith.constant 0 : i32
    %c0_i32_0 = arith.constant 0 : i32
    %c0_i32_1 = arith.constant 0 : i32
    return %c0_i32, %c0_i32_0 : i32, i32
  }
  func.func @transform_14(%arg0: i32) -> (i32, i32) {
    %c0_i32 = arith.constant 0 : i32
    %c0_i32_0 = arith.constant 0 : i32
    %c0_i32_1 = arith.constant 0 : i32
    return %c0_i32, %c0_i32_0 : i32, i32
  }
  func.func @transform_15(%arg0: i32) -> (i32, i32) {
    %c0_i32 = arith.constant 0 : i32
    %c0_i32_0 = arith.constant 0 : i32
    %c0_i32_1 = arith.constant 0 : i32
    return %c0_i32, %c0_i32_0 : i32, i32
  }
  func.func @transform_16(%arg0: i32) -> (i32, i32) {
    %c0_i32 = arith.constant 0 : i32
    %c0_i32_0 = arith.constant 0 : i32
    %c0_i32_1 = arith.constant 0 : i32
    return %c0_i32, %c0_i32_0 : i32, i32
  }
  func.func @transform_17(%arg0: i32) -> (i32, i32) {
    %c0_i32 = arith.constant 0 : i32
    %c0_i32_0 = arith.constant 0 : i32
    %c0_i32_1 = arith.constant 0 : i32
    return %c0_i32, %c0_i32_0 : i32, i32
  }
}

</mosaic_0001>

<bundles_post_ra>
// kernel: tpu_custom_call.1
= control target key start
LH: loop header
LB: loop body
LE: loop exit
PB: predicated region body
PF: predicated region fallthrough
CT: control target
= control target key end

     0   :  { %s12460_s0 = inlined_call_operand.hbm [shape: f32[16,300], index: 0, kind: input, shape index: {}]   ;;  %s12461_s1 = inlined_call_operand.hbm [shape: bf16[300,512], index: 1, kind: input, shape index: {}]   ;;  %s12462_s2 = inlined_call_operand.hbm [shape: f32[1,512], index: 2, kind: input, shape index: {}]   ;;  %s12463_s3 = inlined_call_operand.hbm [shape: bf16[512,128], index: 3, kind: input, shape index: {}]   ;;  %s12464_s4 = inlined_call_operand.hbm [shape: f32[1,128], index: 4, kind: input, shape index: {}]   ;;  %s12465_s5 = inlined_call_operand.hbm [shape: f32[16,32], index: 5, kind: input, shape index: {}]   ;;  %s12466_s6 = inlined_call_operand.hbm [shape: bf16[32,128], index: 6, kind: input, shape index: {}]   ;;  %s12467_s7 = inlined_call_operand.hbm [shape: f32[1,128], index: 7, kind: input, shape index: {}]   ;;  %s12468_s8 = inlined_call_operand.hbm [shape: bf16[128,128], index: 8, kind: input, shape index: {}]   ;;  %s12469_s9 = inlined_call_operand.hbm [shape: f32[1,128], index: 9, kind: input, shape index: {}]   ;;  %s12470_s10 = inlined_call_operand.hbm [shape: f32[16,2048], index: 10, kind: input, shape index: {}]   ;;  %s12471_s11 = inlined_call_operand.hbm [shape: bf16[2048,1024], index: 11, kind: input, shape index: {}]   ;;  %s12472_s12 = inlined_call_operand.hbm [shape: f32[1,1024], index: 12, kind: input, shape index: {}]   ;;  %s12473_s13 = inlined_call_operand.hbm [shape: bf16[1024,128], index: 13, kind: input, shape index: {}]   ;;  %s12474_s14 = inlined_call_operand.hbm [shape: f32[1,128], index: 14, kind: input, shape index: {}]   ;;  %s12475_s15 = inlined_call_operand.hbm [shape: f32[16,128], index: 15, kind: output, shape index: {0}]   ;;  %s12476_s16 = inlined_call_operand.hbm [shape: f32[16,128], index: 16, kind: output, shape index: {1}]   ;;  %s12477_s17 = inlined_call_operand.hbm [shape: f32[16,128], index: 17, kind: output, shape index: {2}]  }
   0x1   :  { %12481 = sst [smem:[#allocation64_spill]] %s12460_s0 }
   0x2   :  { %12482 = sst [smem:[#allocation65_spill]] %s12461_s1 }
   0x3   :  { %23 = vsyncpa [#allocation5], 0 }
   0x4   :  { %24 = vsyncpa [#allocation8], 0 }
   0x5   :  { %25 = vsyncpa [#allocation11], 0 }
   0x6   :  { %26 = vsyncpa [#allocation14], 0 }
   0x7   :  { %27 = vsyncpa [#allocation17], 0 }
   0x8   :  { %28 = vsyncpa [#allocation20], 0 }
   0x9   :  { %29 = vsyncpa [#allocation23], 0 }
   0xa   :  { %30 = vsyncpa [#allocation26], 0 }
   0xb   :  { %31 = vsyncpa [#allocation6], 0 }
   0xc   :  { %32 = vsyncpa [#allocation29], 0  ;;  %s11867_s24 = smov [#allocation7]  }
   0xd   :  { %s50_s25 = sshll.u32 %s11867_s24, 4  ;;  %s51_s25 = int_to_ptr.vmem [resolvable:$true] %s50_s25 }
   0xe   :  { %s11493_s26 = scalar_lea.vmem %s51_s25, 9728  ;;  %p11498_p1 = scmp.lt.s32.totalorder %s51_s25, %s51_s25 }
   0xf   :  { %p11494_p0 = scmp.ne.s32.totalorder %s51_s25, %s11493_s26  ;;  %p11499_p2 = scmp.lt.s32.totalorder %s11493_s26, %s11493_s26 }
  0x11   :  { %p11500_p3 = por %p11499_p2, %p11498_p1 }
  0x13   :  { %p11501_p4 = pnand %p11500_p3, %p11494_p0 }
  0x15   :  { %11504 = shalt.err (!%p11501_p4)
}
  0x16   :  { %s11868_s27 = smov 256   ;;  %s11869_s28 = smov 16  }
  0x17   :  { %s12483_s30 = sld [smem:[#allocation65_spill]]  ;;  %s11870_s18 = smov [#allocation10]  }
  0x18   :  { %s72_s19 = sshll.u32 %s11870_s18, 4  ;;  %s73_s19 = int_to_ptr.vmem [resolvable:$true] %s72_s19 }
  0x19   :  { %s11513_s1 = scalar_lea.vmem %s73_s19, 4096  ;;  %p11518_p6 = scmp.lt.s32.totalorder %s73_s19, %s73_s19 }
  0x1a   :  { %p11514_p5 = scmp.ne.s32.totalorder %s73_s19, %s11513_s1  ;;  %p11519_p7 = scmp.lt.s32.totalorder %s11513_s1, %s11513_s1 }
  0x1c   :  { %p11520_p8 = por %p11519_p7, %p11518_p6 }
  0x1d   :  { %56 = dma.hbm_to_vmem [thread:$0]  %s12483_s30, 9728, %s51_s25, [#allocation8], %s11868_s27, %s11868_s27, %s11869_s28  }
  0x1e   :  { %p11521_p9 = pnand %p11520_p8, %p11514_p5 }
  0x20   :  { %11524 = shalt.err (!%p11521_p9)
}
  0x21   :  { %s11871_s20 = smov 64   ;;  %s11872_s21 = smov 4  }
  0x22   :  { %78 = dma.hbm_to_vmem [thread:$0]  %s12463_s3, 4096, %s73_s19, [#allocation11], %s11871_s20, %s11871_s20, %s11872_s21  }
  0x23   :  { %s11873_s24 = smov [#allocation13]  }
  0x24   :  { %s94_s25 = sshll.u32 %s11873_s24, 4  ;;  %s95_s25 = int_to_ptr.vmem [resolvable:$true] %s94_s25 }
  0x25   :  { %s11533_s26 = scalar_lea.vmem %s95_s25, 256  ;;  %p11538_p11 = scmp.lt.s32.totalorder %s95_s25, %s95_s25 }
  0x26   :  { %p11534_p10 = scmp.ne.s32.totalorder %s95_s25, %s11533_s26  ;;  %p11539_p12 = scmp.lt.s32.totalorder %s11533_s26, %s11533_s26 }
  0x28   :  { %p11540_p13 = por %p11539_p12, %p11538_p11 }
  0x2a   :  { %p11541_p0 = pnand %p11540_p13, %p11534_p10 }
  0x2c   :  { %11544 = shalt.err (!%p11541_p0)
}
  0x2d   :  { %s11874_s27 = smov 128   ;;  %s11875_s28 = smov 8  }
  0x2e   :  { %100 = dma.hbm_to_vmem [thread:$0]  %s12465_s5, 256, %s95_s25, [#allocation14], %s11874_s27, %s11874_s27, %s11875_s28  }
  0x2f   :  { %s11876_s3 = smov [#allocation16]   ;;  %s11877_s18 = smov [#allocation19]  }
  0x30   :  { %s119_s30 = sshll.u32 %s11876_s3, 4  ;;  %s141_s19 = sshll.u32 %s11877_s18, 4  ;;  %s120_s30 = int_to_ptr.vmem [resolvable:$true] %s119_s30  ;;  %s142_s19 = int_to_ptr.vmem [resolvable:$true] %s141_s19 }
  0x31   :  { %s11553_s1 = scalar_lea.vmem %s120_s30, 16  ;;  %s11557_s22 = scalar_lea.vmem %s120_s30, 32 }
  0x32   :  { %p11554_p1 = scmp.ne.s32.totalorder %s120_s30, %s11553_s1  ;;  %p11558_p2 = scmp.lt.s32.totalorder %s120_s30, %s120_s30 }
  0x33   :  { %p11559_p3 = scmp.lt.s32.totalorder %s11557_s22, %s11553_s1 }
  0x35   :  { %p11560_p4 = por %p11559_p3, %p11558_p2 }
  0x37   :  { %p11561_p5 = pnand %p11560_p4, %p11554_p1 }
  0x39   :  { %11564 = shalt.err (!%p11561_p5)
}
  0x3a   :  { %122 = dma.hbm_to_vmem [thread:$0]  %s12467_s7, 16, %s120_s30, [#allocation17]  }
  0x3b   :  { %s11573_s26 = scalar_lea.vmem %s142_s19, 16  ;;  %s11577_s5 = scalar_lea.vmem %s142_s19, 32 }
  0x3c   :  { %p11574_p6 = scmp.ne.s32.totalorder %s142_s19, %s11573_s26  ;;  %p11578_p7 = scmp.lt.s32.totalorder %s142_s19, %s142_s19 }
  0x3d   :  { %p11579_p8 = scmp.lt.s32.totalorder %s11577_s5, %s11573_s26 }
  0x3f   :  { %p11580_p9 = por %p11579_p8, %p11578_p7 }
  0x41   :  { %p11581_p10 = pnand %p11580_p9, %p11574_p6 }
  0x43   :  { %11584 = shalt.err (!%p11581_p10)
}
  0x44   :  { %144 = dma.hbm_to_vmem [thread:$0]  %s12469_s9, 16, %s142_s19, [#allocation20]  }
  0x45   :  { %s11878_s0 = smov [#allocation22]   ;;  %s11879_s18 = smov [#allocation4]  }
  0x46   :  { %s163_s3 = sshll.u32 %s11878_s0, 4  ;;  %s38_s1 = sshll.u32 %s11879_s18, 4  ;;  %s164_s3 = int_to_ptr.vmem [resolvable:$true] %s163_s3  ;;  %s39_s1 = int_to_ptr.vmem [resolvable:$true] %s38_s1 }
  0x47   :  { %s11593_s22 = scalar_lea.vmem %s164_s3, 128  ;;  %p11598_p12 = scmp.lt.s32.totalorder %s164_s3, %s164_s3 }
  0x48   :  { %p11594_p11 = scmp.ne.s32.totalorder %s164_s3, %s11593_s22  ;;  %p11599_p13 = scmp.lt.s32.totalorder %s11593_s22, %s11593_s22 }
  0x4a   :  { %p11600_p0 = por %p11599_p13, %p11598_p12 }
  0x4c   :  { %p11601_p1 = pnand %p11600_p0, %p11594_p11 }
  0x4e   :  { %11604 = shalt.err (!%p11601_p1)
}
  0x4f   :  { %166 = dma.hbm_to_vmem [thread:$0]  %s12472_s12, 128, %s164_s3, [#allocation23]  }
  0x50   :  { %s11613_s23 = scalar_lea.vmem %s39_s1, 768  ;;  %p11618_p3 = scmp.lt.s32.totalorder %s39_s1, %s39_s1 }
  0x51   :  { %p11614_p2 = scmp.ne.s32.totalorder %s39_s1, %s11613_s23  ;;  %p11619_p4 = scmp.lt.s32.totalorder %s11613_s23, %s11613_s23 }
  0x53   :  { %p11620_p5 = por %p11619_p4, %p11618_p3 }
  0x55   :  { %p11621_p6 = pnand %p11620_p5, %p11614_p2 }
  0x57   :  { %11624 = shalt.err (!%p11621_p6)
}
  0x58   :  { %s11880_s9 = smov 384   ;;  %s11881_s19 = smov 24  }
  0x59   :  { %s12484_s5 = sld [smem:[#allocation64_spill]]  ;;  %s11882_s25 = smov [#allocation9]  }
  0x5a   :  { %s63_s29 = sshll.u32 %s11882_s25, 4  ;;  %s11883_s0 = smov [#allocation12]   ;;  %s64_s29 = int_to_ptr.vmem [resolvable:$true] %s63_s29 }
  0x5b   :  { %s85_s18 = sshll.u32 %s11883_s0, 4  ;;  %s11633_s12 = scalar_lea.vmem %s64_s29, 64  ;;  %s86_s18 = int_to_ptr.vmem [resolvable:$true] %s85_s18 }
  0x5c   :  { %p11634_p7 = scmp.ne.s32.totalorder %s64_s29, %s11633_s12  ;;  %p11638_p8 = scmp.lt.s32.totalorder %s64_s29, %s64_s29 }
  0x5d   :  { %p11639_p9 = scmp.lt.s32.totalorder %s11633_s12, %s11633_s12 }
  0x5f   :  { %44 = dma.hbm_to_vmem [thread:$0]  %s12484_s5, 768, %s39_s1, [#allocation5], %s11880_s9, %s11880_s9, %s11881_s19  }
  0x60   :  { %p11640_p10 = por %p11639_p9, %p11638_p8 }
  0x62   :  { %p11641_p11 = pnand %p11640_p10, %p11634_p7 }
  0x64   :  { %11644 = shalt.err (!%p11641_p11)
}
  0x65   :  { %66 = dma.hbm_to_vmem [thread:$0]  %s12462_s2, 64, %s64_s29, [#allocation8]  }
  0x66   :  { %s11653_s7 = scalar_lea.vmem %s86_s18, 16  ;;  %s11657_s1 = scalar_lea.vmem %s86_s18, 32 }
  0x67   :  { %p11654_p12 = scmp.ne.s32.totalorder %s86_s18, %s11653_s7  ;;  %p11658_p13 = scmp.lt.s32.totalorder %s86_s18, %s86_s18 }
  0x68   :  { %p11659_p0 = scmp.lt.s32.totalorder %s11657_s1, %s11653_s7 }
  0x6a   :  { %p11660_p1 = por %p11659_p0, %p11658_p13 }
  0x6c   :  { %p11661_p2 = pnand %p11660_p1, %p11654_p12 }
  0x6e   :  { %11664 = shalt.err (!%p11661_p2)
}
  0x6f   :  { %88 = dma.hbm_to_vmem [thread:$0]  %s12464_s4, 16, %s86_s18, [#allocation11]  }
  0x70   :  { %s11884_s9 = smov [#allocation15]   ;;  %s11885_s24 = smov [#allocation18]  }
  0x71   :  { %s106_s19 = sshll.u32 %s11884_s9, 4  ;;  %s128_s26 = sshll.u32 %s11885_s24, 4  ;;  %s107_s19 = int_to_ptr.vmem [resolvable:$true] %s106_s19  ;;  %s129_s26 = int_to_ptr.vmem [resolvable:$true] %s128_s26 }
  0x72   :  { %s11673_s5 = scalar_lea.vmem %s107_s19, 256  ;;  %p11678_p4 = scmp.lt.s32.totalorder %s107_s19, %s107_s19 }
  0x73   :  { %p11674_p3 = scmp.ne.s32.totalorder %s107_s19, %s11673_s5  ;;  %p11679_p5 = scmp.lt.s32.totalorder %s11673_s5, %s11673_s5 }
  0x75   :  { %p11680_p6 = por %p11679_p5, %p11678_p4 }
  0x77   :  { %p11681_p7 = pnand %p11680_p6, %p11674_p3 }
  0x79   :  { %11684 = shalt.err (!%p11681_p7)
}
  0x7a   :  { %112 = dma.hbm_to_vmem [thread:$0]  %s12466_s6, 256, %s107_s19, [#allocation14], %s11871_s20, %s11871_s20, %s11872_s21  }
  0x7b   :  { %s11693_s4 = scalar_lea.vmem %s129_s26, 1024  ;;  %p11698_p9 = scmp.lt.s32.totalorder %s129_s26, %s129_s26 }
  0x7c   :  { %p11694_p8 = scmp.ne.s32.totalorder %s129_s26, %s11693_s4  ;;  %p11699_p10 = scmp.lt.s32.totalorder %s11693_s4, %s11693_s4 }
  0x7e   :  { %p11700_p11 = por %p11699_p10, %p11698_p9 }
  0x80   :  { %p11701_p12 = pnand %p11700_p11, %p11694_p8 }
  0x82   :  { %11704 = shalt.err (!%p11701_p12)
}
  0x83   :  { %134 = dma.hbm_to_vmem [thread:$0]  %s12468_s8, 1024, %s129_s26, [#allocation17], %s11871_s20, %s11871_s20, %s11872_s21  }
  0x84   :  { %s11886_s18 = smov [#allocation21]  }
  0x85   :  { %s150_s12 = sshll.u32 %s11886_s18, 4  ;;  %s151_s12 = int_to_ptr.vmem [resolvable:$true] %s150_s12 }
  0x86   :  { %s11713_s3 = scalar_lea.vmem %s151_s12, 4096  ;;  %p11718_p0 = scmp.lt.s32.totalorder %s151_s12, %s151_s12 }
  0x87   :  { %p11714_p13 = scmp.ne.s32.totalorder %s151_s12, %s11713_s3  ;;  %p11719_p1 = scmp.lt.s32.totalorder %s11713_s3, %s11713_s3 }
  0x89   :  { %p11720_p2 = por %p11719_p1, %p11718_p0 }
  0x8b   :  { %p11721_p3 = pnand %p11720_p2, %p11714_p13 }
  0x8d   :  { %11724 = shalt.err (!%p11721_p3)
}
  0x8e   :  { %s11887_s6 = smov 2048   ;;  %s11888_s1 = smov [#allocation24]  }
  0x8f   :  { %156 = dma.hbm_to_vmem [thread:$0]  %s12470_s10, 4096, %s151_s12, [#allocation20], %s11887_s6, %s11887_s6, %s11874_s27  }
  0x90   :  { %s172_s30 = sshll.u32 %s11888_s1, 4  ;;  %s11889_s8 = smov [#allocation25]   ;;  %s173_s30 = int_to_ptr.vmem [resolvable:$true] %s172_s30 }
  0x91   :  { %s185_s23 = sshll.u32 %s11889_s8, 4  ;;  %s11733_s9 = scalar_lea.vmem %s173_s30, 8192  ;;  %s186_s23 = int_to_ptr.vmem [resolvable:$true] %s185_s23 }
  0x92   :  { %p11734_p4 = scmp.ne.s32.totalorder %s173_s30, %s11733_s9  ;;  %p11738_p5 = scmp.lt.s32.totalorder %s173_s30, %s173_s30 }
  0x93   :  { %p11739_p6 = scmp.lt.s32.totalorder %s11733_s9, %s11733_s9 }
  0x95   :  { %p11740_p7 = por %p11739_p6, %p11738_p5 }
  0x97   :  { %p11741_p8 = pnand %p11740_p7, %p11734_p4 }
  0x99   :  { %11744 = shalt.err (!%p11741_p8)
}
  0x9a   :  { %178 = dma.hbm_to_vmem [thread:$0]  %s12473_s13, 8192, %s173_s30, [#allocation23], %s11871_s20, %s11871_s20, %s11872_s21  }
  0x9b   :  { %s11753_s10 = scalar_lea.vmem %s186_s23, 16  ;;  %s11757_s26 = scalar_lea.vmem %s186_s23, 32 }
  0x9c   :  { %p11754_p9 = scmp.ne.s32.totalorder %s186_s23, %s11753_s10  ;;  %p11758_p10 = scmp.lt.s32.totalorder %s186_s23, %s186_s23 }
  0x9d   :  { %p11759_p11 = scmp.lt.s32.totalorder %s11757_s26, %s11753_s10 }
  0x9f   :  { %p11760_p12 = por %p11759_p11, %p11758_p10 }
  0xa1   :  { %p11761_p13 = pnand %p11760_p12, %p11754_p9 }
  0xa3   :  { %11764 = shalt.err (!%p11761_p13)
}
  0xa4   :  { %188 = dma.hbm_to_vmem [thread:$0]  %s12474_s14, 16, %s186_s23, [#allocation26]  }
  0xa5   :  { %11845 = dma.done.wait [#allocation5], 768  }
  0xa6   :  { %11846 = vsyncadd [#allocation5], 4294966528 }
  0xa7   :  { %11847 = dma.done.wait [#allocation8], 9792  }
  0xa8   :  { %11848 = vsyncadd [#allocation8], 4294957504 }
  0xa9   :  { %11849 = dma.done.wait [#allocation11], 4112  }
  0xaa   :  { %11850 = vsyncadd [#allocation11], 4294963184 }
  0xab   :  { %11851 = dma.done.wait [#allocation14], 512  }
  0xac   :  { %11852 = vsyncadd [#allocation14], 4294966784 }
  0xad   :  { %11853 = dma.done.wait [#allocation17], 1040  }
  0xae   :  { %11854 = vsyncadd [#allocation17], 4294966256 }
  0xaf   :  { %11855 = dma.done.wait [#allocation20], 4112  }
  0xb0   :  { %11856 = vsyncadd [#allocation20], 4294963184 }
  0xb1   :  { %11857 = dma.done.wait [#allocation23], 8320  }
  0xb2   :  { %11858 = vsyncadd [#allocation23], 4294958976 }
  0xb3   :  { %11859 = dma.done.wait [#allocation26], 16  }
  0xb4   :  { %11860 = vsyncadd [#allocation26], 4294967280  ;;  %v11264_v0 = vld [vmem:[#allocation7 + $0xe4] ss:$16 sps:$4 sm:$0xff]   ;;  %v11266_v1 = vld [vmem:[#allocation7 + $0xe0] ss:$16 sps:$4 sm:$0xff]  }
  0xb5   :  { %808 = vmatprep.subr.bf16.mxu0 %v11264_v0  ;;  %v11267_v2 = vld [vmem:[#allocation7 + $0xc4] ss:$16 sps:$4 sm:$0xff]   ;;  %v11269_v3 = vld [vmem:[#allocation7 + $0xc0] ss:$16 sps:$4 sm:$0xff]   ;;  %v11282_v7 = vld [vmem:[#allocation7 + $0xec] ss:$16 sps:$4 sm:$0xff]  }
  0xb6   :  { %809 = vmatpush1.bf16.msra.mxu0 %v11266_v1  ;;  %v11270_v4 = vld [vmem:[#allocation7 + $0xa4] ss:$16 sps:$4 sm:$0xff]   ;;  %v11272_v5 = vld [vmem:[#allocation7 + $0xa0] ss:$16 sps:$4 sm:$0xff]   ;;  %v11284_v8 = vld [vmem:[#allocation7 + $0xe8] ss:$16 sps:$4 sm:$0xff]   ;;  %894 = vmatprep.subr.bf16.mxu1 %v11282_v7 }
  0xb7   :  { %810 = vmatprep.subr.bf16.mxu0 %v11267_v2  ;;  %v11273_v6 = vld [vmem:[#allocation7 + $0x84] ss:$16 sps:$4 sm:$0xff]   ;;  %v11275_v9 = vld [vmem:[#allocation7 + $0x80] ss:$16 sps:$4 sm:$0xff]   ;;  %895 = vmatpush1.bf16.msra.mxu1 %v11284_v8  ;;  %v11288_v10 = vld [vmem:[#allocation7 + $0xcc] ss:$16 sps:$4 sm:$0xff]  }
  0xb8   :  { %v11290_v11 = vld [vmem:[#allocation7 + $0xc8] ss:$16 sps:$4 sm:$0xff]   ;;  %v11276_v12 = vld [vmem:[#allocation7 + $0x64] ss:$16 sps:$4 sm:$0xff]   ;;  %896 = vmatprep.subr.bf16.mxu1 %v11288_v10  ;;  %v11278_v13 = vld [vmem:[#allocation7 + $0x60] ss:$16 sps:$4 sm:$0xff]  }
  0xb9   :  { %v11294_v14 = vld [vmem:[#allocation7 + $0xac] ss:$16 sps:$4 sm:$0xff]   ;;  %v11279_v15 = vld [vmem:[#allocation7 + $0x44] ss:$16 sps:$4 sm:$0xff]   ;;  %v11296_v16 = vld [vmem:[#allocation7 + $0xa8] ss:$16 sps:$4 sm:$0xff]  }
  0xba   :  { %811 = vmatpush1.bf16.msra.mxu0 %v11269_v3  ;;  %v11300_v17 = vld [vmem:[#allocation7 + $0x8c] ss:$16 sps:$4 sm:$0xff]   ;;  %v11281_v18 = vld [vmem:[#allocation7 + $0x40] ss:$16 sps:$4 sm:$0xff]   ;;  %v11285_v19 = vld [vmem:[#allocation7 + $0x24] ss:$16 sps:$4 sm:$0xff]  }
  0xbb   :  { %812 = vmatprep.subr.bf16.mxu0 %v11270_v4  ;;  %897 = vmatpush1.bf16.msra.mxu1 %v11290_v11  ;;  %v11302_v20 = vld [vmem:[#allocation7 + $0x88] ss:$16 sps:$4 sm:$0xff]   ;;  %v11306_v21 = vld [vmem:[#allocation7 + $0x6c] ss:$16 sps:$4 sm:$0xff]   ;;  %v11287_v22 = vld [vmem:[#allocation7 + $0x20] ss:$16 sps:$4 sm:$0xff]  }
  0xbc   :  { %898 = vmatprep.subr.bf16.mxu1 %v11294_v14  ;;  %v11291_v23 = vld [vmem:[#allocation7 + $0x4] ss:$16 sps:$4 sm:$0xff]   ;;  %v11308_v24 = vld [vmem:[#allocation7 + $0x68] ss:$16 sps:$4 sm:$0xff]   ;;  %v11312_v25 = vld [vmem:[#allocation7 + $0x4c] ss:$16 sps:$4 sm:$0xff]  }
  0xbd   :  { %v11293_v26 = vld [vmem:[#allocation7] ss:$16 sps:$4 sm:$0xff]   ;;  %v11297_v27 = vld [vmem:[#allocation7 + $0x1e4] ss:$16 sps:$4 sm:$0xff]   ;;  %v11314_v28 = vld [vmem:[#allocation7 + $0x48] ss:$16 sps:$4 sm:$0xff]  }
  0xbe   :  { %813 = vmatpush1.bf16.msra.mxu0 %v11272_v5  ;;  %v11318_v29 = vld [vmem:[#allocation7 + $0x2c] ss:$16 sps:$4 sm:$0xff]   ;;  %v11299_v30 = vld [vmem:[#allocation7 + $0x1e0] ss:$16 sps:$4 sm:$0xff]   ;;  %v11303_v31 = vld [vmem:[#allocation7 + $0x1c4] ss:$16 sps:$4 sm:$0xff]  }
  0xbf   :  { %814 = vmatprep.subr.bf16.mxu0 %v11273_v6  ;;  %899 = vmatpush1.bf16.msra.mxu1 %v11296_v16  ;;  %v11320_v32 = vld [vmem:[#allocation7 + $0x28] ss:$16 sps:$4 sm:$0xff]   ;;  %v11324_v33 = vld [vmem:[#allocation7 + $0xc] ss:$16 sps:$4 sm:$0xff]   ;;  %v11305_v34 = vld [vmem:[#allocation7 + $0x1c0] ss:$16 sps:$4 sm:$0xff]  }
  0xc0   :  { %900 = vmatprep.subr.bf16.mxu1 %v11300_v17  ;;  %v11326_v35 = vld [vmem:[#allocation7 + $0x8] ss:$16 sps:$4 sm:$0xff]   ;;  %v11309_v37 = vld [vmem:[#allocation7 + $0x1a4] ss:$16 sps:$4 sm:$0xff]   ;;  %v11330_v38 = vld [vmem:[#allocation7 + $0x1ec] ss:$16 sps:$4 sm:$0xff]  }
  0xc1   :  { %v244_v36 = vld [vmem:[#allocation4 + $0x8] sm:$0xff]  ;;  %v247_v39 = vld [vmem:[#allocation4 + $0x20] sm:$0xff]  ;;  %vm795_vm0 = vcmask 1045504   ;;  %v246_v1 = vld [vmem:[#allocation4 + $0x18] sm:$0xff]  ;;  %v11890_v14 = vmov 0   ;;  %vm791_vm1 = vcmask 359424  }
  0xc2   :  { %815 = vmatpush1.bf16.msra.mxu0 %v11275_v9  ;;  %v392_v40 = vpack.c.bf16 %v247_v39, %v244_v36  ;;  %v11311_v41 = vld [vmem:[#allocation7 + $0x1a0] ss:$16 sps:$4 sm:$0xff]   ;;  %v11315_v42 = vld [vmem:[#allocation7 + $0x184] ss:$16 sps:$4 sm:$0xff]   ;;  %v11332_v43 = vld [vmem:[#allocation7 + $0x1e8] ss:$16 sps:$4 sm:$0xff]  }
  0xc3   :  { %816 = vmatprep.subr.bf16.mxu0 %v11276_v12  ;;  %901 = vmatpush1.bf16.msra.mxu1 %v11302_v20  ;;  %v11336_v44 = vld [vmem:[#allocation7 + $0x1cc] ss:$16 sps:$4 sm:$0xff]   ;;  %v11317_v45 = vld [vmem:[#allocation7 + $0x180] ss:$16 sps:$4 sm:$0xff]   ;;  %v11321_v46 = vld [vmem:[#allocation7 + $0x164] ss:$16 sps:$4 sm:$0xff]  }
  0xc4   :  { %902 = vmatprep.subr.bf16.mxu1 %v11306_v21  ;;  %840 = vmatprep.mubr.bf16.mxu0 %v392_v40  ;;  %v11338_v47 = vld [vmem:[#allocation7 + $0x1c8] ss:$16 sps:$4 sm:$0xff]   ;;  %v11342_v48 = vld [vmem:[#allocation7 + $0x1ac] ss:$16 sps:$4 sm:$0xff]   ;;  %v11323_v49 = vld [vmem:[#allocation7 + $0x160] ss:$16 sps:$4 sm:$0xff]  }
  0xc5   :  { %926 = vmatprep.mubr.bf16.mxu1 %v392_v40  ;;  %v11327_v50 = vld [vmem:[#allocation7 + $0x144] ss:$16 sps:$4 sm:$0xff]   ;;  %v11344_v51 = vld [vmem:[#allocation7 + $0x1a8] ss:$16 sps:$4 sm:$0xff]   ;;  %v11348_v52 = vld [vmem:[#allocation7 + $0x18c] ss:$16 sps:$4 sm:$0xff]  }
  0xc6   :  { %817 = vmatpush1.bf16.msra.mxu0 %v11278_v13  ;;  %v11329_v53 = vld [vmem:[#allocation7 + $0x140] ss:$16 sps:$4 sm:$0xff]   ;;  %v11333_v54 = vld [vmem:[#allocation7 + $0x124] ss:$16 sps:$4 sm:$0xff]   ;;  %v11350_v56 = vld [vmem:[#allocation7 + $0x188] ss:$16 sps:$4 sm:$0xff]  }
  0xc7   :  { %818 = vmatprep.subr.bf16.mxu0 %v11279_v15  ;;  %903 = vmatpush1.bf16.msra.mxu1 %v11308_v24  ;;  %v11347_v55 = vld [vmem:[#allocation7 + $0x240] ss:$16 sps:$4 sm:$0x3f]   ;;  %v11354_v57 = vld [vmem:[#allocation7 + $0x16c] ss:$16 sps:$4 sm:$0xff]   ;;  %v11390_v36 = vld [vmem:[#allocation10 + $0xf0] sm:$0xff]  }
  0xc8   :  { %904 = vmatprep.subr.bf16.mxu1 %v11312_v25  ;;  %v11365_v58 = vld [vmem:[#allocation7 + $0x248] ss:$16 sps:$4 sm:$0x3f]   ;;  %v11335_v59 = vld [vmem:[#allocation7 + $0x120] ss:$16 sps:$4 sm:$0xff]   ;;  %v797_v2 = vsel %vm795_vm0, %v11347_v55, 0 }
  0xc9   :  { %v11339_v60 = vld [vmem:[#allocation7 + $0x104] ss:$16 sps:$4 sm:$0xff]   ;;  %v11356_v61 = vld [vmem:[#allocation7 + $0x168] ss:$16 sps:$4 sm:$0xff]   ;;  %v11360_v62 = vld [vmem:[#allocation7 + $0x14c] ss:$16 sps:$4 sm:$0xff]  }
  0xca   :  { %819 = vmatpush1.bf16.msra.mxu0 %v11281_v18  ;;  %v11341_v63 = vld [vmem:[#allocation7 + $0x100] ss:$16 sps:$4 sm:$0xff]   ;;  %v11362_v3 = vld [vmem:[#allocation7 + $0x148] ss:$16 sps:$4 sm:$0xff]   ;;  %v803_v4 = vsel %vm795_vm0, %v11365_v58, 0  ;;  %vm11892_vm2 = vmmov 0  }
  0xcb   :  { %820 = vmatprep.subr.bf16.mxu0 %v11285_v19  ;;  %905 = vmatpush1.bf16.msra.mxu1 %v11314_v28  ;;  %v243_v0 = vld [vmem:[#allocation4] sm:$0xff]  ;;  %v11366_v6 = vld [vmem:[#allocation7 + $0x12c] ss:$16 sps:$4 sm:$0xff]   ;;  %v11368_v9 = vld [vmem:[#allocation7 + $0x128] ss:$16 sps:$4 sm:$0xff]   ;;  %vm1317_vm3 = vcmask 261120  }
  0xcc   :  { %906 = vmatprep.subr.bf16.mxu1 %v11318_v29  ;;  %v11345_v5 = vld [vmem:[#allocation7 + $0x244] ss:$16 sps:$4 sm:$0x3f]   ;;  %v391_v7 = vpack.c.bf16 %v246_v1, %v243_v0  ;;  %v11372_v10 = vld [vmem:[#allocation7 + $0x10c] ss:$16 sps:$4 sm:$0xff]   ;;  %s11893_s13 = smov [#allocation2]  }
  0xcd   :  { %v11353_v8 = vld [vmem:[#allocation7 + $0x224] ss:$16 sps:$4 sm:$0xff]   ;;  %v11351_v11 = vld [vmem:[#allocation7 + $0x220] ss:$16 sps:$4 sm:$0xff]   ;;  %v11374_v13 = vld [vmem:[#allocation7 + $0x108] ss:$16 sps:$4 sm:$0xff]  }
  0xce   :  { %821 = vmatpush1.bf16.msra.mxu0 %v11287_v22  ;;  %v11359_v12 = vld [vmem:[#allocation7 + $0x204] ss:$16 sps:$4 sm:$0xff]   ;;  %v11357_v15 = vld [vmem:[#allocation7 + $0x200] ss:$16 sps:$4 sm:$0xff]   ;;  %v248_v17 = vld [vmem:[#allocation4 + $0x28] sm:$0xff]  ;;  %s239_s14 = sshll.u32 %s11893_s13, 4  ;;  %s240_s14 = int_to_ptr.vmem [resolvable:$true] %s239_s14 }
  0xcf   :  { %822 = vmatprep.subr.bf16.mxu0 %v11291_v23  ;;  %907 = vmatpush1.bf16.msra.mxu1 %v11320_v32  ;;  %v245_v16 = vld [vmem:[#allocation4 + $0x10] sm:$0xff]  ;;  %v11363_v18 = vld [vmem:[#allocation7 + $0x24c] ss:$16 sps:$4 sm:$0x3f]   ;;  %v11369_v21 = vld [vmem:[#allocation7 + $0x228] ss:$16 sps:$4 sm:$0xff]   ;;  %p11778_p1 = scmp.lt.s32.totalorder %s240_s14, %s240_s14 }
  0xd0   :  { %908 = vmatprep.subr.bf16.mxu1 %v11324_v33  ;;  %v393_v19 = vpack.c.bf16 %v248_v17, %v245_v16  ;;  %v11371_v20 = vld [vmem:[#allocation7 + $0x22c] ss:$16 sps:$4 sm:$0xff]   ;;  %v11375_v23 = vld [vmem:[#allocation7 + $0x208] ss:$16 sps:$4 sm:$0xff]   ;;  %s11773_s20 = scalar_lea.vmem %s240_s14, 131072 }
  0xd1   :  { %v11377_v22 = vld [vmem:[#allocation7 + $0x20c] ss:$16 sps:$4 sm:$0xff]   ;;  %v11385_v32 = vld [vmem:[#allocation10 + $0x20] sm:$0xff]   ;;  %v11393_v40 = vld [vmem:[#allocation10 + $0x10] sm:$0xff]   ;;  %p11774_p0 = scmp.ne.s32.totalorder %s240_s14, %s11773_s20  ;;  %p11779_p2 = scmp.lt.s32.totalorder %s11773_s20, %s11773_s20 }
  0xd2   :  { %823 = vmatpush1.bf16.msra.mxu0 %v11293_v26  ;;  %v11378_v24 = vld [vmem:[#allocation10 + $0x78] sm:$0xff]   ;;  %v11380_v26 = vld [vmem:[#allocation10 + $0x70] sm:$0xff]   ;;  %v11382_v28 = vld [vmem:[#allocation10 + $0x68] sm:$0xff]  }
  0xd3   :  { %824 = vmatprep.subr.bf16.mxu0 %v11297_v27  ;;  %909 = vmatpush1.bf16.msra.mxu1 %v11326_v35  ;;  %v11379_v25 = vld [vmem:[#allocation10 + $0x38] sm:$0xff]   ;;  %v11381_v27 = vld [vmem:[#allocation10 + $0x30] sm:$0xff]   ;;  %v11383_v29 = vld [vmem:[#allocation10 + $0x28] sm:$0xff]   ;;  %p11780_p3 = por %p11779_p2, %p11778_p1 }
  0xd4   :  { %910 = vmatprep.subr.bf16.mxu1 %v11330_v38  ;;  %v11387_v33 = vld [vmem:[#allocation10 + $0xb8] sm:$0xff]   ;;  %v11392_v38 = vld [vmem:[#allocation10 + $0x50] sm:$0xff]   ;;  %v11394_v39 = vld [vmem:[#allocation10 + $0xe8] sm:$0xff]  }
  0xd5   :  { %v11389_v35 = vld [vmem:[#allocation10 + $0x18] sm:$0xff]   ;;  %v11410_v55 = vld [vmem:[#allocation10 + $0xc0] sm:$0xff]   ;;  %p11781_p4 = pnand %p11780_p3, %p11774_p0 }
  0xd6   :  { %825 = vmatpush2.bf16.msra.mxu0 %v11299_v30  ;;  %v11384_v30 = vld [vmem:[#allocation10 + $0x60] sm:$0xff]  }
  0xd7   :  { %826 = vmatprep.subr.bf16.mxu0 %v11303_v31  ;;  %911 = vmatpush2.bf16.msra.mxu1 %v11332_v43  ;;  %v11386_v31 = vld [vmem:[#allocation10 + $0xf8] sm:$0xff]   ;;  %v11398_v43 = vld [vmem:[#allocation10 + $0xe0] sm:$0xff]  }
  0xd8   :  { %912 = vmatprep.subr.bf16.mxu1 %v11336_v44  ;;  %v11397_v44 = vld [vmem:[#allocation10 + $0x8] sm:$0xff]  }
  0xda   :  { %827 = vmatpush2.bf16.msra.mxu0 %v11305_v34  ;;  %v11388_v34 = vld [vmem:[#allocation10 + $0x58] sm:$0xff]  }
  0xdb   :  { %828 = vmatprep.subr.bf16.mxu0 %v11309_v37  ;;  %913 = vmatpush2.bf16.msra.mxu1 %v11338_v47  ;;  %v11391_v37 = vld [vmem:[#allocation10 + $0xb0] sm:$0xff]   ;;  %v11402_v47 = vld [vmem:[#allocation10 + $0xd8] sm:$0xff]  }
  0xdc   :  { %914 = vmatprep.subr.bf16.mxu1 %v11342_v48  ;;  %v11401_v48 = vld [vmem:[#allocation10] sm:$0xff]  }
  0xde   :  { %829 = vmatpush2.bf16.msra.mxu0 %v11311_v41  ;;  %v11395_v41 = vld [vmem:[#allocation10 + $0xa8] sm:$0xff]  }
  0xdf   :  { %830 = vmatprep.subr.bf16.mxu0 %v11315_v42  ;;  %915 = vmatpush2.bf16.msra.mxu1 %v11344_v51  ;;  %v11396_v42 = vld [vmem:[#allocation10 + $0x48] sm:$0xff]   ;;  %v11406_v51 = vld [vmem:[#allocation10 + $0x90] sm:$0xff]  }
  0xe0   :  { %916 = vmatprep.subr.bf16.mxu1 %v11348_v52  ;;  %v11891_v52 = vmov 0.0  }
  0xe2   :  { %831 = vmatpush2.bf16.msra.mxu0 %v11317_v45  ;;  %v11399_v45 = vld [vmem:[#allocation10 + $0xa0] sm:$0xff]  }
  0xe3   :  { %832 = vmatprep.subr.bf16.mxu0 %v11321_v46  ;;  %917 = vmatpush2.bf16.msra.mxu1 %v11350_v56  ;;  %v11400_v46 = vld [vmem:[#allocation10 + $0x40] sm:$0xff]  }
  0xe4   :  { %918 = vmatprep.subr.bf16.mxu1 %v11354_v57  ;;  %v11411_v56 = vld [vmem:[#allocation10 + $0x80] sm:$0xff]   ;;  %v395_v57 = vlaneseq }
  0xe6   :  { %833 = vmatpush2.bf16.msra.mxu0 %v11323_v49  ;;  %v11403_v49 = vld [vmem:[#allocation10 + $0x98] sm:$0xff]  }
  0xe7   :  { %834 = vmatprep.subr.bf16.mxu0 %v11327_v50  ;;  %919 = vmatpush2.bf16.msra.mxu1 %v11356_v61  ;;  %v11404_v50 = vld [vmem:[#allocation10 + $0xd0] sm:$0xff]  }
  0xe8   :  { %920 = vmatprep.subr.bf16.mxu1 %v11360_v62 }
  0xea   :  { %835 = vmatpush2.bf16.msra.mxu0 %v11329_v53  ;;  %v11407_v53 = vld [vmem:[#allocation10 + $0xc8] sm:$0xff]  }
  0xeb   :  { %836 = vmatprep.subr.bf16.mxu0 %v11333_v54  ;;  %921 = vmatpush2.bf16.msra.mxu1 %v11362_v3  ;;  %v11409_v54 = vld [vmem:[#allocation10 + $0x88] sm:$0xff]  }
  0xec   :  { %922 = vmatprep.subr.bf16.mxu1 %v11366_v6 }
  0xee   :  { %837 = vmatpush2.bf16.msra.mxu0 %v11335_v59 }
  0xef   :  { %838 = vmatprep.subr.bf16.mxu0 %v11339_v60  ;;  %923 = vmatpush2.bf16.msra.mxu1 %v11368_v9  ;;  %v12053_v60 = vshrl.u32 %v395_v57, 7  ;;  %v11415_v57 = vld [vmem:[#allocation18 + $0x20] sm:$0xff]  }
  0xf0   :  { %924 = vmatprep.subr.bf16.mxu1 %v11372_v10 }
  0xf1   :  { %v12480_v62 = vsub.s32 1, %v12053_v60  ;;  %v397_v0 = vsub.s32 0, %v12053_v60  ;;  %v12479_v10 = vsub.s32 3, %v12053_v60 }
  0xf2   :  { %839 = vmatpush2.bf16.msra.mxu0 %v11341_v63  ;;  %v325_v63 = vld [vmem:[#allocation9] sm:$0xf] }
  0xf3   :  { %9922 = vmatprep.subr.msk.bf16.mxu0 %vm795_vm0, %v11345_v5  ;;  %925 = vmatpush2.bf16.msra.mxu1 %v11374_v13  ;;  %v398_v3 = vrot.slane %v325_v63, %v397_v0 }
  0xf4   :  { %11084 = vmatprep.subr.bf16.mxu1 %v11386_v31 }
  0xf5   :  { %841 = vmatmul.mubr.bf16.vlgmr.msra.gmra.mxu0 %v391_v7 }
  0xf6   :  { %862 = vmatpush1.bf16.msra.mxu0 %v797_v2  ;;  %883 = vmatprep.mubr.bf16.mxu0 %v11890_v14  ;;  %v402_v2 = vrot.slane %v325_v63, %v12480_v62 }
  0xf7   :  { %863 = vmatprep.subr.bf16.mxu0 %v11353_v8  ;;  %927 = vmatmul.mubr.bf16.vlgmr.msra.gmra.mxu1 %v391_v7  ;;  %v12478_v7 = vsub.s32 2, %v12053_v60 }
  0xf8   :  { %11085 = vmatpush3.bf16.msra.mxu1 %v11387_v33 }
  0xf9   :  { %11086 = vmatprep.subr.bf16.mxu1 %v11390_v36 }
  0xfa   :  { %864 = vmatpush1.bf16.msra.mxu0 %v11351_v11 }
  0xfb   :  { %865 = vmatprep.subr.bf16.mxu0 %v11359_v12 }
  0xfc   :  { %11087 = vmatpush3.bf16.msra.mxu1 %v11391_v37 }
  0xfd   :  { %11088 = vmatprep.subr.bf16.mxu1 %v11394_v39  ;;  %v11408_v39 = vld [vmem:[#allocation15] sm:$0xff]  }
  0xfe   :  { %866 = vmatpush1.bf16.msra.mxu0 %v11357_v15 }
  0xff   :  { %9924 = vmatprep.subr.msk.bf16.mxu0 %vm795_vm0, %v11363_v18 }
 0x100   :  { %11089 = vmatpush3.bf16.msra.mxu1 %v11395_v41  ;;  %v1275_v41 = vld [vmem:[#allocation13 + $0x8] sm:$0xff] }
 0x101   :  { %9923 = vmatmul.mubr.msk.bf16.vlgmr.msra.gmra.mxu0 %vm791_vm1, %v393_v19  ;;  %11090 = vmatprep.subr.bf16.mxu1 %v11398_v43 }
 0x102   :  { %948 = vmatpush1.bf16.msra.mxu0 %v803_v4  ;;  %969 = vmatprep.mubr.bf16.mxu0 %v11890_v14 }
 0x103   :  { %949 = vmatprep.subr.bf16.mxu0 %v11371_v20 }
 0x104   :  { %11091 = vmatpush3.bf16.msra.mxu1 %v11399_v45 }
 0x105   :  { %11092 = vmatprep.subr.bf16.mxu1 %v11402_v47 }
 0x106   :  { %950 = vmatpush1.bf16.msra.mxu0 %v11369_v21  ;;  %v410_v21 = vrot.slane %v325_v63, %v12479_v10 }
 0x107   :  { %951 = vmatprep.subr.bf16.mxu0 %v11377_v22 }
 0x108   :  { %11093 = vmatpush3.bf16.msra.mxu1 %v11403_v49 }
 0x109   :  { %11094 = vmatprep.subr.bf16.mxu1 %v11404_v50 }
 0x10a   :  { %952 = vmatpush1.bf16.msra.mxu0 %v11375_v23 }
 0x10b   :  { %11062 = vmatprep.subr.bf16.mxu0 %v11378_v24 }
 0x10c   :  { %11095 = vmatpush3.bf16.msra.mxu1 %v11406_v51 }
 0x10d   :  { %9925 = vmatmul.mubr.msk.bf16.vlgmr.msra.gmra.mxu0 %vm791_vm1, %v393_v19  ;;  %11096 = vmatprep.subr.bf16.mxu1 %v11407_v53  ;;  %v406_v19 = vrot.slane %v325_v63, %v12478_v7  ;;  %v11419_v63 = vld [vmem:[#allocation18] sm:$0xff]  }
 0x10e   :  { %11063 = vmatpush3.bf16.msra.mxu0 %v11379_v25 }
 0x10f   :  { %11064 = vmatprep.subr.bf16.mxu0 %v11380_v26 }
 0x110   :  { %11097 = vmatpush3.bf16.msra.mxu1 %v11409_v54  ;;  %v11412_v54 = vld [vmem:[#allocation18 + $0x38] sm:$0xff]  }
 0x111   :  { %11098 = vmatprep.subr.bf16.mxu1 %v11410_v55  ;;  %v11413_v55 = vld [vmem:[#allocation18 + $0x30] sm:$0xff]  }
 0x112   :  { %11065 = vmatpush3.bf16.msra.mxu0 %v11381_v27 }
 0x113   :  { %11066 = vmatprep.subr.bf16.mxu0 %v11382_v28 }
 0x114   :  { %11099 = vmatpush3.bf16.msra.mxu1 %v11411_v56  ;;  %v11414_v56 = vld [vmem:[#allocation18 + $0x28] sm:$0xff]  }
 0x115   :  { %11214 = vmatprep.subr.bf16.mxu1 %v11891_v52 }
 0x116   :  { %11067 = vmatpush3.bf16.msra.mxu0 %v11383_v29 }
 0x117   :  { %11068 = vmatprep.subr.bf16.mxu0 %v11384_v30  ;;  %v11405_v30 = vld [vmem:[#allocation15 + $0x8] sm:$0xff]  }
 0x11a   :  { %11069 = vmatpush3.bf16.msra.mxu0 %v11385_v32 }
 0x11b   :  { %11070 = vmatprep.subr.bf16.mxu0 %v11388_v34 }
 0x11e   :  { %11071 = vmatpush3.bf16.msra.mxu0 %v11389_v35 }
 0x11f   :  { %11072 = vmatprep.subr.bf16.mxu0 %v11392_v38 }
 0x122   :  { %11073 = vmatpush3.bf16.msra.mxu0 %v11393_v40  ;;  %v1274_v40 = vld [vmem:[#allocation13] sm:$0xff] }
 0x123   :  { %11074 = vmatprep.subr.bf16.mxu0 %v11396_v42 }
 0x126   :  { %11075 = vmatpush3.bf16.msra.mxu0 %v11397_v44 }
 0x127   :  { %11076 = vmatprep.subr.bf16.mxu0 %v11400_v46  ;;  %v1298_v46 = vpack.c.bf16 %v1275_v41, %v1274_v40 }
 0x12a   :  { %11077 = vmatpush3.bf16.msra.mxu0 %v11401_v48 }
 0x12b   :  { %11206 = vmatprep.subr.bf16.mxu0 %v11891_v52 }
 0x1b5   :  { %v842_v58 = vpop.f32.mrf.mxu0 }
 0x1b6   :  { %v843_v11 = vadd.f32 %v842_v58, %v398_v3  ;;  %v11416_v58 = vld [vmem:[#allocation18 + $0x18] sm:$0xff]  }
 0x1b7   :  { %v844_v59 = vpop.f32.mrf.mxu0  ;;  %v928_v5 = vpop.f32.mrf.mxu1 }
 0x1b8   :  { %v845_v8 = vadd.f32 %v844_v59, %v402_v2  ;;  %v929_v27 = vadd.f32 %v928_v5, %v406_v19  ;;  %v11417_v59 = vld [vmem:[#allocation18 + $0x10] sm:$0xff]   ;;  %v9959_v5 = vld [vmem:[#allocation16] ss:$0 sm:$0xff] }
 0x1b9   :  { %v846_v61 = vpop.f32.mrf.mxu0  ;;  %v930_v13 = vpop.f32.mrf.mxu1 }
 0x1ba   :  { %v847_v9 = vadd.f32 %v846_v61, %v398_v3  ;;  %v931_v29 = vadd.f32 %v930_v13, %v410_v21  ;;  %v11418_v61 = vld [vmem:[#allocation18 + $0x8] sm:$0xff]  }
 0x1bb   :  { %v848_v1 = vpop.f32.mrf.mxu0  ;;  %v932_v23 = vpop.f32.mrf.mxu1 }
 0x1bc   :  { %v849_v14 = vadd.f32 %v848_v1, %v402_v2  ;;  %v933_v34 = vadd.f32 %v932_v23, %v406_v19 }
 0x1bd   :  { %v934_v33 = vpop.f32.mrf.mxu1 }
 0x1be   :  { %v935_v38 = vadd.f32 %v934_v33, %v410_v21 }
 0x1c1   :  { %v885_v4 = vpop.f32.mrf.mxu0 }
 0x1c2   :  { %v886_v17 = vadd.f32 %v885_v4, %v843_v11  ;;  %v9926_v11 = vld [vmem:[#allocation12] ss:$0 sm:$0xff] }
 0x1c3   :  { %v887_v6 = vpop.f32.mrf.mxu0 }
 0x1c4   :  { %v888_v15 = vadd.f32 %v887_v6, %v845_v8  ;;  %v980_v26 = vmax.f32 %v886_v17, 0.0 }
 0x1c5   :  { %v889_v12 = vpop.f32.mrf.mxu0 }
 0x1c6   :  { %v890_v16 = vadd.f32 %v889_v12, %v847_v9  ;;  %v981_v24 = vmax.f32 %v888_v15, 0.0 }
 0x1c7   :  { %v891_v18 = vpop.f32.mrf.mxu0 }
 0x1c8   :  { %v892_v20 = vadd.f32 %v891_v18, %v849_v14  ;;  %v984_v22 = vmax.f32 %v890_v16, 0.0 }
 0x1ca   :  { %v985_v25 = vmax.f32 %v892_v20, 0.0  ;;  %v988_v31 = vpack.c.bf16 %v984_v22, %v980_v26 }
 0x1cc   :  { %v989_v28 = vpack.c.bf16 %v985_v25, %v981_v24 }
 0x1cd   :  { %v971_v32 = vpop.f32.mrf.mxu0 }
 0x1ce   :  { %1222 = vmatprep.mubr.bf16.mxu0 %v989_v28  ;;  %v972_v35 = vadd.f32 %v971_v32, %v929_v27 }
 0x1cf   :  { %v973_v36 = vpop.f32.mrf.mxu0  ;;  %1223 = vmatmul.mubr.bf16.vlgmr.msra.gmra.mxu0 %v988_v31 }
 0x1d0   :  { %v974_v37 = vadd.f32 %v973_v36, %v931_v29  ;;  %11207 = vmatpush3.bf16.msra.mxu0 %v11405_v30  ;;  %11210 = vmatprep.mubr.msk.bf16.mxu0 %vm11892_vm2, %v11891_v52  ;;  %v982_v44 = vmax.f32 %v972_v35, 0.0 }
 0x1d1   :  { %v975_v42 = vpop.f32.mrf.mxu0  ;;  %11208 = vmatprep.subr.bf16.mxu0 %v11891_v52 }
 0x1d2   :  { %v976_v43 = vadd.f32 %v975_v42, %v933_v34  ;;  %v983_v47 = vmax.f32 %v974_v37, 0.0 }
 0x1d3   :  { %v977_v45 = vpop.f32.mrf.mxu0 }
 0x1d4   :  { %v986_v48 = vmax.f32 %v976_v43, 0.0  ;;  %v978_v49 = vadd.f32 %v977_v45, %v935_v38  ;;  %11209 = vmatpush3.bf16.msra.mxu0 %v11408_v39 }
 0x1d6   :  { %v987_v50 = vmax.f32 %v978_v49, 0.0  ;;  %v990_v51 = vpack.c.bf16 %v986_v48, %v982_v44 }
 0x1d7   :  { %11211 = vmatmul.mubr.msk.bf16.vlgmr.msra.gmra.mxu0 %vm1317_vm3, %v1298_v46 }
 0x1d8   :  { %v991_v53 = vpack.c.bf16 %v987_v50, %v983_v47 }
 0x1da   :  { %1263 = vmatprep.mubr.bf16.mxu1 %v991_v53 }
 0x1db   :  { %1264 = vmatmul.mubr.bf16.vlgmr.msra.gmra.mxu1 %v990_v51 }
 0x1dc   :  { %11215 = vmatpush3.bf16.msra.mxu1 %v11412_v54  ;;  %11230 = vmatprep.mubr.msk.bf16.mxu1 %vm11892_vm2, %v11891_v52 }
 0x1dd   :  { %11216 = vmatprep.subr.bf16.mxu1 %v11891_v52 }
 0x1e0   :  { %11217 = vmatpush3.bf16.msra.mxu1 %v11413_v55 }
 0x1e1   :  { %11218 = vmatprep.subr.bf16.mxu1 %v11891_v52 }
 0x1e4   :  { %11219 = vmatpush3.bf16.msra.mxu1 %v11414_v56 }
 0x1e5   :  { %11220 = vmatprep.subr.bf16.mxu1 %v11891_v52 }
 0x1e8   :  { %11221 = vmatpush3.bf16.msra.mxu1 %v11415_v57 }
 0x1e9   :  { %11222 = vmatprep.subr.bf16.mxu1 %v11891_v52 }
 0x1ec   :  { %11223 = vmatpush3.bf16.msra.mxu1 %v11416_v58 }
 0x1ed   :  { %11224 = vmatprep.subr.bf16.mxu1 %v11891_v52 }
 0x1f0   :  { %11225 = vmatpush3.bf16.msra.mxu1 %v11417_v59 }
 0x1f1   :  { %11226 = vmatprep.subr.bf16.mxu1 %v11891_v52 }
 0x1f4   :  { %11227 = vmatpush3.bf16.msra.mxu1 %v11418_v61 }
 0x1f5   :  { %11228 = vmatprep.subr.bf16.mxu1 %v11891_v52 }
 0x1f8   :  { %11229 = vmatpush3.bf16.msra.mxu1 %v11419_v63 }
 0x28f   :  { %v11078_v1 = vpop.f32.mrf.mxu0 }
 0x291   :  { %v11079_v2 = vpop.f32.mrf.mxu0 }
 0x292   :  { %v11080_v8 = vadd.f32 %v11079_v2, %v11078_v1 }
 0x293   :  { %v11081_v3 = vpop.f32.mrf.mxu0 }
 0x294   :  { %v1225_v16 = vadd.f32 %v11080_v8, %v9926_v11 }
 0x295   :  { %v11082_v4 = vpop.f32.mrf.mxu0 }
 0x296   :  { %v11083_v19 = vadd.f32 %v11082_v4, %v11081_v3 }
 0x297   :  { %v1355_v6 = vpop.f32.mrf.mxu0 }
 0x298   :  { %v1356_v12 = vadd.f32 %v9959_v5, %v1355_v6  ;;  %v1228_v26 = vadd.f32 %v11083_v19, %v9926_v11 }
 0x299   :  { %v11212_v9 = vpop.f32.mrf.mxu0 }
 0x29a   :  { %v1362_v52 = vmax.f32 %v1356_v12, 0.0 }
 0x29b   :  { %v11100_v13 = vpop.f32.mrf.mxu1  ;;  %v1358_v14 = vpop.f32.mrf.mxu0 }
 0x29c   :  { %v1359_v15 = vadd.f32 %v9959_v5, %v1358_v14 }
 0x29d   :  { %v11101_v17 = vpop.f32.mrf.mxu1  ;;  %v11213_v18 = vpop.f32.mrf.mxu0 }
 0x29e   :  { %v1363_v20 = vmax.f32 %v1359_v15, 0.0  ;;  %v11102_v21 = vadd.f32 %v11101_v17, %v11100_v13 }
 0x29f   :  { %v11103_v22 = vpop.f32.mrf.mxu1 }
 0x2a0   :  { %v1364_v23 = vpack.c.bf16 %v1363_v20, %v1362_v52  ;;  %v1266_v24 = vadd.f32 %v11102_v21, %v1225_v16 }
 0x2a1   :  { %v11104_v25 = vpop.f32.mrf.mxu1 }
 0x2a2   :  { %1272 = vst [vmem:[#allocation27] sm:$0xff] %v1266_v24  ;;  %v11105_v27 = vadd.f32 %v11104_v25, %v11103_v22  ;;  %11231 = vmatmul.mubr.bf16.vlgmr.msra.gmra.mxu1 %v1364_v23 }
 0x2a4   :  { %v1269_v28 = vadd.f32 %v11105_v27, %v1228_v26 }
 0x2a6   :  { %1273 = vst [vmem:[#allocation27 + $0x8] sm:$0xff] %v1269_v28 }
 0x2a7   :  { %11784 = shalt.err (!%p11781_p4)  }
 0x2a8   :  { %242 = dma.hbm_to_vmem [thread:$0]  %s12471_s11, 131072, %s240_s14, [#allocation3]  ;;  %v9963_v29 = vld [vmem:[#allocation19] ss:$0 sm:$0xff] }
 0x362   :  { %v1453_v30 = vpop.f32.mrf.mxu1 }
 0x363   :  { %v1454_v31 = vadd.f32 %v9963_v29, %v1453_v30 }
 0x364   :  { %v11232_v32 = vpop.f32.mrf.mxu1 }
 0x365   :  { %1460 = vst [vmem:[#allocation28] sm:$0xff] %v1454_v31 }
 0x366   :  { %v1456_v33 = vpop.f32.mrf.mxu1 }
 0x367   :  { %v1457_v34 = vadd.f32 %v9963_v29, %v1456_v33 }
 0x368   :  { %v11233_v35 = vpop.f32.mrf.mxu1 }
 0x369   :  { %1461 = vst [vmem:[#allocation28 + $0x8] sm:$0xff] %v1457_v34 }
 0x36a   :  { %11861 = dma.done.wait [#allocation3], 131072 }
 0x36b   :  { %11862 = vsyncadd [#allocation3], 4294836224  ;;  %v1554_v36 = vld [vmem:[#allocation2 + $0x1c0] sm:$0xff]  ;;  %s11894_s11 = smov [#allocation28]   ;;  %s11895_s29 = smov [#allocation27]  }
 0x36c   :  { %v1558_v37 = vld [vmem:[#allocation2 + $0x1e0] sm:$0xff]  ;;  %s9802_s4 = sshll.u32 %s11894_s11, 4  ;;  %s9790_s0 = sshll.u32 %s11895_s29, 4  ;;  %s9803_s4 = int_to_ptr.vmem [resolvable:$true] %s9802_s4  ;;  %s9791_s0 = int_to_ptr.vmem [resolvable:$true] %s9790_s0 }
 0x36d   :  { %v1682_v38 = vld [vmem:[#allocation2 + $0x5c0] sm:$0xff]  ;;  %v10029_v39 = vcombine.high %v1554_v36, %v1558_v37  ;;  %v10028_v41 = vcombine.low %v1554_v36, %v1558_v37  ;;  %v1469_v36 = vld [vmem:[#allocation21 + $0x18] sm:$0xff]  ;;  %s11785_s18 = scalar_lea.vmem %s9803_s4, 256  ;;  %p11790_p6 = scmp.lt.s32.totalorder %s9803_s4, %s9803_s4 }
 0x36e   :  { %v1686_v40 = vld [vmem:[#allocation2 + $0x5e0] sm:$0xff]  ;;  %v1485_v37 = vld [vmem:[#allocation21 + $0x98] sm:$0xff]  ;;  %p11786_p5 = scmp.ne.s32.totalorder %s9803_s4, %s11785_s18  ;;  %p11791_p7 = scmp.lt.s32.totalorder %s11785_s18, %s11785_s18 }
 0x36f   :  { %v1546_v42 = vld [vmem:[#allocation2 + $0x180] sm:$0xff]  ;;  %v10157_v44 = vcombine.high %v1682_v38, %v1686_v40  ;;  %v10156_v45 = vcombine.low %v1682_v38, %v1686_v40  ;;  %7829 = vmatprep.subr.bf16.mxu0 %v10029_v39  ;;  %v12084_v40 = vpack.c.bf16 %v1485_v37, %v1469_v36 }
 0x370   :  { %v1550_v43 = vld [vmem:[#allocation2 + $0x1a0] sm:$0xff]  ;;  %7830 = vmatpush1.bf16.msra.mxu0 %v10028_v41  ;;  %p11792_p8 = por %p11791_p7, %p11790_p6 }
 0x371   :  { %v10021_v46 = vcombine.high %v1546_v42, %v1550_v43  ;;  %v1674_v47 = vld [vmem:[#allocation2 + $0x580] sm:$0xff]  ;;  %7872 = vmatprep.subr.bf16.mxu1 %v10157_v44  ;;  %v10020_v55 = vcombine.low %v1546_v42, %v1550_v43  ;;  %7904 = vmatprep.mubr.bf16.mxu1 %v12084_v40 }
 0x372   :  { %v1678_v48 = vld [vmem:[#allocation2 + $0x5a0] sm:$0xff]  ;;  %7873 = vmatpush1.bf16.msra.mxu1 %v10156_v45  ;;  %p11793_p9 = pnand %p11792_p8, %p11786_p5 }
 0x373   :  { %v1538_v49 = vld [vmem:[#allocation2 + $0x140] sm:$0xff]  ;;  %v10149_v50 = vcombine.high %v1674_v47, %v1678_v48  ;;  %7831 = vmatprep.subr.bf16.mxu0 %v10021_v46  ;;  %v10148_v56 = vcombine.low %v1674_v47, %v1678_v48 }
 0x374   :  { %v1542_v51 = vld [vmem:[#allocation2 + $0x160] sm:$0xff]  ;;  %7832 = vmatpush1.bf16.msra.mxu0 %v10020_v55 }
 0x375   :  { %v1666_v53 = vld [vmem:[#allocation2 + $0x540] sm:$0xff]  ;;  %v10013_v57 = vcombine.high %v1538_v49, %v1542_v51  ;;  %7874 = vmatprep.subr.bf16.mxu1 %v10149_v50  ;;  %v10012_v2 = vcombine.low %v1538_v49, %v1542_v51 }
 0x376   :  { %v1670_v54 = vld [vmem:[#allocation2 + $0x560] sm:$0xff]  ;;  %7875 = vmatpush1.bf16.msra.mxu1 %v10148_v56 }
 0x377   :  { %v10141_v58 = vcombine.high %v1666_v53, %v1670_v54  ;;  %v1530_v59 = vld [vmem:[#allocation2 + $0x100] sm:$0xff]  ;;  %7833 = vmatprep.subr.bf16.mxu0 %v10013_v57  ;;  %v10140_v3 = vcombine.low %v1666_v53, %v1670_v54 }
 0x378   :  { %v1534_v61 = vld [vmem:[#allocation2 + $0x120] sm:$0xff]  ;;  %7834 = vmatpush1.bf16.msra.mxu0 %v10012_v2 }
 0x379   :  { %v1658_v63 = vld [vmem:[#allocation2 + $0x500] sm:$0xff]  ;;  %v10005_v4 = vcombine.high %v1530_v59, %v1534_v61  ;;  %7876 = vmatprep.subr.bf16.mxu1 %v10141_v58  ;;  %v10004_v12 = vcombine.low %v1530_v59, %v1534_v61 }
 0x37a   :  { %v1662_v1 = vld [vmem:[#allocation2 + $0x520] sm:$0xff]  ;;  %7877 = vmatpush1.bf16.msra.mxu1 %v10140_v3 }
 0x37b   :  { %v10133_v5 = vcombine.high %v1658_v63, %v1662_v1  ;;  %v1522_v6 = vld [vmem:[#allocation2 + $0xc0] sm:$0xff]  ;;  %7835 = vmatprep.subr.bf16.mxu0 %v10005_v4  ;;  %v10132_v13 = vcombine.low %v1658_v63, %v1662_v1 }
 0x37c   :  { %v1526_v8 = vld [vmem:[#allocation2 + $0xe0] sm:$0xff]  ;;  %7836 = vmatpush1.bf16.msra.mxu0 %v10004_v12 }
 0x37d   :  { %v1650_v9 = vld [vmem:[#allocation2 + $0x4c0] sm:$0xff]  ;;  %v9997_v14 = vcombine.high %v1522_v6, %v1526_v8  ;;  %7878 = vmatprep.subr.bf16.mxu1 %v10133_v5  ;;  %v9996_v52 = vcombine.low %v1522_v6, %v1526_v8 }
 0x37e   :  { %v1654_v11 = vld [vmem:[#allocation2 + $0x4e0] sm:$0xff]  ;;  %7879 = vmatpush1.bf16.msra.mxu1 %v10132_v13 }
 0x37f   :  { %v10125_v15 = vcombine.high %v1650_v9, %v1654_v11  ;;  %v1514_v16 = vld [vmem:[#allocation2 + $0x80] sm:$0xff]  ;;  %7837 = vmatprep.subr.bf16.mxu0 %v9997_v14  ;;  %v10124_v20 = vcombine.low %v1650_v9, %v1654_v11 }
 0x380   :  { %v1518_v17 = vld [vmem:[#allocation2 + $0xa0] sm:$0xff]  ;;  %7838 = vmatpush1.bf16.msra.mxu0 %v9996_v52 }
 0x381   :  { %v1642_v18 = vld [vmem:[#allocation2 + $0x480] sm:$0xff]  ;;  %v9989_v21 = vcombine.high %v1514_v16, %v1518_v17  ;;  %7880 = vmatprep.subr.bf16.mxu1 %v10125_v15  ;;  %v9988_v27 = vcombine.low %v1514_v16, %v1518_v17 }
 0x382   :  { %v1646_v19 = vld [vmem:[#allocation2 + $0x4a0] sm:$0xff]  ;;  %7881 = vmatpush1.bf16.msra.mxu1 %v10124_v20 }
 0x383   :  { %v10117_v22 = vcombine.high %v1642_v18, %v1646_v19  ;;  %v1506_v23 = vld [vmem:[#allocation2 + $0x40] sm:$0xff]  ;;  %7839 = vmatprep.subr.bf16.mxu0 %v9989_v21  ;;  %v10116_v28 = vcombine.low %v1642_v18, %v1646_v19 }
 0x384   :  { %v1510_v24 = vld [vmem:[#allocation2 + $0x60] sm:$0xff]  ;;  %7840 = vmatpush1.bf16.msra.mxu0 %v9988_v27 }
 0x385   :  { %v1634_v25 = vld [vmem:[#allocation2 + $0x440] sm:$0xff]  ;;  %v9981_v29 = vcombine.high %v1506_v23, %v1510_v24  ;;  %7882 = vmatprep.subr.bf16.mxu1 %v10117_v22  ;;  %v9980_v41 = vcombine.low %v1506_v23, %v1510_v24 }
 0x386   :  { %v1638_v26 = vld [vmem:[#allocation2 + $0x460] sm:$0xff]  ;;  %7883 = vmatpush1.bf16.msra.mxu1 %v10116_v28 }
 0x387   :  { %v1498_v30 = vld [vmem:[#allocation2] sm:$0xff]  ;;  %v10109_v33 = vcombine.high %v1634_v25, %v1638_v26  ;;  %7841 = vmatprep.subr.bf16.mxu0 %v9981_v29  ;;  %v10108_v42 = vcombine.low %v1634_v25, %v1638_v26 }
 0x388   :  { %v1467_v31 = vld [vmem:[#allocation21 + $0x8] sm:$0xff]  ;;  %7842 = vmatpush1.bf16.msra.mxu0 %v9980_v41 }
 0x389   :  { %v1483_v32 = vld [vmem:[#allocation21 + $0x88] sm:$0xff]  ;;  %7884 = vmatprep.subr.bf16.mxu1 %v10109_v33 }
 0x38a   :  { %v1502_v34 = vld [vmem:[#allocation2 + $0x20] sm:$0xff]  ;;  %v12082_v35 = vpack.c.bf16 %v1483_v32, %v1467_v31  ;;  %7885 = vmatpush1.bf16.msra.mxu1 %v10108_v42 }
 0x38b   :  { %v1626_v38 = vld [vmem:[#allocation2 + $0x400] sm:$0xff]  ;;  %v9973_v43 = vcombine.high %v1498_v30, %v1502_v34  ;;  %v9972_v49 = vcombine.low %v1498_v30, %v1502_v34 }
 0x38c   :  { %v1630_v39 = vld [vmem:[#allocation2 + $0x420] sm:$0xff]  ;;  %7861 = vmatprep.mubr.bf16.mxu0 %v12082_v35 }
 0x38d   :  { %v10101_v44 = vcombine.high %v1626_v38, %v1630_v39  ;;  %v1618_v45 = vld [vmem:[#allocation2 + $0x3c0] sm:$0xff]  ;;  %7843 = vmatprep.subr.bf16.mxu0 %v9973_v43  ;;  %v10100_v50 = vcombine.low %v1626_v38, %v1630_v39 }
 0x38e   :  { %v1622_v46 = vld [vmem:[#allocation2 + $0x3e0] sm:$0xff]  ;;  %7844 = vmatpush1.bf16.msra.mxu0 %v9972_v49 }
 0x38f   :  { %v1746_v47 = vld [vmem:[#allocation2 + $0x7c0] sm:$0xff]  ;;  %v10093_v51 = vcombine.high %v1618_v45, %v1622_v46  ;;  %7886 = vmatprep.subr.bf16.mxu1 %v10101_v44  ;;  %v10092_v58 = vcombine.low %v1618_v45, %v1622_v46 }
 0x390   :  { %v1750_v48 = vld [vmem:[#allocation2 + $0x7e0] sm:$0xff]  ;;  %7887 = vmatpush1.bf16.msra.mxu1 %v10100_v50 }
 0x391   :  { %v10221_v53 = vcombine.high %v1746_v47, %v1750_v48  ;;  %v1610_v54 = vld [vmem:[#allocation2 + $0x380] sm:$0xff]  ;;  %7845 = vmatprep.subr.bf16.mxu0 %v10093_v51  ;;  %v10220_v59 = vcombine.low %v1746_v47, %v1750_v48 }
 0x392   :  { %v1614_v55 = vld [vmem:[#allocation2 + $0x3a0] sm:$0xff]  ;;  %7846 = vmatpush2.bf16.msra.mxu0 %v10092_v58 }
 0x393   :  { %v1738_v56 = vld [vmem:[#allocation2 + $0x780] sm:$0xff]  ;;  %v10085_v61 = vcombine.high %v1610_v54, %v1614_v55  ;;  %7888 = vmatprep.subr.bf16.mxu1 %v10221_v53  ;;  %v10084_v5 = vcombine.low %v1610_v54, %v1614_v55 }
 0x394   :  { %v1742_v57 = vld [vmem:[#allocation2 + $0x7a0] sm:$0xff]  ;;  %7889 = vmatpush2.bf16.msra.mxu1 %v10220_v59 }
 0x395   :  { %v10213_v63 = vcombine.high %v1738_v56, %v1742_v57  ;;  %v1602_v1 = vld [vmem:[#allocation2 + $0x340] sm:$0xff]  ;;  %7847 = vmatprep.subr.bf16.mxu0 %v10085_v61  ;;  %v10212_v6 = vcombine.low %v1738_v56, %v1742_v57 }
 0x396   :  { %v1606_v2 = vld [vmem:[#allocation2 + $0x360] sm:$0xff]  ;;  %7848 = vmatpush2.bf16.msra.mxu0 %v10084_v5 }
 0x397   :  { %v1730_v3 = vld [vmem:[#allocation2 + $0x740] sm:$0xff]  ;;  %v10077_v8 = vcombine.high %v1602_v1, %v1606_v2  ;;  %7890 = vmatprep.subr.bf16.mxu1 %v10213_v63  ;;  %v10076_v15 = vcombine.low %v1602_v1, %v1606_v2  ;;  %v1468_v63 = vld [vmem:[#allocation21 + $0x10] sm:$0xff] }
 0x398   :  { %v1734_v4 = vld [vmem:[#allocation2 + $0x760] sm:$0xff]  ;;  %7891 = vmatpush2.bf16.msra.mxu1 %v10212_v6  ;;  %v1484_v1 = vld [vmem:[#allocation21 + $0x90] sm:$0xff] }
 0x399   :  { %v10205_v9 = vcombine.high %v1730_v3, %v1734_v4  ;;  %v1594_v11 = vld [vmem:[#allocation2 + $0x300] sm:$0xff]  ;;  %7849 = vmatprep.subr.bf16.mxu0 %v10077_v8  ;;  %v10204_v16 = vcombine.low %v1730_v3, %v1734_v4 }
 0x39a   :  { %v1598_v12 = vld [vmem:[#allocation2 + $0x320] sm:$0xff]  ;;  %7850 = vmatpush2.bf16.msra.mxu0 %v10076_v15  ;;  %v1473_v15 = vld [vmem:[#allocation21 + $0x38] sm:$0xff] }
 0x39b   :  { %v1722_v13 = vld [vmem:[#allocation2 + $0x700] sm:$0xff]  ;;  %v10069_v17 = vcombine.high %v1594_v11, %v1598_v12  ;;  %7892 = vmatprep.subr.bf16.mxu1 %v10205_v9  ;;  %v10068_v22 = vcombine.low %v1594_v11, %v1598_v12 }
 0x39c   :  { %v1726_v14 = vld [vmem:[#allocation2 + $0x720] sm:$0xff]  ;;  %7893 = vmatpush2.bf16.msra.mxu1 %v10204_v16  ;;  %v1489_v16 = vld [vmem:[#allocation21 + $0xb8] sm:$0xff] }
 0x39d   :  { %v10197_v18 = vcombine.high %v1722_v13, %v1726_v14  ;;  %v1586_v19 = vld [vmem:[#allocation2 + $0x2c0] sm:$0xff]  ;;  %7851 = vmatprep.subr.bf16.mxu0 %v10069_v17  ;;  %v10196_v23 = vcombine.low %v1722_v13, %v1726_v14  ;;  %v12090_v13 = vpack.c.bf16 %v1484_v1, %v1468_v63 }
 0x39e   :  { %v1590_v52 = vld [vmem:[#allocation2 + $0x2e0] sm:$0xff]  ;;  %7852 = vmatpush2.bf16.msra.mxu0 %v10068_v22 }
 0x39f   :  { %v1714_v20 = vld [vmem:[#allocation2 + $0x6c0] sm:$0xff]  ;;  %v10061_v24 = vcombine.high %v1586_v19, %v1590_v52  ;;  %7894 = vmatprep.subr.bf16.mxu1 %v10197_v18  ;;  %v10060_v30 = vcombine.low %v1586_v19, %v1590_v52 }
 0x3a0   :  { %v1718_v21 = vld [vmem:[#allocation2 + $0x6e0] sm:$0xff]  ;;  %7895 = vmatpush2.bf16.msra.mxu1 %v10196_v23 }
 0x3a1   :  { %v10189_v25 = vcombine.high %v1714_v20, %v1718_v21  ;;  %v1578_v26 = vld [vmem:[#allocation2 + $0x280] sm:$0xff]  ;;  %7853 = vmatprep.subr.bf16.mxu0 %v10061_v24  ;;  %v10188_v31 = vcombine.low %v1714_v20, %v1718_v21  ;;  %v12095_v24 = vpack.c.bf16 %v1489_v16, %v1473_v15 }
 0x3a2   :  { %v1582_v27 = vld [vmem:[#allocation2 + $0x2a0] sm:$0xff]  ;;  %7854 = vmatpush2.bf16.msra.mxu0 %v10060_v30 }
 0x3a3   :  { %v1706_v28 = vld [vmem:[#allocation2 + $0x680] sm:$0xff]  ;;  %v10053_v32 = vcombine.high %v1578_v26, %v1582_v27  ;;  %7896 = vmatprep.subr.bf16.mxu1 %v10189_v25  ;;  %v10052_v39 = vcombine.low %v1578_v26, %v1582_v27 }
 0x3a4   :  { %v1710_v29 = vld [vmem:[#allocation2 + $0x6a0] sm:$0xff]  ;;  %7897 = vmatpush2.bf16.msra.mxu1 %v10188_v31 }
 0x3a5   :  { %v10181_v33 = vcombine.high %v1706_v28, %v1710_v29  ;;  %v1570_v34 = vld [vmem:[#allocation2 + $0x240] sm:$0xff]  ;;  %7855 = vmatprep.subr.bf16.mxu0 %v10053_v32  ;;  %v10180_v41 = vcombine.low %v1706_v28, %v1710_v29 }
 0x3a6   :  { %v1574_v36 = vld [vmem:[#allocation2 + $0x260] sm:$0xff]  ;;  %7856 = vmatpush2.bf16.msra.mxu0 %v10052_v39 }
 0x3a7   :  { %v1698_v37 = vld [vmem:[#allocation2 + $0x640] sm:$0xff]  ;;  %v10045_v42 = vcombine.high %v1570_v34, %v1574_v36  ;;  %7898 = vmatprep.subr.bf16.mxu1 %v10181_v33  ;;  %v10044_v48 = vcombine.low %v1570_v34, %v1574_v36 }
 0x3a8   :  { %v1702_v38 = vld [vmem:[#allocation2 + $0x660] sm:$0xff]  ;;  %7899 = vmatpush2.bf16.msra.mxu1 %v10180_v41 }
 0x3a9   :  { %v10173_v43 = vcombine.high %v1698_v37, %v1702_v38  ;;  %v1562_v44 = vld [vmem:[#allocation2 + $0x200] sm:$0xff]  ;;  %7857 = vmatprep.subr.bf16.mxu0 %v10045_v42  ;;  %v10172_v49 = vcombine.low %v1698_v37, %v1702_v38 }
 0x3aa   :  { %v1566_v45 = vld [vmem:[#allocation2 + $0x220] sm:$0xff]  ;;  %7858 = vmatpush2.bf16.msra.mxu0 %v10044_v48 }
 0x3ab   :  { %v1690_v46 = vld [vmem:[#allocation2 + $0x600] sm:$0xff]  ;;  %v10037_v50 = vcombine.high %v1562_v44, %v1566_v45  ;;  %7900 = vmatprep.subr.bf16.mxu1 %v10173_v43  ;;  %v10036_v57 = vcombine.low %v1562_v44, %v1566_v45 }
 0x3ac   :  { %v1694_v47 = vld [vmem:[#allocation2 + $0x620] sm:$0xff]  ;;  %7901 = vmatpush2.bf16.msra.mxu1 %v10172_v49 }
 0x3ad   :  { %v10165_v51 = vcombine.high %v1690_v46, %v1694_v47  ;;  %v1810_v53 = vld [vmem:[#allocation2 + $0x9c0] sm:$0xff]  ;;  %7859 = vmatprep.subr.bf16.mxu0 %v10037_v50  ;;  %v10164_v61 = vcombine.low %v1690_v46, %v1694_v47 }
 0x3ae   :  { %v1814_v54 = vld [vmem:[#allocation2 + $0x9e0] sm:$0xff]  ;;  %7860 = vmatpush2.bf16.msra.mxu0 %v10036_v57 }
 0x3af   :  { %v1938_v55 = vld [vmem:[#allocation2 + $0xdc0] sm:$0xff]  ;;  %v10285_v2 = vcombine.high %v1810_v53, %v1814_v54  ;;  %7902 = vmatprep.subr.bf16.mxu1 %v10165_v51  ;;  %v10284_v14 = vcombine.low %v1810_v53, %v1814_v54 }
 0x3b0   :  { %v1942_v56 = vld [vmem:[#allocation2 + $0xde0] sm:$0xff]  ;;  %7903 = vmatpush2.bf16.msra.mxu1 %v10164_v61 }
 0x3b1   :  { %v1466_v58 = vld [vmem:[#allocation21] sm:$0xff]  ;;  %v10413_v3 = vcombine.high %v1938_v55, %v1942_v56  ;;  %v1471_v11 = vld [vmem:[#allocation21 + $0x28] sm:$0xff]  ;;  %7915 = vmatprep.subr.bf16.mxu0 %v10285_v2  ;;  %v10412_v17 = vcombine.low %v1938_v55, %v1942_v56 }
 0x3b2   :  { %v1482_v59 = vld [vmem:[#allocation21 + $0x80] sm:$0xff]  ;;  %v1487_v12 = vld [vmem:[#allocation21 + $0xa8] sm:$0xff] }
 0x3b3   :  { %v1802_v4 = vld [vmem:[#allocation2 + $0x980] sm:$0xff]  ;;  %v12088_v8 = vpack.c.bf16 %v1482_v59, %v1466_v58  ;;  %7958 = vmatprep.subr.bf16.mxu1 %v10413_v3  ;;  %v12092_v21 = vpack.c.bf16 %v1487_v12, %v1471_v11  ;;  %7905 = vmatmul.mubr.bf16.vlgmr.msra.gmra.mxu1 %v12090_v13 }
 0x3b4   :  { %v1806_v5 = vld [vmem:[#allocation2 + $0x9a0] sm:$0xff]  ;;  %7959 = vmatpush1.bf16.msra.mxu1 %v10412_v17  ;;  %7990 = vmatprep.mubr.bf16.mxu1 %v12095_v24 }
 0x3b5   :  { %v1930_v6 = vld [vmem:[#allocation2 + $0xd80] sm:$0xff]  ;;  %v10277_v18 = vcombine.high %v1802_v4, %v1806_v5  ;;  %7862 = vmatmul.mubr.bf16.vlgmr.msra.gmra.mxu0 %v12088_v8  ;;  %v10276_v25 = vcombine.low %v1802_v4, %v1806_v5 }
 0x3b6   :  { %v1934_v9 = vld [vmem:[#allocation2 + $0xda0] sm:$0xff]  ;;  %7916 = vmatpush1.bf16.msra.mxu0 %v10284_v14  ;;  %7947 = vmatprep.mubr.bf16.mxu0 %v12092_v21 }
 0x3b7   :  { %v10405_v19 = vcombine.high %v1930_v6, %v1934_v9  ;;  %v1794_v52 = vld [vmem:[#allocation2 + $0x940] sm:$0xff]  ;;  %7917 = vmatprep.subr.bf16.mxu0 %v10277_v18  ;;  %v10404_v26 = vcombine.low %v1930_v6, %v1934_v9 }
 0x3b8   :  { %v1798_v20 = vld [vmem:[#allocation2 + $0x960] sm:$0xff] }
 0x3b9   :  { %v1922_v22 = vld [vmem:[#allocation2 + $0xd40] sm:$0xff]  ;;  %v10269_v27 = vcombine.high %v1794_v52, %v1798_v20  ;;  %7960 = vmatprep.subr.bf16.mxu1 %v10405_v19  ;;  %v10268_v33 = vcombine.low %v1794_v52, %v1798_v20 }
 0x3ba   :  { %v1926_v23 = vld [vmem:[#allocation2 + $0xd60] sm:$0xff]  ;;  %7918 = vmatpush1.bf16.msra.mxu0 %v10276_v25  ;;  %7961 = vmatpush1.bf16.msra.mxu1 %v10404_v26 }
 0x3bb   :  { %v10397_v28 = vcombine.high %v1922_v22, %v1926_v23  ;;  %v1786_v29 = vld [vmem:[#allocation2 + $0x900] sm:$0xff]  ;;  %7919 = vmatprep.subr.bf16.mxu0 %v10269_v27  ;;  %v10396_v34 = vcombine.low %v1922_v22, %v1926_v23 }
 0x3bc   :  { %v1790_v30 = vld [vmem:[#allocation2 + $0x920] sm:$0xff] }
 0x3bd   :  { %v1914_v31 = vld [vmem:[#allocation2 + $0xd00] sm:$0xff]  ;;  %v10261_v36 = vcombine.high %v1786_v29, %v1790_v30  ;;  %7962 = vmatprep.subr.bf16.mxu1 %v10397_v28  ;;  %v10260_v43 = vcombine.low %v1786_v29, %v1790_v30 }
 0x3be   :  { %v1918_v32 = vld [vmem:[#allocation2 + $0xd20] sm:$0xff]  ;;  %7920 = vmatpush1.bf16.msra.mxu0 %v10268_v33  ;;  %7963 = vmatpush1.bf16.msra.mxu1 %v10396_v34 }
 0x3bf   :  { %v10389_v37 = vcombine.high %v1914_v31, %v1918_v32  ;;  %v1778_v38 = vld [vmem:[#allocation2 + $0x8c0] sm:$0xff]  ;;  %7921 = vmatprep.subr.bf16.mxu0 %v10261_v36  ;;  %v10388_v44 = vcombine.low %v1914_v31, %v1918_v32 }
 0x3c0   :  { %v1782_v39 = vld [vmem:[#allocation2 + $0x8e0] sm:$0xff] }
 0x3c1   :  { %v1906_v41 = vld [vmem:[#allocation2 + $0xcc0] sm:$0xff]  ;;  %v10253_v45 = vcombine.high %v1778_v38, %v1782_v39  ;;  %7964 = vmatprep.subr.bf16.mxu1 %v10389_v37  ;;  %v10252_v51 = vcombine.low %v1778_v38, %v1782_v39 }
 0x3c2   :  { %v1910_v42 = vld [vmem:[#allocation2 + $0xce0] sm:$0xff]  ;;  %7922 = vmatpush1.bf16.msra.mxu0 %v10260_v43  ;;  %7965 = vmatpush1.bf16.msra.mxu1 %v10388_v44 }
 0x3c3   :  { %v1770_v46 = vld [vmem:[#allocation2 + $0x880] sm:$0xff]  ;;  %v10381_v49 = vcombine.high %v1906_v41, %v1910_v42  ;;  %7923 = vmatprep.subr.bf16.mxu0 %v10253_v45  ;;  %v10380_v53 = vcombine.low %v1906_v41, %v1910_v42 }
 0x3c4   :  { %v1774_v47 = vld [vmem:[#allocation2 + $0x8a0] sm:$0xff] }
 0x3c5   :  { %v1898_v48 = vld [vmem:[#allocation2 + $0xc80] sm:$0xff]  ;;  %v10245_v54 = vcombine.high %v1770_v46, %v1774_v47  ;;  %7966 = vmatprep.subr.bf16.mxu1 %v10381_v49  ;;  %v10244_v61 = vcombine.low %v1770_v46, %v1774_v47 }
 0x3c6   :  { %v1902_v50 = vld [vmem:[#allocation2 + $0xca0] sm:$0xff]  ;;  %7924 = vmatpush1.bf16.msra.mxu0 %v10252_v51  ;;  %7967 = vmatpush1.bf16.msra.mxu1 %v10380_v53 }
 0x3c7   :  { %v1762_v55 = vld [vmem:[#allocation2 + $0x840] sm:$0xff]  ;;  %v10373_v58 = vcombine.high %v1898_v48, %v1902_v50  ;;  %7925 = vmatprep.subr.bf16.mxu0 %v10245_v54  ;;  %v10372_v63 = vcombine.low %v1898_v48, %v1902_v50 }
 0x3c8   :  { %v1766_v56 = vld [vmem:[#allocation2 + $0x860] sm:$0xff] }
 0x3c9   :  { %v1890_v57 = vld [vmem:[#allocation2 + $0xc40] sm:$0xff]  ;;  %v10237_v1 = vcombine.high %v1762_v55, %v1766_v56  ;;  %7968 = vmatprep.subr.bf16.mxu1 %v10373_v58  ;;  %v10236_v9 = vcombine.low %v1762_v55, %v1766_v56 }
 0x3ca   :  { %v1894_v59 = vld [vmem:[#allocation2 + $0xc60] sm:$0xff]  ;;  %7926 = vmatpush1.bf16.msra.mxu0 %v10244_v61  ;;  %7969 = vmatpush1.bf16.msra.mxu1 %v10372_v63 }
 0x3cb   :  { %v1754_v2 = vld [vmem:[#allocation2 + $0x800] sm:$0xff]  ;;  %v10365_v5 = vcombine.high %v1890_v57, %v1894_v59  ;;  %7927 = vmatprep.subr.bf16.mxu0 %v10237_v1  ;;  %v10364_v11 = vcombine.low %v1890_v57, %v1894_v59 }
 0x3cc   :  { %v1758_v3 = vld [vmem:[#allocation2 + $0x820] sm:$0xff] }
 0x3cd   :  { %v1882_v4 = vld [vmem:[#allocation2 + $0xc00] sm:$0xff]  ;;  %v10229_v12 = vcombine.high %v1754_v2, %v1758_v3  ;;  %7970 = vmatprep.subr.bf16.mxu1 %v10365_v5  ;;  %v10228_v19 = vcombine.low %v1754_v2, %v1758_v3 }
 0x3ce   :  { %v1886_v6 = vld [vmem:[#allocation2 + $0xc20] sm:$0xff]  ;;  %7928 = vmatpush1.bf16.msra.mxu0 %v10236_v9  ;;  %7971 = vmatpush1.bf16.msra.mxu1 %v10364_v11 }
 0x3cf   :  { %v1874_v14 = vld [vmem:[#allocation2 + $0xbc0] sm:$0xff]  ;;  %v10357_v17 = vcombine.high %v1882_v4, %v1886_v6  ;;  %7929 = vmatprep.subr.bf16.mxu0 %v10229_v12  ;;  %v10356_v52 = vcombine.low %v1882_v4, %v1886_v6 }
 0x3d0   :  { %v1878_v15 = vld [vmem:[#allocation2 + $0xbe0] sm:$0xff] }
 0x3d1   :  { %v2002_v16 = vld [vmem:[#allocation2 + $0xfc0] sm:$0xff]  ;;  %v10349_v20 = vcombine.high %v1874_v14, %v1878_v15  ;;  %7972 = vmatprep.subr.bf16.mxu1 %v10357_v17  ;;  %v10348_v28 = vcombine.low %v1874_v14, %v1878_v15 }
 0x3d2   :  { %v2006_v18 = vld [vmem:[#allocation2 + $0xfe0] sm:$0xff]  ;;  %7930 = vmatpush1.bf16.msra.mxu0 %v10228_v19  ;;  %7973 = vmatpush1.bf16.msra.mxu1 %v10356_v52 }
 0x3d3   :  { %v1866_v22 = vld [vmem:[#allocation2 + $0xb80] sm:$0xff]  ;;  %v10477_v26 = vcombine.high %v2002_v16, %v2006_v18  ;;  %7931 = vmatprep.subr.bf16.mxu0 %v10349_v20  ;;  %v10476_v29 = vcombine.low %v2002_v16, %v2006_v18 }
 0x3d4   :  { %v1870_v23 = vld [vmem:[#allocation2 + $0xba0] sm:$0xff] }
 0x3d5   :  { %v1994_v25 = vld [vmem:[#allocation2 + $0xf80] sm:$0xff]  ;;  %v10341_v30 = vcombine.high %v1866_v22, %v1870_v23  ;;  %7974 = vmatprep.subr.bf16.mxu1 %v10477_v26  ;;  %v10340_v37 = vcombine.low %v1866_v22, %v1870_v23 }
 0x3d6   :  { %v1998_v27 = vld [vmem:[#allocation2 + $0xfa0] sm:$0xff]  ;;  %7932 = vmatpush2.bf16.msra.mxu0 %v10348_v28  ;;  %7975 = vmatpush2.bf16.msra.mxu1 %v10476_v29 }
 0x3d7   :  { %v1858_v31 = vld [vmem:[#allocation2 + $0xb40] sm:$0xff]  ;;  %v10469_v34 = vcombine.high %v1994_v25, %v1998_v27  ;;  %7933 = vmatprep.subr.bf16.mxu0 %v10341_v30  ;;  %v10468_v38 = vcombine.low %v1994_v25, %v1998_v27 }
 0x3d8   :  { %v1862_v32 = vld [vmem:[#allocation2 + $0xb60] sm:$0xff] }
 0x3d9   :  { %v1986_v33 = vld [vmem:[#allocation2 + $0xf40] sm:$0xff]  ;;  %v10333_v39 = vcombine.high %v1858_v31, %v1862_v32  ;;  %7976 = vmatprep.subr.bf16.mxu1 %v10469_v34  ;;  %v10332_v46 = vcombine.low %v1858_v31, %v1862_v32  ;;  %v1488_v34 = vld [vmem:[#allocation21 + $0xb0] sm:$0xff] }
 0x3da   :  { %v1990_v36 = vld [vmem:[#allocation2 + $0xf60] sm:$0xff]  ;;  %7934 = vmatpush2.bf16.msra.mxu0 %v10340_v37  ;;  %7977 = vmatpush2.bf16.msra.mxu1 %v10468_v38 }
 0x3db   :  { %v1850_v41 = vld [vmem:[#allocation2 + $0xb00] sm:$0xff]  ;;  %v10461_v44 = vcombine.high %v1986_v33, %v1990_v36  ;;  %7935 = vmatprep.subr.bf16.mxu0 %v10333_v39  ;;  %v10460_v47 = vcombine.low %v1986_v33, %v1990_v36  ;;  %v1472_v33 = vld [vmem:[#allocation21 + $0x30] sm:$0xff] }
 0x3dc   :  { %v1854_v42 = vld [vmem:[#allocation2 + $0xb20] sm:$0xff] }
 0x3dd   :  { %v1978_v43 = vld [vmem:[#allocation2 + $0xf00] sm:$0xff]  ;;  %v10325_v48 = vcombine.high %v1850_v41, %v1854_v42  ;;  %7978 = vmatprep.subr.bf16.mxu1 %v10461_v44  ;;  %v10324_v55 = vcombine.low %v1850_v41, %v1854_v42 }
 0x3de   :  { %v1982_v45 = vld [vmem:[#allocation2 + $0xf20] sm:$0xff]  ;;  %7936 = vmatpush2.bf16.msra.mxu0 %v10332_v46  ;;  %7979 = vmatpush2.bf16.msra.mxu1 %v10460_v47 }
 0x3df   :  { %v1842_v49 = vld [vmem:[#allocation2 + $0xac0] sm:$0xff]  ;;  %v10453_v53 = vcombine.high %v1978_v43, %v1982_v45  ;;  %7937 = vmatprep.subr.bf16.mxu0 %v10325_v48  ;;  %v10452_v56 = vcombine.low %v1978_v43, %v1982_v45  ;;  %v12102_v48 = vpack.c.bf16 %v1488_v34, %v1472_v33 }
 0x3e0   :  { %v1846_v50 = vld [vmem:[#allocation2 + $0xae0] sm:$0xff] }
 0x3e1   :  { %v1970_v51 = vld [vmem:[#allocation2 + $0xec0] sm:$0xff]  ;;  %v10317_v57 = vcombine.high %v1842_v49, %v1846_v50  ;;  %7980 = vmatprep.subr.bf16.mxu1 %v10453_v53  ;;  %v10316_v2 = vcombine.low %v1842_v49, %v1846_v50  ;;  %v1477_v50 = vld [vmem:[#allocation21 + $0x58] sm:$0xff] }
 0x3e2   :  { %v1974_v54 = vld [vmem:[#allocation2 + $0xee0] sm:$0xff]  ;;  %7938 = vmatpush2.bf16.msra.mxu0 %v10324_v55  ;;  %7981 = vmatpush2.bf16.msra.mxu1 %v10452_v56 }
 0x3e3   :  { %v1834_v58 = vld [vmem:[#allocation2 + $0xa80] sm:$0xff]  ;;  %v10445_v63 = vcombine.high %v1970_v51, %v1974_v54  ;;  %7939 = vmatprep.subr.bf16.mxu0 %v10317_v57  ;;  %v10444_v3 = vcombine.low %v1970_v51, %v1974_v54  ;;  %v1493_v51 = vld [vmem:[#allocation21 + $0xd8] sm:$0xff] }
 0x3e4   :  { %v1838_v59 = vld [vmem:[#allocation2 + $0xaa0] sm:$0xff] }
 0x3e5   :  { %v1962_v61 = vld [vmem:[#allocation2 + $0xe80] sm:$0xff]  ;;  %v10309_v4 = vcombine.high %v1834_v58, %v1838_v59  ;;  %7982 = vmatprep.subr.bf16.mxu1 %v10445_v63  ;;  %v10308_v14 = vcombine.low %v1834_v58, %v1838_v59  ;;  %v12107_v63 = vpack.c.bf16 %v1493_v51, %v1477_v50 }
 0x3e6   :  { %v1966_v1 = vld [vmem:[#allocation2 + $0xea0] sm:$0xff]  ;;  %7940 = vmatpush2.bf16.msra.mxu0 %v10316_v2  ;;  %7983 = vmatpush2.bf16.msra.mxu1 %v10444_v3 }
 0x3e7   :  { %v1826_v5 = vld [vmem:[#allocation2 + $0xa40] sm:$0xff]  ;;  %v10437_v11 = vcombine.high %v1962_v61, %v1966_v1  ;;  %7941 = vmatprep.subr.bf16.mxu0 %v10309_v4  ;;  %v10436_v15 = vcombine.low %v1962_v61, %v1966_v1 }
 0x3e8   :  { %v1830_v6 = vld [vmem:[#allocation2 + $0xa60] sm:$0xff] }
 0x3e9   :  { %v1954_v9 = vld [vmem:[#allocation2 + $0xe40] sm:$0xff]  ;;  %v10301_v16 = vcombine.high %v1826_v5, %v1830_v6  ;;  %7984 = vmatprep.subr.bf16.mxu1 %v10437_v11  ;;  %v10300_v22 = vcombine.low %v1826_v5, %v1830_v6 }
 0x3ea   :  { %v1958_v12 = vld [vmem:[#allocation2 + $0xe60] sm:$0xff]  ;;  %7942 = vmatpush2.bf16.msra.mxu0 %v10308_v14  ;;  %7985 = vmatpush2.bf16.msra.mxu1 %v10436_v15 }
 0x3eb   :  { %v1818_v17 = vld [vmem:[#allocation2 + $0xa00] sm:$0xff]  ;;  %v10429_v52 = vcombine.high %v1954_v9, %v1958_v12  ;;  %7943 = vmatprep.subr.bf16.mxu0 %v10301_v16  ;;  %v10428_v23 = vcombine.low %v1954_v9, %v1958_v12 }
 0x3ec   :  { %v1822_v18 = vld [vmem:[#allocation2 + $0xa20] sm:$0xff] }
 0x3ed   :  { %v1946_v19 = vld [vmem:[#allocation2 + $0xe00] sm:$0xff]  ;;  %v10293_v25 = vcombine.high %v1818_v17, %v1822_v18  ;;  %7986 = vmatprep.subr.bf16.mxu1 %v10429_v52  ;;  %v10292_v36 = vcombine.low %v1818_v17, %v1822_v18 }
 0x3ee   :  { %v1950_v20 = vld [vmem:[#allocation2 + $0xe20] sm:$0xff]  ;;  %7944 = vmatpush2.bf16.msra.mxu0 %v10300_v22  ;;  %7987 = vmatpush2.bf16.msra.mxu1 %v10428_v23 }
 0x3ef   :  { %v2066_v26 = vld [vmem:[#allocation2 + $0x11c0] sm:$0xff]  ;;  %v10421_v29 = vcombine.high %v1946_v19, %v1950_v20  ;;  %7945 = vmatprep.subr.bf16.mxu0 %v10293_v25  ;;  %v10420_v39 = vcombine.low %v1946_v19, %v1950_v20 }
 0x3f0   :  { %v2070_v27 = vld [vmem:[#allocation2 + $0x11e0] sm:$0xff] }
 0x3f1   :  { %v2194_v28 = vld [vmem:[#allocation2 + $0x15c0] sm:$0xff]  ;;  %v10541_v41 = vcombine.high %v2066_v26, %v2070_v27  ;;  %7988 = vmatprep.subr.bf16.mxu1 %v10421_v29  ;;  %v10540_v49 = vcombine.low %v2066_v26, %v2070_v27 }
 0x3f2   :  { %v1470_v30 = vld [vmem:[#allocation21 + $0x20] sm:$0xff]  ;;  %v1475_v44 = vld [vmem:[#allocation21 + $0x48] sm:$0xff]  ;;  %7946 = vmatpush2.bf16.msra.mxu0 %v10292_v36  ;;  %7989 = vmatpush2.bf16.msra.mxu1 %v10420_v39 }
 0x3f3   :  { %v1486_v31 = vld [vmem:[#allocation21 + $0xa0] sm:$0xff]  ;;  %v1491_v46 = vld [vmem:[#allocation21 + $0xc8] sm:$0xff]  ;;  %8001 = vmatprep.subr.bf16.mxu0 %v10541_v41 }
 0x3f4   :  { %v2198_v32 = vld [vmem:[#allocation2 + $0x15e0] sm:$0xff]  ;;  %v12100_v47 = vpack.c.bf16 %v1486_v31, %v1470_v30  ;;  %v12104_v58 = vpack.c.bf16 %v1491_v46, %v1475_v44 }
 0x3f5   :  { %v2058_v37 = vld [vmem:[#allocation2 + $0x1180] sm:$0xff]  ;;  %v10669_v45 = vcombine.high %v2194_v28, %v2198_v32  ;;  %v10668_v53 = vcombine.low %v2194_v28, %v2198_v32  ;;  %7991 = vmatmul.mubr.bf16.vlgmr.msra.gmra.mxu1 %v12102_v48 }
 0x3f6   :  { %v2062_v38 = vld [vmem:[#allocation2 + $0x11a0] sm:$0xff]  ;;  %7948 = vmatmul.mubr.bf16.vlgmr.msra.gmra.mxu0 %v12100_v47  ;;  %8076 = vmatprep.mubr.bf16.mxu1 %v12107_v63 }
 0x3f7   :  { %v2186_v42 = vld [vmem:[#allocation2 + $0x1580] sm:$0xff]  ;;  %v10533_v54 = vcombine.high %v2058_v37, %v2062_v38  ;;  %8044 = vmatprep.subr.bf16.mxu1 %v10669_v45  ;;  %8002 = vmatpush1.bf16.msra.mxu0 %v10540_v49  ;;  %v10532_v1 = vcombine.low %v2058_v37, %v2062_v38 }
 0x3f8   :  { %v2190_v43 = vld [vmem:[#allocation2 + $0x15a0] sm:$0xff]  ;;  %8045 = vmatpush1.bf16.msra.mxu1 %v10668_v53  ;;  %8033 = vmatprep.mubr.bf16.mxu0 %v12104_v58 }
 0x3f9   :  { %v10661_v55 = vcombine.high %v2186_v42, %v2190_v43  ;;  %v2050_v56 = vld [vmem:[#allocation2 + $0x1140] sm:$0xff]  ;;  %8003 = vmatprep.subr.bf16.mxu0 %v10533_v54  ;;  %v10660_v2 = vcombine.low %v2186_v42, %v2190_v43 }
 0x3fa   :  { %v2054_v57 = vld [vmem:[#allocation2 + $0x1160] sm:$0xff] }
 0x3fb   :  { %v2178_v59 = vld [vmem:[#allocation2 + $0x1540] sm:$0xff]  ;;  %v10525_v3 = vcombine.high %v2050_v56, %v2054_v57  ;;  %8046 = vmatprep.subr.bf16.mxu1 %v10661_v55  ;;  %8004 = vmatpush1.bf16.msra.mxu0 %v10532_v1  ;;  %v10524_v12 = vcombine.low %v2050_v56, %v2054_v57 }
 0x3fc   :  { %v2182_v61 = vld [vmem:[#allocation2 + $0x1560] sm:$0xff]  ;;  %8047 = vmatpush1.bf16.msra.mxu1 %v10660_v2 }
 0x3fd   :  { %v2042_v4 = vld [vmem:[#allocation2 + $0x1100] sm:$0xff]  ;;  %v10653_v9 = vcombine.high %v2178_v59, %v2182_v61  ;;  %8005 = vmatprep.subr.bf16.mxu0 %v10525_v3  ;;  %v10652_v14 = vcombine.low %v2178_v59, %v2182_v61 }
 0x3fe   :  { %v2046_v5 = vld [vmem:[#allocation2 + $0x1120] sm:$0xff] }
 0x3ff   :  { %v2170_v6 = vld [vmem:[#allocation2 + $0x1500] sm:$0xff]  ;;  %v10517_v15 = vcombine.high %v2042_v4, %v2046_v5  ;;  %8048 = vmatprep.subr.bf16.mxu1 %v10653_v9  ;;  %8006 = vmatpush1.bf16.msra.mxu0 %v10524_v12  ;;  %v10516_v20 = vcombine.low %v2042_v4, %v2046_v5 }
 0x400   :  { %v2174_v11 = vld [vmem:[#allocation2 + $0x1520] sm:$0xff]  ;;  %8049 = vmatpush1.bf16.msra.mxu1 %v10652_v14 }
 0x401   :  { %v2034_v16 = vld [vmem:[#allocation2 + $0x10c0] sm:$0xff]  ;;  %v10645_v19 = vcombine.high %v2170_v6, %v2174_v11  ;;  %8007 = vmatprep.subr.bf16.mxu0 %v10517_v15  ;;  %v10644_v22 = vcombine.low %v2170_v6, %v2174_v11 }
 0x402   :  { %v2038_v17 = vld [vmem:[#allocation2 + $0x10e0] sm:$0xff] }
 0x403   :  { %v2162_v18 = vld [vmem:[#allocation2 + $0x14c0] sm:$0xff]  ;;  %v10509_v23 = vcombine.high %v2034_v16, %v2038_v17  ;;  %8050 = vmatprep.subr.bf16.mxu1 %v10645_v19  ;;  %8008 = vmatpush1.bf16.msra.mxu0 %v10516_v20  ;;  %v10508_v30 = vcombine.low %v2034_v16, %v2038_v17 }
 0x404   :  { %v2166_v52 = vld [vmem:[#allocation2 + $0x14e0] sm:$0xff]  ;;  %8051 = vmatpush1.bf16.msra.mxu1 %v10644_v22 }
 0x405   :  { %v2026_v25 = vld [vmem:[#allocation2 + $0x1080] sm:$0xff]  ;;  %v10637_v28 = vcombine.high %v2162_v18, %v2166_v52  ;;  %8009 = vmatprep.subr.bf16.mxu0 %v10509_v23  ;;  %v10636_v31 = vcombine.low %v2162_v18, %v2166_v52 }
 0x406   :  { %v2030_v26 = vld [vmem:[#allocation2 + $0x10a0] sm:$0xff] }
 0x407   :  { %v2154_v27 = vld [vmem:[#allocation2 + $0x1480] sm:$0xff]  ;;  %v10501_v32 = vcombine.high %v2026_v25, %v2030_v26  ;;  %8052 = vmatprep.subr.bf16.mxu1 %v10637_v28  ;;  %8010 = vmatpush1.bf16.msra.mxu0 %v10508_v30  ;;  %v10500_v39 = vcombine.low %v2026_v25, %v2030_v26 }
 0x408   :  { %v2158_v29 = vld [vmem:[#allocation2 + $0x14a0] sm:$0xff]  ;;  %8053 = vmatpush1.bf16.msra.mxu1 %v10636_v31 }
 0x409   :  { %v10629_v33 = vcombine.high %v2154_v27, %v2158_v29  ;;  %v2018_v34 = vld [vmem:[#allocation2 + $0x1040] sm:$0xff]  ;;  %8011 = vmatprep.subr.bf16.mxu0 %v10501_v32  ;;  %v10628_v41 = vcombine.low %v2154_v27, %v2158_v29 }
 0x40a   :  { %v2022_v36 = vld [vmem:[#allocation2 + $0x1060] sm:$0xff] }
 0x40b   :  { %v2146_v37 = vld [vmem:[#allocation2 + $0x1440] sm:$0xff]  ;;  %v10493_v42 = vcombine.high %v2018_v34, %v2022_v36  ;;  %8054 = vmatprep.subr.bf16.mxu1 %v10629_v33  ;;  %8012 = vmatpush1.bf16.msra.mxu0 %v10500_v39  ;;  %v10492_v50 = vcombine.low %v2018_v34, %v2022_v36 }
 0x40c   :  { %v2150_v38 = vld [vmem:[#allocation2 + $0x1460] sm:$0xff]  ;;  %8055 = vmatpush1.bf16.msra.mxu1 %v10628_v41 }
 0x40d   :  { %v10621_v43 = vcombine.high %v2146_v37, %v2150_v38  ;;  %v2010_v44 = vld [vmem:[#allocation2 + $0x1000] sm:$0xff]  ;;  %8013 = vmatprep.subr.bf16.mxu0 %v10493_v42  ;;  %v10620_v51 = vcombine.low %v2146_v37, %v2150_v38 }
 0x40e   :  { %v2014_v45 = vld [vmem:[#allocation2 + $0x1020] sm:$0xff] }
 0x40f   :  { %v2138_v46 = vld [vmem:[#allocation2 + $0x1400] sm:$0xff]  ;;  %v10485_v53 = vcombine.high %v2010_v44, %v2014_v45  ;;  %8056 = vmatprep.subr.bf16.mxu1 %v10621_v43  ;;  %8014 = vmatpush1.bf16.msra.mxu0 %v10492_v50  ;;  %v10484_v61 = vcombine.low %v2010_v44, %v2014_v45 }
 0x410   :  { %v2142_v49 = vld [vmem:[#allocation2 + $0x1420] sm:$0xff]  ;;  %8057 = vmatpush1.bf16.msra.mxu1 %v10620_v51 }
 0x411   :  { %v10613_v54 = vcombine.high %v2138_v46, %v2142_v49  ;;  %v2130_v55 = vld [vmem:[#allocation2 + $0x13c0] sm:$0xff]  ;;  %8015 = vmatprep.subr.bf16.mxu0 %v10485_v53  ;;  %v10612_v1 = vcombine.low %v2138_v46, %v2142_v49 }
 0x412   :  { %v2134_v56 = vld [vmem:[#allocation2 + $0x13e0] sm:$0xff] }
 0x413   :  { %v2258_v57 = vld [vmem:[#allocation2 + $0x17c0] sm:$0xff]  ;;  %v10605_v2 = vcombine.high %v2130_v55, %v2134_v56  ;;  %8058 = vmatprep.subr.bf16.mxu1 %v10613_v54  ;;  %8016 = vmatpush1.bf16.msra.mxu0 %v10484_v61  ;;  %v10604_v11 = vcombine.low %v2130_v55, %v2134_v56 }
 0x414   :  { %v2262_v59 = vld [vmem:[#allocation2 + $0x17e0] sm:$0xff]  ;;  %8059 = vmatpush1.bf16.msra.mxu1 %v10612_v1 }
 0x415   :  { %v10733_v3 = vcombine.high %v2258_v57, %v2262_v59  ;;  %v2122_v4 = vld [vmem:[#allocation2 + $0x1380] sm:$0xff]  ;;  %8017 = vmatprep.subr.bf16.mxu0 %v10605_v2  ;;  %v10732_v12 = vcombine.low %v2258_v57, %v2262_v59 }
 0x416   :  { %v2126_v5 = vld [vmem:[#allocation2 + $0x13a0] sm:$0xff] }
 0x417   :  { %v2250_v6 = vld [vmem:[#allocation2 + $0x1780] sm:$0xff]  ;;  %v10597_v14 = vcombine.high %v2122_v4, %v2126_v5  ;;  %8060 = vmatprep.subr.bf16.mxu1 %v10733_v3  ;;  %8018 = vmatpush2.bf16.msra.mxu0 %v10604_v11  ;;  %v10596_v52 = vcombine.low %v2122_v4, %v2126_v5 }
 0x418   :  { %v2254_v9 = vld [vmem:[#allocation2 + $0x17a0] sm:$0xff]  ;;  %8061 = vmatpush2.bf16.msra.mxu1 %v10732_v12 }
 0x419   :  { %v10725_v15 = vcombine.high %v2250_v6, %v2254_v9  ;;  %v2114_v16 = vld [vmem:[#allocation2 + $0x1340] sm:$0xff]  ;;  %8019 = vmatprep.subr.bf16.mxu0 %v10597_v14  ;;  %v10724_v20 = vcombine.low %v2250_v6, %v2254_v9 }
 0x41a   :  { %v2118_v17 = vld [vmem:[#allocation2 + $0x1360] sm:$0xff] }
 0x41b   :  { %v2242_v18 = vld [vmem:[#allocation2 + $0x1740] sm:$0xff]  ;;  %v10589_v22 = vcombine.high %v2114_v16, %v2118_v17  ;;  %8062 = vmatprep.subr.bf16.mxu1 %v10725_v15  ;;  %8020 = vmatpush2.bf16.msra.mxu0 %v10596_v52  ;;  %v10588_v29 = vcombine.low %v2114_v16, %v2118_v17 }
 0x41c   :  { %v2246_v19 = vld [vmem:[#allocation2 + $0x1760] sm:$0xff]  ;;  %8063 = vmatpush2.bf16.msra.mxu1 %v10724_v20 }
 0x41d   :  { %v10717_v23 = vcombine.high %v2242_v18, %v2246_v19  ;;  %v2106_v25 = vld [vmem:[#allocation2 + $0x1300] sm:$0xff]  ;;  %8021 = vmatprep.subr.bf16.mxu0 %v10589_v22  ;;  %v10716_v30 = vcombine.low %v2242_v18, %v2246_v19 }
 0x41e   :  { %v2110_v26 = vld [vmem:[#allocation2 + $0x1320] sm:$0xff] }
 0x41f   :  { %v2234_v27 = vld [vmem:[#allocation2 + $0x1700] sm:$0xff]  ;;  %v10581_v31 = vcombine.high %v2106_v25, %v2110_v26  ;;  %8064 = vmatprep.subr.bf16.mxu1 %v10717_v23  ;;  %8022 = vmatpush2.bf16.msra.mxu0 %v10588_v29  ;;  %v10580_v38 = vcombine.low %v2106_v25, %v2110_v26  ;;  %v1476_v23 = vld [vmem:[#allocation21 + $0x50] sm:$0xff] }
 0x420   :  { %v2238_v28 = vld [vmem:[#allocation2 + $0x1720] sm:$0xff]  ;;  %8065 = vmatpush2.bf16.msra.mxu1 %v10716_v30  ;;  %v1492_v25 = vld [vmem:[#allocation21 + $0xd0] sm:$0xff] }
 0x421   :  { %v10709_v32 = vcombine.high %v2234_v27, %v2238_v28  ;;  %v2098_v33 = vld [vmem:[#allocation2 + $0x12c0] sm:$0xff]  ;;  %8023 = vmatprep.subr.bf16.mxu0 %v10581_v31  ;;  %v10708_v39 = vcombine.low %v2234_v27, %v2238_v28 }
 0x422   :  { %v2102_v34 = vld [vmem:[#allocation2 + $0x12e0] sm:$0xff] }
 0x423   :  { %v2226_v36 = vld [vmem:[#allocation2 + $0x16c0] sm:$0xff]  ;;  %v10573_v41 = vcombine.high %v2098_v33, %v2102_v34  ;;  %8066 = vmatprep.subr.bf16.mxu1 %v10709_v32  ;;  %8024 = vmatpush2.bf16.msra.mxu0 %v10580_v38  ;;  %v10572_v49 = vcombine.low %v2098_v33, %v2102_v34  ;;  %v1481_v38 = vld [vmem:[#allocation21 + $0x78] sm:$0xff] }
 0x424   :  { %v2230_v37 = vld [vmem:[#allocation2 + $0x16e0] sm:$0xff]  ;;  %8067 = vmatpush2.bf16.msra.mxu1 %v10708_v39  ;;  %v1497_v39 = vld [vmem:[#allocation21 + $0xf8] sm:$0xff] }
 0x425   :  { %v10701_v42 = vcombine.high %v2226_v36, %v2230_v37  ;;  %v2090_v43 = vld [vmem:[#allocation2 + $0x1280] sm:$0xff]  ;;  %8025 = vmatprep.subr.bf16.mxu0 %v10573_v41  ;;  %v10700_v50 = vcombine.low %v2226_v36, %v2230_v37  ;;  %v12114_v36 = vpack.c.bf16 %v1492_v25, %v1476_v23 }
 0x426   :  { %v2094_v44 = vld [vmem:[#allocation2 + $0x12a0] sm:$0xff] }
 0x427   :  { %v2218_v45 = vld [vmem:[#allocation2 + $0x1680] sm:$0xff]  ;;  %v10565_v51 = vcombine.high %v2090_v43, %v2094_v44  ;;  %8068 = vmatprep.subr.bf16.mxu1 %v10701_v42  ;;  %8026 = vmatpush2.bf16.msra.mxu0 %v10572_v49  ;;  %v10564_v59 = vcombine.low %v2090_v43, %v2094_v44 }
 0x428   :  { %v2222_v46 = vld [vmem:[#allocation2 + $0x16a0] sm:$0xff]  ;;  %8069 = vmatpush2.bf16.msra.mxu1 %v10700_v50 }
 0x429   :  { %v10693_v53 = vcombine.high %v2218_v45, %v2222_v46  ;;  %v2082_v54 = vld [vmem:[#allocation2 + $0x1240] sm:$0xff]  ;;  %8027 = vmatprep.subr.bf16.mxu0 %v10565_v51  ;;  %v10692_v61 = vcombine.low %v2218_v45, %v2222_v46  ;;  %v12119_v51 = vpack.c.bf16 %v1497_v39, %v1481_v38 }
 0x42a   :  { %v2086_v55 = vld [vmem:[#allocation2 + $0x1260] sm:$0xff] }
 0x42b   :  { %v2210_v56 = vld [vmem:[#allocation2 + $0x1640] sm:$0xff]  ;;  %v10557_v1 = vcombine.high %v2082_v54, %v2086_v55  ;;  %8070 = vmatprep.subr.bf16.mxu1 %v10693_v53  ;;  %8028 = vmatpush2.bf16.msra.mxu0 %v10564_v59  ;;  %v10556_v9 = vcombine.low %v2082_v54, %v2086_v55 }
 0x42c   :  { %v2214_v57 = vld [vmem:[#allocation2 + $0x1660] sm:$0xff]  ;;  %8071 = vmatpush2.bf16.msra.mxu1 %v10692_v61 }
 0x42d   :  { %v10685_v2 = vcombine.high %v2210_v56, %v2214_v57  ;;  %v2074_v3 = vld [vmem:[#allocation2 + $0x1200] sm:$0xff]  ;;  %8029 = vmatprep.subr.bf16.mxu0 %v10557_v1  ;;  %v10684_v11 = vcombine.low %v2210_v56, %v2214_v57 }
 0x42e   :  { %v2078_v4 = vld [vmem:[#allocation2 + $0x1220] sm:$0xff] }
 0x42f   :  { %v2202_v5 = vld [vmem:[#allocation2 + $0x1600] sm:$0xff]  ;;  %v10549_v12 = vcombine.high %v2074_v3, %v2078_v4  ;;  %8072 = vmatprep.subr.bf16.mxu1 %v10685_v2  ;;  %8030 = vmatpush2.bf16.msra.mxu0 %v10556_v9  ;;  %v10548_v19 = vcombine.low %v2074_v3, %v2078_v4 }
 0x430   :  { %v2206_v6 = vld [vmem:[#allocation2 + $0x1620] sm:$0xff]  ;;  %8073 = vmatpush2.bf16.msra.mxu1 %v10684_v11 }
 0x431   :  { %v10677_v14 = vcombine.high %v2202_v5, %v2206_v6  ;;  %v2322_v15 = vld [vmem:[#allocation2 + $0x19c0] sm:$0xff]  ;;  %8031 = vmatprep.subr.bf16.mxu0 %v10549_v12  ;;  %v10676_v22 = vcombine.low %v2202_v5, %v2206_v6 }
 0x432   :  { %v2326_v16 = vld [vmem:[#allocation2 + $0x19e0] sm:$0xff] }
 0x433   :  { %v2450_v17 = vld [vmem:[#allocation2 + $0x1dc0] sm:$0xff]  ;;  %v10797_v26 = vcombine.high %v2322_v15, %v2326_v16  ;;  %8074 = vmatprep.subr.bf16.mxu1 %v10677_v14  ;;  %8032 = vmatpush2.bf16.msra.mxu0 %v10548_v19  ;;  %v10796_v37 = vcombine.low %v2322_v15, %v2326_v16 }
 0x434   :  { %v2454_v18 = vld [vmem:[#allocation2 + $0x1de0] sm:$0xff]  ;;  %8075 = vmatpush2.bf16.msra.mxu1 %v10676_v22 }
 0x435   :  { %v1474_v52 = vld [vmem:[#allocation21 + $0x40] sm:$0xff]  ;;  %v10925_v27 = vcombine.high %v2450_v17, %v2454_v18  ;;  %v1479_v33 = vld [vmem:[#allocation21 + $0x68] sm:$0xff]  ;;  %8087 = vmatprep.subr.bf16.mxu0 %v10797_v26  ;;  %v10924_v41 = vcombine.low %v2450_v17, %v2454_v18 }
 0x436   :  { %v1490_v20 = vld [vmem:[#allocation21 + $0xc0] sm:$0xff]  ;;  %v1495_v34 = vld [vmem:[#allocation21 + $0xe8] sm:$0xff] }
 0x437   :  { %v2314_v28 = vld [vmem:[#allocation2 + $0x1980] sm:$0xff]  ;;  %v12112_v31 = vpack.c.bf16 %v1490_v20, %v1474_v52  ;;  %8130 = vmatprep.subr.bf16.mxu1 %v10925_v27  ;;  %v12116_v46 = vpack.c.bf16 %v1495_v34, %v1479_v33  ;;  %8077 = vmatmul.mubr.bf16.vlgmr.msra.gmra.mxu1 %v12114_v36 }
 0x438   :  { %v2318_v29 = vld [vmem:[#allocation2 + $0x19a0] sm:$0xff]  ;;  %8131 = vmatpush1.bf16.msra.mxu1 %v10924_v41  ;;  %8162 = vmatprep.mubr.bf16.mxu1 %v12119_v51 }
 0x439   :  { %v2442_v30 = vld [vmem:[#allocation2 + $0x1d80] sm:$0xff]  ;;  %v10789_v42 = vcombine.high %v2314_v28, %v2318_v29  ;;  %8034 = vmatmul.mubr.bf16.vlgmr.msra.gmra.mxu0 %v12112_v31  ;;  %v10788_v53 = vcombine.low %v2314_v28, %v2318_v29 }
 0x43a   :  { %v2446_v32 = vld [vmem:[#allocation2 + $0x1da0] sm:$0xff]  ;;  %8088 = vmatpush1.bf16.msra.mxu0 %v10796_v37  ;;  %8119 = vmatprep.mubr.bf16.mxu0 %v12116_v46 }
 0x43b   :  { %v10917_v43 = vcombine.high %v2442_v30, %v2446_v32  ;;  %v2306_v44 = vld [vmem:[#allocation2 + $0x1940] sm:$0xff]  ;;  %8089 = vmatprep.subr.bf16.mxu0 %v10789_v42  ;;  %v10916_v54 = vcombine.low %v2442_v30, %v2446_v32 }
 0x43c   :  { %v2310_v45 = vld [vmem:[#allocation2 + $0x1960] sm:$0xff] }
 0x43d   :  { %v2434_v49 = vld [vmem:[#allocation2 + $0x1d40] sm:$0xff]  ;;  %v10781_v55 = vcombine.high %v2306_v44, %v2310_v45  ;;  %8132 = vmatprep.subr.bf16.mxu1 %v10917_v43  ;;  %v10780_v2 = vcombine.low %v2306_v44, %v2310_v45 }
 0x43e   :  { %v2438_v50 = vld [vmem:[#allocation2 + $0x1d60] sm:$0xff]  ;;  %8090 = vmatpush1.bf16.msra.mxu0 %v10788_v53  ;;  %8133 = vmatpush1.bf16.msra.mxu1 %v10916_v54 }
 0x43f   :  { %v10909_v56 = vcombine.high %v2434_v49, %v2438_v50  ;;  %v2298_v57 = vld [vmem:[#allocation2 + $0x1900] sm:$0xff]  ;;  %8091 = vmatprep.subr.bf16.mxu0 %v10781_v55  ;;  %v10908_v3 = vcombine.low %v2434_v49, %v2438_v50 }
 0x440   :  { %v2302_v59 = vld [vmem:[#allocation2 + $0x1920] sm:$0xff] }
 0x441   :  { %v2426_v61 = vld [vmem:[#allocation2 + $0x1d00] sm:$0xff]  ;;  %v10773_v4 = vcombine.high %v2298_v57, %v2302_v59  ;;  %8134 = vmatprep.subr.bf16.mxu1 %v10909_v56  ;;  %v10772_v14 = vcombine.low %v2298_v57, %v2302_v59 }
 0x442   :  { %v2430_v1 = vld [vmem:[#allocation2 + $0x1d20] sm:$0xff]  ;;  %8092 = vmatpush1.bf16.msra.mxu0 %v10780_v2  ;;  %8135 = vmatpush1.bf16.msra.mxu1 %v10908_v3 }
 0x443   :  { %v10901_v5 = vcombine.high %v2426_v61, %v2430_v1  ;;  %v2290_v6 = vld [vmem:[#allocation2 + $0x18c0] sm:$0xff]  ;;  %8093 = vmatprep.subr.bf16.mxu0 %v10773_v4  ;;  %v10900_v15 = vcombine.low %v2426_v61, %v2430_v1 }
 0x444   :  { %v2294_v9 = vld [vmem:[#allocation2 + $0x18e0] sm:$0xff] }
 0x445   :  { %v2418_v11 = vld [vmem:[#allocation2 + $0x1cc0] sm:$0xff]  ;;  %v10765_v16 = vcombine.high %v2290_v6, %v2294_v9  ;;  %8136 = vmatprep.subr.bf16.mxu1 %v10901_v5  ;;  %v10764_v22 = vcombine.low %v2290_v6, %v2294_v9 }
 0x446   :  { %v2422_v12 = vld [vmem:[#allocation2 + $0x1ce0] sm:$0xff]  ;;  %8094 = vmatpush1.bf16.msra.mxu0 %v10772_v14  ;;  %8137 = vmatpush1.bf16.msra.mxu1 %v10900_v15 }
 0x447   :  { %v10893_v17 = vcombine.high %v2418_v11, %v2422_v12  ;;  %v2282_v18 = vld [vmem:[#allocation2 + $0x1880] sm:$0xff]  ;;  %8095 = vmatprep.subr.bf16.mxu0 %v10765_v16  ;;  %v10892_v23 = vcombine.low %v2418_v11, %v2422_v12 }
 0x448   :  { %v2286_v19 = vld [vmem:[#allocation2 + $0x18a0] sm:$0xff] }
 0x449   :  { %v2410_v52 = vld [vmem:[#allocation2 + $0x1c80] sm:$0xff]  ;;  %v10757_v25 = vcombine.high %v2282_v18, %v2286_v19  ;;  %8138 = vmatprep.subr.bf16.mxu1 %v10893_v17  ;;  %v10756_v32 = vcombine.low %v2282_v18, %v2286_v19 }
 0x44a   :  { %v2414_v20 = vld [vmem:[#allocation2 + $0x1ca0] sm:$0xff]  ;;  %8096 = vmatpush1.bf16.msra.mxu0 %v10764_v22  ;;  %8139 = vmatpush1.bf16.msra.mxu1 %v10892_v23 }
 0x44b   :  { %v10885_v26 = vcombine.high %v2410_v52, %v2414_v20  ;;  %v2274_v27 = vld [vmem:[#allocation2 + $0x1840] sm:$0xff]  ;;  %8097 = vmatprep.subr.bf16.mxu0 %v10757_v25  ;;  %v10884_v33 = vcombine.low %v2410_v52, %v2414_v20 }
 0x44c   :  { %v2278_v28 = vld [vmem:[#allocation2 + $0x1860] sm:$0xff] }
 0x44d   :  { %v2402_v29 = vld [vmem:[#allocation2 + $0x1c40] sm:$0xff]  ;;  %v10749_v34 = vcombine.high %v2274_v27, %v2278_v28  ;;  %8140 = vmatprep.subr.bf16.mxu1 %v10885_v26  ;;  %v10748_v43 = vcombine.low %v2274_v27, %v2278_v28 }
 0x44e   :  { %v2406_v30 = vld [vmem:[#allocation2 + $0x1c60] sm:$0xff]  ;;  %8098 = vmatpush1.bf16.msra.mxu0 %v10756_v32  ;;  %8141 = vmatpush1.bf16.msra.mxu1 %v10884_v33 }
 0x44f   :  { %v10877_v37 = vcombine.high %v2402_v29, %v2406_v30  ;;  %v2266_v38 = vld [vmem:[#allocation2 + $0x1800] sm:$0xff]  ;;  %8099 = vmatprep.subr.bf16.mxu0 %v10749_v34  ;;  %v10876_v44 = vcombine.low %v2402_v29, %v2406_v30 }
 0x450   :  { %v2270_v39 = vld [vmem:[#allocation2 + $0x1820] sm:$0xff] }
 0x451   :  { %v2394_v41 = vld [vmem:[#allocation2 + $0x1c00] sm:$0xff]  ;;  %v10741_v45 = vcombine.high %v2266_v38, %v2270_v39  ;;  %8142 = vmatprep.subr.bf16.mxu1 %v10877_v37  ;;  %v10740_v56 = vcombine.low %v2266_v38, %v2270_v39 }
 0x452   :  { %v2398_v42 = vld [vmem:[#allocation2 + $0x1c20] sm:$0xff]  ;;  %8100 = vmatpush1.bf16.msra.mxu0 %v10748_v43  ;;  %8143 = vmatpush1.bf16.msra.mxu1 %v10876_v44 }
 0x453   :  { %v10869_v49 = vcombine.high %v2394_v41, %v2398_v42  ;;  %v2386_v50 = vld [vmem:[#allocation2 + $0x1bc0] sm:$0xff]  ;;  %8101 = vmatprep.subr.bf16.mxu0 %v10741_v45  ;;  %v10868_v57 = vcombine.low %v2394_v41, %v2398_v42 }
 0x454   :  { %v2390_v53 = vld [vmem:[#allocation2 + $0x1be0] sm:$0xff] }
 0x455   :  { %v2514_v54 = vld [vmem:[#allocation2 + $0x1fc0] sm:$0xff]  ;;  %v10861_v59 = vcombine.high %v2386_v50, %v2390_v53  ;;  %8144 = vmatprep.subr.bf16.mxu1 %v10869_v49  ;;  %v10860_v5 = vcombine.low %v2386_v50, %v2390_v53 }
 0x456   :  { %v2518_v55 = vld [vmem:[#allocation2 + $0x1fe0] sm:$0xff]  ;;  %8102 = vmatpush1.bf16.msra.mxu0 %v10740_v56  ;;  %8145 = vmatpush1.bf16.msra.mxu1 %v10868_v57 }
 0x457   :  { %v10989_v61 = vcombine.high %v2514_v54, %v2518_v55  ;;  %v2378_v1 = vld [vmem:[#allocation2 + $0x1b80] sm:$0xff]  ;;  %8103 = vmatprep.subr.bf16.mxu0 %v10861_v59  ;;  %v10988_v6 = vcombine.low %v2514_v54, %v2518_v55 }
 0x458   :  { %v2382_v2 = vld [vmem:[#allocation2 + $0x1ba0] sm:$0xff] }
 0x459   :  { %v2506_v3 = vld [vmem:[#allocation2 + $0x1f80] sm:$0xff]  ;;  %v10853_v9 = vcombine.high %v2378_v1, %v2382_v2  ;;  %8146 = vmatprep.subr.bf16.mxu1 %v10989_v61  ;;  %v10852_v17 = vcombine.low %v2378_v1, %v2382_v2 }
 0x45a   :  { %v2510_v4 = vld [vmem:[#allocation2 + $0x1fa0] sm:$0xff]  ;;  %8104 = vmatpush2.bf16.msra.mxu0 %v10860_v5  ;;  %8147 = vmatpush2.bf16.msra.mxu1 %v10988_v6 }
 0x45b   :  { %v10981_v11 = vcombine.high %v2506_v3, %v2510_v4  ;;  %v2370_v12 = vld [vmem:[#allocation2 + $0x1b40] sm:$0xff]  ;;  %8105 = vmatprep.subr.bf16.mxu0 %v10853_v9  ;;  %v10980_v18 = vcombine.low %v2506_v3, %v2510_v4 }
 0x45c   :  { %v2374_v14 = vld [vmem:[#allocation2 + $0x1b60] sm:$0xff] }
 0x45d   :  { %v2498_v15 = vld [vmem:[#allocation2 + $0x1f40] sm:$0xff]  ;;  %v10845_v19 = vcombine.high %v2370_v12, %v2374_v14  ;;  %8148 = vmatprep.subr.bf16.mxu1 %v10981_v11  ;;  %v10844_v26 = vcombine.low %v2370_v12, %v2374_v14 }
 0x45e   :  { %v2502_v16 = vld [vmem:[#allocation2 + $0x1f60] sm:$0xff]  ;;  %8106 = vmatpush2.bf16.msra.mxu0 %v10852_v17  ;;  %8149 = vmatpush2.bf16.msra.mxu1 %v10980_v18  ;;  %v1559_v17 = vld [vmem:[#allocation2 + $0x1e8] sm:$0xff] }
 0x45f   :  { %v10973_v52 = vcombine.high %v2498_v15, %v2502_v16  ;;  %v2362_v20 = vld [vmem:[#allocation2 + $0x1b00] sm:$0xff]  ;;  %8107 = vmatprep.subr.bf16.mxu0 %v10845_v19  ;;  %v10972_v27 = vcombine.low %v2498_v15, %v2502_v16  ;;  %v1555_v16 = vld [vmem:[#allocation2 + $0x1c8] sm:$0xff] }
 0x460   :  { %v2366_v22 = vld [vmem:[#allocation2 + $0x1b20] sm:$0xff]  ;;  %v1683_v18 = vld [vmem:[#allocation2 + $0x5c8] sm:$0xff] }
 0x461   :  { %v2490_v23 = vld [vmem:[#allocation2 + $0x1f00] sm:$0xff]  ;;  %v10837_v28 = vcombine.high %v2362_v20, %v2366_v22  ;;  %8150 = vmatprep.subr.bf16.mxu1 %v10973_v52  ;;  %v10836_v37 = vcombine.low %v2362_v20, %v2366_v22  ;;  %v1687_v19 = vld [vmem:[#allocation2 + $0x5e8] sm:$0xff] }
 0x462   :  { %v2494_v25 = vld [vmem:[#allocation2 + $0x1f20] sm:$0xff]  ;;  %8108 = vmatpush2.bf16.msra.mxu0 %v10844_v26  ;;  %8151 = vmatpush2.bf16.msra.mxu1 %v10972_v27  ;;  %v1480_v26 = vld [vmem:[#allocation21 + $0x70] sm:$0xff] }
 0x463   :  { %v10965_v29 = vcombine.high %v2490_v23, %v2494_v25  ;;  %v2354_v30 = vld [vmem:[#allocation2 + $0x1ac0] sm:$0xff]  ;;  %8109 = vmatprep.subr.bf16.mxu0 %v10837_v28  ;;  %v10964_v38 = vcombine.low %v2490_v23, %v2494_v25  ;;  %v1496_v27 = vld [vmem:[#allocation21 + $0xf0] sm:$0xff]  ;;  %v10031_v28 = vcombine.high %v1555_v16, %v1559_v17 }
 0x464   :  { %v2358_v32 = vld [vmem:[#allocation2 + $0x1ae0] sm:$0xff] }
 0x465   :  { %v2482_v33 = vld [vmem:[#allocation2 + $0x1ec0] sm:$0xff]  ;;  %v10829_v39 = vcombine.high %v2354_v30, %v2358_v32  ;;  %8152 = vmatprep.subr.bf16.mxu1 %v10965_v29  ;;  %v10828_v49 = vcombine.low %v2354_v30, %v2358_v32  ;;  %v10159_v29 = vcombine.high %v1683_v18, %v1687_v19  ;;  %v1547_v30 = vld [vmem:[#allocation2 + $0x188] sm:$0xff] }
 0x466   :  { %v2486_v34 = vld [vmem:[#allocation2 + $0x1ee0] sm:$0xff]  ;;  %8110 = vmatpush2.bf16.msra.mxu0 %v10836_v37  ;;  %8153 = vmatpush2.bf16.msra.mxu1 %v10964_v38  ;;  %v1551_v32 = vld [vmem:[#allocation2 + $0x1a8] sm:$0xff] }
 0x467   :  { %v10957_v41 = vcombine.high %v2482_v33, %v2486_v34  ;;  %v2346_v42 = vld [vmem:[#allocation2 + $0x1a80] sm:$0xff]  ;;  %8111 = vmatprep.subr.bf16.mxu0 %v10829_v39  ;;  %v10956_v50 = vcombine.low %v2482_v33, %v2486_v34  ;;  %v1675_v34 = vld [vmem:[#allocation2 + $0x588] sm:$0xff]  ;;  %v12128_v39 = vpack.c.bf16 %v1496_v27, %v1480_v26 }
 0x468   :  { %v2350_v43 = vld [vmem:[#allocation2 + $0x1aa0] sm:$0xff]  ;;  %v1679_v37 = vld [vmem:[#allocation2 + $0x5a8] sm:$0xff] }
 0x469   :  { %v2474_v44 = vld [vmem:[#allocation2 + $0x1e80] sm:$0xff]  ;;  %v10821_v53 = vcombine.high %v2346_v42, %v2350_v43  ;;  %8154 = vmatprep.subr.bf16.mxu1 %v10957_v41  ;;  %v10820_v61 = vcombine.low %v2346_v42, %v2350_v43  ;;  %v10030_v41 = vcombine.low %v1555_v16, %v1559_v17  ;;  %v10158_v42 = vcombine.low %v1683_v18, %v1687_v19 }
 0x46a   :  { %v2478_v45 = vld [vmem:[#allocation2 + $0x1ea0] sm:$0xff]  ;;  %8112 = vmatpush2.bf16.msra.mxu0 %v10828_v49  ;;  %8155 = vmatpush2.bf16.msra.mxu1 %v10956_v50  ;;  %v10023_v43 = vcombine.high %v1547_v30, %v1551_v32  ;;  %v1543_v49 = vld [vmem:[#allocation2 + $0x168] sm:$0xff] }
 0x46b   :  { %v10949_v54 = vcombine.high %v2474_v44, %v2478_v45  ;;  %v2338_v55 = vld [vmem:[#allocation2 + $0x1a40] sm:$0xff]  ;;  %8113 = vmatprep.subr.bf16.mxu0 %v10821_v53  ;;  %v10948_v1 = vcombine.low %v2474_v44, %v2478_v45  ;;  %v10151_v44 = vcombine.high %v1675_v34, %v1679_v37  ;;  %v1539_v45 = vld [vmem:[#allocation2 + $0x148] sm:$0xff] }
 0x46c   :  { %v2342_v56 = vld [vmem:[#allocation2 + $0x1a60] sm:$0xff]  ;;  %v1667_v53 = vld [vmem:[#allocation2 + $0x548] sm:$0xff] }
 0x46d   :  { %v2466_v57 = vld [vmem:[#allocation2 + $0x1e40] sm:$0xff]  ;;  %v10813_v2 = vcombine.high %v2338_v55, %v2342_v56  ;;  %8156 = vmatprep.subr.bf16.mxu1 %v10949_v54  ;;  %v10812_v11 = vcombine.low %v2338_v55, %v2342_v56  ;;  %v1671_v54 = vld [vmem:[#allocation2 + $0x568] sm:$0xff] }
 0x46e   :  { %v2470_v59 = vld [vmem:[#allocation2 + $0x1e60] sm:$0xff]  ;;  %8114 = vmatpush2.bf16.msra.mxu0 %v10820_v61  ;;  %8157 = vmatpush2.bf16.msra.mxu1 %v10948_v1  ;;  %v10015_v61 = vcombine.high %v1539_v45, %v1543_v49  ;;  %v10142_v16 = vcombine.low %v1667_v53, %v1671_v54 }
 0x46f   :  { %v10941_v3 = vcombine.high %v2466_v57, %v2470_v59  ;;  %v2330_v4 = vld [vmem:[#allocation2 + $0x1a00] sm:$0xff]  ;;  %8115 = vmatprep.subr.bf16.mxu0 %v10813_v2  ;;  %v10940_v12 = vcombine.low %v2466_v57, %v2470_v59  ;;  %v10150_v59 = vcombine.low %v1675_v34, %v1679_v37  ;;  %v1647_v34 = vld [vmem:[#allocation2 + $0x4a8] sm:$0xff] }
 0x470   :  { %v2334_v5 = vld [vmem:[#allocation2 + $0x1a20] sm:$0xff] }
 0x471   :  { %v2458_v6 = vld [vmem:[#allocation2 + $0x1e00] sm:$0xff]  ;;  %v10805_v14 = vcombine.high %v2330_v4, %v2334_v5  ;;  %8158 = vmatprep.subr.bf16.mxu1 %v10941_v3  ;;  %v10804_v52 = vcombine.low %v2330_v4, %v2334_v5  ;;  %v10143_v3 = vcombine.high %v1667_v53, %v1671_v54  ;;  %v1531_v4 = vld [vmem:[#allocation2 + $0x108] sm:$0xff] }
 0x472   :  { %v2462_v9 = vld [vmem:[#allocation2 + $0x1e20] sm:$0xff]  ;;  %8116 = vmatpush2.bf16.msra.mxu0 %v10812_v11  ;;  %8159 = vmatpush2.bf16.msra.mxu1 %v10940_v12  ;;  %v1535_v5 = vld [vmem:[#allocation2 + $0x128] sm:$0xff] }
 0x473   :  { %v10933_v15 = vcombine.high %v2458_v6, %v2462_v9  ;;  %v1478_v20 = vld [vmem:[#allocation21 + $0x60] sm:$0xff]  ;;  %8117 = vmatprep.subr.bf16.mxu0 %v10805_v14  ;;  %v10932_v23 = vcombine.low %v2458_v6, %v2462_v9  ;;  %v7906_v56 = vpop.f32.mrf.mxu1  ;;  %v1659_v9 = vld [vmem:[#allocation2 + $0x508] sm:$0xff]  ;;  %v10014_v14 = vcombine.low %v1539_v45, %v1543_v49  ;;  %v10007_v17 = vcombine.high %v1531_v4, %v1535_v5 }
 0x474   :  { %v1494_v22 = vld [vmem:[#allocation21 + $0xe0] sm:$0xff]  ;;  %v1663_v11 = vld [vmem:[#allocation2 + $0x528] sm:$0xff] }
 0x475   :  { %v2522_v25 = vld [vmem:[#allocation22] sm:$0xff]  ;;  %8160 = vmatprep.subr.bf16.mxu1 %v10933_v15  ;;  %v12124_v33 = vpack.c.bf16 %v1494_v22, %v1478_v20  ;;  %v7863_v50 = vpop.f32.mrf.mxu0  ;;  %v12136_v2 = vpop.f32.mrf.mxu1  ;;  %v10135_v19 = vcombine.high %v1659_v9, %v1663_v11  ;;  %v1527_v20 = vld [vmem:[#allocation2 + $0xe8] sm:$0xff]  ;;  %v10134_v26 = vcombine.low %v1659_v9, %v1663_v11 }
 0x476   :  { %8118 = vmatpush2.bf16.msra.mxu0 %v10804_v52  ;;  %v2672_v38 = vrot.slane %v2522_v25, %v397_v0  ;;  %8161 = vmatpush2.bf16.msra.mxu1 %v10932_v23  ;;  %v10022_v0 = vcombine.low %v1547_v30, %v1551_v32  ;;  %v1523_v52 = vld [vmem:[#allocation2 + $0xc8] sm:$0xff]  ;;  %v10006_v25 = vcombine.low %v1531_v4, %v1535_v5 }
 0x477   :  { %8173 = vmatprep.subr.bf16.mxu0 %v10031_v28  ;;  %8216 = vmatprep.subr.bf16.mxu1 %v10159_v29  ;;  %v12132_v57 = vpop.f32.mrf.mxu0  ;;  %v7910_v15 = vpop.f32.mrf.mxu1  ;;  %v1651_v22 = vld [vmem:[#allocation2 + $0x4c8] sm:$0xff]  ;;  %v9999_v27 = vcombine.high %v1523_v52, %v1527_v20  ;;  %v9998_v37 = vcombine.low %v1523_v52, %v1527_v20 }
 0x478   :  { %v7864_v55 = vadd.f32 %v7863_v50, %v2672_v38  ;;  %v1655_v23 = vld [vmem:[#allocation2 + $0x4e8] sm:$0xff] }
 0x479   :  { %8120 = vmatmul.mubr.bf16.vlgmr.msra.gmra.mxu0 %v12124_v33  ;;  %8163 = vmatmul.mubr.bf16.vlgmr.msra.gmra.mxu1 %v12128_v39  ;;  %v7867_v6 = vpop.f32.mrf.mxu0  ;;  %v10127_v28 = vcombine.high %v1651_v22, %v1655_v23  ;;  %v1515_v29 = vld [vmem:[#allocation2 + $0x88] sm:$0xff] }
 0x47a   :  { %8174 = vmatpush1.bf16.msra.mxu0 %v10030_v41  ;;  %8217 = vmatpush1.bf16.msra.mxu1 %v10158_v42  ;;  %v12134_v1 = vadd.f32 %v7906_v56, %v7864_v55  ;;  %v7868_v12 = vadd.f32 %v7867_v6, %v2672_v38  ;;  %v1519_v30 = vld [vmem:[#allocation2 + $0xa8] sm:$0xff]  ;;  %v10126_v38 = vcombine.low %v1651_v22, %v1655_v23 }
 0x47b   :  { %8175 = vmatprep.subr.bf16.mxu0 %v10023_v43  ;;  %8218 = vmatprep.subr.bf16.mxu1 %v10151_v44  ;;  %v1643_v32 = vld [vmem:[#allocation2 + $0x488] sm:$0xff]  ;;  %v9991_v41 = vcombine.high %v1515_v29, %v1519_v30  ;;  %v9990_v50 = vcombine.low %v1515_v29, %v1519_v30 }
 0x47c   :  { %8205 = vmatprep.mubr.bf16.mxu0 %v12082_v35  ;;  %8248 = vmatprep.mubr.bf16.mxu1 %v12084_v40  ;;  %v12140_v18 = vadd.f32 %v7910_v15, %v7868_v12  ;;  %v10119_v42 = vcombine.high %v1643_v32, %v1647_v34  ;;  %v1507_v43 = vld [vmem:[#allocation2 + $0x48] sm:$0xff]  ;;  %v10118_v53 = vcombine.low %v1643_v32, %v1647_v34 }
 0x47d   :  { %v1511_v44 = vld [vmem:[#allocation2 + $0x68] sm:$0xff] }
 0x47e   :  { %8176 = vmatpush1.bf16.msra.mxu0 %v10022_v0  ;;  %8219 = vmatpush1.bf16.msra.mxu1 %v10150_v59  ;;  %v1635_v45 = vld [vmem:[#allocation2 + $0x448] sm:$0xff]  ;;  %v9983_v54 = vcombine.high %v1507_v43, %v1511_v44 }
 0x47f   :  { %8177 = vmatprep.subr.bf16.mxu0 %v10015_v61  ;;  %8220 = vmatprep.subr.bf16.mxu1 %v10143_v3  ;;  %v1639_v49 = vld [vmem:[#allocation2 + $0x468] sm:$0xff]  ;;  %v9982_v3 = vcombine.low %v1507_v43, %v1511_v44 }
 0x480   :  { %v10111_v55 = vcombine.high %v1635_v45, %v1639_v49  ;;  %v1499_v56 = vld [vmem:[#allocation2 + $0x8] sm:$0xff]  ;;  %v10110_v4 = vcombine.low %v1635_v45, %v1639_v49 }
 0x481   :  { %v1503_v0 = vld [vmem:[#allocation2 + $0x28] sm:$0xff] }
 0x482   :  { %8178 = vmatpush1.bf16.msra.mxu0 %v10014_v14  ;;  %8221 = vmatpush1.bf16.msra.mxu1 %v10142_v16  ;;  %v1627_v59 = vld [vmem:[#allocation2 + $0x408] sm:$0xff]  ;;  %v9975_v5 = vcombine.high %v1499_v56, %v1503_v0  ;;  %v9974_v15 = vcombine.low %v1499_v56, %v1503_v0 }
 0x483   :  { %8179 = vmatprep.subr.bf16.mxu0 %v10007_v17  ;;  %8222 = vmatprep.subr.bf16.mxu1 %v10135_v19  ;;  %v1631_v61 = vld [vmem:[#allocation2 + $0x428] sm:$0xff] }
 0x484   :  { %v10103_v6 = vcombine.high %v1627_v59, %v1631_v61  ;;  %v1619_v9 = vld [vmem:[#allocation2 + $0x3c8] sm:$0xff]  ;;  %v10102_v16 = vcombine.low %v1627_v59, %v1631_v61 }
 0x485   :  { %v1623_v11 = vld [vmem:[#allocation2 + $0x3e8] sm:$0xff] }
 0x486   :  { %8180 = vmatpush1.bf16.msra.mxu0 %v10006_v25  ;;  %8223 = vmatpush1.bf16.msra.mxu1 %v10134_v26  ;;  %v1747_v12 = vld [vmem:[#allocation2 + $0x7c8] sm:$0xff]  ;;  %v10095_v17 = vcombine.high %v1619_v9, %v1623_v11  ;;  %v10094_v25 = vcombine.low %v1619_v9, %v1623_v11 }
 0x487   :  { %8181 = vmatprep.subr.bf16.mxu0 %v9999_v27  ;;  %8224 = vmatprep.subr.bf16.mxu1 %v10127_v28  ;;  %v1751_v14 = vld [vmem:[#allocation2 + $0x7e8] sm:$0xff] }
 0x488   :  { %v10223_v19 = vcombine.high %v1747_v12, %v1751_v14  ;;  %v1611_v52 = vld [vmem:[#allocation2 + $0x388] sm:$0xff]  ;;  %v10222_v26 = vcombine.low %v1747_v12, %v1751_v14 }
 0x489   :  { %v1615_v20 = vld [vmem:[#allocation2 + $0x3a8] sm:$0xff] }
 0x48a   :  { %8182 = vmatpush1.bf16.msra.mxu0 %v9998_v37  ;;  %8225 = vmatpush1.bf16.msra.mxu1 %v10126_v38  ;;  %v1739_v22 = vld [vmem:[#allocation2 + $0x788] sm:$0xff]  ;;  %v10087_v27 = vcombine.high %v1611_v52, %v1615_v20  ;;  %v10086_v37 = vcombine.low %v1611_v52, %v1615_v20 }
 0x48b   :  { %8183 = vmatprep.subr.bf16.mxu0 %v9991_v41  ;;  %8226 = vmatprep.subr.bf16.mxu1 %v10119_v42  ;;  %v1743_v23 = vld [vmem:[#allocation2 + $0x7a8] sm:$0xff] }
 0x48c   :  { %v10215_v28 = vcombine.high %v1739_v22, %v1743_v23  ;;  %v1603_v29 = vld [vmem:[#allocation2 + $0x348] sm:$0xff]  ;;  %v10214_v38 = vcombine.low %v1739_v22, %v1743_v23 }
 0x48d   :  { %v1607_v30 = vld [vmem:[#allocation2 + $0x368] sm:$0xff] }
 0x48e   :  { %8184 = vmatpush1.bf16.msra.mxu0 %v9990_v50  ;;  %8227 = vmatpush1.bf16.msra.mxu1 %v10118_v53  ;;  %v1731_v32 = vld [vmem:[#allocation2 + $0x748] sm:$0xff]  ;;  %v10079_v41 = vcombine.high %v1603_v29, %v1607_v30  ;;  %v10078_v50 = vcombine.low %v1603_v29, %v1607_v30 }
 0x48f   :  { %8185 = vmatprep.subr.bf16.mxu0 %v9983_v54  ;;  %8228 = vmatprep.subr.bf16.mxu1 %v10111_v55  ;;  %v1735_v34 = vld [vmem:[#allocation2 + $0x768] sm:$0xff] }
 0x490   :  { %v10207_v42 = vcombine.high %v1731_v32, %v1735_v34  ;;  %v1595_v43 = vld [vmem:[#allocation2 + $0x308] sm:$0xff]  ;;  %v10206_v53 = vcombine.low %v1731_v32, %v1735_v34 }
 0x491   :  { %v1599_v44 = vld [vmem:[#allocation2 + $0x328] sm:$0xff] }
 0x492   :  { %8186 = vmatpush1.bf16.msra.mxu0 %v9982_v3  ;;  %8229 = vmatpush1.bf16.msra.mxu1 %v10110_v4  ;;  %v1723_v45 = vld [vmem:[#allocation2 + $0x708] sm:$0xff]  ;;  %v10071_v54 = vcombine.high %v1595_v43, %v1599_v44  ;;  %v10070_v3 = vcombine.low %v1595_v43, %v1599_v44 }
 0x493   :  { %8187 = vmatprep.subr.bf16.mxu0 %v9975_v5  ;;  %8230 = vmatprep.subr.bf16.mxu1 %v10103_v6  ;;  %v1727_v49 = vld [vmem:[#allocation2 + $0x728] sm:$0xff] }
 0x494   :  { %v10199_v55 = vcombine.high %v1723_v45, %v1727_v49  ;;  %v1587_v56 = vld [vmem:[#allocation2 + $0x2c8] sm:$0xff]  ;;  %v10198_v4 = vcombine.low %v1723_v45, %v1727_v49 }
 0x495   :  { %v1591_v0 = vld [vmem:[#allocation2 + $0x2e8] sm:$0xff] }
 0x496   :  { %8188 = vmatpush1.bf16.msra.mxu0 %v9974_v15  ;;  %8231 = vmatpush1.bf16.msra.mxu1 %v10102_v16  ;;  %v1715_v59 = vld [vmem:[#allocation2 + $0x6c8] sm:$0xff]  ;;  %v10063_v5 = vcombine.high %v1587_v56, %v1591_v0  ;;  %v10062_v15 = vcombine.low %v1587_v56, %v1591_v0 }
 0x497   :  { %8189 = vmatprep.subr.bf16.mxu0 %v10095_v17  ;;  %8232 = vmatprep.subr.bf16.mxu1 %v10223_v19  ;;  %v1719_v61 = vld [vmem:[#allocation2 + $0x6e8] sm:$0xff] }
 0x498   :  { %v10191_v6 = vcombine.high %v1715_v59, %v1719_v61  ;;  %v1579_v9 = vld [vmem:[#allocation2 + $0x288] sm:$0xff]  ;;  %v10190_v16 = vcombine.low %v1715_v59, %v1719_v61 }
 0x499   :  { %v1583_v11 = vld [vmem:[#allocation2 + $0x2a8] sm:$0xff] }
 0x49a   :  { %8190 = vmatpush2.bf16.msra.mxu0 %v10094_v25  ;;  %8233 = vmatpush2.bf16.msra.mxu1 %v10222_v26  ;;  %v1707_v12 = vld [vmem:[#allocation2 + $0x688] sm:$0xff]  ;;  %v10055_v17 = vcombine.high %v1579_v9, %v1583_v11  ;;  %v10054_v25 = vcombine.low %v1579_v9, %v1583_v11  ;;  %v12144_v9 = vpop.f32.mrf.mxu1 }
 0x49b   :  { %8191 = vmatprep.subr.bf16.mxu0 %v10087_v27  ;;  %8234 = vmatprep.subr.bf16.mxu1 %v10215_v28  ;;  %v1711_v14 = vld [vmem:[#allocation2 + $0x6a8] sm:$0xff] }
 0x49c   :  { %v10183_v19 = vcombine.high %v1707_v12, %v1711_v14  ;;  %v1571_v52 = vld [vmem:[#allocation2 + $0x248] sm:$0xff]  ;;  %v10182_v26 = vcombine.low %v1707_v12, %v1711_v14 }
 0x49d   :  { %v1575_v20 = vld [vmem:[#allocation2 + $0x268] sm:$0xff] }
 0x49e   :  { %8192 = vmatpush2.bf16.msra.mxu0 %v10086_v37  ;;  %8235 = vmatpush2.bf16.msra.mxu1 %v10214_v38  ;;  %v1699_v22 = vld [vmem:[#allocation2 + $0x648] sm:$0xff]  ;;  %v10047_v27 = vcombine.high %v1571_v52, %v1575_v20  ;;  %v10046_v37 = vcombine.low %v1571_v52, %v1575_v20 }
 0x49f   :  { %8193 = vmatprep.subr.bf16.mxu0 %v10079_v41  ;;  %8236 = vmatprep.subr.bf16.mxu1 %v10207_v42  ;;  %v1703_v23 = vld [vmem:[#allocation2 + $0x668] sm:$0xff] }
 0x4a0   :  { %v10175_v28 = vcombine.high %v1699_v22, %v1703_v23  ;;  %v1563_v29 = vld [vmem:[#allocation2 + $0x208] sm:$0xff]  ;;  %v10174_v38 = vcombine.low %v1699_v22, %v1703_v23 }
 0x4a1   :  { %v1567_v30 = vld [vmem:[#allocation2 + $0x228] sm:$0xff] }
 0x4a2   :  { %8194 = vmatpush2.bf16.msra.mxu0 %v10078_v50  ;;  %8237 = vmatpush2.bf16.msra.mxu1 %v10206_v53  ;;  %v1691_v32 = vld [vmem:[#allocation2 + $0x608] sm:$0xff]  ;;  %v10039_v41 = vcombine.high %v1563_v29, %v1567_v30  ;;  %v10038_v50 = vcombine.low %v1563_v29, %v1567_v30 }
 0x4a3   :  { %8195 = vmatprep.subr.bf16.mxu0 %v10071_v54  ;;  %8238 = vmatprep.subr.bf16.mxu1 %v10199_v55  ;;  %v1695_v34 = vld [vmem:[#allocation2 + $0x628] sm:$0xff] }
 0x4a4   :  { %v10167_v42 = vcombine.high %v1691_v32, %v1695_v34  ;;  %v1811_v43 = vld [vmem:[#allocation2 + $0x9c8] sm:$0xff]  ;;  %v10166_v53 = vcombine.low %v1691_v32, %v1695_v34 }
 0x4a5   :  { %v1815_v44 = vld [vmem:[#allocation2 + $0x9e8] sm:$0xff] }
 0x4a6   :  { %8196 = vmatpush2.bf16.msra.mxu0 %v10070_v3  ;;  %8239 = vmatpush2.bf16.msra.mxu1 %v10198_v4  ;;  %v1939_v45 = vld [vmem:[#allocation2 + $0xdc8] sm:$0xff]  ;;  %v10287_v54 = vcombine.high %v1811_v43, %v1815_v44  ;;  %v10286_v3 = vcombine.low %v1811_v43, %v1815_v44  ;;  %v12142_v4 = vpop.f32.mrf.mxu0 }
 0x4a7   :  { %8197 = vmatprep.subr.bf16.mxu0 %v10063_v5  ;;  %8240 = vmatprep.subr.bf16.mxu1 %v10191_v6  ;;  %v1943_v49 = vld [vmem:[#allocation2 + $0xde8] sm:$0xff] }
 0x4a8   :  { %v10415_v55 = vcombine.high %v1939_v45, %v1943_v49  ;;  %v1803_v56 = vld [vmem:[#allocation2 + $0x988] sm:$0xff]  ;;  %v10414_v5 = vcombine.low %v1939_v45, %v1943_v49 }
 0x4a9   :  { %v1807_v0 = vld [vmem:[#allocation2 + $0x9a8] sm:$0xff] }
 0x4aa   :  { %8198 = vmatpush2.bf16.msra.mxu0 %v10062_v15  ;;  %8241 = vmatpush2.bf16.msra.mxu1 %v10190_v16  ;;  %v1931_v59 = vld [vmem:[#allocation2 + $0xd88] sm:$0xff]  ;;  %v10279_v6 = vcombine.high %v1803_v56, %v1807_v0  ;;  %v10278_v20 = vcombine.low %v1803_v56, %v1807_v0 }
 0x4ab   :  { %8199 = vmatprep.subr.bf16.mxu0 %v10055_v17  ;;  %8242 = vmatprep.subr.bf16.mxu1 %v10183_v19  ;;  %v1935_v61 = vld [vmem:[#allocation2 + $0xda8] sm:$0xff] }
 0x4ac   :  { %v10407_v11 = vcombine.high %v1931_v59, %v1935_v61  ;;  %v1795_v12 = vld [vmem:[#allocation2 + $0x948] sm:$0xff]  ;;  %v10406_v23 = vcombine.low %v1931_v59, %v1935_v61 }
 0x4ad   :  { %v1799_v14 = vld [vmem:[#allocation2 + $0x968] sm:$0xff] }
 0x4ae   :  { %8200 = vmatpush2.bf16.msra.mxu0 %v10054_v25  ;;  %8243 = vmatpush2.bf16.msra.mxu1 %v10182_v26  ;;  %v1923_v16 = vld [vmem:[#allocation2 + $0xd48] sm:$0xff]  ;;  %v10271_v25 = vcombine.high %v1795_v12, %v1799_v14 }
 0x4af   :  { %8201 = vmatprep.subr.bf16.mxu0 %v10047_v27  ;;  %8244 = vmatprep.subr.bf16.mxu1 %v10175_v28  ;;  %v1927_v17 = vld [vmem:[#allocation2 + $0xd68] sm:$0xff] }
 0x4b0   :  { %v10399_v28 = vcombine.high %v1923_v16, %v1927_v17  ;;  %v1787_v29 = vld [vmem:[#allocation2 + $0x908] sm:$0xff] }
 0x4b1   :  { %v1791_v30 = vld [vmem:[#allocation2 + $0x928] sm:$0xff] }
 0x4b2   :  { %8202 = vmatpush2.bf16.msra.mxu0 %v10046_v37  ;;  %8245 = vmatpush2.bf16.msra.mxu1 %v10174_v38  ;;  %v1915_v32 = vld [vmem:[#allocation2 + $0xd08] sm:$0xff]  ;;  %v10270_v38 = vcombine.low %v1795_v12, %v1799_v14  ;;  %v10263_v43 = vcombine.high %v1787_v29, %v1791_v30 }
 0x4b3   :  { %8203 = vmatprep.subr.bf16.mxu0 %v10039_v41  ;;  %8246 = vmatprep.subr.bf16.mxu1 %v10167_v42  ;;  %v1919_v34 = vld [vmem:[#allocation2 + $0xd28] sm:$0xff]  ;;  %v10398_v42 = vcombine.low %v1923_v16, %v1927_v17 }
 0x4b4   :  { %v10391_v45 = vcombine.high %v1915_v32, %v1919_v34  ;;  %v1779_v49 = vld [vmem:[#allocation2 + $0x8c8] sm:$0xff] }
 0x4b5   :  { %v7992_v52 = vpop.f32.mrf.mxu1  ;;  %v1771_v59 = vld [vmem:[#allocation2 + $0x888] sm:$0xff] }
 0x4b6   :  { %8204 = vmatpush2.bf16.msra.mxu0 %v10038_v50  ;;  %8247 = vmatpush2.bf16.msra.mxu1 %v10166_v53  ;;  %v7949_v15 = vpop.f32.mrf.mxu0  ;;  %v1783_v50 = vld [vmem:[#allocation2 + $0x8e8] sm:$0xff] }
 0x4b7   :  { %8259 = vmatprep.subr.bf16.mxu0 %v10287_v54  ;;  %8302 = vmatprep.subr.bf16.mxu1 %v10415_v55  ;;  %v7950_v19 = vadd.f32 %v7949_v15, %v12134_v1  ;;  %v12153_v27 = vpop.f32.mrf.mxu1  ;;  %v1907_v53 = vld [vmem:[#allocation2 + $0xcc8] sm:$0xff]  ;;  %v10262_v55 = vcombine.low %v1787_v29, %v1791_v30  ;;  %v10255_v56 = vcombine.high %v1779_v49, %v1783_v50 }
 0x4b8   :  { %v12149_v22 = vpop.f32.mrf.mxu0  ;;  %v1911_v54 = vld [vmem:[#allocation2 + $0xce8] sm:$0xff] }
 0x4b9   :  { %8206 = vmatmul.mubr.bf16.vlgmr.msra.gmra.mxu0 %v12088_v8  ;;  %8249 = vmatmul.mubr.bf16.vlgmr.msra.gmra.mxu1 %v12090_v13  ;;  %v12151_v26 = vadd.f32 %v7992_v52, %v7950_v19  ;;  %v7996_v41 = vpop.f32.mrf.mxu1  ;;  %v10383_v0 = vcombine.high %v1907_v53, %v1911_v54  ;;  %v1775_v61 = vld [vmem:[#allocation2 + $0x8a8] sm:$0xff] }
 0x4ba   :  { %8260 = vmatpush1.bf16.msra.mxu0 %v10286_v3  ;;  %8303 = vmatpush1.bf16.msra.mxu1 %v10414_v5  ;;  %v7953_v1 = vpop.f32.mrf.mxu0  ;;  %v1899_v3 = vld [vmem:[#allocation2 + $0xc88] sm:$0xff]  ;;  %v10247_v12 = vcombine.high %v1771_v59, %v1775_v61  ;;  %v10246_v52 = vcombine.low %v1771_v59, %v1775_v61 }
 0x4bb   :  { %8261 = vmatprep.subr.bf16.mxu0 %v10279_v6  ;;  %8304 = vmatprep.subr.bf16.mxu1 %v10407_v11  ;;  %v7954_v37 = vadd.f32 %v7953_v1, %v12140_v18  ;;  %v10390_v18 = vcombine.low %v1915_v32, %v1919_v34  ;;  %v1903_v5 = vld [vmem:[#allocation2 + $0xca8] sm:$0xff]  ;;  %v10254_v6 = vcombine.low %v1779_v49, %v1783_v50 }
 0x4bc   :  { %8291 = vmatprep.mubr.bf16.mxu0 %v12092_v21  ;;  %8334 = vmatprep.mubr.bf16.mxu1 %v12095_v24  ;;  %v10382_v11 = vcombine.low %v1907_v53, %v1911_v54  ;;  %v10375_v14 = vcombine.high %v1899_v3, %v1903_v5  ;;  %v1763_v15 = vld [vmem:[#allocation2 + $0x848] sm:$0xff] }
 0x4bd   :  { %v12158_v44 = vadd.f32 %v7996_v41, %v7954_v37  ;;  %v1767_v16 = vld [vmem:[#allocation2 + $0x868] sm:$0xff] }
 0x4be   :  { %8262 = vmatpush1.bf16.msra.mxu0 %v10278_v20  ;;  %8305 = vmatpush1.bf16.msra.mxu1 %v10406_v23  ;;  %v1891_v17 = vld [vmem:[#allocation2 + $0xc48] sm:$0xff]  ;;  %v10374_v20 = vcombine.low %v1899_v3, %v1903_v5  ;;  %v10239_v23 = vcombine.high %v1763_v15, %v1767_v16  ;;  %v10238_v32 = vcombine.low %v1763_v15, %v1767_v16 }
 0x4bf   :  { %8263 = vmatprep.subr.bf16.mxu0 %v10271_v25  ;;  %8306 = vmatprep.subr.bf16.mxu1 %v10399_v28  ;;  %v1895_v19 = vld [vmem:[#allocation2 + $0xc68] sm:$0xff] }
 0x4c0   :  { %v10367_v25 = vcombine.high %v1891_v17, %v1895_v19  ;;  %v1755_v28 = vld [vmem:[#allocation2 + $0x808] sm:$0xff]  ;;  %v10366_v34 = vcombine.low %v1891_v17, %v1895_v19 }
 0x4c1   :  { %v1759_v29 = vld [vmem:[#allocation2 + $0x828] sm:$0xff] }
 0x4c2   :  { %8264 = vmatpush1.bf16.msra.mxu0 %v10270_v38  ;;  %8307 = vmatpush1.bf16.msra.mxu1 %v10398_v42  ;;  %v1883_v30 = vld [vmem:[#allocation2 + $0xc08] sm:$0xff]  ;;  %v10231_v37 = vcombine.high %v1755_v28, %v1759_v29  ;;  %v10230_v49 = vcombine.low %v1755_v28, %v1759_v29 }
 0x4c3   :  { %8265 = vmatprep.subr.bf16.mxu0 %v10263_v43  ;;  %8308 = vmatprep.subr.bf16.mxu1 %v10391_v45  ;;  %v1887_v1 = vld [vmem:[#allocation2 + $0xc28] sm:$0xff] }
 0x4c4   :  { %v10359_v38 = vcombine.high %v1883_v30, %v1887_v1  ;;  %v1875_v41 = vld [vmem:[#allocation2 + $0xbc8] sm:$0xff]  ;;  %v10358_v50 = vcombine.low %v1883_v30, %v1887_v1 }
 0x4c5   :  { %v1879_v42 = vld [vmem:[#allocation2 + $0xbe8] sm:$0xff] }
 0x4c6   :  { %8266 = vmatpush1.bf16.msra.mxu0 %v10262_v55  ;;  %8309 = vmatpush1.bf16.msra.mxu1 %v10390_v18  ;;  %v2003_v43 = vld [vmem:[#allocation2 + $0xfc8] sm:$0xff]  ;;  %v10351_v53 = vcombine.high %v1875_v41, %v1879_v42  ;;  %v10350_v59 = vcombine.low %v1875_v41, %v1879_v42 }
 0x4c7   :  { %8267 = vmatprep.subr.bf16.mxu0 %v10255_v56  ;;  %8310 = vmatprep.subr.bf16.mxu1 %v10383_v0  ;;  %v2007_v45 = vld [vmem:[#allocation2 + $0xfe8] sm:$0xff] }
 0x4c8   :  { %v10479_v54 = vcombine.high %v2003_v43, %v2007_v45  ;;  %v1867_v55 = vld [vmem:[#allocation2 + $0xb88] sm:$0xff]  ;;  %v10478_v61 = vcombine.low %v2003_v43, %v2007_v45 }
 0x4c9   :  { %v1871_v18 = vld [vmem:[#allocation2 + $0xba8] sm:$0xff] }
 0x4ca   :  { %8268 = vmatpush1.bf16.msra.mxu0 %v10254_v6  ;;  %8311 = vmatpush1.bf16.msra.mxu1 %v10382_v11  ;;  %v1995_v56 = vld [vmem:[#allocation2 + $0xf88] sm:$0xff]  ;;  %v10343_v3 = vcombine.high %v1867_v55, %v1871_v18  ;;  %v10342_v15 = vcombine.low %v1867_v55, %v1871_v18 }
 0x4cb   :  { %8269 = vmatprep.subr.bf16.mxu0 %v10247_v12  ;;  %8312 = vmatprep.subr.bf16.mxu1 %v10375_v14  ;;  %v1999_v0 = vld [vmem:[#allocation2 + $0xfa8] sm:$0xff] }
 0x4cc   :  { %v10471_v5 = vcombine.high %v1995_v56, %v1999_v0  ;;  %v1859_v6 = vld [vmem:[#allocation2 + $0xb48] sm:$0xff]  ;;  %v10470_v16 = vcombine.low %v1995_v56, %v1999_v0 }
 0x4cd   :  { %v1863_v11 = vld [vmem:[#allocation2 + $0xb68] sm:$0xff] }
 0x4ce   :  { %8270 = vmatpush1.bf16.msra.mxu0 %v10246_v52  ;;  %8313 = vmatpush1.bf16.msra.mxu1 %v10374_v20  ;;  %v1987_v12 = vld [vmem:[#allocation2 + $0xf48] sm:$0xff]  ;;  %v10335_v17 = vcombine.high %v1859_v6, %v1863_v11  ;;  %v10334_v28 = vcombine.low %v1859_v6, %v1863_v11 }
 0x4cf   :  { %8271 = vmatprep.subr.bf16.mxu0 %v10239_v23  ;;  %8314 = vmatprep.subr.bf16.mxu1 %v10367_v25  ;;  %v1991_v14 = vld [vmem:[#allocation2 + $0xf68] sm:$0xff] }
 0x4d0   :  { %v10463_v19 = vcombine.high %v1987_v12, %v1991_v14  ;;  %v1851_v52 = vld [vmem:[#allocation2 + $0xb08] sm:$0xff]  ;;  %v10462_v29 = vcombine.low %v1987_v12, %v1991_v14 }
 0x4d1   :  { %v1855_v20 = vld [vmem:[#allocation2 + $0xb28] sm:$0xff] }
 0x4d2   :  { %8272 = vmatpush1.bf16.msra.mxu0 %v10238_v32  ;;  %8315 = vmatpush1.bf16.msra.mxu1 %v10366_v34  ;;  %v1979_v23 = vld [vmem:[#allocation2 + $0xf08] sm:$0xff]  ;;  %v10327_v30 = vcombine.high %v1851_v52, %v1855_v20  ;;  %v10326_v41 = vcombine.low %v1851_v52, %v1855_v20 }
 0x4d3   :  { %8273 = vmatprep.subr.bf16.mxu0 %v10231_v37  ;;  %8316 = vmatprep.subr.bf16.mxu1 %v10359_v38  ;;  %v1983_v25 = vld [vmem:[#allocation2 + $0xf28] sm:$0xff] }
 0x4d4   :  { %v10455_v1 = vcombine.high %v1979_v23, %v1983_v25  ;;  %v1843_v32 = vld [vmem:[#allocation2 + $0xac8] sm:$0xff]  ;;  %v10454_v42 = vcombine.low %v1979_v23, %v1983_v25 }
 0x4d5   :  { %v1847_v34 = vld [vmem:[#allocation2 + $0xae8] sm:$0xff] }
 0x4d6   :  { %8274 = vmatpush1.bf16.msra.mxu0 %v10230_v49  ;;  %8317 = vmatpush1.bf16.msra.mxu1 %v10358_v50  ;;  %v1971_v37 = vld [vmem:[#allocation2 + $0xec8] sm:$0xff]  ;;  %v10319_v43 = vcombine.high %v1843_v32, %v1847_v34  ;;  %v10318_v55 = vcombine.low %v1843_v32, %v1847_v34 }
 0x4d7   :  { %8275 = vmatprep.subr.bf16.mxu0 %v10351_v53  ;;  %8318 = vmatprep.subr.bf16.mxu1 %v10479_v54  ;;  %v1975_v38 = vld [vmem:[#allocation2 + $0xee8] sm:$0xff] }
 0x4d8   :  { %v10447_v45 = vcombine.high %v1971_v37, %v1975_v38  ;;  %v1835_v49 = vld [vmem:[#allocation2 + $0xa88] sm:$0xff]  ;;  %v10446_v18 = vcombine.low %v1971_v37, %v1975_v38 }
 0x4d9   :  { %v1839_v50 = vld [vmem:[#allocation2 + $0xaa8] sm:$0xff] }
 0x4da   :  { %8276 = vmatpush2.bf16.msra.mxu0 %v10350_v59  ;;  %8319 = vmatpush2.bf16.msra.mxu1 %v10478_v61  ;;  %v1963_v53 = vld [vmem:[#allocation2 + $0xe88] sm:$0xff]  ;;  %v10311_v56 = vcombine.high %v1835_v49, %v1839_v50  ;;  %v10310_v6 = vcombine.low %v1835_v49, %v1839_v50  ;;  %v12160_v50 = vpop.f32.mrf.mxu0 }
 0x4db   :  { %8277 = vmatprep.subr.bf16.mxu0 %v10343_v3  ;;  %8320 = vmatprep.subr.bf16.mxu1 %v10471_v5  ;;  %v1967_v54 = vld [vmem:[#allocation2 + $0xea8] sm:$0xff] }
 0x4dc   :  { %v10439_v0 = vcombine.high %v1963_v53, %v1967_v54  ;;  %v1827_v59 = vld [vmem:[#allocation2 + $0xa48] sm:$0xff]  ;;  %v10438_v11 = vcombine.low %v1963_v53, %v1967_v54 }
 0x4dd   :  { %v1831_v61 = vld [vmem:[#allocation2 + $0xa68] sm:$0xff] }
 0x4de   :  { %8278 = vmatpush2.bf16.msra.mxu0 %v10342_v15  ;;  %8321 = vmatpush2.bf16.msra.mxu1 %v10470_v16  ;;  %v1955_v3 = vld [vmem:[#allocation2 + $0xe48] sm:$0xff]  ;;  %v10303_v12 = vcombine.high %v1827_v59, %v1831_v61  ;;  %v10302_v52 = vcombine.low %v1827_v59, %v1831_v61 }
 0x4df   :  { %8279 = vmatprep.subr.bf16.mxu0 %v10335_v17  ;;  %8322 = vmatprep.subr.bf16.mxu1 %v10463_v19  ;;  %v1959_v5 = vld [vmem:[#allocation2 + $0xe68] sm:$0xff] }
 0x4e0   :  { %v10431_v14 = vcombine.high %v1955_v3, %v1959_v5  ;;  %v1819_v15 = vld [vmem:[#allocation2 + $0xa08] sm:$0xff]  ;;  %v10430_v20 = vcombine.low %v1955_v3, %v1959_v5 }
 0x4e1   :  { %v1823_v16 = vld [vmem:[#allocation2 + $0xa28] sm:$0xff] }
 0x4e2   :  { %8280 = vmatpush2.bf16.msra.mxu0 %v10334_v28  ;;  %8323 = vmatpush2.bf16.msra.mxu1 %v10462_v29  ;;  %v1947_v17 = vld [vmem:[#allocation2 + $0xe08] sm:$0xff]  ;;  %v10295_v23 = vcombine.high %v1819_v15, %v1823_v16  ;;  %v10294_v32 = vcombine.low %v1819_v15, %v1823_v16 }
 0x4e3   :  { %8281 = vmatprep.subr.bf16.mxu0 %v10327_v30  ;;  %8324 = vmatprep.subr.bf16.mxu1 %v10455_v1  ;;  %v1951_v19 = vld [vmem:[#allocation2 + $0xe28] sm:$0xff] }
 0x4e4   :  { %v10423_v25 = vcombine.high %v1947_v17, %v1951_v19  ;;  %v2067_v28 = vld [vmem:[#allocation2 + $0x11c8] sm:$0xff]  ;;  %v10422_v34 = vcombine.low %v1947_v17, %v1951_v19 }
 0x4e5   :  { %v2071_v29 = vld [vmem:[#allocation2 + $0x11e8] sm:$0xff] }
 0x4e6   :  { %8282 = vmatpush2.bf16.msra.mxu0 %v10326_v41  ;;  %8325 = vmatpush2.bf16.msra.mxu1 %v10454_v42  ;;  %v2195_v30 = vld [vmem:[#allocation2 + $0x15c8] sm:$0xff]  ;;  %v10543_v37 = vcombine.high %v2067_v28, %v2071_v29  ;;  %v10542_v49 = vcombine.low %v2067_v28, %v2071_v29 }
 0x4e7   :  { %8283 = vmatprep.subr.bf16.mxu0 %v10319_v43  ;;  %8326 = vmatprep.subr.bf16.mxu1 %v10447_v45  ;;  %v2199_v1 = vld [vmem:[#allocation2 + $0x15e8] sm:$0xff] }
 0x4e8   :  { %v10671_v38 = vcombine.high %v2195_v30, %v2199_v1  ;;  %v2059_v41 = vld [vmem:[#allocation2 + $0x1188] sm:$0xff]  ;;  %v10670_v53 = vcombine.low %v2195_v30, %v2199_v1 }
 0x4e9   :  { %v2063_v42 = vld [vmem:[#allocation2 + $0x11a8] sm:$0xff] }
 0x4ea   :  { %8284 = vmatpush2.bf16.msra.mxu0 %v10318_v55  ;;  %8327 = vmatpush2.bf16.msra.mxu1 %v10446_v18  ;;  %v2187_v43 = vld [vmem:[#allocation2 + $0x1588] sm:$0xff]  ;;  %v10535_v54 = vcombine.high %v2059_v41, %v2063_v42  ;;  %v12162_v55 = vpop.f32.mrf.mxu1 }
 0x4eb   :  { %8285 = vmatprep.subr.bf16.mxu0 %v10311_v56  ;;  %8328 = vmatprep.subr.bf16.mxu1 %v10439_v0  ;;  %v2191_v45 = vld [vmem:[#allocation2 + $0x15a8] sm:$0xff] }
 0x4ec   :  { %v10663_v18 = vcombine.high %v2187_v43, %v2191_v45  ;;  %v2051_v56 = vld [vmem:[#allocation2 + $0x1148] sm:$0xff] }
 0x4ed   :  { %v2055_v0 = vld [vmem:[#allocation2 + $0x1168] sm:$0xff] }
 0x4ee   :  { %8286 = vmatpush2.bf16.msra.mxu0 %v10310_v6  ;;  %8329 = vmatpush2.bf16.msra.mxu1 %v10438_v11  ;;  %v2179_v61 = vld [vmem:[#allocation2 + $0x1548] sm:$0xff]  ;;  %v10534_v11 = vcombine.low %v2059_v41, %v2063_v42  ;;  %v10527_v15 = vcombine.high %v2051_v56, %v2055_v0  ;;  %v10526_v29 = vcombine.low %v2051_v56, %v2055_v0 }
 0x4ef   :  { %8287 = vmatprep.subr.bf16.mxu0 %v10303_v12  ;;  %8330 = vmatprep.subr.bf16.mxu1 %v10431_v14  ;;  %v2183_v3 = vld [vmem:[#allocation2 + $0x1568] sm:$0xff]  ;;  %v10662_v14 = vcombine.low %v2187_v43, %v2191_v45 }
 0x4f0   :  { %v10655_v19 = vcombine.high %v2179_v61, %v2183_v3  ;;  %v10654_v1 = vcombine.low %v2179_v61, %v2183_v3  ;;  %v2039_v41 = vld [vmem:[#allocation2 + $0x10e8] sm:$0xff] }
 0x4f1   :  { %v2163_v42 = vld [vmem:[#allocation2 + $0x14c8] sm:$0xff] }
 0x4f2   :  { %8288 = vmatpush2.bf16.msra.mxu0 %v10302_v52  ;;  %8331 = vmatpush2.bf16.msra.mxu1 %v10430_v20  ;;  %v2043_v52 = vld [vmem:[#allocation2 + $0x1108] sm:$0xff] }
 0x4f3   :  { %8289 = vmatprep.subr.bf16.mxu0 %v10295_v23  ;;  %8332 = vmatprep.subr.bf16.mxu1 %v10423_v25  ;;  %v2047_v20 = vld [vmem:[#allocation2 + $0x1128] sm:$0xff] }
 0x4f4   :  { %v2171_v23 = vld [vmem:[#allocation2 + $0x1508] sm:$0xff]  ;;  %v10518_v45 = vcombine.low %v2043_v52, %v2047_v20 }
 0x4f5   :  { %v2175_v25 = vld [vmem:[#allocation2 + $0x1528] sm:$0xff] }
 0x4f6   :  { %8290 = vmatpush2.bf16.msra.mxu0 %v10294_v32  ;;  %8333 = vmatpush2.bf16.msra.mxu1 %v10422_v34  ;;  %v10519_v32 = vcombine.high %v2043_v52, %v2047_v20  ;;  %v2167_v43 = vld [vmem:[#allocation2 + $0x14e8] sm:$0xff] }
 0x4f7   :  { %8345 = vmatprep.subr.bf16.mxu0 %v10543_v37  ;;  %8388 = vmatprep.subr.bf16.mxu1 %v10671_v38  ;;  %v8078_v6 = vpop.f32.mrf.mxu1  ;;  %v10647_v37 = vcombine.high %v2171_v23, %v2175_v25  ;;  %v2035_v38 = vld [vmem:[#allocation2 + $0x10c8] sm:$0xff]  ;;  %v10638_v61 = vcombine.low %v2163_v42, %v2167_v43 }
 0x4f8   :  { %v2155_v56 = vld [vmem:[#allocation2 + $0x1488] sm:$0xff] }
 0x4f9   :  { %v8035_v59 = vpop.f32.mrf.mxu0  ;;  %8292 = vmatmul.mubr.bf16.vlgmr.msra.gmra.mxu0 %v12100_v47  ;;  %8335 = vmatmul.mubr.bf16.vlgmr.msra.gmra.mxu1 %v12102_v48  ;;  %v12171_v17 = vpop.f32.mrf.mxu1  ;;  %v2159_v0 = vld [vmem:[#allocation2 + $0x14a8] sm:$0xff] }
 0x4fa   :  { %v8036_v5 = vadd.f32 %v8035_v59, %v12151_v26  ;;  %8346 = vmatpush1.bf16.msra.mxu0 %v10542_v49  ;;  %8389 = vmatpush1.bf16.msra.mxu1 %v10670_v53  ;;  %v10511_v49 = vcombine.high %v2035_v38, %v2039_v41  ;;  %v10639_v53 = vcombine.high %v2163_v42, %v2167_v43  ;;  %v2259_v42 = vld [vmem:[#allocation2 + $0x17c8] sm:$0xff] }
 0x4fb   :  { %v12167_v12 = vpop.f32.mrf.mxu0  ;;  %8347 = vmatprep.subr.bf16.mxu0 %v10535_v54  ;;  %8390 = vmatprep.subr.bf16.mxu1 %v10663_v18  ;;  %v8082_v30 = vpop.f32.mrf.mxu1  ;;  %v2027_v54 = vld [vmem:[#allocation2 + $0x1088] sm:$0xff]  ;;  %v10510_v59 = vcombine.low %v2035_v38, %v2039_v41  ;;  %v10630_v52 = vcombine.low %v2155_v56, %v2159_v0 }
 0x4fc   :  { %v12169_v16 = vadd.f32 %v8078_v6, %v8036_v5  ;;  %8377 = vmatprep.mubr.bf16.mxu0 %v12104_v58  ;;  %8420 = vmatprep.mubr.bf16.mxu1 %v12107_v63  ;;  %v2031_v18 = vld [vmem:[#allocation2 + $0x10a8] sm:$0xff]  ;;  %v10631_v5 = vcombine.high %v2155_v56, %v2159_v0 }
 0x4fd   :  { %v8039_v26 = vpop.f32.mrf.mxu0  ;;  %v10503_v3 = vcombine.high %v2027_v54, %v2031_v18  ;;  %v2019_v6 = vld [vmem:[#allocation2 + $0x1048] sm:$0xff] }
 0x4fe   :  { %v8040_v28 = vadd.f32 %v8039_v26, %v12158_v44  ;;  %8348 = vmatpush1.bf16.msra.mxu0 %v10534_v11  ;;  %8391 = vmatpush1.bf16.msra.mxu1 %v10662_v14  ;;  %v10646_v44 = vcombine.low %v2171_v23, %v2175_v25  ;;  %v2023_v11 = vld [vmem:[#allocation2 + $0x1068] sm:$0xff] }
 0x4ff   :  { %8349 = vmatprep.subr.bf16.mxu0 %v10527_v15  ;;  %8392 = vmatprep.subr.bf16.mxu1 %v10655_v19  ;;  %v2147_v14 = vld [vmem:[#allocation2 + $0x1448] sm:$0xff]  ;;  %v10502_v19 = vcombine.low %v2027_v54, %v2031_v18  ;;  %v10495_v20 = vcombine.high %v2019_v6, %v2023_v11 }
 0x500   :  { %v12176_v34 = vadd.f32 %v8082_v30, %v8040_v28  ;;  %v2151_v15 = vld [vmem:[#allocation2 + $0x1468] sm:$0xff]  ;;  %v10494_v30 = vcombine.low %v2019_v6, %v2023_v11 }
 0x501   :  { %v10623_v26 = vcombine.high %v2147_v14, %v2151_v15  ;;  %v2011_v23 = vld [vmem:[#allocation2 + $0x1008] sm:$0xff] }
 0x502   :  { %8350 = vmatpush1.bf16.msra.mxu0 %v10526_v29  ;;  %8393 = vmatpush1.bf16.msra.mxu1 %v10654_v1  ;;  %v2015_v25 = vld [vmem:[#allocation2 + $0x1028] sm:$0xff]  ;;  %v10622_v1 = vcombine.low %v2147_v14, %v2151_v15 }
 0x503   :  { %8351 = vmatprep.subr.bf16.mxu0 %v10519_v32  ;;  %8394 = vmatprep.subr.bf16.mxu1 %v10647_v37  ;;  %v2139_v28 = vld [vmem:[#allocation2 + $0x1408] sm:$0xff]  ;;  %v10487_v32 = vcombine.high %v2011_v23, %v2015_v25 }
 0x504   :  { %v2143_v29 = vld [vmem:[#allocation2 + $0x1428] sm:$0xff] }
 0x505   :  { %v10615_v37 = vcombine.high %v2139_v28, %v2143_v29  ;;  %v2131_v38 = vld [vmem:[#allocation2 + $0x13c8] sm:$0xff] }
 0x506   :  { %8352 = vmatpush1.bf16.msra.mxu0 %v10518_v45  ;;  %8395 = vmatpush1.bf16.msra.mxu1 %v10646_v44  ;;  %v2135_v41 = vld [vmem:[#allocation2 + $0x13e8] sm:$0xff]  ;;  %v10486_v45 = vcombine.low %v2011_v23, %v2015_v25  ;;  %v10614_v44 = vcombine.low %v2139_v28, %v2143_v29 }
 0x507   :  { %8353 = vmatprep.subr.bf16.mxu0 %v10511_v49  ;;  %8396 = vmatprep.subr.bf16.mxu1 %v10639_v53  ;;  %v2263_v43 = vld [vmem:[#allocation2 + $0x17e8] sm:$0xff]  ;;  %v10607_v49 = vcombine.high %v2131_v38, %v2135_v41 }
 0x508   :  { %v10735_v53 = vcombine.high %v2259_v42, %v2263_v43  ;;  %v2123_v54 = vld [vmem:[#allocation2 + $0x1388] sm:$0xff] }
 0x509   :  { %v2127_v18 = vld [vmem:[#allocation2 + $0x13a8] sm:$0xff] }
 0x50a   :  { %8354 = vmatpush1.bf16.msra.mxu0 %v10510_v59  ;;  %8397 = vmatpush1.bf16.msra.mxu1 %v10638_v61  ;;  %v2251_v56 = vld [vmem:[#allocation2 + $0x1788] sm:$0xff]  ;;  %v10606_v59 = vcombine.low %v2131_v38, %v2135_v41  ;;  %v10734_v61 = vcombine.low %v2259_v42, %v2263_v43 }
 0x50b   :  { %8355 = vmatprep.subr.bf16.mxu0 %v10503_v3  ;;  %8398 = vmatprep.subr.bf16.mxu1 %v10631_v5  ;;  %v2255_v0 = vld [vmem:[#allocation2 + $0x17a8] sm:$0xff]  ;;  %v10599_v3 = vcombine.high %v2123_v54, %v2127_v18 }
 0x50c   :  { %v10727_v5 = vcombine.high %v2251_v56, %v2255_v0  ;;  %v2115_v6 = vld [vmem:[#allocation2 + $0x1348] sm:$0xff] }
 0x50d   :  { %v2119_v11 = vld [vmem:[#allocation2 + $0x1368] sm:$0xff] }
 0x50e   :  { %8356 = vmatpush1.bf16.msra.mxu0 %v10502_v19  ;;  %8399 = vmatpush1.bf16.msra.mxu1 %v10630_v52  ;;  %v2243_v14 = vld [vmem:[#allocation2 + $0x1748] sm:$0xff]  ;;  %v10598_v19 = vcombine.low %v2123_v54, %v2127_v18  ;;  %v10726_v52 = vcombine.low %v2251_v56, %v2255_v0 }
 0x50f   :  { %8357 = vmatprep.subr.bf16.mxu0 %v10495_v20  ;;  %8400 = vmatprep.subr.bf16.mxu1 %v10623_v26  ;;  %v2247_v15 = vld [vmem:[#allocation2 + $0x1768] sm:$0xff]  ;;  %v10591_v20 = vcombine.high %v2115_v6, %v2119_v11 }
 0x510   :  { %v10719_v26 = vcombine.high %v2243_v14, %v2247_v15  ;;  %v2107_v23 = vld [vmem:[#allocation2 + $0x1308] sm:$0xff] }
 0x511   :  { %v2111_v25 = vld [vmem:[#allocation2 + $0x1328] sm:$0xff] }
 0x512   :  { %8358 = vmatpush1.bf16.msra.mxu0 %v10494_v30  ;;  %8401 = vmatpush1.bf16.msra.mxu1 %v10622_v1  ;;  %v2235_v28 = vld [vmem:[#allocation2 + $0x1708] sm:$0xff]  ;;  %v10590_v30 = vcombine.low %v2115_v6, %v2119_v11  ;;  %v10718_v1 = vcombine.low %v2243_v14, %v2247_v15 }
 0x513   :  { %8359 = vmatprep.subr.bf16.mxu0 %v10487_v32  ;;  %8402 = vmatprep.subr.bf16.mxu1 %v10615_v37  ;;  %v2239_v29 = vld [vmem:[#allocation2 + $0x1728] sm:$0xff]  ;;  %v10583_v32 = vcombine.high %v2107_v23, %v2111_v25 }
 0x514   :  { %v10711_v37 = vcombine.high %v2235_v28, %v2239_v29  ;;  %v2099_v38 = vld [vmem:[#allocation2 + $0x12c8] sm:$0xff] }
 0x515   :  { %v2103_v41 = vld [vmem:[#allocation2 + $0x12e8] sm:$0xff] }
 0x516   :  { %8360 = vmatpush1.bf16.msra.mxu0 %v10486_v45  ;;  %8403 = vmatpush1.bf16.msra.mxu1 %v10614_v44  ;;  %v2227_v42 = vld [vmem:[#allocation2 + $0x16c8] sm:$0xff]  ;;  %v10582_v45 = vcombine.low %v2107_v23, %v2111_v25  ;;  %v10710_v44 = vcombine.low %v2235_v28, %v2239_v29 }
 0x517   :  { %8361 = vmatprep.subr.bf16.mxu0 %v10607_v49  ;;  %8404 = vmatprep.subr.bf16.mxu1 %v10735_v53  ;;  %v2231_v43 = vld [vmem:[#allocation2 + $0x16e8] sm:$0xff]  ;;  %v10575_v49 = vcombine.high %v2099_v38, %v2103_v41 }
 0x518   :  { %v10703_v53 = vcombine.high %v2227_v42, %v2231_v43  ;;  %v2091_v54 = vld [vmem:[#allocation2 + $0x1288] sm:$0xff] }
 0x519   :  { %v2095_v18 = vld [vmem:[#allocation2 + $0x12a8] sm:$0xff] }
 0x51a   :  { %8362 = vmatpush2.bf16.msra.mxu0 %v10606_v59  ;;  %8405 = vmatpush2.bf16.msra.mxu1 %v10734_v61  ;;  %v2219_v56 = vld [vmem:[#allocation2 + $0x1688] sm:$0xff]  ;;  %v10574_v59 = vcombine.low %v2099_v38, %v2103_v41  ;;  %v10702_v61 = vcombine.low %v2227_v42, %v2231_v43 }
 0x51b   :  { %8363 = vmatprep.subr.bf16.mxu0 %v10599_v3  ;;  %8406 = vmatprep.subr.bf16.mxu1 %v10727_v5  ;;  %v2223_v0 = vld [vmem:[#allocation2 + $0x16a8] sm:$0xff]  ;;  %v10567_v3 = vcombine.high %v2091_v54, %v2095_v18 }
 0x51c   :  { %v10695_v5 = vcombine.high %v2219_v56, %v2223_v0  ;;  %v2083_v6 = vld [vmem:[#allocation2 + $0x1248] sm:$0xff] }
 0x51d   :  { %v2087_v11 = vld [vmem:[#allocation2 + $0x1268] sm:$0xff] }
 0x51e   :  { %8364 = vmatpush2.bf16.msra.mxu0 %v10598_v19  ;;  %8407 = vmatpush2.bf16.msra.mxu1 %v10726_v52  ;;  %v2211_v14 = vld [vmem:[#allocation2 + $0x1648] sm:$0xff]  ;;  %v10566_v19 = vcombine.low %v2091_v54, %v2095_v18  ;;  %v10694_v52 = vcombine.low %v2219_v56, %v2223_v0 }
 0x51f   :  { %8365 = vmatprep.subr.bf16.mxu0 %v10591_v20  ;;  %8408 = vmatprep.subr.bf16.mxu1 %v10719_v26  ;;  %v2215_v15 = vld [vmem:[#allocation2 + $0x1668] sm:$0xff]  ;;  %v10559_v20 = vcombine.high %v2083_v6, %v2087_v11 }
 0x520   :  { %v10687_v26 = vcombine.high %v2211_v14, %v2215_v15  ;;  %v2075_v23 = vld [vmem:[#allocation2 + $0x1208] sm:$0xff] }
 0x521   :  { %v2079_v25 = vld [vmem:[#allocation2 + $0x1228] sm:$0xff] }
 0x522   :  { %8366 = vmatpush2.bf16.msra.mxu0 %v10590_v30  ;;  %8409 = vmatpush2.bf16.msra.mxu1 %v10718_v1  ;;  %v2203_v28 = vld [vmem:[#allocation2 + $0x1608] sm:$0xff]  ;;  %v10558_v30 = vcombine.low %v2083_v6, %v2087_v11  ;;  %v10686_v1 = vcombine.low %v2211_v14, %v2215_v15  ;;  %v12180_v6 = vpop.f32.mrf.mxu1 }
 0x523   :  { %8367 = vmatprep.subr.bf16.mxu0 %v10583_v32  ;;  %8410 = vmatprep.subr.bf16.mxu1 %v10711_v37  ;;  %v2207_v29 = vld [vmem:[#allocation2 + $0x1628] sm:$0xff]  ;;  %v10551_v32 = vcombine.high %v2075_v23, %v2079_v25 }
 0x524   :  { %v10679_v37 = vcombine.high %v2203_v28, %v2207_v29  ;;  %v2323_v38 = vld [vmem:[#allocation2 + $0x19c8] sm:$0xff] }
 0x525   :  { %v2327_v41 = vld [vmem:[#allocation2 + $0x19e8] sm:$0xff] }
 0x526   :  { %8368 = vmatpush2.bf16.msra.mxu0 %v10582_v45  ;;  %8411 = vmatpush2.bf16.msra.mxu1 %v10710_v44  ;;  %v2451_v42 = vld [vmem:[#allocation2 + $0x1dc8] sm:$0xff]  ;;  %v10550_v45 = vcombine.low %v2075_v23, %v2079_v25  ;;  %v10678_v44 = vcombine.low %v2203_v28, %v2207_v29 }
 0x527   :  { %8369 = vmatprep.subr.bf16.mxu0 %v10575_v49  ;;  %8412 = vmatprep.subr.bf16.mxu1 %v10703_v53  ;;  %v2455_v43 = vld [vmem:[#allocation2 + $0x1de8] sm:$0xff]  ;;  %v10799_v49 = vcombine.high %v2323_v38, %v2327_v41 }
 0x528   :  { %v10927_v53 = vcombine.high %v2451_v42, %v2455_v43  ;;  %v2315_v54 = vld [vmem:[#allocation2 + $0x1988] sm:$0xff] }
 0x529   :  { %v2319_v18 = vld [vmem:[#allocation2 + $0x19a8] sm:$0xff] }
 0x52a   :  { %8370 = vmatpush2.bf16.msra.mxu0 %v10574_v59  ;;  %8413 = vmatpush2.bf16.msra.mxu1 %v10702_v61  ;;  %v2443_v56 = vld [vmem:[#allocation2 + $0x1d88] sm:$0xff]  ;;  %v10798_v59 = vcombine.low %v2323_v38, %v2327_v41  ;;  %v12178_v61 = vpop.f32.mrf.mxu0  ;;  %v10790_v25 = vcombine.low %v2315_v54, %v2319_v18 }
 0x52b   :  { %8371 = vmatprep.subr.bf16.mxu0 %v10567_v3  ;;  %8414 = vmatprep.subr.bf16.mxu1 %v10695_v5  ;;  %v2447_v0 = vld [vmem:[#allocation2 + $0x1da8] sm:$0xff]  ;;  %v10926_v3 = vcombine.low %v2451_v42, %v2455_v43  ;;  %v10791_v5 = vcombine.high %v2315_v54, %v2319_v18 }
 0x52c   :  { %v10919_v11 = vcombine.high %v2443_v56, %v2447_v0  ;;  %v2307_v14 = vld [vmem:[#allocation2 + $0x1948] sm:$0xff]  ;;  %v10918_v29 = vcombine.low %v2443_v56, %v2447_v0 }
 0x52d   :  { %v2311_v15 = vld [vmem:[#allocation2 + $0x1968] sm:$0xff] }
 0x52e   :  { %8372 = vmatpush2.bf16.msra.mxu0 %v10566_v19  ;;  %8415 = vmatpush2.bf16.msra.mxu1 %v10694_v52  ;;  %v2435_v52 = vld [vmem:[#allocation2 + $0x1d48] sm:$0xff] }
 0x52f   :  { %8373 = vmatprep.subr.bf16.mxu0 %v10559_v20  ;;  %8416 = vmatprep.subr.bf16.mxu1 %v10687_v26  ;;  %v2439_v20 = vld [vmem:[#allocation2 + $0x1d68] sm:$0xff] }
 0x530   :  { %v2299_v38 = vld [vmem:[#allocation2 + $0x1908] sm:$0xff] }
 0x531   :  { %v2303_v41 = vld [vmem:[#allocation2 + $0x1928] sm:$0xff] }
 0x532   :  { %8374 = vmatpush2.bf16.msra.mxu0 %v10558_v30  ;;  %8417 = vmatpush2.bf16.msra.mxu1 %v10686_v1  ;;  %v10783_v30 = vcombine.high %v2307_v14, %v2311_v15  ;;  %v2427_v42 = vld [vmem:[#allocation2 + $0x1d08] sm:$0xff]  ;;  %v10775_v54 = vcombine.high %v2299_v38, %v2303_v41 }
 0x533   :  { %8375 = vmatprep.subr.bf16.mxu0 %v10551_v32  ;;  %8418 = vmatprep.subr.bf16.mxu1 %v10679_v37  ;;  %v10911_v37 = vcombine.high %v2435_v52, %v2439_v20  ;;  %v2431_v43 = vld [vmem:[#allocation2 + $0x1d28] sm:$0xff] }
 0x534   :  { %v10903_v56 = vcombine.high %v2427_v42, %v2431_v43  ;;  %v2291_v0 = vld [vmem:[#allocation2 + $0x18c8] sm:$0xff] }
 0x536   :  { %8376 = vmatpush2.bf16.msra.mxu0 %v10550_v45  ;;  %8419 = vmatpush2.bf16.msra.mxu1 %v10678_v44  ;;  %v10782_v44 = vcombine.low %v2307_v14, %v2311_v15 }
 0x537   :  { %8431 = vmatprep.subr.bf16.mxu0 %v10799_v49  ;;  %8474 = vmatprep.subr.bf16.mxu1 %v10927_v53  ;;  %v10910_v53 = vcombine.low %v2435_v52, %v2439_v20  ;;  %v2283_v20 = vld [vmem:[#allocation2 + $0x1888] sm:$0xff] }
 0x539   :  { %v8121_v19 = vpop.f32.mrf.mxu0  ;;  %8378 = vmatmul.mubr.bf16.vlgmr.msra.gmra.mxu0 %v12112_v31  ;;  %v8164_v23 = vpop.f32.mrf.mxu1  ;;  %8421 = vmatmul.mubr.bf16.vlgmr.msra.gmra.mxu1 %v12114_v36 }
 0x53a   :  { %v8122_v26 = vadd.f32 %v8121_v19, %v12169_v16  ;;  %8432 = vmatpush1.bf16.msra.mxu0 %v10798_v59  ;;  %8475 = vmatpush1.bf16.msra.mxu1 %v10926_v3  ;;  %v2295_v59 = vld [vmem:[#allocation2 + $0x18e8] sm:$0xff] }
 0x53b   :  { %v12185_v28 = vpop.f32.mrf.mxu0  ;;  %8433 = vmatprep.subr.bf16.mxu0 %v10791_v5  ;;  %v12187_v32 = vpop.f32.mrf.mxu1  ;;  %8476 = vmatprep.subr.bf16.mxu1 %v10919_v11  ;;  %v2419_v3 = vld [vmem:[#allocation2 + $0x1cc8] sm:$0xff]  ;;  %v10767_v14 = vcombine.high %v2291_v0, %v2295_v59 }
 0x53c   :  { %v8165_v1 = vadd.f32 %v8164_v23, %v8122_v26  ;;  %8463 = vmatprep.mubr.bf16.mxu0 %v12116_v46  ;;  %8506 = vmatprep.mubr.bf16.mxu1 %v12119_v51  ;;  %v2423_v5 = vld [vmem:[#allocation2 + $0x1ce8] sm:$0xff]  ;;  %v10774_v26 = vcombine.low %v2299_v38, %v2303_v41 }
 0x53d   :  { %v8125_v16 = vpop.f32.mrf.mxu0  ;;  %v8168_v49 = vpop.f32.mrf.mxu1  ;;  %v10895_v52 = vcombine.high %v2419_v3, %v2423_v5  ;;  %v2287_v23 = vld [vmem:[#allocation2 + $0x18a8] sm:$0xff] }
 0x53e   :  { %v8126_v45 = vadd.f32 %v8125_v16, %v12176_v34  ;;  %8434 = vmatpush1.bf16.msra.mxu0 %v10790_v25  ;;  %8477 = vmatpush1.bf16.msra.mxu1 %v10918_v29  ;;  %v9205_v11 = vmax.f32 %v8165_v1, 0.0  ;;  %v10902_v34 = vcombine.low %v2427_v42, %v2431_v43  ;;  %v2411_v25 = vld [vmem:[#allocation2 + $0x1c88] sm:$0xff]  ;;  %v10894_v1 = vcombine.low %v2419_v3, %v2423_v5 }
 0x53f   :  { %8435 = vmatprep.subr.bf16.mxu0 %v10783_v30  ;;  %8478 = vmatprep.subr.bf16.mxu1 %v10911_v37  ;;  %v2415_v29 = vld [vmem:[#allocation2 + $0x1ca8] sm:$0xff]  ;;  %v10766_v30 = vcombine.low %v2291_v0, %v2295_v59  ;;  %v10759_v37 = vcombine.high %v2283_v20, %v2287_v23 }
 0x540   :  { %v8169_v18 = vadd.f32 %v8168_v49, %v8126_v45  ;;  %v10887_v38 = vcombine.high %v2411_v25, %v2415_v29  ;;  %v2275_v41 = vld [vmem:[#allocation2 + $0x1848] sm:$0xff]  ;;  %v10758_v45 = vcombine.low %v2283_v20, %v2287_v23 }
 0x541   :  { %v2279_v16 = vld [vmem:[#allocation2 + $0x1868] sm:$0xff] }
 0x542   :  { %v9213_v19 = vmax.f32 %v8169_v18, 0.0  ;;  %8436 = vmatpush1.bf16.msra.mxu0 %v10782_v44  ;;  %8479 = vmatpush1.bf16.msra.mxu1 %v10910_v53  ;;  %v2403_v42 = vld [vmem:[#allocation2 + $0x1c48] sm:$0xff]  ;;  %v10886_v44 = vcombine.low %v2411_v25, %v2415_v29  ;;  %v10751_v49 = vcombine.high %v2275_v41, %v2279_v16  ;;  %v10750_v59 = vcombine.low %v2275_v41, %v2279_v16 }
 0x543   :  { %8437 = vmatprep.subr.bf16.mxu0 %v10775_v54  ;;  %8480 = vmatprep.subr.bf16.mxu1 %v10903_v56  ;;  %v2407_v43 = vld [vmem:[#allocation2 + $0x1c68] sm:$0xff] }
 0x544   :  { %v12192_v15 = vpack.c.bf16 %v9213_v19, %v9205_v11  ;;  %v10879_v53 = vcombine.high %v2403_v42, %v2407_v43  ;;  %v2267_v54 = vld [vmem:[#allocation2 + $0x1808] sm:$0xff]  ;;  %v10878_v3 = vcombine.low %v2403_v42, %v2407_v43 }
 0x545   :  { %v2271_v18 = vld [vmem:[#allocation2 + $0x1828] sm:$0xff] }
 0x546   :  { %12485 = vst [vmem:[#allocation46_spill] sm:$0xff] %v12192_v15  ;;  %8438 = vmatpush1.bf16.msra.mxu0 %v10774_v26  ;;  %8481 = vmatpush1.bf16.msra.mxu1 %v10902_v34  ;;  %v2395_v56 = vld [vmem:[#allocation2 + $0x1c08] sm:$0xff]  ;;  %v10743_v5 = vcombine.high %v2267_v54, %v2271_v18 }
 0x547   :  { %8439 = vmatprep.subr.bf16.mxu0 %v10767_v14  ;;  %8482 = vmatprep.subr.bf16.mxu1 %v10895_v52  ;;  %v2399_v0 = vld [vmem:[#allocation2 + $0x1c28] sm:$0xff]  ;;  %v10742_v52 = vcombine.low %v2267_v54, %v2271_v18 }
 0x548   :  { %v10871_v11 = vcombine.high %v2395_v56, %v2399_v0  ;;  %v2387_v19 = vld [vmem:[#allocation2 + $0x1bc8] sm:$0xff]  ;;  %v10870_v20 = vcombine.low %v2395_v56, %v2399_v0 }
 0x549   :  { %v2391_v26 = vld [vmem:[#allocation2 + $0x1be8] sm:$0xff] }
 0x54a   :  { %8440 = vmatpush1.bf16.msra.mxu0 %v10766_v30  ;;  %8483 = vmatpush1.bf16.msra.mxu1 %v10894_v1  ;;  %v2515_v34 = vld [vmem:[#allocation2 + $0x1fc8] sm:$0xff]  ;;  %v10863_v23 = vcombine.high %v2387_v19, %v2391_v26 }
 0x54b   :  { %8441 = vmatprep.subr.bf16.mxu0 %v10759_v37  ;;  %8484 = vmatprep.subr.bf16.mxu1 %v10887_v38  ;;  %v2519_v14 = vld [vmem:[#allocation2 + $0x1fe8] sm:$0xff]  ;;  %v10862_v38 = vcombine.low %v2387_v19, %v2391_v26 }
 0x54c   :  { %v10991_v25 = vcombine.high %v2515_v34, %v2519_v14  ;;  %v2379_v29 = vld [vmem:[#allocation2 + $0x1b88] sm:$0xff]  ;;  %v10990_v41 = vcombine.low %v2515_v34, %v2519_v14 }
 0x54d   :  { %v2383_v30 = vld [vmem:[#allocation2 + $0x1ba8] sm:$0xff] }
 0x54e   :  { %8442 = vmatpush1.bf16.msra.mxu0 %v10758_v45  ;;  %8485 = vmatpush1.bf16.msra.mxu1 %v10886_v44  ;;  %v2507_v1 = vld [vmem:[#allocation2 + $0x1f88] sm:$0xff]  ;;  %v10855_v16 = vcombine.high %v2379_v29, %v2383_v30 }
 0x54f   :  { %8443 = vmatprep.subr.bf16.mxu0 %v10751_v49  ;;  %8486 = vmatprep.subr.bf16.mxu1 %v10879_v53  ;;  %v2511_v37 = vld [vmem:[#allocation2 + $0x1fa8] sm:$0xff]  ;;  %v10854_v53 = vcombine.low %v2379_v29, %v2383_v30 }
 0x550   :  { %v10983_v42 = vcombine.high %v2507_v1, %v2511_v37  ;;  %v2371_v43 = vld [vmem:[#allocation2 + $0x1b48] sm:$0xff]  ;;  %v10982_v54 = vcombine.low %v2507_v1, %v2511_v37 }
 0x551   :  { %v2375_v45 = vld [vmem:[#allocation2 + $0x1b68] sm:$0xff] }
 0x552   :  { %8444 = vmatpush1.bf16.msra.mxu0 %v10750_v59  ;;  %8487 = vmatpush1.bf16.msra.mxu1 %v10878_v3  ;;  %v2499_v44 = vld [vmem:[#allocation2 + $0x1f48] sm:$0xff]  ;;  %v10847_v18 = vcombine.high %v2371_v43, %v2375_v45 }
 0x553   :  { %8445 = vmatprep.subr.bf16.mxu0 %v10743_v5  ;;  %8488 = vmatprep.subr.bf16.mxu1 %v10871_v11  ;;  %v2503_v49 = vld [vmem:[#allocation2 + $0x1f68] sm:$0xff]  ;;  %v10846_v11 = vcombine.low %v2371_v43, %v2375_v45 }
 0x554   :  { %v10975_v56 = vcombine.high %v2499_v44, %v2503_v49  ;;  %v2363_v0 = vld [vmem:[#allocation2 + $0x1b08] sm:$0xff]  ;;  %v10974_v19 = vcombine.low %v2499_v44, %v2503_v49 }
 0x555   :  { %v2367_v59 = vld [vmem:[#allocation2 + $0x1b28] sm:$0xff] }
 0x556   :  { %8446 = vmatpush1.bf16.msra.mxu0 %v10742_v52  ;;  %8489 = vmatpush1.bf16.msra.mxu1 %v10870_v20  ;;  %v2491_v3 = vld [vmem:[#allocation2 + $0x1f08] sm:$0xff]  ;;  %v10839_v26 = vcombine.high %v2363_v0, %v2367_v59 }
 0x557   :  { %8447 = vmatprep.subr.bf16.mxu0 %v10863_v23  ;;  %8490 = vmatprep.subr.bf16.mxu1 %v10991_v25  ;;  %v2495_v5 = vld [vmem:[#allocation2 + $0x1f28] sm:$0xff]  ;;  %v10838_v25 = vcombine.low %v2363_v0, %v2367_v59 }
 0x558   :  { %v10967_v34 = vcombine.high %v2491_v3, %v2495_v5  ;;  %v2355_v14 = vld [vmem:[#allocation2 + $0x1ac8] sm:$0xff]  ;;  %v10966_v29 = vcombine.low %v2491_v3, %v2495_v5 }
 0x559   :  { %v2359_v52 = vld [vmem:[#allocation2 + $0x1ae8] sm:$0xff] }
 0x55a   :  { %8448 = vmatpush2.bf16.msra.mxu0 %v10862_v38  ;;  %8491 = vmatpush2.bf16.msra.mxu1 %v10990_v41  ;;  %v2483_v20 = vld [vmem:[#allocation2 + $0x1ec8] sm:$0xff]  ;;  %v10831_v30 = vcombine.high %v2355_v14, %v2359_v52 }
 0x55b   :  { %8449 = vmatprep.subr.bf16.mxu0 %v10855_v16  ;;  %8492 = vmatprep.subr.bf16.mxu1 %v10983_v42  ;;  %v2487_v23 = vld [vmem:[#allocation2 + $0x1ee8] sm:$0xff]  ;;  %v10830_v42 = vcombine.low %v2355_v14, %v2359_v52 }
 0x55c   :  { %v10959_v1 = vcombine.high %v2483_v20, %v2487_v23  ;;  %v2347_v37 = vld [vmem:[#allocation2 + $0x1a88] sm:$0xff]  ;;  %v10958_v43 = vcombine.low %v2483_v20, %v2487_v23  ;;  %v1556_v23 = vld [vmem:[#allocation2 + $0x1d0] sm:$0xff] }
 0x55d   :  { %v2351_v38 = vld [vmem:[#allocation2 + $0x1aa8] sm:$0xff] }
 0x55e   :  { %8450 = vmatpush2.bf16.msra.mxu0 %v10854_v53  ;;  %8493 = vmatpush2.bf16.msra.mxu1 %v10982_v54  ;;  %v2475_v41 = vld [vmem:[#allocation2 + $0x1e88] sm:$0xff]  ;;  %v10823_v45 = vcombine.high %v2347_v37, %v2351_v38 }
 0x55f   :  { %8451 = vmatprep.subr.bf16.mxu0 %v10847_v18  ;;  %8494 = vmatprep.subr.bf16.mxu1 %v10975_v56  ;;  %v2479_v16 = vld [vmem:[#allocation2 + $0x1ea8] sm:$0xff]  ;;  %v10822_v56 = vcombine.low %v2347_v37, %v2351_v38 }
 0x560   :  { %v10951_v44 = vcombine.high %v2475_v41, %v2479_v16  ;;  %v2339_v49 = vld [vmem:[#allocation2 + $0x1a48] sm:$0xff]  ;;  %v10950_v0 = vcombine.low %v2475_v41, %v2479_v16  ;;  %v1548_v16 = vld [vmem:[#allocation2 + $0x190] sm:$0xff] }
 0x561   :  { %v2343_v53 = vld [vmem:[#allocation2 + $0x1a68] sm:$0xff] }
 0x562   :  { %8452 = vmatpush2.bf16.msra.mxu0 %v10846_v11  ;;  %8495 = vmatpush2.bf16.msra.mxu1 %v10974_v19  ;;  %v2467_v54 = vld [vmem:[#allocation2 + $0x1e48] sm:$0xff]  ;;  %v10815_v59 = vcombine.high %v2339_v49, %v2343_v53 }
 0x563   :  { %8453 = vmatprep.subr.bf16.mxu0 %v10839_v26  ;;  %8496 = vmatprep.subr.bf16.mxu1 %v10967_v34  ;;  %v2471_v18 = vld [vmem:[#allocation2 + $0x1e68] sm:$0xff]  ;;  %v10814_v34 = vcombine.low %v2339_v49, %v2343_v53 }
 0x564   :  { %v10943_v3 = vcombine.high %v2467_v54, %v2471_v18  ;;  %v2331_v5 = vld [vmem:[#allocation2 + $0x1a08] sm:$0xff]  ;;  %v10942_v14 = vcombine.low %v2467_v54, %v2471_v18  ;;  %v1540_v18 = vld [vmem:[#allocation2 + $0x150] sm:$0xff] }
 0x565   :  { %v2335_v11 = vld [vmem:[#allocation2 + $0x1a28] sm:$0xff] }
 0x566   :  { %8454 = vmatpush2.bf16.msra.mxu0 %v10838_v25  ;;  %8497 = vmatpush2.bf16.msra.mxu1 %v10966_v29  ;;  %v2459_v19 = vld [vmem:[#allocation2 + $0x1e08] sm:$0xff]  ;;  %v10807_v52 = vcombine.high %v2331_v5, %v2335_v11  ;;  %v1560_v25 = vld [vmem:[#allocation2 + $0x1f0] sm:$0xff] }
 0x567   :  { %8455 = vmatprep.subr.bf16.mxu0 %v10831_v30  ;;  %8498 = vmatprep.subr.bf16.mxu1 %v10959_v1  ;;  %v2463_v26 = vld [vmem:[#allocation2 + $0x1e28] sm:$0xff]  ;;  %v1684_v29 = vld [vmem:[#allocation2 + $0x5d0] sm:$0xff]  ;;  %v10806_v1 = vcombine.low %v2331_v5, %v2335_v11  ;;  %v10033_v38 = vcombine.high %v1556_v23, %v1560_v25 }
 0x568   :  { %v10935_v20 = vcombine.high %v2459_v19, %v2463_v26  ;;  %v1688_v30 = vld [vmem:[#allocation2 + $0x5f0] sm:$0xff]  ;;  %v10934_v37 = vcombine.low %v2459_v19, %v2463_v26 }
 0x569   :  { %v10161_v41 = vcombine.high %v1684_v29, %v1688_v30  ;;  %v10160_v49 = vcombine.low %v1684_v29, %v1688_v30  ;;  %v1532_v26 = vld [vmem:[#allocation2 + $0x110] sm:$0xff] }
 0x56a   :  { %8456 = vmatpush2.bf16.msra.mxu0 %v10830_v42  ;;  %8499 = vmatpush2.bf16.msra.mxu1 %v10958_v43  ;;  %v1552_v42 = vld [vmem:[#allocation2 + $0x1b0] sm:$0xff] }
 0x56b   :  { %8457 = vmatprep.subr.bf16.mxu0 %v10823_v45  ;;  %8500 = vmatprep.subr.bf16.mxu1 %v10951_v44  ;;  %v1676_v43 = vld [vmem:[#allocation2 + $0x590] sm:$0xff]  ;;  %v10032_v44 = vcombine.low %v1556_v23, %v1560_v25  ;;  %v10025_v53 = vcombine.high %v1548_v16, %v1552_v42 }
 0x56c   :  { %v1680_v45 = vld [vmem:[#allocation2 + $0x5b0] sm:$0xff] }
 0x56d   :  { %v10153_v54 = vcombine.high %v1676_v43, %v1680_v45  ;;  %v10152_v5 = vcombine.low %v1676_v43, %v1680_v45  ;;  %v1524_v30 = vld [vmem:[#allocation2 + $0xd0] sm:$0xff] }
 0x56e   :  { %8458 = vmatpush2.bf16.msra.mxu0 %v10822_v56  ;;  %8501 = vmatpush2.bf16.msra.mxu1 %v10950_v0  ;;  %v1544_v56 = vld [vmem:[#allocation2 + $0x170] sm:$0xff] }
 0x56f   :  { %8459 = vmatprep.subr.bf16.mxu0 %v10815_v59  ;;  %8502 = vmatprep.subr.bf16.mxu1 %v10943_v3  ;;  %v1668_v0 = vld [vmem:[#allocation2 + $0x550] sm:$0xff]  ;;  %v10024_v3 = vcombine.low %v1548_v16, %v1552_v42  ;;  %v10017_v11 = vcombine.high %v1540_v18, %v1544_v56 }
 0x570   :  { %v1672_v59 = vld [vmem:[#allocation2 + $0x570] sm:$0xff] }
 0x571   :  { %v10145_v19 = vcombine.high %v1668_v0, %v1672_v59  ;;  %v10144_v23 = vcombine.low %v1668_v0, %v1672_v59  ;;  %v1516_v45 = vld [vmem:[#allocation2 + $0x90] sm:$0xff] }
 0x572   :  { %8460 = vmatpush2.bf16.msra.mxu0 %v10814_v34  ;;  %8503 = vmatpush2.bf16.msra.mxu1 %v10942_v14  ;;  %v1536_v34 = vld [vmem:[#allocation2 + $0x130] sm:$0xff] }
 0x573   :  { %8461 = vmatprep.subr.bf16.mxu0 %v10807_v52  ;;  %8504 = vmatprep.subr.bf16.mxu1 %v10935_v20  ;;  %v1660_v14 = vld [vmem:[#allocation2 + $0x510] sm:$0xff]  ;;  %v10016_v20 = vcombine.low %v1540_v18, %v1544_v56  ;;  %v10009_v25 = vcombine.high %v1532_v26, %v1536_v34 }
 0x574   :  { %v1664_v52 = vld [vmem:[#allocation2 + $0x530] sm:$0xff] }
 0x575   :  { %v10137_v29 = vcombine.high %v1660_v14, %v1664_v52  ;;  %v10136_v16 = vcombine.low %v1660_v14, %v1664_v52  ;;  %v1508_v59 = vld [vmem:[#allocation2 + $0x50] sm:$0xff] }
 0x576   :  { %8462 = vmatpush2.bf16.msra.mxu0 %v10806_v1  ;;  %8505 = vmatpush2.bf16.msra.mxu1 %v10934_v37  ;;  %v1528_v1 = vld [vmem:[#allocation2 + $0xf0] sm:$0xff] }
 0x577   :  { %8517 = vmatprep.subr.bf16.mxu0 %v10033_v38  ;;  %8560 = vmatprep.subr.bf16.mxu1 %v10161_v41  ;;  %v1652_v37 = vld [vmem:[#allocation2 + $0x4d0] sm:$0xff]  ;;  %v10008_v41 = vcombine.low %v1532_v26, %v1536_v34  ;;  %v10001_v42 = vcombine.high %v1524_v30, %v1528_v1 }
 0x578   :  { %v1656_v38 = vld [vmem:[#allocation2 + $0x4f0] sm:$0xff] }
 0x579   :  { %8464 = vmatmul.mubr.bf16.vlgmr.msra.gmra.mxu0 %v12124_v33  ;;  %8507 = vmatmul.mubr.bf16.vlgmr.msra.gmra.mxu1 %v12128_v39  ;;  %v10129_v43 = vcombine.high %v1652_v37, %v1656_v38  ;;  %v10128_v18 = vcombine.low %v1652_v37, %v1656_v38  ;;  %v1500_v52 = vld [vmem:[#allocation2 + $0x10] sm:$0xff] }
 0x57a   :  { %8518 = vmatpush1.bf16.msra.mxu0 %v10032_v44  ;;  %8561 = vmatpush1.bf16.msra.mxu1 %v10160_v49  ;;  %v1520_v44 = vld [vmem:[#allocation2 + $0xb0] sm:$0xff] }
 0x57b   :  { %8519 = vmatprep.subr.bf16.mxu0 %v10025_v53  ;;  %8562 = vmatprep.subr.bf16.mxu1 %v10153_v54  ;;  %v1644_v49 = vld [vmem:[#allocation2 + $0x490] sm:$0xff]  ;;  %v10000_v54 = vcombine.low %v1524_v30, %v1528_v1  ;;  %v9993_v56 = vcombine.high %v1516_v45, %v1520_v44 }
 0x57c   :  { %8549 = vmatprep.mubr.bf16.mxu0 %v12082_v35  ;;  %8592 = vmatprep.mubr.bf16.mxu1 %v12084_v40  ;;  %v1648_v53 = vld [vmem:[#allocation2 + $0x4b0] sm:$0xff] }
 0x57d   :  { %v10121_v0 = vcombine.high %v1644_v49, %v1648_v53  ;;  %v10120_v26 = vcombine.low %v1644_v49, %v1648_v53  ;;  %v1620_v38 = vld [vmem:[#allocation2 + $0x3d0] sm:$0xff] }
 0x57e   :  { %8520 = vmatpush1.bf16.msra.mxu0 %v10024_v3  ;;  %8563 = vmatpush1.bf16.msra.mxu1 %v10152_v5  ;;  %v1512_v3 = vld [vmem:[#allocation2 + $0x70] sm:$0xff] }
 0x57f   :  { %8521 = vmatprep.subr.bf16.mxu0 %v10017_v11  ;;  %8564 = vmatprep.subr.bf16.mxu1 %v10145_v19  ;;  %v1636_v5 = vld [vmem:[#allocation2 + $0x450] sm:$0xff]  ;;  %v9992_v19 = vcombine.low %v1516_v45, %v1520_v44  ;;  %v9985_v34 = vcombine.high %v1508_v59, %v1512_v3 }
 0x580   :  { %v1640_v11 = vld [vmem:[#allocation2 + $0x470] sm:$0xff] }
 0x581   :  { %v10113_v14 = vcombine.high %v1636_v5, %v1640_v11  ;;  %v10112_v30 = vcombine.low %v1636_v5, %v1640_v11  ;;  %v1612_v53 = vld [vmem:[#allocation2 + $0x390] sm:$0xff] }
 0x582   :  { %8522 = vmatpush1.bf16.msra.mxu0 %v10016_v20  ;;  %8565 = vmatpush1.bf16.msra.mxu1 %v10144_v23  ;;  %v1504_v20 = vld [vmem:[#allocation2 + $0x30] sm:$0xff] }
 0x583   :  { %8523 = vmatprep.subr.bf16.mxu0 %v10009_v25  ;;  %8566 = vmatprep.subr.bf16.mxu1 %v10137_v29  ;;  %v1628_v23 = vld [vmem:[#allocation2 + $0x410] sm:$0xff]  ;;  %v9984_v29 = vcombine.low %v1508_v59, %v1512_v3  ;;  %v9977_v1 = vcombine.high %v1500_v52, %v1504_v20 }
 0x584   :  { %v1632_v25 = vld [vmem:[#allocation2 + $0x430] sm:$0xff] }
 0x585   :  { %v10105_v37 = vcombine.high %v1628_v23, %v1632_v25  ;;  %v10104_v45 = vcombine.low %v1628_v23, %v1632_v25  ;;  %v1604_v11 = vld [vmem:[#allocation2 + $0x350] sm:$0xff] }
 0x586   :  { %8524 = vmatpush1.bf16.msra.mxu0 %v10008_v41  ;;  %8567 = vmatpush1.bf16.msra.mxu1 %v10136_v16  ;;  %v1624_v41 = vld [vmem:[#allocation2 + $0x3f0] sm:$0xff] }
 0x587   :  { %8525 = vmatprep.subr.bf16.mxu0 %v10001_v42  ;;  %8568 = vmatprep.subr.bf16.mxu1 %v10129_v43  ;;  %v1748_v16 = vld [vmem:[#allocation2 + $0x7d0] sm:$0xff]  ;;  %v9976_v43 = vcombine.low %v1500_v52, %v1504_v20  ;;  %v10097_v44 = vcombine.high %v1620_v38, %v1624_v41 }
 0x588   :  { %v1752_v42 = vld [vmem:[#allocation2 + $0x7f0] sm:$0xff] }
 0x589   :  { %v10225_v49 = vcombine.high %v1748_v16, %v1752_v42  ;;  %v10224_v59 = vcombine.low %v1748_v16, %v1752_v42  ;;  %v1596_v25 = vld [vmem:[#allocation2 + $0x310] sm:$0xff] }
 0x58a   :  { %8526 = vmatpush1.bf16.msra.mxu0 %v10000_v54  ;;  %8569 = vmatpush1.bf16.msra.mxu1 %v10128_v18  ;;  %v1616_v54 = vld [vmem:[#allocation2 + $0x3b0] sm:$0xff] }
 0x58b   :  { %8527 = vmatprep.subr.bf16.mxu0 %v9993_v56  ;;  %8570 = vmatprep.subr.bf16.mxu1 %v10121_v0  ;;  %v1740_v18 = vld [vmem:[#allocation2 + $0x790] sm:$0xff]  ;;  %v10096_v0 = vcombine.low %v1620_v38, %v1624_v41  ;;  %v10089_v3 = vcombine.high %v1612_v53, %v1616_v54 }
 0x58c   :  { %v1744_v56 = vld [vmem:[#allocation2 + $0x7b0] sm:$0xff] }
 0x58d   :  { %v10217_v5 = vcombine.high %v1740_v18, %v1744_v56  ;;  %v10216_v52 = vcombine.low %v1740_v18, %v1744_v56  ;;  %v1588_v42 = vld [vmem:[#allocation2 + $0x2d0] sm:$0xff] }
 0x58e   :  { %8528 = vmatpush1.bf16.msra.mxu0 %v9992_v19  ;;  %8571 = vmatpush1.bf16.msra.mxu1 %v10120_v26  ;;  %v1608_v19 = vld [vmem:[#allocation2 + $0x370] sm:$0xff] }
 0x58f   :  { %8529 = vmatprep.subr.bf16.mxu0 %v9985_v34  ;;  %8572 = vmatprep.subr.bf16.mxu1 %v10113_v14  ;;  %v1732_v26 = vld [vmem:[#allocation2 + $0x750] sm:$0xff]  ;;  %v10088_v14 = vcombine.low %v1612_v53, %v1616_v54  ;;  %v10081_v20 = vcombine.high %v1604_v11, %v1608_v19 }
 0x590   :  { %v1736_v34 = vld [vmem:[#allocation2 + $0x770] sm:$0xff] }
 0x591   :  { %v10209_v23 = vcombine.high %v1732_v26, %v1736_v34  ;;  %v10208_v38 = vcombine.low %v1732_v26, %v1736_v34  ;;  %v1580_v56 = vld [vmem:[#allocation2 + $0x290] sm:$0xff] }
 0x592   :  { %8530 = vmatpush1.bf16.msra.mxu0 %v9984_v29  ;;  %8573 = vmatpush1.bf16.msra.mxu1 %v10112_v30  ;;  %v1600_v29 = vld [vmem:[#allocation2 + $0x330] sm:$0xff] }
 0x593   :  { %8531 = vmatprep.subr.bf16.mxu0 %v9977_v1  ;;  %8574 = vmatprep.subr.bf16.mxu1 %v10105_v37  ;;  %v1724_v30 = vld [vmem:[#allocation2 + $0x710] sm:$0xff]  ;;  %v10080_v37 = vcombine.low %v1604_v11, %v1608_v19  ;;  %v10073_v41 = vcombine.high %v1596_v25, %v1600_v29 }
 0x594   :  { %v1728_v1 = vld [vmem:[#allocation2 + $0x730] sm:$0xff] }
 0x595   :  { %v10201_v16 = vcombine.high %v1724_v30, %v1728_v1  ;;  %v10200_v53 = vcombine.low %v1724_v30, %v1728_v1  ;;  %v1572_v34 = vld [vmem:[#allocation2 + $0x250] sm:$0xff] }
 0x596   :  { %8532 = vmatpush1.bf16.msra.mxu0 %v9976_v43  ;;  %8575 = vmatpush1.bf16.msra.mxu1 %v10104_v45  ;;  %v1592_v43 = vld [vmem:[#allocation2 + $0x2f0] sm:$0xff] }
 0x597   :  { %8533 = vmatprep.subr.bf16.mxu0 %v10097_v44  ;;  %8576 = vmatprep.subr.bf16.mxu1 %v10225_v49  ;;  %v1716_v45 = vld [vmem:[#allocation2 + $0x6d0] sm:$0xff]  ;;  %v10072_v49 = vcombine.low %v1596_v25, %v1600_v29  ;;  %v10065_v54 = vcombine.high %v1588_v42, %v1592_v43 }
 0x598   :  { %v1720_v44 = vld [vmem:[#allocation2 + $0x6f0] sm:$0xff] }
 0x599   :  { %v10193_v18 = vcombine.high %v1716_v45, %v1720_v44  ;;  %v10192_v11 = vcombine.low %v1716_v45, %v1720_v44  ;;  %v1564_v1 = vld [vmem:[#allocation2 + $0x210] sm:$0xff] }
 0x59a   :  { %8534 = vmatpush2.bf16.msra.mxu0 %v10096_v0  ;;  %8577 = vmatpush2.bf16.msra.mxu1 %v10224_v59  ;;  %v1584_v0 = vld [vmem:[#allocation2 + $0x2b0] sm:$0xff] }
 0x59b   :  { %8535 = vmatprep.subr.bf16.mxu0 %v10089_v3  ;;  %8578 = vmatprep.subr.bf16.mxu1 %v10217_v5  ;;  %v1708_v59 = vld [vmem:[#allocation2 + $0x690] sm:$0xff]  ;;  %v10064_v5 = vcombine.low %v1588_v42, %v1592_v43  ;;  %v10057_v19 = vcombine.high %v1580_v56, %v1584_v0 }
 0x59c   :  { %v1712_v3 = vld [vmem:[#allocation2 + $0x6b0] sm:$0xff] }
 0x59d   :  { %v10185_v26 = vcombine.high %v1708_v59, %v1712_v3  ;;  %v10184_v25 = vcombine.low %v1708_v59, %v1712_v3  ;;  %v1812_v44 = vld [vmem:[#allocation2 + $0x9d0] sm:$0xff] }
 0x59e   :  { %8536 = vmatpush2.bf16.msra.mxu0 %v10088_v14  ;;  %8579 = vmatpush2.bf16.msra.mxu1 %v10216_v52  ;;  %v1576_v14 = vld [vmem:[#allocation2 + $0x270] sm:$0xff] }
 0x59f   :  { %8537 = vmatprep.subr.bf16.mxu0 %v10081_v20  ;;  %8580 = vmatprep.subr.bf16.mxu1 %v10209_v23  ;;  %v1700_v52 = vld [vmem:[#allocation2 + $0x650] sm:$0xff]  ;;  %v10056_v23 = vcombine.low %v1580_v56, %v1584_v0  ;;  %v10049_v29 = vcombine.high %v1572_v34, %v1576_v14 }
 0x5a0   :  { %v1704_v20 = vld [vmem:[#allocation2 + $0x670] sm:$0xff] }
 0x5a1   :  { %v10177_v30 = vcombine.high %v1700_v52, %v1704_v20  ;;  %v10176_v42 = vcombine.low %v1700_v52, %v1704_v20  ;;  %v1804_v3 = vld [vmem:[#allocation2 + $0x990] sm:$0xff] }
 0x5a2   :  { %8538 = vmatpush2.bf16.msra.mxu0 %v10080_v37  ;;  %8581 = vmatpush2.bf16.msra.mxu1 %v10208_v38  ;;  %v1568_v37 = vld [vmem:[#allocation2 + $0x230] sm:$0xff] }
 0x5a3   :  { %8539 = vmatprep.subr.bf16.mxu0 %v10073_v41  ;;  %8582 = vmatprep.subr.bf16.mxu1 %v10201_v16  ;;  %v1692_v38 = vld [vmem:[#allocation2 + $0x610] sm:$0xff]  ;;  %v10048_v16 = vcombine.low %v1572_v34, %v1576_v14  ;;  %v10041_v43 = vcombine.high %v1564_v1, %v1568_v37 }
 0x5a4   :  { %v1696_v41 = vld [vmem:[#allocation2 + $0x630] sm:$0xff] }
 0x5a5   :  { %v10169_v45 = vcombine.high %v1692_v38, %v1696_v41  ;;  %v10168_v56 = vcombine.low %v1692_v38, %v1696_v41  ;;  %v1796_v20 = vld [vmem:[#allocation2 + $0x950] sm:$0xff] }
 0x5a6   :  { %8540 = vmatpush2.bf16.msra.mxu0 %v10072_v49  ;;  %8583 = vmatpush2.bf16.msra.mxu1 %v10200_v53  ;;  %v1816_v49 = vld [vmem:[#allocation2 + $0x9f0] sm:$0xff] }
 0x5a7   :  { %8541 = vmatprep.subr.bf16.mxu0 %v10065_v54  ;;  %8584 = vmatprep.subr.bf16.mxu1 %v10193_v18  ;;  %v1940_v53 = vld [vmem:[#allocation2 + $0xdd0] sm:$0xff]  ;;  %v10040_v18 = vcombine.low %v1564_v1, %v1568_v37  ;;  %v10289_v0 = vcombine.high %v1812_v44, %v1816_v49 }
 0x5a8   :  { %v1944_v54 = vld [vmem:[#allocation2 + $0xdf0] sm:$0xff] }
 0x5a9   :  { %v10417_v59 = vcombine.high %v1940_v53, %v1944_v54  ;;  %v10416_v34 = vcombine.low %v1940_v53, %v1944_v54  ;;  %v1788_v41 = vld [vmem:[#allocation2 + $0x910] sm:$0xff] }
 0x5aa   :  { %8542 = vmatpush2.bf16.msra.mxu0 %v10064_v5  ;;  %8585 = vmatpush2.bf16.msra.mxu1 %v10192_v11  ;;  %v1808_v5 = vld [vmem:[#allocation2 + $0x9b0] sm:$0xff] }
 0x5ab   :  { %8543 = vmatprep.subr.bf16.mxu0 %v10057_v19  ;;  %8586 = vmatprep.subr.bf16.mxu1 %v10185_v26  ;;  %v1932_v11 = vld [vmem:[#allocation2 + $0xd90] sm:$0xff]  ;;  %v10288_v26 = vcombine.low %v1812_v44, %v1816_v49  ;;  %v10281_v14 = vcombine.high %v1804_v3, %v1808_v5 }
 0x5ac   :  { %v1936_v19 = vld [vmem:[#allocation2 + $0xdb0] sm:$0xff] }
 0x5ad   :  { %v10409_v52 = vcombine.high %v1932_v11, %v1936_v19  ;;  %v10408_v1 = vcombine.low %v1932_v11, %v1936_v19  ;;  %v1780_v54 = vld [vmem:[#allocation2 + $0x8d0] sm:$0xff] }
 0x5ae   :  { %8544 = vmatpush2.bf16.msra.mxu0 %v10056_v23  ;;  %8587 = vmatpush2.bf16.msra.mxu1 %v10184_v25  ;;  %v1800_v23 = vld [vmem:[#allocation2 + $0x970] sm:$0xff] }
 0x5af   :  { %8545 = vmatprep.subr.bf16.mxu0 %v10049_v29  ;;  %8588 = vmatprep.subr.bf16.mxu1 %v10177_v30  ;;  %v1924_v25 = vld [vmem:[#allocation2 + $0xd50] sm:$0xff]  ;;  %v10280_v30 = vcombine.low %v1804_v3, %v1808_v5  ;;  %v10273_v37 = vcombine.high %v1796_v20, %v1800_v23 }
 0x5b0   :  { %v1928_v29 = vld [vmem:[#allocation2 + $0xd70] sm:$0xff] }
 0x5b1   :  { %v10401_v38 = vcombine.high %v1924_v25, %v1928_v29  ;;  %v10400_v44 = vcombine.low %v1924_v25, %v1928_v29  ;;  %v1772_v19 = vld [vmem:[#allocation2 + $0x890] sm:$0xff] }
 0x5b2   :  { %8546 = vmatpush2.bf16.msra.mxu0 %v10048_v16  ;;  %8589 = vmatpush2.bf16.msra.mxu1 %v10176_v42  ;;  %v1792_v16 = vld [vmem:[#allocation2 + $0x930] sm:$0xff] }
 0x5b3   :  { %8547 = vmatprep.subr.bf16.mxu0 %v10041_v43  ;;  %8590 = vmatprep.subr.bf16.mxu1 %v10169_v45  ;;  %v1916_v42 = vld [vmem:[#allocation2 + $0xd10] sm:$0xff]  ;;  %v10272_v45 = vcombine.low %v1796_v20, %v1800_v23  ;;  %v10265_v49 = vcombine.high %v1788_v41, %v1792_v16 }
 0x5b4   :  { %v1920_v43 = vld [vmem:[#allocation2 + $0xd30] sm:$0xff] }
 0x5b5   :  { %v10393_v53 = vcombine.high %v1916_v42, %v1920_v43  ;;  %v10392_v3 = vcombine.low %v1916_v42, %v1920_v43  ;;  %v1764_v29 = vld [vmem:[#allocation2 + $0x850] sm:$0xff] }
 0x5b6   :  { %8548 = vmatpush2.bf16.msra.mxu0 %v10040_v18  ;;  %8591 = vmatpush2.bf16.msra.mxu1 %v10168_v56  ;;  %v1784_v18 = vld [vmem:[#allocation2 + $0x8f0] sm:$0xff] }
 0x5b7   :  { %8603 = vmatprep.subr.bf16.mxu0 %v10289_v0  ;;  %8646 = vmatprep.subr.bf16.mxu1 %v10417_v59  ;;  %v1908_v56 = vld [vmem:[#allocation2 + $0xcd0] sm:$0xff]  ;;  %v10264_v59 = vcombine.low %v1788_v41, %v1792_v16  ;;  %v10257_v5 = vcombine.high %v1780_v54, %v1784_v18 }
 0x5b8   :  { %v1912_v0 = vld [vmem:[#allocation2 + $0xcf0] sm:$0xff] }
 0x5b9   :  { %8550 = vmatmul.mubr.bf16.vlgmr.msra.gmra.mxu0 %v12088_v8  ;;  %8593 = vmatmul.mubr.bf16.vlgmr.msra.gmra.mxu1 %v12090_v13  ;;  %v10385_v11 = vcombine.high %v1908_v56, %v1912_v0  ;;  %v10384_v20 = vcombine.low %v1908_v56, %v1912_v0  ;;  %v1756_v43 = vld [vmem:[#allocation2 + $0x810] sm:$0xff] }
 0x5ba   :  { %8604 = vmatpush1.bf16.msra.mxu0 %v10288_v26  ;;  %8647 = vmatpush1.bf16.msra.mxu1 %v10416_v34  ;;  %v1776_v26 = vld [vmem:[#allocation2 + $0x8b0] sm:$0xff] }
 0x5bb   :  { %8605 = vmatprep.subr.bf16.mxu0 %v10281_v14  ;;  %8648 = vmatprep.subr.bf16.mxu1 %v10409_v52  ;;  %v1900_v34 = vld [vmem:[#allocation2 + $0xc90] sm:$0xff]  ;;  %v10256_v52 = vcombine.low %v1780_v54, %v1784_v18  ;;  %v10249_v23 = vcombine.high %v1772_v19, %v1776_v26 }
 0x5bc   :  { %8635 = vmatprep.mubr.bf16.mxu0 %v12092_v21  ;;  %8678 = vmatprep.mubr.bf16.mxu1 %v12095_v24  ;;  %v1904_v14 = vld [vmem:[#allocation2 + $0xcb0] sm:$0xff] }
 0x5bd   :  { %v10377_v25 = vcombine.high %v1900_v34, %v1904_v14  ;;  %v10376_v41 = vcombine.low %v1900_v34, %v1904_v14  ;;  %v1876_v0 = vld [vmem:[#allocation2 + $0xbd0] sm:$0xff] }
 0x5be   :  { %8606 = vmatpush1.bf16.msra.mxu0 %v10280_v30  ;;  %8649 = vmatpush1.bf16.msra.mxu1 %v10408_v1  ;;  %v1768_v30 = vld [vmem:[#allocation2 + $0x870] sm:$0xff] }
 0x5bf   :  { %8607 = vmatprep.subr.bf16.mxu0 %v10273_v37  ;;  %8650 = vmatprep.subr.bf16.mxu1 %v10401_v38  ;;  %v1892_v1 = vld [vmem:[#allocation2 + $0xc50] sm:$0xff]  ;;  %v10248_v38 = vcombine.low %v1772_v19, %v1776_v26  ;;  %v10241_v16 = vcombine.high %v1764_v29, %v1768_v30 }
 0x5c0   :  { %v1896_v37 = vld [vmem:[#allocation2 + $0xc70] sm:$0xff] }
 0x5c1   :  { %v10369_v42 = vcombine.high %v1892_v1, %v1896_v37  ;;  %v10368_v54 = vcombine.low %v1892_v1, %v1896_v37  ;;  %v1868_v14 = vld [vmem:[#allocation2 + $0xb90] sm:$0xff] }
 0x5c2   :  { %8608 = vmatpush1.bf16.msra.mxu0 %v10272_v45  ;;  %8651 = vmatpush1.bf16.msra.mxu1 %v10400_v44  ;;  %v1760_v45 = vld [vmem:[#allocation2 + $0x830] sm:$0xff] }
 0x5c3   :  { %8609 = vmatprep.subr.bf16.mxu0 %v10265_v49  ;;  %8652 = vmatprep.subr.bf16.mxu1 %v10393_v53  ;;  %v1884_v44 = vld [vmem:[#allocation2 + $0xc10] sm:$0xff]  ;;  %v10240_v53 = vcombine.low %v1764_v29, %v1768_v30  ;;  %v10233_v18 = vcombine.high %v1756_v43, %v1760_v45 }
 0x5c4   :  { %v1888_v49 = vld [vmem:[#allocation2 + $0xc30] sm:$0xff] }
 0x5c5   :  { %v10361_v56 = vcombine.high %v1884_v44, %v1888_v49  ;;  %v10360_v19 = vcombine.low %v1884_v44, %v1888_v49  ;;  %v1860_v37 = vld [vmem:[#allocation2 + $0xb50] sm:$0xff] }
 0x5c6   :  { %8610 = vmatpush1.bf16.msra.mxu0 %v10264_v59  ;;  %8653 = vmatpush1.bf16.msra.mxu1 %v10392_v3  ;;  %v1880_v59 = vld [vmem:[#allocation2 + $0xbf0] sm:$0xff] }
 0x5c7   :  { %8611 = vmatprep.subr.bf16.mxu0 %v10257_v5  ;;  %8654 = vmatprep.subr.bf16.mxu1 %v10385_v11  ;;  %v2004_v3 = vld [vmem:[#allocation2 + $0xfd0] sm:$0xff]  ;;  %v10232_v11 = vcombine.low %v1756_v43, %v1760_v45  ;;  %v10353_v26 = vcombine.high %v1876_v0, %v1880_v59 }
 0x5c8   :  { %v2008_v5 = vld [vmem:[#allocation2 + $0xff0] sm:$0xff] }
 0x5c9   :  { %v10481_v34 = vcombine.high %v2004_v3, %v2008_v5  ;;  %v10480_v29 = vcombine.low %v2004_v3, %v2008_v5  ;;  %v1852_v49 = vld [vmem:[#allocation2 + $0xb10] sm:$0xff] }
 0x5ca   :  { %8612 = vmatpush1.bf16.msra.mxu0 %v10256_v52  ;;  %8655 = vmatpush1.bf16.msra.mxu1 %v10384_v20  ;;  %v1872_v52 = vld [vmem:[#allocation2 + $0xbb0] sm:$0xff] }
 0x5cb   :  { %8613 = vmatprep.subr.bf16.mxu0 %v10249_v23  ;;  %8656 = vmatprep.subr.bf16.mxu1 %v10377_v25  ;;  %v1996_v20 = vld [vmem:[#allocation2 + $0xf90] sm:$0xff]  ;;  %v10352_v25 = vcombine.low %v1876_v0, %v1880_v59  ;;  %v10345_v30 = vcombine.high %v1868_v14, %v1872_v52 }
 0x5cc   :  { %v2000_v23 = vld [vmem:[#allocation2 + $0xfb0] sm:$0xff] }
 0x5cd   :  { %v10473_v1 = vcombine.high %v1996_v20, %v2000_v23  ;;  %v10472_v43 = vcombine.low %v1996_v20, %v2000_v23  ;;  %v1844_v5 = vld [vmem:[#allocation2 + $0xad0] sm:$0xff] }
 0x5ce   :  { %8614 = vmatpush1.bf16.msra.mxu0 %v10248_v38  ;;  %8657 = vmatpush1.bf16.msra.mxu1 %v10376_v41  ;;  %v1864_v38 = vld [vmem:[#allocation2 + $0xb70] sm:$0xff] }
 0x5cf   :  { %8615 = vmatprep.subr.bf16.mxu0 %v10241_v16  ;;  %8658 = vmatprep.subr.bf16.mxu1 %v10369_v42  ;;  %v1988_v41 = vld [vmem:[#allocation2 + $0xf50] sm:$0xff]  ;;  %v10344_v42 = vcombine.low %v1868_v14, %v1872_v52  ;;  %v10337_v45 = vcombine.high %v1860_v37, %v1864_v38 }
 0x5d0   :  { %v1992_v16 = vld [vmem:[#allocation2 + $0xf70] sm:$0xff] }
 0x5d1   :  { %v10465_v44 = vcombine.high %v1988_v41, %v1992_v16  ;;  %v10464_v0 = vcombine.low %v1988_v41, %v1992_v16  ;;  %v1836_v23 = vld [vmem:[#allocation2 + $0xa90] sm:$0xff] }
 0x5d2   :  { %8616 = vmatpush1.bf16.msra.mxu0 %v10240_v53  ;;  %8659 = vmatpush1.bf16.msra.mxu1 %v10368_v54  ;;  %v1856_v53 = vld [vmem:[#allocation2 + $0xb30] sm:$0xff] }
 0x5d3   :  { %8617 = vmatprep.subr.bf16.mxu0 %v10233_v18  ;;  %8660 = vmatprep.subr.bf16.mxu1 %v10361_v56  ;;  %v1980_v54 = vld [vmem:[#allocation2 + $0xf10] sm:$0xff]  ;;  %v10336_v56 = vcombine.low %v1860_v37, %v1864_v38  ;;  %v10329_v59 = vcombine.high %v1852_v49, %v1856_v53 }
 0x5d4   :  { %v1984_v18 = vld [vmem:[#allocation2 + $0xf30] sm:$0xff] }
 0x5d5   :  { %v10457_v3 = vcombine.high %v1980_v54, %v1984_v18  ;;  %v10456_v14 = vcombine.low %v1980_v54, %v1984_v18  ;;  %v1828_v16 = vld [vmem:[#allocation2 + $0xa50] sm:$0xff] }
 0x5d6   :  { %8618 = vmatpush1.bf16.msra.mxu0 %v10232_v11  ;;  %8661 = vmatpush1.bf16.msra.mxu1 %v10360_v19  ;;  %v1848_v11 = vld [vmem:[#allocation2 + $0xaf0] sm:$0xff] }
 0x5d7   :  { %8619 = vmatprep.subr.bf16.mxu0 %v10353_v26  ;;  %8662 = vmatprep.subr.bf16.mxu1 %v10481_v34  ;;  %v1972_v19 = vld [vmem:[#allocation2 + $0xed0] sm:$0xff]  ;;  %v10328_v34 = vcombine.low %v1852_v49, %v1856_v53  ;;  %v10321_v52 = vcombine.high %v1844_v5, %v1848_v11 }
 0x5d8   :  { %v1976_v26 = vld [vmem:[#allocation2 + $0xef0] sm:$0xff] }
 0x5d9   :  { %v10449_v20 = vcombine.high %v1972_v19, %v1976_v26  ;;  %v10448_v37 = vcombine.low %v1972_v19, %v1976_v26  ;;  %v1820_v18 = vld [vmem:[#allocation2 + $0xa10] sm:$0xff] }
 0x5da   :  { %8620 = vmatpush2.bf16.msra.mxu0 %v10352_v25  ;;  %8663 = vmatpush2.bf16.msra.mxu1 %v10480_v29  ;;  %v1840_v25 = vld [vmem:[#allocation2 + $0xab0] sm:$0xff] }
 0x5db   :  { %8621 = vmatprep.subr.bf16.mxu0 %v10345_v30  ;;  %8664 = vmatprep.subr.bf16.mxu1 %v10473_v1  ;;  %v1964_v29 = vld [vmem:[#allocation2 + $0xe90] sm:$0xff]  ;;  %v10320_v1 = vcombine.low %v1844_v5, %v1848_v11  ;;  %v10313_v38 = vcombine.high %v1836_v23, %v1840_v25 }
 0x5dc   :  { %v1968_v30 = vld [vmem:[#allocation2 + $0xeb0] sm:$0xff] }
 0x5dd   :  { %v10441_v41 = vcombine.high %v1964_v29, %v1968_v30  ;;  %v10440_v49 = vcombine.low %v1964_v29, %v1968_v30  ;;  %v2068_v26 = vld [vmem:[#allocation2 + $0x11d0] sm:$0xff] }
 0x5de   :  { %8622 = vmatpush2.bf16.msra.mxu0 %v10344_v42  ;;  %8665 = vmatpush2.bf16.msra.mxu1 %v10472_v43  ;;  %v1832_v42 = vld [vmem:[#allocation2 + $0xa70] sm:$0xff] }
 0x5df   :  { %8623 = vmatprep.subr.bf16.mxu0 %v10337_v45  ;;  %8666 = vmatprep.subr.bf16.mxu1 %v10465_v44  ;;  %v1956_v43 = vld [vmem:[#allocation2 + $0xe50] sm:$0xff]  ;;  %v10312_v44 = vcombine.low %v1836_v23, %v1840_v25  ;;  %v10305_v53 = vcombine.high %v1828_v16, %v1832_v42 }
 0x5e0   :  { %v1960_v45 = vld [vmem:[#allocation2 + $0xe70] sm:$0xff] }
 0x5e1   :  { %v10433_v54 = vcombine.high %v1956_v43, %v1960_v45  ;;  %v10432_v5 = vcombine.low %v1956_v43, %v1960_v45  ;;  %v2060_v30 = vld [vmem:[#allocation2 + $0x1190] sm:$0xff] }
 0x5e2   :  { %8624 = vmatpush2.bf16.msra.mxu0 %v10336_v56  ;;  %8667 = vmatpush2.bf16.msra.mxu1 %v10464_v0  ;;  %v1824_v56 = vld [vmem:[#allocation2 + $0xa30] sm:$0xff] }
 0x5e3   :  { %8625 = vmatprep.subr.bf16.mxu0 %v10329_v59  ;;  %8668 = vmatprep.subr.bf16.mxu1 %v10457_v3  ;;  %v1948_v0 = vld [vmem:[#allocation2 + $0xe10] sm:$0xff]  ;;  %v10304_v3 = vcombine.low %v1828_v16, %v1832_v42  ;;  %v10297_v11 = vcombine.high %v1820_v18, %v1824_v56 }
 0x5e4   :  { %v1952_v59 = vld [vmem:[#allocation2 + $0xe30] sm:$0xff] }
 0x5e5   :  { %v10425_v19 = vcombine.high %v1948_v0, %v1952_v59  ;;  %v10424_v23 = vcombine.low %v1948_v0, %v1952_v59  ;;  %v2052_v45 = vld [vmem:[#allocation2 + $0x1150] sm:$0xff] }
 0x5e6   :  { %8626 = vmatpush2.bf16.msra.mxu0 %v10328_v34  ;;  %8669 = vmatpush2.bf16.msra.mxu1 %v10456_v14  ;;  %v2072_v34 = vld [vmem:[#allocation2 + $0x11f0] sm:$0xff] }
 0x5e7   :  { %8627 = vmatprep.subr.bf16.mxu0 %v10321_v52  ;;  %8670 = vmatprep.subr.bf16.mxu1 %v10449_v20  ;;  %v2196_v14 = vld [vmem:[#allocation2 + $0x15d0] sm:$0xff]  ;;  %v10296_v20 = vcombine.low %v1820_v18, %v1824_v56  ;;  %v10545_v25 = vcombine.high %v2068_v26, %v2072_v34 }
 0x5e8   :  { %v2200_v52 = vld [vmem:[#allocation2 + $0x15f0] sm:$0xff] }
 0x5e9   :  { %v10673_v29 = vcombine.high %v2196_v14, %v2200_v52  ;;  %v10672_v16 = vcombine.low %v2196_v14, %v2200_v52  ;;  %v2044_v59 = vld [vmem:[#allocation2 + $0x1110] sm:$0xff] }
 0x5ea   :  { %8628 = vmatpush2.bf16.msra.mxu0 %v10320_v1  ;;  %8671 = vmatpush2.bf16.msra.mxu1 %v10448_v37  ;;  %v2064_v1 = vld [vmem:[#allocation2 + $0x11b0] sm:$0xff] }
 0x5eb   :  { %8629 = vmatprep.subr.bf16.mxu0 %v10313_v38  ;;  %8672 = vmatprep.subr.bf16.mxu1 %v10441_v41  ;;  %v2188_v37 = vld [vmem:[#allocation2 + $0x1590] sm:$0xff]  ;;  %v10544_v41 = vcombine.low %v2068_v26, %v2072_v34  ;;  %v10537_v42 = vcombine.high %v2060_v30, %v2064_v1 }
 0x5ec   :  { %v2192_v38 = vld [vmem:[#allocation2 + $0x15b0] sm:$0xff] }
 0x5ed   :  { %v10665_v43 = vcombine.high %v2188_v37, %v2192_v38  ;;  %v10664_v18 = vcombine.low %v2188_v37, %v2192_v38  ;;  %v2036_v52 = vld [vmem:[#allocation2 + $0x10d0] sm:$0xff] }
 0x5ee   :  { %8630 = vmatpush2.bf16.msra.mxu0 %v10312_v44  ;;  %8673 = vmatpush2.bf16.msra.mxu1 %v10440_v49  ;;  %v2056_v44 = vld [vmem:[#allocation2 + $0x1170] sm:$0xff] }
 0x5ef   :  { %8631 = vmatprep.subr.bf16.mxu0 %v10305_v53  ;;  %8674 = vmatprep.subr.bf16.mxu1 %v10433_v54  ;;  %v2180_v49 = vld [vmem:[#allocation2 + $0x1550] sm:$0xff]  ;;  %v10536_v54 = vcombine.low %v2060_v30, %v2064_v1  ;;  %v10529_v56 = vcombine.high %v2052_v45, %v2056_v44 }
 0x5f0   :  { %v2184_v53 = vld [vmem:[#allocation2 + $0x1570] sm:$0xff] }
 0x5f1   :  { %v10657_v0 = vcombine.high %v2180_v49, %v2184_v53  ;;  %v10656_v26 = vcombine.low %v2180_v49, %v2184_v53  ;;  %v2028_v38 = vld [vmem:[#allocation2 + $0x1090] sm:$0xff] }
 0x5f2   :  { %8632 = vmatpush2.bf16.msra.mxu0 %v10304_v3  ;;  %8675 = vmatpush2.bf16.msra.mxu1 %v10432_v5  ;;  %v2048_v3 = vld [vmem:[#allocation2 + $0x1130] sm:$0xff] }
 0x5f3   :  { %8633 = vmatprep.subr.bf16.mxu0 %v10297_v11  ;;  %8676 = vmatprep.subr.bf16.mxu1 %v10425_v19  ;;  %v2172_v5 = vld [vmem:[#allocation2 + $0x1510] sm:$0xff]  ;;  %v10528_v19 = vcombine.low %v2052_v45, %v2056_v44  ;;  %v10521_v34 = vcombine.high %v2044_v59, %v2048_v3 }
 0x5f4   :  { %v2176_v11 = vld [vmem:[#allocation2 + $0x1530] sm:$0xff] }
 0x5f5   :  { %v10649_v14 = vcombine.high %v2172_v5, %v2176_v11  ;;  %v10648_v30 = vcombine.low %v2172_v5, %v2176_v11  ;;  %v2020_v53 = vld [vmem:[#allocation2 + $0x1050] sm:$0xff] }
 0x5f6   :  { %8634 = vmatpush2.bf16.msra.mxu0 %v10296_v20  ;;  %8677 = vmatpush2.bf16.msra.mxu1 %v10424_v23  ;;  %v2040_v20 = vld [vmem:[#allocation2 + $0x10f0] sm:$0xff] }
 0x5f7   :  { %8689 = vmatprep.subr.bf16.mxu0 %v10545_v25  ;;  %8732 = vmatprep.subr.bf16.mxu1 %v10673_v29  ;;  %v2164_v23 = vld [vmem:[#allocation2 + $0x14d0] sm:$0xff]  ;;  %v10520_v29 = vcombine.low %v2044_v59, %v2048_v3  ;;  %v10513_v1 = vcombine.high %v2036_v52, %v2040_v20 }
 0x5f8   :  { %v2168_v25 = vld [vmem:[#allocation2 + $0x14f0] sm:$0xff] }
 0x5f9   :  { %8636 = vmatmul.mubr.bf16.vlgmr.msra.gmra.mxu0 %v12100_v47  ;;  %8679 = vmatmul.mubr.bf16.vlgmr.msra.gmra.mxu1 %v12102_v48  ;;  %v10641_v37 = vcombine.high %v2164_v23, %v2168_v25  ;;  %v10640_v45 = vcombine.low %v2164_v23, %v2168_v25  ;;  %v2012_v11 = vld [vmem:[#allocation2 + $0x1010] sm:$0xff] }
 0x5fa   :  { %8690 = vmatpush1.bf16.msra.mxu0 %v10544_v41  ;;  %8733 = vmatpush1.bf16.msra.mxu1 %v10672_v16  ;;  %v2032_v41 = vld [vmem:[#allocation2 + $0x10b0] sm:$0xff] }
 0x5fb   :  { %8691 = vmatprep.subr.bf16.mxu0 %v10537_v42  ;;  %8734 = vmatprep.subr.bf16.mxu1 %v10665_v43  ;;  %v2156_v16 = vld [vmem:[#allocation2 + $0x1490] sm:$0xff]  ;;  %v10512_v43 = vcombine.low %v2036_v52, %v2040_v20  ;;  %v10505_v44 = vcombine.high %v2028_v38, %v2032_v41 }
 0x5fc   :  { %8721 = vmatprep.mubr.bf16.mxu0 %v12104_v58  ;;  %8764 = vmatprep.mubr.bf16.mxu1 %v12107_v63  ;;  %v2160_v42 = vld [vmem:[#allocation2 + $0x14b0] sm:$0xff] }
 0x5fd   :  { %v10633_v49 = vcombine.high %v2156_v16, %v2160_v42  ;;  %v10632_v59 = vcombine.low %v2156_v16, %v2160_v42  ;;  %v2132_v25 = vld [vmem:[#allocation2 + $0x13d0] sm:$0xff] }
 0x5fe   :  { %8692 = vmatpush1.bf16.msra.mxu0 %v10536_v54  ;;  %8735 = vmatpush1.bf16.msra.mxu1 %v10664_v18  ;;  %v2024_v54 = vld [vmem:[#allocation2 + $0x1070] sm:$0xff] }
 0x5ff   :  { %8693 = vmatprep.subr.bf16.mxu0 %v10529_v56  ;;  %8736 = vmatprep.subr.bf16.mxu1 %v10657_v0  ;;  %v2148_v18 = vld [vmem:[#allocation2 + $0x1450] sm:$0xff]  ;;  %v10504_v0 = vcombine.low %v2028_v38, %v2032_v41  ;;  %v10497_v3 = vcombine.high %v2020_v53, %v2024_v54 }
 0x600   :  { %v2152_v56 = vld [vmem:[#allocation2 + $0x1470] sm:$0xff] }
 0x601   :  { %v10625_v5 = vcombine.high %v2148_v18, %v2152_v56  ;;  %v10624_v52 = vcombine.low %v2148_v18, %v2152_v56  ;;  %v2124_v42 = vld [vmem:[#allocation2 + $0x1390] sm:$0xff] }
 0x602   :  { %8694 = vmatpush1.bf16.msra.mxu0 %v10528_v19  ;;  %8737 = vmatpush1.bf16.msra.mxu1 %v10656_v26  ;;  %v2016_v19 = vld [vmem:[#allocation2 + $0x1030] sm:$0xff] }
 0x603   :  { %8695 = vmatprep.subr.bf16.mxu0 %v10521_v34  ;;  %8738 = vmatprep.subr.bf16.mxu1 %v10649_v14  ;;  %v2140_v26 = vld [vmem:[#allocation2 + $0x1410] sm:$0xff]  ;;  %v10496_v14 = vcombine.low %v2020_v53, %v2024_v54  ;;  %v10489_v20 = vcombine.high %v2012_v11, %v2016_v19 }
 0x604   :  { %v2144_v34 = vld [vmem:[#allocation2 + $0x1430] sm:$0xff] }
 0x605   :  { %v10617_v23 = vcombine.high %v2140_v26, %v2144_v34  ;;  %v10616_v38 = vcombine.low %v2140_v26, %v2144_v34  ;;  %v2116_v56 = vld [vmem:[#allocation2 + $0x1350] sm:$0xff] }
 0x606   :  { %8696 = vmatpush1.bf16.msra.mxu0 %v10520_v29  ;;  %8739 = vmatpush1.bf16.msra.mxu1 %v10648_v30  ;;  %v2136_v29 = vld [vmem:[#allocation2 + $0x13f0] sm:$0xff] }
 0x607   :  { %8697 = vmatprep.subr.bf16.mxu0 %v10513_v1  ;;  %8740 = vmatprep.subr.bf16.mxu1 %v10641_v37  ;;  %v2260_v30 = vld [vmem:[#allocation2 + $0x17d0] sm:$0xff]  ;;  %v10488_v37 = vcombine.low %v2012_v11, %v2016_v19  ;;  %v10609_v41 = vcombine.high %v2132_v25, %v2136_v29 }
 0x608   :  { %v2264_v1 = vld [vmem:[#allocation2 + $0x17f0] sm:$0xff] }
 0x609   :  { %v10737_v16 = vcombine.high %v2260_v30, %v2264_v1  ;;  %v10736_v53 = vcombine.low %v2260_v30, %v2264_v1  ;;  %v2108_v34 = vld [vmem:[#allocation2 + $0x1310] sm:$0xff] }
 0x60a   :  { %8698 = vmatpush1.bf16.msra.mxu0 %v10512_v43  ;;  %8741 = vmatpush1.bf16.msra.mxu1 %v10640_v45  ;;  %v2128_v43 = vld [vmem:[#allocation2 + $0x13b0] sm:$0xff] }
 0x60b   :  { %8699 = vmatprep.subr.bf16.mxu0 %v10505_v44  ;;  %8742 = vmatprep.subr.bf16.mxu1 %v10633_v49  ;;  %v2252_v45 = vld [vmem:[#allocation2 + $0x1790] sm:$0xff]  ;;  %v10608_v49 = vcombine.low %v2132_v25, %v2136_v29  ;;  %v10601_v54 = vcombine.high %v2124_v42, %v2128_v43 }
 0x60c   :  { %v2256_v44 = vld [vmem:[#allocation2 + $0x17b0] sm:$0xff] }
 0x60d   :  { %v10729_v18 = vcombine.high %v2252_v45, %v2256_v44  ;;  %v10728_v11 = vcombine.low %v2252_v45, %v2256_v44  ;;  %v2100_v1 = vld [vmem:[#allocation2 + $0x12d0] sm:$0xff] }
 0x60e   :  { %8700 = vmatpush1.bf16.msra.mxu0 %v10504_v0  ;;  %8743 = vmatpush1.bf16.msra.mxu1 %v10632_v59  ;;  %v2120_v0 = vld [vmem:[#allocation2 + $0x1370] sm:$0xff] }
 0x60f   :  { %8701 = vmatprep.subr.bf16.mxu0 %v10497_v3  ;;  %8744 = vmatprep.subr.bf16.mxu1 %v10625_v5  ;;  %v2244_v59 = vld [vmem:[#allocation2 + $0x1750] sm:$0xff]  ;;  %v10600_v5 = vcombine.low %v2124_v42, %v2128_v43  ;;  %v10593_v19 = vcombine.high %v2116_v56, %v2120_v0 }
 0x610   :  { %v2248_v3 = vld [vmem:[#allocation2 + $0x1770] sm:$0xff] }
 0x611   :  { %v10721_v26 = vcombine.high %v2244_v59, %v2248_v3  ;;  %v10720_v25 = vcombine.low %v2244_v59, %v2248_v3  ;;  %v2092_v44 = vld [vmem:[#allocation2 + $0x1290] sm:$0xff] }
 0x612   :  { %8702 = vmatpush1.bf16.msra.mxu0 %v10496_v14  ;;  %8745 = vmatpush1.bf16.msra.mxu1 %v10624_v52  ;;  %v2112_v14 = vld [vmem:[#allocation2 + $0x1330] sm:$0xff] }
 0x613   :  { %8703 = vmatprep.subr.bf16.mxu0 %v10489_v20  ;;  %8746 = vmatprep.subr.bf16.mxu1 %v10617_v23  ;;  %v2236_v52 = vld [vmem:[#allocation2 + $0x1710] sm:$0xff]  ;;  %v10592_v23 = vcombine.low %v2116_v56, %v2120_v0  ;;  %v10585_v29 = vcombine.high %v2108_v34, %v2112_v14 }
 0x614   :  { %v2240_v20 = vld [vmem:[#allocation2 + $0x1730] sm:$0xff] }
 0x615   :  { %v10713_v30 = vcombine.high %v2236_v52, %v2240_v20  ;;  %v10712_v42 = vcombine.low %v2236_v52, %v2240_v20  ;;  %v2084_v3 = vld [vmem:[#allocation2 + $0x1250] sm:$0xff] }
 0x616   :  { %8704 = vmatpush1.bf16.msra.mxu0 %v10488_v37  ;;  %8747 = vmatpush1.bf16.msra.mxu1 %v10616_v38  ;;  %v2104_v37 = vld [vmem:[#allocation2 + $0x12f0] sm:$0xff] }
 0x617   :  { %8705 = vmatprep.subr.bf16.mxu0 %v10609_v41  ;;  %8748 = vmatprep.subr.bf16.mxu1 %v10737_v16  ;;  %v2228_v38 = vld [vmem:[#allocation2 + $0x16d0] sm:$0xff]  ;;  %v10584_v16 = vcombine.low %v2108_v34, %v2112_v14  ;;  %v10577_v43 = vcombine.high %v2100_v1, %v2104_v37 }
 0x618   :  { %v2232_v41 = vld [vmem:[#allocation2 + $0x16f0] sm:$0xff] }
 0x619   :  { %v10705_v45 = vcombine.high %v2228_v38, %v2232_v41  ;;  %v10704_v56 = vcombine.low %v2228_v38, %v2232_v41  ;;  %v2076_v20 = vld [vmem:[#allocation2 + $0x1210] sm:$0xff] }
 0x61a   :  { %8706 = vmatpush2.bf16.msra.mxu0 %v10608_v49  ;;  %8749 = vmatpush2.bf16.msra.mxu1 %v10736_v53  ;;  %v2096_v49 = vld [vmem:[#allocation2 + $0x12b0] sm:$0xff] }
 0x61b   :  { %8707 = vmatprep.subr.bf16.mxu0 %v10601_v54  ;;  %8750 = vmatprep.subr.bf16.mxu1 %v10729_v18  ;;  %v2220_v53 = vld [vmem:[#allocation2 + $0x1690] sm:$0xff]  ;;  %v10576_v18 = vcombine.low %v2100_v1, %v2104_v37  ;;  %v10569_v0 = vcombine.high %v2092_v44, %v2096_v49 }
 0x61c   :  { %v2224_v54 = vld [vmem:[#allocation2 + $0x16b0] sm:$0xff] }
 0x61d   :  { %v10697_v59 = vcombine.high %v2220_v53, %v2224_v54  ;;  %v10696_v34 = vcombine.low %v2220_v53, %v2224_v54  ;;  %v2324_v41 = vld [vmem:[#allocation2 + $0x19d0] sm:$0xff] }
 0x61e   :  { %8708 = vmatpush2.bf16.msra.mxu0 %v10600_v5  ;;  %8751 = vmatpush2.bf16.msra.mxu1 %v10728_v11  ;;  %v2088_v5 = vld [vmem:[#allocation2 + $0x1270] sm:$0xff] }
 0x61f   :  { %8709 = vmatprep.subr.bf16.mxu0 %v10593_v19  ;;  %8752 = vmatprep.subr.bf16.mxu1 %v10721_v26  ;;  %v2212_v11 = vld [vmem:[#allocation2 + $0x1650] sm:$0xff]  ;;  %v10568_v26 = vcombine.low %v2092_v44, %v2096_v49  ;;  %v10561_v14 = vcombine.high %v2084_v3, %v2088_v5 }
 0x620   :  { %v2216_v19 = vld [vmem:[#allocation2 + $0x1670] sm:$0xff] }
 0x621   :  { %v10689_v52 = vcombine.high %v2212_v11, %v2216_v19  ;;  %v10688_v1 = vcombine.low %v2212_v11, %v2216_v19  ;;  %v2316_v54 = vld [vmem:[#allocation2 + $0x1990] sm:$0xff] }
 0x622   :  { %8710 = vmatpush2.bf16.msra.mxu0 %v10592_v23  ;;  %8753 = vmatpush2.bf16.msra.mxu1 %v10720_v25  ;;  %v2080_v23 = vld [vmem:[#allocation2 + $0x1230] sm:$0xff] }
 0x623   :  { %8711 = vmatprep.subr.bf16.mxu0 %v10585_v29  ;;  %8754 = vmatprep.subr.bf16.mxu1 %v10713_v30  ;;  %v2204_v25 = vld [vmem:[#allocation2 + $0x1610] sm:$0xff]  ;;  %v10560_v30 = vcombine.low %v2084_v3, %v2088_v5  ;;  %v10553_v37 = vcombine.high %v2076_v20, %v2080_v23 }
 0x624   :  { %v2208_v29 = vld [vmem:[#allocation2 + $0x1630] sm:$0xff] }
 0x625   :  { %v10681_v38 = vcombine.high %v2204_v25, %v2208_v29  ;;  %v10680_v44 = vcombine.low %v2204_v25, %v2208_v29  ;;  %v2308_v19 = vld [vmem:[#allocation2 + $0x1950] sm:$0xff] }
 0x626   :  { %8712 = vmatpush2.bf16.msra.mxu0 %v10584_v16  ;;  %8755 = vmatpush2.bf16.msra.mxu1 %v10712_v42  ;;  %v2328_v16 = vld [vmem:[#allocation2 + $0x19f0] sm:$0xff] }
 0x627   :  { %8713 = vmatprep.subr.bf16.mxu0 %v10577_v43  ;;  %8756 = vmatprep.subr.bf16.mxu1 %v10705_v45  ;;  %v2452_v42 = vld [vmem:[#allocation2 + $0x1dd0] sm:$0xff]  ;;  %v10552_v45 = vcombine.low %v2076_v20, %v2080_v23  ;;  %v10801_v49 = vcombine.high %v2324_v41, %v2328_v16 }
 0x628   :  { %v2456_v43 = vld [vmem:[#allocation2 + $0x1df0] sm:$0xff] }
 0x629   :  { %v10929_v53 = vcombine.high %v2452_v42, %v2456_v43  ;;  %v10928_v3 = vcombine.low %v2452_v42, %v2456_v43  ;;  %v2300_v29 = vld [vmem:[#allocation2 + $0x1910] sm:$0xff] }
 0x62a   :  { %8714 = vmatpush2.bf16.msra.mxu0 %v10576_v18  ;;  %8757 = vmatpush2.bf16.msra.mxu1 %v10704_v56  ;;  %v2320_v18 = vld [vmem:[#allocation2 + $0x19b0] sm:$0xff] }
 0x62b   :  { %8715 = vmatprep.subr.bf16.mxu0 %v10569_v0  ;;  %8758 = vmatprep.subr.bf16.mxu1 %v10697_v59  ;;  %v2444_v56 = vld [vmem:[#allocation2 + $0x1d90] sm:$0xff]  ;;  %v10800_v59 = vcombine.low %v2324_v41, %v2328_v16  ;;  %v10793_v5 = vcombine.high %v2316_v54, %v2320_v18 }
 0x62c   :  { %v2448_v0 = vld [vmem:[#allocation2 + $0x1db0] sm:$0xff] }
 0x62d   :  { %v10921_v11 = vcombine.high %v2444_v56, %v2448_v0  ;;  %v10920_v20 = vcombine.low %v2444_v56, %v2448_v0  ;;  %v2292_v43 = vld [vmem:[#allocation2 + $0x18d0] sm:$0xff] }
 0x62e   :  { %8716 = vmatpush2.bf16.msra.mxu0 %v10568_v26  ;;  %8759 = vmatpush2.bf16.msra.mxu1 %v10696_v34  ;;  %v2312_v26 = vld [vmem:[#allocation2 + $0x1970] sm:$0xff] }
 0x62f   :  { %8717 = vmatprep.subr.bf16.mxu0 %v10561_v14  ;;  %8760 = vmatprep.subr.bf16.mxu1 %v10689_v52  ;;  %v2436_v34 = vld [vmem:[#allocation2 + $0x1d50] sm:$0xff]  ;;  %v10792_v52 = vcombine.low %v2316_v54, %v2320_v18  ;;  %v10785_v23 = vcombine.high %v2308_v19, %v2312_v26 }
 0x630   :  { %v2440_v14 = vld [vmem:[#allocation2 + $0x1d70] sm:$0xff] }
 0x631   :  { %v10913_v25 = vcombine.high %v2436_v34, %v2440_v14  ;;  %v10912_v41 = vcombine.low %v2436_v34, %v2440_v14  ;;  %v2284_v0 = vld [vmem:[#allocation2 + $0x1890] sm:$0xff] }
 0x632   :  { %8718 = vmatpush2.bf16.msra.mxu0 %v10560_v30  ;;  %8761 = vmatpush2.bf16.msra.mxu1 %v10688_v1  ;;  %v2304_v30 = vld [vmem:[#allocation2 + $0x1930] sm:$0xff] }
 0x633   :  { %8719 = vmatprep.subr.bf16.mxu0 %v10553_v37  ;;  %8762 = vmatprep.subr.bf16.mxu1 %v10681_v38  ;;  %v2428_v1 = vld [vmem:[#allocation2 + $0x1d10] sm:$0xff]  ;;  %v10784_v38 = vcombine.low %v2308_v19, %v2312_v26  ;;  %v10777_v16 = vcombine.high %v2300_v29, %v2304_v30 }
 0x634   :  { %v2432_v37 = vld [vmem:[#allocation2 + $0x1d30] sm:$0xff] }
 0x635   :  { %v10905_v42 = vcombine.high %v2428_v1, %v2432_v37  ;;  %v10904_v54 = vcombine.low %v2428_v1, %v2432_v37  ;;  %v2276_v14 = vld [vmem:[#allocation2 + $0x1850] sm:$0xff] }
 0x636   :  { %8720 = vmatpush2.bf16.msra.mxu0 %v10552_v45  ;;  %8763 = vmatpush2.bf16.msra.mxu1 %v10680_v44  ;;  %v2296_v45 = vld [vmem:[#allocation2 + $0x18f0] sm:$0xff] }
 0x637   :  { %8775 = vmatprep.subr.bf16.mxu0 %v10801_v49  ;;  %8818 = vmatprep.subr.bf16.mxu1 %v10929_v53  ;;  %v2420_v44 = vld [vmem:[#allocation2 + $0x1cd0] sm:$0xff]  ;;  %v10776_v53 = vcombine.low %v2300_v29, %v2304_v30  ;;  %v10769_v18 = vcombine.high %v2292_v43, %v2296_v45 }
 0x638   :  { %v2424_v49 = vld [vmem:[#allocation2 + $0x1cf0] sm:$0xff] }
 0x639   :  { %8722 = vmatmul.mubr.bf16.vlgmr.msra.gmra.mxu0 %v12112_v31  ;;  %8765 = vmatmul.mubr.bf16.vlgmr.msra.gmra.mxu1 %v12114_v36  ;;  %v10897_v56 = vcombine.high %v2420_v44, %v2424_v49  ;;  %v10896_v19 = vcombine.low %v2420_v44, %v2424_v49  ;;  %v2268_v37 = vld [vmem:[#allocation2 + $0x1810] sm:$0xff] }
 0x63a   :  { %8776 = vmatpush1.bf16.msra.mxu0 %v10800_v59  ;;  %8819 = vmatpush1.bf16.msra.mxu1 %v10928_v3  ;;  %v2288_v59 = vld [vmem:[#allocation2 + $0x18b0] sm:$0xff] }
 0x63b   :  { %8777 = vmatprep.subr.bf16.mxu0 %v10793_v5  ;;  %8820 = vmatprep.subr.bf16.mxu1 %v10921_v11  ;;  %v2412_v3 = vld [vmem:[#allocation2 + $0x1c90] sm:$0xff]  ;;  %v10768_v11 = vcombine.low %v2292_v43, %v2296_v45  ;;  %v10761_v26 = vcombine.high %v2284_v0, %v2288_v59 }
 0x63c   :  { %8807 = vmatprep.mubr.bf16.mxu0 %v12116_v46  ;;  %8850 = vmatprep.mubr.bf16.mxu1 %v12119_v51  ;;  %v2416_v5 = vld [vmem:[#allocation2 + $0x1cb0] sm:$0xff] }
 0x63d   :  { %v10889_v34 = vcombine.high %v2412_v3, %v2416_v5  ;;  %v10888_v29 = vcombine.low %v2412_v3, %v2416_v5  ;;  %v2388_v49 = vld [vmem:[#allocation2 + $0x1bd0] sm:$0xff] }
 0x63e   :  { %8778 = vmatpush1.bf16.msra.mxu0 %v10792_v52  ;;  %8821 = vmatpush1.bf16.msra.mxu1 %v10920_v20  ;;  %v2280_v52 = vld [vmem:[#allocation2 + $0x1870] sm:$0xff] }
 0x63f   :  { %8779 = vmatprep.subr.bf16.mxu0 %v10785_v23  ;;  %8822 = vmatprep.subr.bf16.mxu1 %v10913_v25  ;;  %v2404_v20 = vld [vmem:[#allocation2 + $0x1c50] sm:$0xff]  ;;  %v10760_v25 = vcombine.low %v2284_v0, %v2288_v59  ;;  %v10753_v30 = vcombine.high %v2276_v14, %v2280_v52 }
 0x640   :  { %v2408_v23 = vld [vmem:[#allocation2 + $0x1c70] sm:$0xff] }
 0x641   :  { %v10881_v1 = vcombine.high %v2404_v20, %v2408_v23  ;;  %v10880_v43 = vcombine.low %v2404_v20, %v2408_v23  ;;  %v2380_v5 = vld [vmem:[#allocation2 + $0x1b90] sm:$0xff] }
 0x642   :  { %8780 = vmatpush1.bf16.msra.mxu0 %v10784_v38  ;;  %8823 = vmatpush1.bf16.msra.mxu1 %v10912_v41  ;;  %v2272_v38 = vld [vmem:[#allocation2 + $0x1830] sm:$0xff] }
 0x643   :  { %8781 = vmatprep.subr.bf16.mxu0 %v10777_v16  ;;  %8824 = vmatprep.subr.bf16.mxu1 %v10905_v42  ;;  %v2396_v41 = vld [vmem:[#allocation2 + $0x1c10] sm:$0xff]  ;;  %v10752_v42 = vcombine.low %v2276_v14, %v2280_v52  ;;  %v10745_v45 = vcombine.high %v2268_v37, %v2272_v38 }
 0x644   :  { %v2400_v16 = vld [vmem:[#allocation2 + $0x1c30] sm:$0xff] }
 0x645   :  { %v10873_v44 = vcombine.high %v2396_v41, %v2400_v16  ;;  %v10872_v0 = vcombine.low %v2396_v41, %v2400_v16  ;;  %v2372_v23 = vld [vmem:[#allocation2 + $0x1b50] sm:$0xff] }
 0x646   :  { %8782 = vmatpush1.bf16.msra.mxu0 %v10776_v53  ;;  %8825 = vmatpush1.bf16.msra.mxu1 %v10904_v54  ;;  %v2392_v53 = vld [vmem:[#allocation2 + $0x1bf0] sm:$0xff] }
 0x647   :  { %8783 = vmatprep.subr.bf16.mxu0 %v10769_v18  ;;  %8826 = vmatprep.subr.bf16.mxu1 %v10897_v56  ;;  %v2516_v54 = vld [vmem:[#allocation2 + $0x1fd0] sm:$0xff]  ;;  %v10744_v56 = vcombine.low %v2268_v37, %v2272_v38  ;;  %v10865_v59 = vcombine.high %v2388_v49, %v2392_v53 }
 0x648   :  { %v2520_v18 = vld [vmem:[#allocation2 + $0x1ff0] sm:$0xff] }
 0x649   :  { %v10993_v3 = vcombine.high %v2516_v54, %v2520_v18  ;;  %v10992_v14 = vcombine.low %v2516_v54, %v2520_v18  ;;  %v2364_v16 = vld [vmem:[#allocation2 + $0x1b10] sm:$0xff] }
 0x64a   :  { %8784 = vmatpush1.bf16.msra.mxu0 %v10768_v11  ;;  %8827 = vmatpush1.bf16.msra.mxu1 %v10896_v19  ;;  %v2384_v11 = vld [vmem:[#allocation2 + $0x1bb0] sm:$0xff] }
 0x64b   :  { %8785 = vmatprep.subr.bf16.mxu0 %v10761_v26  ;;  %8828 = vmatprep.subr.bf16.mxu1 %v10889_v34  ;;  %v2508_v19 = vld [vmem:[#allocation2 + $0x1f90] sm:$0xff]  ;;  %v10864_v34 = vcombine.low %v2388_v49, %v2392_v53  ;;  %v10857_v52 = vcombine.high %v2380_v5, %v2384_v11 }
 0x64c   :  { %v2512_v26 = vld [vmem:[#allocation2 + $0x1fb0] sm:$0xff] }
 0x64d   :  { %v10985_v20 = vcombine.high %v2508_v19, %v2512_v26  ;;  %v10984_v37 = vcombine.low %v2508_v19, %v2512_v26  ;;  %v2356_v18 = vld [vmem:[#allocation2 + $0x1ad0] sm:$0xff] }
 0x64e   :  { %8786 = vmatpush1.bf16.msra.mxu0 %v10760_v25  ;;  %8829 = vmatpush1.bf16.msra.mxu1 %v10888_v29  ;;  %v2376_v25 = vld [vmem:[#allocation2 + $0x1b70] sm:$0xff] }
 0x64f   :  { %8787 = vmatprep.subr.bf16.mxu0 %v10753_v30  ;;  %8830 = vmatprep.subr.bf16.mxu1 %v10881_v1  ;;  %v2500_v29 = vld [vmem:[#allocation2 + $0x1f50] sm:$0xff]  ;;  %v10856_v1 = vcombine.low %v2380_v5, %v2384_v11  ;;  %v10849_v38 = vcombine.high %v2372_v23, %v2376_v25 }
 0x650   :  { %v2504_v30 = vld [vmem:[#allocation2 + $0x1f70] sm:$0xff] }
 0x651   :  { %v10977_v41 = vcombine.high %v2500_v29, %v2504_v30  ;;  %v10976_v49 = vcombine.low %v2500_v29, %v2504_v30  ;;  %v2348_v26 = vld [vmem:[#allocation2 + $0x1a90] sm:$0xff] }
 0x652   :  { %8788 = vmatpush1.bf16.msra.mxu0 %v10752_v42  ;;  %8831 = vmatpush1.bf16.msra.mxu1 %v10880_v43  ;;  %v2368_v42 = vld [vmem:[#allocation2 + $0x1b30] sm:$0xff] }
 0x653   :  { %8789 = vmatprep.subr.bf16.mxu0 %v10745_v45  ;;  %8832 = vmatprep.subr.bf16.mxu1 %v10873_v44  ;;  %v2492_v43 = vld [vmem:[#allocation2 + $0x1f10] sm:$0xff]  ;;  %v10848_v44 = vcombine.low %v2372_v23, %v2376_v25  ;;  %v10841_v53 = vcombine.high %v2364_v16, %v2368_v42 }
 0x654   :  { %v2496_v45 = vld [vmem:[#allocation2 + $0x1f30] sm:$0xff] }
 0x655   :  { %v10969_v54 = vcombine.high %v2492_v43, %v2496_v45  ;;  %v10968_v5 = vcombine.low %v2492_v43, %v2496_v45  ;;  %v2340_v30 = vld [vmem:[#allocation2 + $0x1a50] sm:$0xff] }
 0x656   :  { %8790 = vmatpush1.bf16.msra.mxu0 %v10744_v56  ;;  %8833 = vmatpush1.bf16.msra.mxu1 %v10872_v0  ;;  %v2360_v56 = vld [vmem:[#allocation2 + $0x1af0] sm:$0xff] }
 0x657   :  { %8791 = vmatprep.subr.bf16.mxu0 %v10865_v59  ;;  %8834 = vmatprep.subr.bf16.mxu1 %v10993_v3  ;;  %v2484_v0 = vld [vmem:[#allocation2 + $0x1ed0] sm:$0xff]  ;;  %v10840_v3 = vcombine.low %v2364_v16, %v2368_v42  ;;  %v10833_v11 = vcombine.high %v2356_v18, %v2360_v56 }
 0x658   :  { %v2488_v59 = vld [vmem:[#allocation2 + $0x1ef0] sm:$0xff] }
 0x659   :  { %v10961_v19 = vcombine.high %v2484_v0, %v2488_v59  ;;  %v10960_v23 = vcombine.low %v2484_v0, %v2488_v59  ;;  %v2332_v45 = vld [vmem:[#allocation2 + $0x1a10] sm:$0xff]  ;;  %v1557_v59 = vld [vmem:[#allocation2 + $0x1d8] sm:$0xff] }
 0x65a   :  { %8792 = vmatpush2.bf16.msra.mxu0 %v10864_v34  ;;  %8835 = vmatpush2.bf16.msra.mxu1 %v10992_v14  ;;  %v2352_v34 = vld [vmem:[#allocation2 + $0x1ab0] sm:$0xff] }
 0x65b   :  { %8793 = vmatprep.subr.bf16.mxu0 %v10857_v52  ;;  %8836 = vmatprep.subr.bf16.mxu1 %v10985_v20  ;;  %v2476_v14 = vld [vmem:[#allocation2 + $0x1e90] sm:$0xff]  ;;  %v10832_v20 = vcombine.low %v2356_v18, %v2360_v56  ;;  %v10825_v25 = vcombine.high %v2348_v26, %v2352_v34 }
 0x65c   :  { %v2480_v52 = vld [vmem:[#allocation2 + $0x1eb0] sm:$0xff] }
 0x65d   :  { %v10953_v29 = vcombine.high %v2476_v14, %v2480_v52  ;;  %v10952_v16 = vcombine.low %v2476_v14, %v2480_v52  ;;  %v1549_v52 = vld [vmem:[#allocation2 + $0x198] sm:$0xff] }
 0x65e   :  { %8794 = vmatpush2.bf16.msra.mxu0 %v10856_v1  ;;  %8837 = vmatpush2.bf16.msra.mxu1 %v10984_v37  ;;  %v2344_v1 = vld [vmem:[#allocation2 + $0x1a70] sm:$0xff] }
 0x65f   :  { %8795 = vmatprep.subr.bf16.mxu0 %v10849_v38  ;;  %8838 = vmatprep.subr.bf16.mxu1 %v10977_v41  ;;  %v2468_v37 = vld [vmem:[#allocation2 + $0x1e50] sm:$0xff]  ;;  %v10824_v41 = vcombine.low %v2348_v26, %v2352_v34  ;;  %v10817_v42 = vcombine.high %v2340_v30, %v2344_v1 }
 0x660   :  { %v2472_v38 = vld [vmem:[#allocation2 + $0x1e70] sm:$0xff] }
 0x661   :  { %v10945_v43 = vcombine.high %v2468_v37, %v2472_v38  ;;  %v10944_v18 = vcombine.low %v2468_v37, %v2472_v38  ;;  %v1541_v38 = vld [vmem:[#allocation2 + $0x158] sm:$0xff] }
 0x662   :  { %8796 = vmatpush2.bf16.msra.mxu0 %v10848_v44  ;;  %8839 = vmatpush2.bf16.msra.mxu1 %v10976_v49  ;;  %v2336_v44 = vld [vmem:[#allocation2 + $0x1a30] sm:$0xff] }
 0x663   :  { %8797 = vmatprep.subr.bf16.mxu0 %v10841_v53  ;;  %8840 = vmatprep.subr.bf16.mxu1 %v10969_v54  ;;  %v2460_v49 = vld [vmem:[#allocation2 + $0x1e10] sm:$0xff]  ;;  %v10816_v54 = vcombine.low %v2340_v30, %v2344_v1  ;;  %v10809_v56 = vcombine.high %v2332_v45, %v2336_v44 }
 0x664   :  { %v2464_v53 = vld [vmem:[#allocation2 + $0x1e30] sm:$0xff] }
 0x665   :  { %v10937_v0 = vcombine.high %v2460_v49, %v2464_v53  ;;  %v10936_v26 = vcombine.low %v2460_v49, %v2464_v53  ;;  %v1533_v53 = vld [vmem:[#allocation2 + $0x118] sm:$0xff] }
 0x666   :  { %8798 = vmatpush2.bf16.msra.mxu0 %v10840_v3  ;;  %8841 = vmatpush2.bf16.msra.mxu1 %v10968_v5  ;;  %v1561_v3 = vld [vmem:[#allocation2 + $0x1f8] sm:$0xff] }
 0x667   :  { %8799 = vmatprep.subr.bf16.mxu0 %v10833_v11  ;;  %8842 = vmatprep.subr.bf16.mxu1 %v10961_v19  ;;  %v1685_v5 = vld [vmem:[#allocation2 + $0x5d8] sm:$0xff]  ;;  %v10808_v19 = vcombine.low %v2332_v45, %v2336_v44  ;;  %v10035_v34 = vcombine.high %v1557_v59, %v1561_v3 }
 0x668   :  { %v1689_v11 = vld [vmem:[#allocation2 + $0x5f8] sm:$0xff] }
 0x669   :  { %v10163_v14 = vcombine.high %v1685_v5, %v1689_v11  ;;  %v10162_v30 = vcombine.low %v1685_v5, %v1689_v11  ;;  %v1525_v11 = vld [vmem:[#allocation2 + $0xd8] sm:$0xff] }
 0x66a   :  { %8800 = vmatpush2.bf16.msra.mxu0 %v10832_v20  ;;  %8843 = vmatpush2.bf16.msra.mxu1 %v10960_v23  ;;  %v1553_v20 = vld [vmem:[#allocation2 + $0x1b8] sm:$0xff] }
 0x66b   :  { %8801 = vmatprep.subr.bf16.mxu0 %v10825_v25  ;;  %8844 = vmatprep.subr.bf16.mxu1 %v10953_v29  ;;  %v1677_v23 = vld [vmem:[#allocation2 + $0x598] sm:$0xff]  ;;  %v10034_v29 = vcombine.low %v1557_v59, %v1561_v3  ;;  %v10027_v1 = vcombine.high %v1549_v52, %v1553_v20 }
 0x66c   :  { %v1681_v25 = vld [vmem:[#allocation2 + $0x5b8] sm:$0xff] }
 0x66d   :  { %v10155_v37 = vcombine.high %v1677_v23, %v1681_v25  ;;  %v10154_v45 = vcombine.low %v1677_v23, %v1681_v25  ;;  %v1521_v23 = vld [vmem:[#allocation2 + $0xb8] sm:$0xff] }
 0x66e   :  { %8802 = vmatpush2.bf16.msra.mxu0 %v10824_v41  ;;  %8845 = vmatpush2.bf16.msra.mxu1 %v10952_v16  ;;  %v1545_v41 = vld [vmem:[#allocation2 + $0x178] sm:$0xff] }
 0x66f   :  { %8803 = vmatprep.subr.bf16.mxu0 %v10817_v42  ;;  %8846 = vmatprep.subr.bf16.mxu1 %v10945_v43  ;;  %v1669_v16 = vld [vmem:[#allocation2 + $0x558] sm:$0xff]  ;;  %v10026_v43 = vcombine.low %v1549_v52, %v1553_v20  ;;  %v10019_v44 = vcombine.high %v1541_v38, %v1545_v41 }
 0x670   :  { %v1673_v42 = vld [vmem:[#allocation2 + $0x578] sm:$0xff] }
 0x671   :  { %v10147_v49 = vcombine.high %v1669_v16, %v1673_v42  ;;  %v10146_v59 = vcombine.low %v1669_v16, %v1673_v42  ;;  %v1517_v20 = vld [vmem:[#allocation2 + $0x98] sm:$0xff] }
 0x672   :  { %8804 = vmatpush2.bf16.msra.mxu0 %v10816_v54  ;;  %8847 = vmatpush2.bf16.msra.mxu1 %v10944_v18  ;;  %v1537_v54 = vld [vmem:[#allocation2 + $0x138] sm:$0xff] }
 0x673   :  { %8805 = vmatprep.subr.bf16.mxu0 %v10809_v56  ;;  %8848 = vmatprep.subr.bf16.mxu1 %v10937_v0  ;;  %v1661_v18 = vld [vmem:[#allocation2 + $0x518] sm:$0xff]  ;;  %v10018_v0 = vcombine.low %v1541_v38, %v1545_v41  ;;  %v10011_v3 = vcombine.high %v1533_v53, %v1537_v54 }
 0x674   :  { %v1665_v56 = vld [vmem:[#allocation2 + $0x538] sm:$0xff] }
 0x675   :  { %v10139_v5 = vcombine.high %v1661_v18, %v1665_v56  ;;  %v1645_v25 = vld [vmem:[#allocation2 + $0x498] sm:$0xff] }
 0x676   :  { %8806 = vmatpush2.bf16.msra.mxu0 %v10808_v19  ;;  %8849 = vmatpush2.bf16.msra.mxu1 %v10936_v26  ;;  %v1529_v19 = vld [vmem:[#allocation2 + $0xf8] sm:$0xff] }
 0x677   :  { %8861 = vmatprep.subr.bf16.mxu0 %v10035_v34  ;;  %8904 = vmatprep.subr.bf16.mxu1 %v10163_v14  ;;  %v1653_v26 = vld [vmem:[#allocation2 + $0x4d8] sm:$0xff]  ;;  %v10010_v14 = vcombine.low %v1533_v53, %v1537_v54  ;;  %v10003_v52 = vcombine.high %v1525_v11, %v1529_v19 }
 0x678   :  { %v1657_v34 = vld [vmem:[#allocation2 + $0x4f8] sm:$0xff] }
 0x679   :  { %8808 = vmatmul.mubr.bf16.vlgmr.msra.gmra.mxu0 %v12124_v33  ;;  %8851 = vmatmul.mubr.bf16.vlgmr.msra.gmra.mxu1 %v12128_v39  ;;  %v1509_v41 = vld [vmem:[#allocation2 + $0x58] sm:$0xff] }
 0x67a   :  { %8862 = vmatpush1.bf16.msra.mxu0 %v10034_v29  ;;  %8905 = vmatpush1.bf16.msra.mxu1 %v10162_v30  ;;  %v1649_v29 = vld [vmem:[#allocation2 + $0x4b8] sm:$0xff]  ;;  %v10002_v30 = vcombine.low %v1525_v11, %v1529_v19 }
 0x67b   :  { %8863 = vmatprep.subr.bf16.mxu0 %v10027_v1  ;;  %8906 = vmatprep.subr.bf16.mxu1 %v10155_v37  ;;  %v10130_v1 = vcombine.low %v1653_v26, %v1657_v34  ;;  %v9995_v37 = vcombine.high %v1517_v20, %v1521_v23  ;;  %v10123_v38 = vcombine.high %v1645_v25, %v1649_v29  ;;  %v1513_v16 = vld [vmem:[#allocation2 + $0x78] sm:$0xff] }
 0x67c   :  { %8893 = vmatprep.mubr.bf16.mxu0 %v12082_v35  ;;  %8936 = vmatprep.mubr.bf16.mxu1 %v12084_v40  ;;  %v10138_v35 = vcombine.low %v1661_v18, %v1665_v56  ;;  %v10131_v40 = vcombine.high %v1653_v26, %v1657_v34  ;;  %v1637_v42 = vld [vmem:[#allocation2 + $0x458] sm:$0xff] }
 0x67d   :  { %v1501_v54 = vld [vmem:[#allocation2 + $0x18] sm:$0xff] }
 0x67e   :  { %8864 = vmatpush1.bf16.msra.mxu0 %v10026_v43  ;;  %8907 = vmatpush1.bf16.msra.mxu1 %v10154_v45  ;;  %v1641_v43 = vld [vmem:[#allocation2 + $0x478] sm:$0xff]  ;;  %v9994_v45 = vcombine.low %v1517_v20, %v1521_v23 }
 0x67f   :  { %8865 = vmatprep.subr.bf16.mxu0 %v10019_v44  ;;  %8908 = vmatprep.subr.bf16.mxu1 %v10147_v49  ;;  %v10122_v44 = vcombine.low %v1645_v25, %v1649_v29  ;;  %v9987_v49 = vcombine.high %v1509_v41, %v1513_v16  ;;  %v10115_v53 = vcombine.high %v1637_v42, %v1641_v43  ;;  %v1505_v18 = vld [vmem:[#allocation2 + $0x38] sm:$0xff] }
 0x680   :  { %v1629_v56 = vld [vmem:[#allocation2 + $0x418] sm:$0xff] }
 0x681   :  { %v1621_v19 = vld [vmem:[#allocation2 + $0x3d8] sm:$0xff] }
 0x682   :  { %8866 = vmatpush1.bf16.msra.mxu0 %v10018_v0  ;;  %8909 = vmatpush1.bf16.msra.mxu1 %v10146_v59  ;;  %v1633_v0 = vld [vmem:[#allocation2 + $0x438] sm:$0xff]  ;;  %v9986_v59 = vcombine.low %v1509_v41, %v1513_v16 }
 0x683   :  { %8867 = vmatprep.subr.bf16.mxu0 %v10011_v3  ;;  %8910 = vmatprep.subr.bf16.mxu1 %v10139_v5  ;;  %v10114_v3 = vcombine.low %v1637_v42, %v1641_v43  ;;  %v9979_v5 = vcombine.high %v1501_v54, %v1505_v18  ;;  %v10107_v11 = vcombine.high %v1629_v56, %v1633_v0  ;;  %v1625_v26 = vld [vmem:[#allocation2 + $0x3f8] sm:$0xff] }
 0x684   :  { %v1749_v34 = vld [vmem:[#allocation2 + $0x7d8] sm:$0xff] }
 0x685   :  { %v1613_v23 = vld [vmem:[#allocation2 + $0x398] sm:$0xff] }
 0x686   :  { %8868 = vmatpush1.bf16.msra.mxu0 %v10010_v14  ;;  %8911 = vmatpush1.bf16.msra.mxu1 %v10138_v35  ;;  %v1753_v14 = vld [vmem:[#allocation2 + $0x7f8] sm:$0xff]  ;;  %v9978_v35 = vcombine.low %v1501_v54, %v1505_v18 }
 0x687   :  { %8869 = vmatprep.subr.bf16.mxu0 %v10003_v52  ;;  %8912 = vmatprep.subr.bf16.mxu1 %v10131_v40  ;;  %v10106_v52 = vcombine.low %v1629_v56, %v1633_v0  ;;  %v10099_v40 = vcombine.high %v1621_v19, %v1625_v26  ;;  %v10227_v20 = vcombine.high %v1749_v34, %v1753_v14  ;;  %v1617_v25 = vld [vmem:[#allocation2 + $0x3b8] sm:$0xff] }
 0x688   :  { %v1741_v29 = vld [vmem:[#allocation2 + $0x798] sm:$0xff] }
 0x689   :  { %v1605_v16 = vld [vmem:[#allocation2 + $0x358] sm:$0xff] }
 0x68a   :  { %8870 = vmatpush1.bf16.msra.mxu0 %v10002_v30  ;;  %8913 = vmatpush1.bf16.msra.mxu1 %v10130_v1  ;;  %v1745_v30 = vld [vmem:[#allocation2 + $0x7b8] sm:$0xff]  ;;  %v10098_v1 = vcombine.low %v1621_v19, %v1625_v26 }
 0x68b   :  { %8871 = vmatprep.subr.bf16.mxu0 %v9995_v37  ;;  %8914 = vmatprep.subr.bf16.mxu1 %v10123_v38  ;;  %v10226_v37 = vcombine.low %v1749_v34, %v1753_v14  ;;  %v10091_v38 = vcombine.high %v1613_v23, %v1617_v25  ;;  %v10219_v41 = vcombine.high %v1741_v29, %v1745_v30  ;;  %v1609_v42 = vld [vmem:[#allocation2 + $0x378] sm:$0xff] }
 0x68c   :  { %v1733_v43 = vld [vmem:[#allocation2 + $0x758] sm:$0xff] }
 0x68d   :  { %v1597_v18 = vld [vmem:[#allocation2 + $0x318] sm:$0xff] }
 0x68e   :  { %8872 = vmatpush1.bf16.msra.mxu0 %v9994_v45  ;;  %8915 = vmatpush1.bf16.msra.mxu1 %v10122_v44  ;;  %v1737_v45 = vld [vmem:[#allocation2 + $0x778] sm:$0xff]  ;;  %v10090_v44 = vcombine.low %v1613_v23, %v1617_v25 }
 0x68f   :  { %8873 = vmatprep.subr.bf16.mxu0 %v9987_v49  ;;  %8916 = vmatprep.subr.bf16.mxu1 %v10115_v53  ;;  %v10218_v49 = vcombine.low %v1741_v29, %v1745_v30  ;;  %v10083_v53 = vcombine.high %v1605_v16, %v1609_v42  ;;  %v10211_v54 = vcombine.high %v1733_v43, %v1737_v45  ;;  %v1601_v56 = vld [vmem:[#allocation2 + $0x338] sm:$0xff] }
 0x690   :  { %v1725_v0 = vld [vmem:[#allocation2 + $0x718] sm:$0xff] }
 0x691   :  { %v1589_v26 = vld [vmem:[#allocation2 + $0x2d8] sm:$0xff] }
 0x692   :  { %8874 = vmatpush1.bf16.msra.mxu0 %v9986_v59  ;;  %8917 = vmatpush1.bf16.msra.mxu1 %v10114_v3  ;;  %v1729_v59 = vld [vmem:[#allocation2 + $0x738] sm:$0xff]  ;;  %v10082_v3 = vcombine.low %v1605_v16, %v1609_v42 }
 0x693   :  { %8875 = vmatprep.subr.bf16.mxu0 %v9979_v5  ;;  %8918 = vmatprep.subr.bf16.mxu1 %v10107_v11  ;;  %v10210_v5 = vcombine.low %v1733_v43, %v1737_v45  ;;  %v10075_v11 = vcombine.high %v1597_v18, %v1601_v56  ;;  %v10203_v19 = vcombine.high %v1725_v0, %v1729_v59  ;;  %v1593_v34 = vld [vmem:[#allocation2 + $0x2f8] sm:$0xff] }
 0x694   :  { %v1717_v14 = vld [vmem:[#allocation2 + $0x6d8] sm:$0xff] }
 0x695   :  { %v1581_v25 = vld [vmem:[#allocation2 + $0x298] sm:$0xff] }
 0x696   :  { %8876 = vmatpush1.bf16.msra.mxu0 %v9978_v35  ;;  %8919 = vmatpush1.bf16.msra.mxu1 %v10106_v52  ;;  %v1721_v35 = vld [vmem:[#allocation2 + $0x6f8] sm:$0xff]  ;;  %v10074_v52 = vcombine.low %v1597_v18, %v1601_v56 }
 0x697   :  { %8877 = vmatprep.subr.bf16.mxu0 %v10099_v40  ;;  %8920 = vmatprep.subr.bf16.mxu1 %v10227_v20  ;;  %v10202_v40 = vcombine.low %v1725_v0, %v1729_v59  ;;  %v10067_v20 = vcombine.high %v1589_v26, %v1593_v34  ;;  %v10195_v23 = vcombine.high %v1717_v14, %v1721_v35  ;;  %v1585_v29 = vld [vmem:[#allocation2 + $0x2b8] sm:$0xff] }
 0x698   :  { %v1709_v30 = vld [vmem:[#allocation2 + $0x698] sm:$0xff] }
 0x699   :  { %v1573_v42 = vld [vmem:[#allocation2 + $0x258] sm:$0xff] }
 0x69a   :  { %8878 = vmatpush2.bf16.msra.mxu0 %v10098_v1  ;;  %8921 = vmatpush2.bf16.msra.mxu1 %v10226_v37  ;;  %v1713_v1 = vld [vmem:[#allocation2 + $0x6b8] sm:$0xff]  ;;  %v10066_v37 = vcombine.low %v1589_v26, %v1593_v34 }
 0x69b   :  { %8879 = vmatprep.subr.bf16.mxu0 %v10091_v38  ;;  %8922 = vmatprep.subr.bf16.mxu1 %v10219_v41  ;;  %v10194_v38 = vcombine.low %v1717_v14, %v1721_v35  ;;  %v10059_v41 = vcombine.high %v1581_v25, %v1585_v29  ;;  %v10187_v16 = vcombine.high %v1709_v30, %v1713_v1  ;;  %v1577_v43 = vld [vmem:[#allocation2 + $0x278] sm:$0xff] }
 0x69c   :  { %v1701_v45 = vld [vmem:[#allocation2 + $0x658] sm:$0xff] }
 0x69d   :  { %v1565_v56 = vld [vmem:[#allocation2 + $0x218] sm:$0xff] }
 0x69e   :  { %8880 = vmatpush2.bf16.msra.mxu0 %v10090_v44  ;;  %8923 = vmatpush2.bf16.msra.mxu1 %v10218_v49  ;;  %v1705_v44 = vld [vmem:[#allocation2 + $0x678] sm:$0xff]  ;;  %v10058_v49 = vcombine.low %v1581_v25, %v1585_v29 }
 0x69f   :  { %8881 = vmatprep.subr.bf16.mxu0 %v10083_v53  ;;  %8924 = vmatprep.subr.bf16.mxu1 %v10211_v54  ;;  %v10186_v53 = vcombine.low %v1709_v30, %v1713_v1  ;;  %v10051_v54 = vcombine.high %v1573_v42, %v1577_v43  ;;  %v10179_v18 = vcombine.high %v1701_v45, %v1705_v44  ;;  %v1569_v0 = vld [vmem:[#allocation2 + $0x238] sm:$0xff] }
 0x6a0   :  { %v1693_v59 = vld [vmem:[#allocation2 + $0x618] sm:$0xff] }
 0x6a1   :  { %v1813_v34 = vld [vmem:[#allocation2 + $0x9d8] sm:$0xff] }
 0x6a2   :  { %8882 = vmatpush2.bf16.msra.mxu0 %v10082_v3  ;;  %8925 = vmatpush2.bf16.msra.mxu1 %v10210_v5  ;;  %v1697_v3 = vld [vmem:[#allocation2 + $0x638] sm:$0xff]  ;;  %v10050_v5 = vcombine.low %v1573_v42, %v1577_v43 }
 0x6a3   :  { %8883 = vmatprep.subr.bf16.mxu0 %v10075_v11  ;;  %8926 = vmatprep.subr.bf16.mxu1 %v10203_v19  ;;  %v10178_v11 = vcombine.low %v1701_v45, %v1705_v44  ;;  %v10043_v19 = vcombine.high %v1565_v56, %v1569_v0  ;;  %v10171_v26 = vcombine.high %v1693_v59, %v1697_v3  ;;  %v1817_v14 = vld [vmem:[#allocation2 + $0x9f8] sm:$0xff] }
 0x6a4   :  { %v1941_v35 = vld [vmem:[#allocation2 + $0xdd8] sm:$0xff] }
 0x6a5   :  { %v1805_v29 = vld [vmem:[#allocation2 + $0x998] sm:$0xff] }
 0x6a6   :  { %8884 = vmatpush2.bf16.msra.mxu0 %v10074_v52  ;;  %8927 = vmatpush2.bf16.msra.mxu1 %v10202_v40  ;;  %v1945_v52 = vld [vmem:[#allocation2 + $0xdf8] sm:$0xff]  ;;  %v10042_v40 = vcombine.low %v1565_v56, %v1569_v0 }
 0x6a7   :  { %8885 = vmatprep.subr.bf16.mxu0 %v10067_v20  ;;  %8928 = vmatprep.subr.bf16.mxu1 %v10195_v23  ;;  %v10170_v20 = vcombine.low %v1693_v59, %v1697_v3  ;;  %v10291_v23 = vcombine.high %v1813_v34, %v1817_v14  ;;  %v10419_v25 = vcombine.high %v1941_v35, %v1945_v52  ;;  %v1809_v30 = vld [vmem:[#allocation2 + $0x9b8] sm:$0xff] }
 0x6a8   :  { %v1933_v1 = vld [vmem:[#allocation2 + $0xd98] sm:$0xff] }
 0x6a9   :  { %v1797_v43 = vld [vmem:[#allocation2 + $0x958] sm:$0xff] }
 0x6aa   :  { %8886 = vmatpush2.bf16.msra.mxu0 %v10066_v37  ;;  %8929 = vmatpush2.bf16.msra.mxu1 %v10194_v38  ;;  %v1937_v37 = vld [vmem:[#allocation2 + $0xdb8] sm:$0xff]  ;;  %v10290_v38 = vcombine.low %v1813_v34, %v1817_v14 }
 0x6ab   :  { %8887 = vmatprep.subr.bf16.mxu0 %v10059_v41  ;;  %8930 = vmatprep.subr.bf16.mxu1 %v10187_v16  ;;  %v10418_v41 = vcombine.low %v1941_v35, %v1945_v52  ;;  %v10283_v16 = vcombine.high %v1805_v29, %v1809_v30  ;;  %v10411_v42 = vcombine.high %v1933_v1, %v1937_v37  ;;  %v1801_v45 = vld [vmem:[#allocation2 + $0x978] sm:$0xff] }
 0x6ac   :  { %v1925_v44 = vld [vmem:[#allocation2 + $0xd58] sm:$0xff] }
 0x6ad   :  { %v1789_v0 = vld [vmem:[#allocation2 + $0x918] sm:$0xff] }
 0x6ae   :  { %8888 = vmatpush2.bf16.msra.mxu0 %v10058_v49  ;;  %8931 = vmatpush2.bf16.msra.mxu1 %v10186_v53  ;;  %v1929_v49 = vld [vmem:[#allocation2 + $0xd78] sm:$0xff]  ;;  %v10282_v53 = vcombine.low %v1805_v29, %v1809_v30 }
 0x6af   :  { %8889 = vmatprep.subr.bf16.mxu0 %v10051_v54  ;;  %8932 = vmatprep.subr.bf16.mxu1 %v10179_v18  ;;  %v10410_v54 = vcombine.low %v1933_v1, %v1937_v37  ;;  %v10275_v18 = vcombine.high %v1797_v43, %v1801_v45  ;;  %v10403_v56 = vcombine.high %v1925_v44, %v1929_v49  ;;  %v1793_v59 = vld [vmem:[#allocation2 + $0x938] sm:$0xff] }
 0x6b0   :  { %v1917_v3 = vld [vmem:[#allocation2 + $0xd18] sm:$0xff]  ;;  %v10266_v52 = vcombine.low %v1789_v0, %v1793_v59 }
 0x6b1   :  { %v1785_v34 = vld [vmem:[#allocation2 + $0x8f8] sm:$0xff] }
 0x6b2   :  { %8890 = vmatpush2.bf16.msra.mxu0 %v10050_v5  ;;  %8933 = vmatpush2.bf16.msra.mxu1 %v10178_v11  ;;  %v1921_v5 = vld [vmem:[#allocation2 + $0xd38] sm:$0xff]  ;;  %v10267_v11 = vcombine.high %v1789_v0, %v1793_v59 }
 0x6b3   :  { %8891 = vmatprep.subr.bf16.mxu0 %v10043_v19  ;;  %8934 = vmatprep.subr.bf16.mxu1 %v10171_v26  ;;  %v10395_v19 = vcombine.high %v1917_v3, %v1921_v5  ;;  %v1781_v26 = vld [vmem:[#allocation2 + $0x8d8] sm:$0xff] }
 0x6b4   :  { %v1909_v14 = vld [vmem:[#allocation2 + $0xcd8] sm:$0xff]  ;;  %v10258_v30 = vcombine.low %v1781_v26, %v1785_v34 }
 0x6b5   :  { %v1913_v35 = vld [vmem:[#allocation2 + $0xcf8] sm:$0xff] }
 0x6b6   :  { %8892 = vmatpush2.bf16.msra.mxu0 %v10042_v40  ;;  %8935 = vmatpush2.bf16.msra.mxu1 %v10170_v20  ;;  %v10259_v40 = vcombine.high %v1781_v26, %v1785_v34  ;;  %v1773_v20 = vld [vmem:[#allocation2 + $0x898] sm:$0xff]  ;;  %v10386_v1 = vcombine.low %v1909_v14, %v1913_v35 }
 0x6b7   :  { %8947 = vmatprep.subr.bf16.mxu0 %v10291_v23  ;;  %8990 = vmatprep.subr.bf16.mxu1 %v10419_v25  ;;  %v1777_v23 = vld [vmem:[#allocation2 + $0x8b8] sm:$0xff] }
 0x6b8   :  { %v1901_v25 = vld [vmem:[#allocation2 + $0xc98] sm:$0xff]  ;;  %v10251_v37 = vcombine.high %v1773_v20, %v1777_v23 }
 0x6b9   :  { %8894 = vmatmul.mubr.bf16.vlgmr.msra.gmra.mxu0 %v12088_v8  ;;  %8937 = vmatmul.mubr.bf16.vlgmr.msra.gmra.mxu1 %v12090_v13  ;;  %v10274_v8 = vcombine.low %v1797_v43, %v1801_v45  ;;  %v10402_v13 = vcombine.low %v1925_v44, %v1929_v49  ;;  %v1905_v29 = vld [vmem:[#allocation2 + $0xcb8] sm:$0xff]  ;;  %v10250_v45 = vcombine.low %v1773_v20, %v1777_v23 }
 0x6ba   :  { %8948 = vmatpush1.bf16.msra.mxu0 %v10290_v38  ;;  %8991 = vmatpush1.bf16.msra.mxu1 %v10418_v41  ;;  %v10379_v38 = vcombine.high %v1901_v25, %v1905_v29  ;;  %v1765_v41 = vld [vmem:[#allocation2 + $0x858] sm:$0xff]  ;;  %v10378_v44 = vcombine.low %v1901_v25, %v1905_v29 }
 0x6bb   :  { %8949 = vmatprep.subr.bf16.mxu0 %v10283_v16  ;;  %8992 = vmatprep.subr.bf16.mxu1 %v10411_v42  ;;  %v1769_v16 = vld [vmem:[#allocation2 + $0x878] sm:$0xff] }
 0x6bc   :  { %8979 = vmatprep.mubr.bf16.mxu0 %v12092_v21  ;;  %9022 = vmatprep.mubr.bf16.mxu1 %v12095_v24  ;;  %v10394_v21 = vcombine.low %v1917_v3, %v1921_v5  ;;  %v10387_v24 = vcombine.high %v1909_v14, %v1913_v35  ;;  %v1893_v42 = vld [vmem:[#allocation2 + $0xc58] sm:$0xff]  ;;  %v10243_v49 = vcombine.high %v1765_v41, %v1769_v16 }
 0x6bd   :  { %v1897_v43 = vld [vmem:[#allocation2 + $0xc78] sm:$0xff]  ;;  %v10242_v59 = vcombine.low %v1765_v41, %v1769_v16 }
 0x6be   :  { %8950 = vmatpush1.bf16.msra.mxu0 %v10282_v53  ;;  %8993 = vmatpush1.bf16.msra.mxu1 %v10410_v54  ;;  %v10371_v53 = vcombine.high %v1893_v42, %v1897_v43  ;;  %v1757_v54 = vld [vmem:[#allocation2 + $0x818] sm:$0xff]  ;;  %v10370_v3 = vcombine.low %v1893_v42, %v1897_v43 }
 0x6bf   :  { %8951 = vmatprep.subr.bf16.mxu0 %v10275_v18  ;;  %8994 = vmatprep.subr.bf16.mxu1 %v10403_v56  ;;  %v1761_v18 = vld [vmem:[#allocation2 + $0x838] sm:$0xff] }
 0x6c0   :  { %v1885_v56 = vld [vmem:[#allocation2 + $0xc18] sm:$0xff]  ;;  %v10235_v5 = vcombine.high %v1757_v54, %v1761_v18  ;;  %v10234_v34 = vcombine.low %v1757_v54, %v1761_v18 }
 0x6c1   :  { %v1889_v0 = vld [vmem:[#allocation2 + $0xc38] sm:$0xff] }
 0x6c2   :  { %8952 = vmatpush1.bf16.msra.mxu0 %v10274_v8  ;;  %8995 = vmatpush1.bf16.msra.mxu1 %v10402_v13  ;;  %v10363_v8 = vcombine.high %v1885_v56, %v1889_v0  ;;  %v1877_v13 = vld [vmem:[#allocation2 + $0xbd8] sm:$0xff]  ;;  %v10362_v14 = vcombine.low %v1885_v56, %v1889_v0 }
 0x6c3   :  { %8953 = vmatprep.subr.bf16.mxu0 %v10267_v11  ;;  %8996 = vmatprep.subr.bf16.mxu1 %v10395_v19  ;;  %v1881_v11 = vld [vmem:[#allocation2 + $0xbf8] sm:$0xff] }
 0x6c4   :  { %v2005_v19 = vld [vmem:[#allocation2 + $0xfd8] sm:$0xff]  ;;  %v10355_v35 = vcombine.high %v1877_v13, %v1881_v11  ;;  %v10354_v23 = vcombine.low %v1877_v13, %v1881_v11 }
 0x6c5   :  { %v2009_v26 = vld [vmem:[#allocation2 + $0xff8] sm:$0xff] }
 0x6c6   :  { %8954 = vmatpush1.bf16.msra.mxu0 %v10266_v52  ;;  %8997 = vmatpush1.bf16.msra.mxu1 %v10394_v21  ;;  %v10483_v52 = vcombine.high %v2005_v19, %v2009_v26  ;;  %v1869_v21 = vld [vmem:[#allocation2 + $0xb98] sm:$0xff]  ;;  %v10482_v25 = vcombine.low %v2005_v19, %v2009_v26 }
 0x6c7   :  { %8955 = vmatprep.subr.bf16.mxu0 %v10259_v40  ;;  %8998 = vmatprep.subr.bf16.mxu1 %v10387_v24  ;;  %v1873_v40 = vld [vmem:[#allocation2 + $0xbb8] sm:$0xff] }
 0x6c8   :  { %v1997_v24 = vld [vmem:[#allocation2 + $0xf98] sm:$0xff]  ;;  %v10347_v29 = vcombine.high %v1869_v21, %v1873_v40  ;;  %v10346_v16 = vcombine.low %v1869_v21, %v1873_v40 }
 0x6c9   :  { %v2001_v20 = vld [vmem:[#allocation2 + $0xfb8] sm:$0xff] }
 0x6ca   :  { %8956 = vmatpush1.bf16.msra.mxu0 %v10258_v30  ;;  %8999 = vmatpush1.bf16.msra.mxu1 %v10386_v1  ;;  %v10475_v30 = vcombine.high %v1997_v24, %v2001_v20  ;;  %v1861_v1 = vld [vmem:[#allocation2 + $0xb58] sm:$0xff]  ;;  %v10474_v42 = vcombine.low %v1997_v24, %v2001_v20 }
 0x6cb   :  { %8957 = vmatprep.subr.bf16.mxu0 %v10251_v37  ;;  %9000 = vmatprep.subr.bf16.mxu1 %v10379_v38  ;;  %v1865_v37 = vld [vmem:[#allocation2 + $0xb78] sm:$0xff] }
 0x6cc   :  { %v1989_v38 = vld [vmem:[#allocation2 + $0xf58] sm:$0xff]  ;;  %v10339_v43 = vcombine.high %v1861_v1, %v1865_v37  ;;  %v10338_v18 = vcombine.low %v1861_v1, %v1865_v37 }
 0x6cd   :  { %v1993_v41 = vld [vmem:[#allocation2 + $0xf78] sm:$0xff] }
 0x6ce   :  { %8958 = vmatpush1.bf16.msra.mxu0 %v10250_v45  ;;  %9001 = vmatpush1.bf16.msra.mxu1 %v10378_v44  ;;  %v10467_v45 = vcombine.high %v1989_v38, %v1993_v41  ;;  %v1853_v44 = vld [vmem:[#allocation2 + $0xb18] sm:$0xff]  ;;  %v10466_v56 = vcombine.low %v1989_v38, %v1993_v41 }
 0x6cf   :  { %8959 = vmatprep.subr.bf16.mxu0 %v10243_v49  ;;  %9002 = vmatprep.subr.bf16.mxu1 %v10371_v53  ;;  %v1857_v49 = vld [vmem:[#allocation2 + $0xb38] sm:$0xff] }
 0x6d0   :  { %v1981_v53 = vld [vmem:[#allocation2 + $0xf18] sm:$0xff]  ;;  %v10331_v0 = vcombine.high %v1853_v44, %v1857_v49  ;;  %v10330_v11 = vcombine.low %v1853_v44, %v1857_v49 }
 0x6d1   :  { %v1985_v54 = vld [vmem:[#allocation2 + $0xf38] sm:$0xff] }
 0x6d2   :  { %8960 = vmatpush1.bf16.msra.mxu0 %v10242_v59  ;;  %9003 = vmatpush1.bf16.msra.mxu1 %v10370_v3  ;;  %v10459_v59 = vcombine.high %v1981_v53, %v1985_v54  ;;  %v1845_v3 = vld [vmem:[#allocation2 + $0xad8] sm:$0xff]  ;;  %v10458_v19 = vcombine.low %v1981_v53, %v1985_v54 }
 0x6d3   :  { %8961 = vmatprep.subr.bf16.mxu0 %v10235_v5  ;;  %9004 = vmatprep.subr.bf16.mxu1 %v10363_v8  ;;  %v1849_v5 = vld [vmem:[#allocation2 + $0xaf8] sm:$0xff] }
 0x6d4   :  { %v1973_v8 = vld [vmem:[#allocation2 + $0xed8] sm:$0xff]  ;;  %v10323_v26 = vcombine.high %v1845_v3, %v1849_v5  ;;  %v10322_v40 = vcombine.low %v1845_v3, %v1849_v5 }
 0x6d5   :  { %v1977_v13 = vld [vmem:[#allocation2 + $0xef8] sm:$0xff] }
 0x6d6   :  { %8962 = vmatpush1.bf16.msra.mxu0 %v10234_v34  ;;  %9005 = vmatpush1.bf16.msra.mxu1 %v10362_v14  ;;  %v10451_v34 = vcombine.high %v1973_v8, %v1977_v13  ;;  %v1837_v14 = vld [vmem:[#allocation2 + $0xa98] sm:$0xff]  ;;  %v10450_v24 = vcombine.low %v1973_v8, %v1977_v13 }
 0x6d7   :  { %8963 = vmatprep.subr.bf16.mxu0 %v10355_v35  ;;  %9006 = vmatprep.subr.bf16.mxu1 %v10483_v52  ;;  %v1841_v35 = vld [vmem:[#allocation2 + $0xab8] sm:$0xff] }
 0x6d8   :  { %v1965_v52 = vld [vmem:[#allocation2 + $0xe98] sm:$0xff]  ;;  %v10315_v20 = vcombine.high %v1837_v14, %v1841_v35  ;;  %v10314_v37 = vcombine.low %v1837_v14, %v1841_v35 }
 0x6d9   :  { %v1969_v21 = vld [vmem:[#allocation2 + $0xeb8] sm:$0xff] }
 0x6da   :  { %8964 = vmatpush2.bf16.msra.mxu0 %v10354_v23  ;;  %9007 = vmatpush2.bf16.msra.mxu1 %v10482_v25  ;;  %v10443_v23 = vcombine.high %v1965_v52, %v1969_v21  ;;  %v1829_v25 = vld [vmem:[#allocation2 + $0xa58] sm:$0xff]  ;;  %v10442_v38 = vcombine.low %v1965_v52, %v1969_v21 }
 0x6db   :  { %8965 = vmatprep.subr.bf16.mxu0 %v10347_v29  ;;  %9008 = vmatprep.subr.bf16.mxu1 %v10475_v30  ;;  %v1833_v29 = vld [vmem:[#allocation2 + $0xa78] sm:$0xff] }
 0x6dc   :  { %v1957_v30 = vld [vmem:[#allocation2 + $0xe58] sm:$0xff]  ;;  %v10307_v41 = vcombine.high %v1829_v25, %v1833_v29  ;;  %v10306_v49 = vcombine.low %v1829_v25, %v1833_v29 }
 0x6dd   :  { %v1961_v1 = vld [vmem:[#allocation2 + $0xe78] sm:$0xff] }
 0x6de   :  { %8966 = vmatpush2.bf16.msra.mxu0 %v10346_v16  ;;  %9009 = vmatpush2.bf16.msra.mxu1 %v10474_v42  ;;  %v10435_v16 = vcombine.high %v1957_v30, %v1961_v1  ;;  %v1821_v42 = vld [vmem:[#allocation2 + $0xa18] sm:$0xff]  ;;  %v10434_v53 = vcombine.low %v1957_v30, %v1961_v1 }
 0x6df   :  { %8967 = vmatprep.subr.bf16.mxu0 %v10339_v43  ;;  %9010 = vmatprep.subr.bf16.mxu1 %v10467_v45  ;;  %v1825_v43 = vld [vmem:[#allocation2 + $0xa38] sm:$0xff] }
 0x6e0   :  { %v1949_v45 = vld [vmem:[#allocation2 + $0xe18] sm:$0xff]  ;;  %v10299_v54 = vcombine.high %v1821_v42, %v1825_v43  ;;  %v10298_v5 = vcombine.low %v1821_v42, %v1825_v43 }
 0x6e1   :  { %v1953_v44 = vld [vmem:[#allocation2 + $0xe38] sm:$0xff] }
 0x6e2   :  { %8968 = vmatpush2.bf16.msra.mxu0 %v10338_v18  ;;  %9011 = vmatpush2.bf16.msra.mxu1 %v10466_v56  ;;  %v10427_v18 = vcombine.high %v1949_v45, %v1953_v44  ;;  %v2069_v56 = vld [vmem:[#allocation2 + $0x11d8] sm:$0xff]  ;;  %v10426_v8 = vcombine.low %v1949_v45, %v1953_v44 }
 0x6e3   :  { %8969 = vmatprep.subr.bf16.mxu0 %v10331_v0  ;;  %9012 = vmatprep.subr.bf16.mxu1 %v10459_v59  ;;  %v2073_v0 = vld [vmem:[#allocation2 + $0x11f8] sm:$0xff] }
 0x6e4   :  { %v2197_v59 = vld [vmem:[#allocation2 + $0x15d8] sm:$0xff]  ;;  %v10547_v13 = vcombine.high %v2069_v56, %v2073_v0  ;;  %v10546_v35 = vcombine.low %v2069_v56, %v2073_v0 }
 0x6e5   :  { %v2201_v3 = vld [vmem:[#allocation2 + $0x15f8] sm:$0xff] }
 0x6e6   :  { %8970 = vmatpush2.bf16.msra.mxu0 %v10330_v11  ;;  %9013 = vmatpush2.bf16.msra.mxu1 %v10458_v19  ;;  %v10675_v11 = vcombine.high %v2197_v59, %v2201_v3  ;;  %v2061_v19 = vld [vmem:[#allocation2 + $0x1198] sm:$0xff]  ;;  %v10674_v52 = vcombine.low %v2197_v59, %v2201_v3 }
 0x6e7   :  { %8971 = vmatprep.subr.bf16.mxu0 %v10323_v26  ;;  %9014 = vmatprep.subr.bf16.mxu1 %v10451_v34  ;;  %v2065_v26 = vld [vmem:[#allocation2 + $0x11b8] sm:$0xff] }
 0x6e8   :  { %v2189_v34 = vld [vmem:[#allocation2 + $0x1598] sm:$0xff]  ;;  %v10539_v21 = vcombine.high %v2061_v19, %v2065_v26  ;;  %v10538_v29 = vcombine.low %v2061_v19, %v2065_v26 }
 0x6e9   :  { %v2193_v14 = vld [vmem:[#allocation2 + $0x15b8] sm:$0xff] }
 0x6ea   :  { %8972 = vmatpush2.bf16.msra.mxu0 %v10322_v40  ;;  %9015 = vmatpush2.bf16.msra.mxu1 %v10450_v24  ;;  %v10667_v40 = vcombine.high %v2189_v34, %v2193_v14  ;;  %v2053_v24 = vld [vmem:[#allocation2 + $0x1158] sm:$0xff]  ;;  %v10666_v30 = vcombine.low %v2189_v34, %v2193_v14 }
 0x6eb   :  { %8973 = vmatprep.subr.bf16.mxu0 %v10315_v20  ;;  %9016 = vmatprep.subr.bf16.mxu1 %v10443_v23  ;;  %v2057_v20 = vld [vmem:[#allocation2 + $0x1178] sm:$0xff] }
 0x6ec   :  { %v2181_v23 = vld [vmem:[#allocation2 + $0x1558] sm:$0xff]  ;;  %v10531_v1 = vcombine.high %v2053_v24, %v2057_v20 }
 0x6ed   :  { %v2185_v25 = vld [vmem:[#allocation2 + $0x1578] sm:$0xff] }
 0x6ee   :  { %8974 = vmatpush2.bf16.msra.mxu0 %v10314_v37  ;;  %9017 = vmatpush2.bf16.msra.mxu1 %v10442_v38  ;;  %v10659_v37 = vcombine.high %v2181_v23, %v2185_v25  ;;  %v2045_v38 = vld [vmem:[#allocation2 + $0x1118] sm:$0xff] }
 0x6ef   :  { %8975 = vmatprep.subr.bf16.mxu0 %v10307_v41  ;;  %9018 = vmatprep.subr.bf16.mxu1 %v10435_v16  ;;  %v2049_v41 = vld [vmem:[#allocation2 + $0x1138] sm:$0xff] }
 0x6f0   :  { %v2173_v16 = vld [vmem:[#allocation2 + $0x1518] sm:$0xff]  ;;  %v10523_v43 = vcombine.high %v2045_v38, %v2049_v41 }
 0x6f1   :  { %v2177_v42 = vld [vmem:[#allocation2 + $0x1538] sm:$0xff] }
 0x6f2   :  { %8976 = vmatpush2.bf16.msra.mxu0 %v10306_v49  ;;  %9019 = vmatpush2.bf16.msra.mxu1 %v10434_v53  ;;  %v10651_v45 = vcombine.high %v2173_v16, %v2177_v42  ;;  %v2037_v44 = vld [vmem:[#allocation2 + $0x10d8] sm:$0xff] }
 0x6f3   :  { %8977 = vmatprep.subr.bf16.mxu0 %v10299_v54  ;;  %9020 = vmatprep.subr.bf16.mxu1 %v10427_v18  ;;  %v2041_v49 = vld [vmem:[#allocation2 + $0x10f8] sm:$0xff]  ;;  %v10522_v18 = vcombine.low %v2045_v38, %v2049_v41 }
 0x6f4   :  { %v2165_v53 = vld [vmem:[#allocation2 + $0x14d8] sm:$0xff]  ;;  %v10515_v56 = vcombine.high %v2037_v44, %v2041_v49 }
 0x6f5   :  { %v2169_v54 = vld [vmem:[#allocation2 + $0x14f8] sm:$0xff] }
 0x6f6   :  { %8978 = vmatpush2.bf16.msra.mxu0 %v10298_v5  ;;  %9021 = vmatpush2.bf16.msra.mxu1 %v10426_v8  ;;  %v2029_v0 = vld [vmem:[#allocation2 + $0x1098] sm:$0xff]  ;;  %v10514_v8 = vcombine.low %v2037_v44, %v2041_v49 }
 0x6f7   :  { %9033 = vmatprep.subr.bf16.mxu0 %v10547_v13  ;;  %9076 = vmatprep.subr.bf16.mxu1 %v10675_v11  ;;  %v2033_v59 = vld [vmem:[#allocation2 + $0x10b8] sm:$0xff]  ;;  %v10642_v13 = vcombine.low %v2165_v53, %v2169_v54 }
 0x6f8   :  { %v2157_v3 = vld [vmem:[#allocation2 + $0x1498] sm:$0xff]  ;;  %v10507_v11 = vcombine.high %v2029_v0, %v2033_v59 }
 0x6f9   :  { %8980 = vmatmul.mubr.bf16.vlgmr.msra.gmra.mxu0 %v12100_v47  ;;  %9023 = vmatmul.mubr.bf16.vlgmr.msra.gmra.mxu1 %v12102_v48  ;;  %v10530_v47 = vcombine.low %v2053_v24, %v2057_v20  ;;  %v10658_v48 = vcombine.low %v2181_v23, %v2185_v25  ;;  %v2161_v5 = vld [vmem:[#allocation2 + $0x14b8] sm:$0xff] }
 0x6fa   :  { %9034 = vmatpush1.bf16.msra.mxu0 %v10546_v35  ;;  %9077 = vmatpush1.bf16.msra.mxu1 %v10674_v52  ;;  %v10635_v19 = vcombine.high %v2157_v3, %v2161_v5  ;;  %v2021_v26 = vld [vmem:[#allocation2 + $0x1058] sm:$0xff]  ;;  %v10506_v52 = vcombine.low %v2029_v0, %v2033_v59 }
 0x6fb   :  { %9035 = vmatprep.subr.bf16.mxu0 %v10539_v21  ;;  %9078 = vmatprep.subr.bf16.mxu1 %v10667_v40  ;;  %v2025_v34 = vld [vmem:[#allocation2 + $0x1078] sm:$0xff]  ;;  %v10634_v21 = vcombine.low %v2157_v3, %v2161_v5 }
 0x6fc   :  { %9065 = vmatprep.mubr.bf16.mxu0 %v12104_v58  ;;  %9108 = vmatprep.mubr.bf16.mxu1 %v12107_v63  ;;  %v10650_v58 = vcombine.low %v2173_v16, %v2177_v42  ;;  %v10643_v63 = vcombine.high %v2165_v53, %v2169_v54  ;;  %v2149_v14 = vld [vmem:[#allocation2 + $0x1458] sm:$0xff]  ;;  %v10499_v40 = vcombine.high %v2021_v26, %v2025_v34 }
 0x6fd   :  { %v2153_v35 = vld [vmem:[#allocation2 + $0x1478] sm:$0xff] }
 0x6fe   :  { %9036 = vmatpush1.bf16.msra.mxu0 %v10538_v29  ;;  %9079 = vmatpush1.bf16.msra.mxu1 %v10666_v30  ;;  %v10627_v24 = vcombine.high %v2149_v14, %v2153_v35  ;;  %v2013_v20 = vld [vmem:[#allocation2 + $0x1018] sm:$0xff]  ;;  %v10498_v30 = vcombine.low %v2021_v26, %v2025_v34 }
 0x6ff   :  { %9037 = vmatprep.subr.bf16.mxu0 %v10531_v1  ;;  %9080 = vmatprep.subr.bf16.mxu1 %v10659_v37  ;;  %v2017_v23 = vld [vmem:[#allocation2 + $0x1038] sm:$0xff]  ;;  %v10626_v1 = vcombine.low %v2149_v14, %v2153_v35 }
 0x700   :  { %v2141_v25 = vld [vmem:[#allocation2 + $0x1418] sm:$0xff]  ;;  %v10491_v37 = vcombine.high %v2013_v20, %v2017_v23 }
 0x701   :  { %v2145_v29 = vld [vmem:[#allocation2 + $0x1438] sm:$0xff] }
 0x702   :  { %9038 = vmatpush1.bf16.msra.mxu0 %v10530_v47  ;;  %9081 = vmatpush1.bf16.msra.mxu1 %v10658_v48  ;;  %v10619_v38 = vcombine.high %v2141_v25, %v2145_v29  ;;  %v2133_v41 = vld [vmem:[#allocation2 + $0x13d8] sm:$0xff]  ;;  %v10490_v48 = vcombine.low %v2013_v20, %v2017_v23 }
 0x703   :  { %9039 = vmatprep.subr.bf16.mxu0 %v10523_v43  ;;  %9082 = vmatprep.subr.bf16.mxu1 %v10651_v45  ;;  %v2137_v16 = vld [vmem:[#allocation2 + $0x13f8] sm:$0xff]  ;;  %v10618_v43 = vcombine.low %v2141_v25, %v2145_v29  ;;  %v12226_v25 = vpop.f32.mrf.mxu1 }
 0x704   :  { %v2261_v42 = vld [vmem:[#allocation2 + $0x17d8] sm:$0xff]  ;;  %v10611_v45 = vcombine.high %v2133_v41, %v2137_v16 }
 0x705   :  { %v2265_v47 = vld [vmem:[#allocation2 + $0x17f8] sm:$0xff] }
 0x706   :  { %9040 = vmatpush1.bf16.msra.mxu0 %v10522_v18  ;;  %9083 = vmatpush1.bf16.msra.mxu1 %v10650_v58  ;;  %v10739_v44 = vcombine.high %v2261_v42, %v2265_v47  ;;  %v2125_v49 = vld [vmem:[#allocation2 + $0x1398] sm:$0xff]  ;;  %v10610_v58 = vcombine.low %v2133_v41, %v2137_v16  ;;  %v12230_v16 = vpop.f32.mrf.mxu1 }
 0x707   :  { %9041 = vmatprep.subr.bf16.mxu0 %v10515_v56  ;;  %9084 = vmatprep.subr.bf16.mxu1 %v10643_v63  ;;  %v2129_v53 = vld [vmem:[#allocation2 + $0x13b8] sm:$0xff]  ;;  %v10738_v56 = vcombine.low %v2261_v42, %v2265_v47  ;;  %12486 = vst [vmem:[#allocation47_spill] sm:$0xff] %v12230_v16 }
 0x708   :  { %v2253_v54 = vld [vmem:[#allocation2 + $0x1798] sm:$0xff]  ;;  %v10603_v63 = vcombine.high %v2125_v49, %v2129_v53 }
 0x709   :  { %v2257_v18 = vld [vmem:[#allocation2 + $0x17b8] sm:$0xff] }
 0x70a   :  { %9042 = vmatpush1.bf16.msra.mxu0 %v10514_v8  ;;  %9085 = vmatpush1.bf16.msra.mxu1 %v10642_v13  ;;  %v10731_v0 = vcombine.high %v2253_v54, %v2257_v18  ;;  %v2117_v59 = vld [vmem:[#allocation2 + $0x1358] sm:$0xff]  ;;  %v12222_v13 = vpop.f32.mrf.mxu0 }
 0x70b   :  { %9043 = vmatprep.subr.bf16.mxu0 %v10507_v11  ;;  %9086 = vmatprep.subr.bf16.mxu1 %v10635_v19  ;;  %v2121_v3 = vld [vmem:[#allocation2 + $0x1378] sm:$0xff]  ;;  %v10602_v11 = vcombine.low %v2125_v49, %v2129_v53  ;;  %v10730_v19 = vcombine.low %v2253_v54, %v2257_v18  ;;  %v12234_v18 = vpop.f32.mrf.mxu1 }
 0x70c   :  { %v2245_v5 = vld [vmem:[#allocation2 + $0x1758] sm:$0xff]  ;;  %v10595_v26 = vcombine.high %v2117_v59, %v2121_v3  ;;  %v12224_v34 = vpop.f32.mrf.mxu0 }
 0x70d   :  { %v2249_v8 = vld [vmem:[#allocation2 + $0x1778] sm:$0xff] }
 0x70e   :  { %9044 = vmatpush1.bf16.msra.mxu0 %v10506_v52  ;;  %9087 = vmatpush1.bf16.msra.mxu1 %v10634_v21  ;;  %v10723_v14 = vcombine.high %v2245_v5, %v2249_v8  ;;  %v2109_v35 = vld [vmem:[#allocation2 + $0x1318] sm:$0xff]  ;;  %v10722_v20 = vcombine.low %v2245_v5, %v2249_v8  ;;  %v12228_v29 = vpop.f32.mrf.mxu0 }
 0x70f   :  { %9045 = vmatprep.subr.bf16.mxu0 %v10499_v40  ;;  %9088 = vmatprep.subr.bf16.mxu1 %v10627_v24  ;;  %v2113_v52 = vld [vmem:[#allocation2 + $0x1338] sm:$0xff]  ;;  %v10594_v24 = vcombine.low %v2117_v59, %v2121_v3 }
 0x710   :  { %v2237_v21 = vld [vmem:[#allocation2 + $0x1718] sm:$0xff]  ;;  %v10587_v23 = vcombine.high %v2109_v35, %v2113_v52  ;;  %v10586_v42 = vcombine.low %v2109_v35, %v2113_v52 }
 0x711   :  { %v2241_v40 = vld [vmem:[#allocation2 + $0x1738] sm:$0xff] }
 0x712   :  { %9046 = vmatpush1.bf16.msra.mxu0 %v10498_v30  ;;  %9089 = vmatpush1.bf16.msra.mxu1 %v10626_v1  ;;  %v10715_v30 = vcombine.high %v2237_v21, %v2241_v40  ;;  %v2101_v1 = vld [vmem:[#allocation2 + $0x12d8] sm:$0xff]  ;;  %v10714_v47 = vcombine.low %v2237_v21, %v2241_v40 }
 0x713   :  { %9047 = vmatprep.subr.bf16.mxu0 %v10491_v37  ;;  %9090 = vmatprep.subr.bf16.mxu1 %v10619_v38  ;;  %v2105_v37 = vld [vmem:[#allocation2 + $0x12f8] sm:$0xff] }
 0x714   :  { %v2229_v38 = vld [vmem:[#allocation2 + $0x16d8] sm:$0xff] }
 0x715   :  { %v2233_v41 = vld [vmem:[#allocation2 + $0x16f8] sm:$0xff] }
 0x716   :  { %9048 = vmatpush1.bf16.msra.mxu0 %v10490_v48  ;;  %9091 = vmatpush1.bf16.msra.mxu1 %v10618_v43  ;;  %v10579_v48 = vcombine.high %v2101_v1, %v2105_v37  ;;  %v12232_v43 = vpop.f32.mrf.mxu0  ;;  %v2097_v49 = vld [vmem:[#allocation2 + $0x12b8] sm:$0xff] }
 0x717   :  { %9049 = vmatprep.subr.bf16.mxu0 %v10611_v45  ;;  %9092 = vmatprep.subr.bf16.mxu1 %v10739_v44  ;;  %v10707_v45 = vcombine.high %v2229_v38, %v2233_v41  ;;  %v2093_v44 = vld [vmem:[#allocation2 + $0x1298] sm:$0xff] }
 0x718   :  { %v2221_v53 = vld [vmem:[#allocation2 + $0x1698] sm:$0xff] }
 0x719   :  { %v2225_v54 = vld [vmem:[#allocation2 + $0x16b8] sm:$0xff] }
 0x71a   :  { %9050 = vmatpush2.bf16.msra.mxu0 %v10610_v58  ;;  %9093 = vmatpush2.bf16.msra.mxu1 %v10738_v56  ;;  %v10578_v58 = vcombine.low %v2101_v1, %v2105_v37  ;;  %v10706_v56 = vcombine.low %v2229_v38, %v2233_v41  ;;  %v10699_v59 = vcombine.high %v2221_v53, %v2225_v54  ;;  %v2085_v3 = vld [vmem:[#allocation2 + $0x1258] sm:$0xff] }
 0x71b   :  { %9051 = vmatprep.subr.bf16.mxu0 %v10603_v63  ;;  %9094 = vmatprep.subr.bf16.mxu1 %v10731_v0  ;;  %v10571_v63 = vcombine.high %v2093_v44, %v2097_v49  ;;  %v12236_v0 = vpop.f32.mrf.mxu0  ;;  %v2089_v5 = vld [vmem:[#allocation2 + $0x1278] sm:$0xff]  ;;  %v10698_v35 = vcombine.low %v2221_v53, %v2225_v54 }
 0x71c   :  { %v2213_v8 = vld [vmem:[#allocation2 + $0x1658] sm:$0xff]  ;;  %v10563_v52 = vcombine.high %v2085_v3, %v2089_v5  ;;  %v10562_v37 = vcombine.low %v2085_v3, %v2089_v5 }
 0x71d   :  { %v2077_v40 = vld [vmem:[#allocation2 + $0x1218] sm:$0xff] }
 0x71e   :  { %9052 = vmatpush2.bf16.msra.mxu0 %v10602_v11  ;;  %9095 = vmatpush2.bf16.msra.mxu1 %v10730_v19  ;;  %v2217_v11 = vld [vmem:[#allocation2 + $0x1678] sm:$0xff]  ;;  %v12238_v19 = vpop.f32.mrf.mxu1 }
 0x71f   :  { %9053 = vmatprep.subr.bf16.mxu0 %v10595_v26  ;;  %9096 = vmatprep.subr.bf16.mxu1 %v10723_v14  ;;  %12487 = vst [vmem:[#allocation48_spill] sm:$0xff] %v12238_v19  ;;  %v12240_v26 = vpop.f32.mrf.mxu0  ;;  %v10570_v14 = vcombine.low %v2093_v44, %v2097_v49  ;;  %v10691_v21 = vcombine.high %v2213_v8, %v2217_v11  ;;  %v2453_v44 = vld [vmem:[#allocation2 + $0x1dd8] sm:$0xff] }
 0x720   :  { %12488 = vst [vmem:[#allocation49_spill] sm:$0xff] %v12240_v26  ;;  %v10690_v38 = vcombine.low %v2213_v8, %v2217_v11  ;;  %v2457_v49 = vld [vmem:[#allocation2 + $0x1df8] sm:$0xff] }
 0x721   :  { %v12244_v1 = vpop.f32.mrf.mxu0  ;;  %v2317_v3 = vld [vmem:[#allocation2 + $0x1998] sm:$0xff] }
 0x722   :  { %9054 = vmatpush2.bf16.msra.mxu0 %v10594_v24  ;;  %9097 = vmatpush2.bf16.msra.mxu1 %v10722_v20  ;;  %v2081_v24 = vld [vmem:[#allocation2 + $0x1238] sm:$0xff] }
 0x723   :  { %9055 = vmatprep.subr.bf16.mxu0 %v10587_v23  ;;  %9098 = vmatprep.subr.bf16.mxu1 %v10715_v30  ;;  %v2205_v20 = vld [vmem:[#allocation2 + $0x1618] sm:$0xff]  ;;  %v12242_v30 = vpop.f32.mrf.mxu1  ;;  %v10555_v41 = vcombine.high %v2077_v40, %v2081_v24  ;;  %v12248_v53 = vpop.f32.mrf.mxu0  ;;  %v10554_v54 = vcombine.low %v2077_v40, %v2081_v24 }
 0x724   :  { %v2209_v23 = vld [vmem:[#allocation2 + $0x1638] sm:$0xff]  ;;  %12490 = vst [vmem:[#allocation51_spill] sm:$0xff] %v12248_v53 }
 0x725   :  { %v2321_v5 = vld [vmem:[#allocation2 + $0x19b8] sm:$0xff] }
 0x726   :  { %9056 = vmatpush2.bf16.msra.mxu0 %v10586_v42  ;;  %9099 = vmatpush2.bf16.msra.mxu1 %v10714_v47  ;;  %v12246_v42 = vpop.f32.mrf.mxu1  ;;  %v10683_v47 = vcombine.high %v2205_v20, %v2209_v23  ;;  %v2445_v8 = vld [vmem:[#allocation2 + $0x1d98] sm:$0xff] }
 0x727   :  { %9057 = vmatprep.subr.bf16.mxu0 %v10579_v48  ;;  %9100 = vmatprep.subr.bf16.mxu1 %v10707_v45  ;;  %12489 = vst [vmem:[#allocation50_spill] sm:$0xff] %v12246_v42  ;;  %v2325_v48 = vld [vmem:[#allocation2 + $0x19d8] sm:$0xff] }
 0x728   :  { %v2329_v45 = vld [vmem:[#allocation2 + $0x19f8] sm:$0xff] }
 0x729   :  { %v2449_v11 = vld [vmem:[#allocation2 + $0x1db8] sm:$0xff] }
 0x72a   :  { %9058 = vmatpush2.bf16.msra.mxu0 %v10578_v58  ;;  %9101 = vmatpush2.bf16.msra.mxu1 %v10706_v56  ;;  %v10682_v58 = vcombine.low %v2205_v20, %v2209_v23  ;;  %v10803_v56 = vcombine.high %v2325_v48, %v2329_v45  ;;  %v10923_v20 = vcombine.high %v2445_v8, %v2449_v11  ;;  %v2309_v23 = vld [vmem:[#allocation2 + $0x1958] sm:$0xff] }
 0x72b   :  { %9059 = vmatprep.subr.bf16.mxu0 %v10571_v63  ;;  %9102 = vmatprep.subr.bf16.mxu1 %v10699_v59  ;;  %v12250_v63 = vpop.f32.mrf.mxu1  ;;  %v10931_v59 = vcombine.high %v2453_v44, %v2457_v49  ;;  %v2365_v19 = vld [vmem:[#allocation2 + $0x1b18] sm:$0xff] }
 0x72d   :  { %v12254_v40 = vpop.f32.mrf.mxu1 }
 0x72e   :  { %9060 = vmatpush2.bf16.msra.mxu0 %v10570_v14  ;;  %9103 = vmatpush2.bf16.msra.mxu1 %v10698_v35  ;;  %v12252_v14 = vpop.f32.mrf.mxu0  ;;  %v10802_v35 = vcombine.low %v2325_v48, %v2329_v45  ;;  %12491 = vst [vmem:[#allocation52_spill] sm:$0xff] %v12254_v40  ;;  %v10922_v48 = vcombine.low %v2445_v8, %v2449_v11 }
 0x72f   :  { %9061 = vmatprep.subr.bf16.mxu0 %v10563_v52  ;;  %9104 = vmatprep.subr.bf16.mxu1 %v10691_v21  ;;  %v10930_v52 = vcombine.low %v2453_v44, %v2457_v49  ;;  %v10795_v21 = vcombine.high %v2317_v3, %v2321_v5  ;;  %v12260_v44 = vpop.f32.mrf.mxu1 }
 0x730   :  { %v12256_v24 = vpop.f32.mrf.mxu0 }
 0x731   :  { %12492 = vst [vmem:[#allocation53_spill] sm:$0xff] %v12256_v24 }
 0x732   :  { %9062 = vmatpush2.bf16.msra.mxu0 %v10562_v37  ;;  %9105 = vmatpush2.bf16.msra.mxu1 %v10690_v38  ;;  %v2313_v37 = vld [vmem:[#allocation2 + $0x1978] sm:$0xff]  ;;  %v12262_v49 = vpop.f32.mrf.mxu0 }
 0x733   :  { %9063 = vmatprep.subr.bf16.mxu0 %v10555_v41  ;;  %9106 = vmatprep.subr.bf16.mxu1 %v10683_v47  ;;  %v2437_v38 = vld [vmem:[#allocation2 + $0x1d58] sm:$0xff]  ;;  %v10794_v47 = vcombine.low %v2317_v3, %v2321_v5  ;;  %v10787_v45 = vcombine.high %v2309_v23, %v2313_v37  ;;  %v10786_v3 = vcombine.low %v2309_v23, %v2313_v37 }
 0x734   :  { %v2441_v41 = vld [vmem:[#allocation2 + $0x1d78] sm:$0xff]  ;;  %v12268_v11 = vpop.f32.mrf.mxu0 }
 0x735   :  { %v10914_v5 = vcombine.low %v2437_v38, %v2441_v41  ;;  %12494 = vst [vmem:[#allocation55_spill] sm:$0xff] %v12268_v11 }
 0x736   :  { %9064 = vmatpush2.bf16.msra.mxu0 %v10554_v54  ;;  %9107 = vmatpush2.bf16.msra.mxu1 %v10682_v58  ;;  %v10915_v54 = vcombine.high %v2437_v38, %v2441_v41  ;;  %v2301_v58 = vld [vmem:[#allocation2 + $0x1918] sm:$0xff]  ;;  %v12272_v37 = vpop.f32.mrf.mxu0 }
 0x737   :  { %9119 = vmatprep.subr.bf16.mxu0 %v10803_v56  ;;  %9162 = vmatprep.subr.bf16.mxu1 %v10931_v59  ;;  %v2305_v56 = vld [vmem:[#allocation2 + $0x1938] sm:$0xff] }
 0x738   :  { %v2433_v59 = vld [vmem:[#allocation2 + $0x1d38] sm:$0xff]  ;;  %v10779_v8 = vcombine.high %v2301_v58, %v2305_v56  ;;  %v12276_v62 = vpop.f32.mrf.mxu0 }
 0x739   :  { %9066 = vmatmul.mubr.bf16.vlgmr.msra.gmra.mxu0 %v12112_v31  ;;  %9109 = vmatmul.mubr.bf16.vlgmr.msra.gmra.mxu1 %v12114_v36  ;;  %v2429_v31 = vld [vmem:[#allocation2 + $0x1d18] sm:$0xff]  ;;  %v12266_v36 = vpop.f32.mrf.mxu1  ;;  %12496 = vst [vmem:[#allocation57_spill] sm:$0xff] %v12276_v62 }
 0x73a   :  { %9120 = vmatpush1.bf16.msra.mxu0 %v10802_v35  ;;  %9163 = vmatpush1.bf16.msra.mxu1 %v10930_v52  ;;  %12493 = vst [vmem:[#allocation54_spill] sm:$0xff] %v12266_v36  ;;  %v10907_v35 = vcombine.high %v2429_v31, %v2433_v59  ;;  %v2293_v52 = vld [vmem:[#allocation2 + $0x18d8] sm:$0xff]  ;;  %v12280_v36 = vpop.f32.mrf.mxu0 }
 0x73b   :  { %9121 = vmatprep.subr.bf16.mxu0 %v10795_v21  ;;  %9164 = vmatprep.subr.bf16.mxu1 %v10923_v20  ;;  %v2297_v21 = vld [vmem:[#allocation2 + $0x18f8] sm:$0xff]  ;;  %v12270_v7 = vpop.f32.mrf.mxu1 }
 0x73c   :  { %9151 = vmatprep.mubr.bf16.mxu0 %v12116_v46  ;;  %9194 = vmatprep.mubr.bf16.mxu1 %v12119_v51  ;;  %v2421_v20 = vld [vmem:[#allocation2 + $0x1cd8] sm:$0xff]  ;;  %v10778_v51 = vcombine.low %v2301_v58, %v2305_v56  ;;  %v10771_v23 = vcombine.high %v2293_v52, %v2297_v21  ;;  %v10770_v15 = vcombine.low %v2293_v52, %v2297_v21  ;;  %v12284_v62 = vpop.f32.mrf.mxu0 }
 0x73d   :  { %v2425_v46 = vld [vmem:[#allocation2 + $0x1cf8] sm:$0xff]  ;;  %v12274_v10 = vpop.f32.mrf.mxu1  ;;  %12498 = vst [vmem:[#allocation59_spill] sm:$0xff] %v12284_v62 }
 0x73e   :  { %9122 = vmatpush1.bf16.msra.mxu0 %v10794_v47  ;;  %9165 = vmatpush1.bf16.msra.mxu1 %v10922_v48  ;;  %v10906_v47 = vcombine.low %v2429_v31, %v2433_v59  ;;  %v10899_v38 = vcombine.high %v2421_v20, %v2425_v46  ;;  %v2285_v41 = vld [vmem:[#allocation2 + $0x1898] sm:$0xff]  ;;  %12495 = vst [vmem:[#allocation56_spill] sm:$0xff] %v12274_v10 }
 0x73f   :  { %9123 = vmatprep.subr.bf16.mxu0 %v10787_v45  ;;  %9166 = vmatprep.subr.bf16.mxu1 %v10915_v54  ;;  %v2289_v48 = vld [vmem:[#allocation2 + $0x18b8] sm:$0xff]  ;;  %v10898_v58 = vcombine.low %v2421_v20, %v2425_v46 }
 0x740   :  { %v2413_v45 = vld [vmem:[#allocation2 + $0x1c98] sm:$0xff]  ;;  %v10763_v56 = vcombine.high %v2285_v41, %v2289_v48  ;;  %v10762_v10 = vcombine.low %v2285_v41, %v2289_v48 }
 0x741   :  { %v2417_v54 = vld [vmem:[#allocation2 + $0x1cb8] sm:$0xff] }
 0x742   :  { %9124 = vmatpush1.bf16.msra.mxu0 %v10786_v3  ;;  %9167 = vmatpush1.bf16.msra.mxu1 %v10914_v5  ;;  %v10891_v31 = vcombine.high %v2413_v45, %v2417_v54  ;;  %v2277_v59 = vld [vmem:[#allocation2 + $0x1858] sm:$0xff] }
 0x743   :  { %9125 = vmatprep.subr.bf16.mxu0 %v10779_v8  ;;  %9168 = vmatprep.subr.bf16.mxu1 %v10907_v35  ;;  %v2281_v3 = vld [vmem:[#allocation2 + $0x1878] sm:$0xff]  ;;  %v12278_v35 = vpop.f32.mrf.mxu1 }
 0x744   :  { %v2405_v5 = vld [vmem:[#allocation2 + $0x1c58] sm:$0xff]  ;;  %v10755_v52 = vcombine.high %v2277_v59, %v2281_v3  ;;  %v10754_v24 = vcombine.low %v2277_v59, %v2281_v3 }
 0x745   :  { %v2409_v8 = vld [vmem:[#allocation2 + $0x1c78] sm:$0xff]  ;;  %v12282_v21 = vpop.f32.mrf.mxu1 }
 0x746   :  { %9126 = vmatpush1.bf16.msra.mxu0 %v10778_v51  ;;  %9169 = vmatpush1.bf16.msra.mxu1 %v10906_v47  ;;  %v10890_v51 = vcombine.low %v2413_v45, %v2417_v54  ;;  %12497 = vst [vmem:[#allocation58_spill] sm:$0xff] %v12282_v21  ;;  %v10883_v20 = vcombine.high %v2405_v5, %v2409_v8  ;;  %v2269_v46 = vld [vmem:[#allocation2 + $0x1818] sm:$0xff]  ;;  %v12288_v21 = vpop.f32.mrf.mxu0 }
 0x747   :  { %9127 = vmatprep.subr.bf16.mxu0 %v10771_v23  ;;  %9170 = vmatprep.subr.bf16.mxu1 %v10899_v38  ;;  %v2273_v47 = vld [vmem:[#allocation2 + $0x1838] sm:$0xff]  ;;  %v12286_v48 = vpop.f32.mrf.mxu1 }
 0x748   :  { %v2397_v23 = vld [vmem:[#allocation2 + $0x1c18] sm:$0xff]  ;;  %v10747_v41 = vcombine.high %v2269_v46, %v2273_v47  ;;  %v10746_v11 = vcombine.low %v2269_v46, %v2273_v47 }
 0x749   :  { %v2401_v38 = vld [vmem:[#allocation2 + $0x1c38] sm:$0xff]  ;;  %v12290_v3 = vpop.f32.mrf.mxu1 }
 0x74a   :  { %9128 = vmatpush1.bf16.msra.mxu0 %v10770_v15  ;;  %9171 = vmatpush1.bf16.msra.mxu1 %v10898_v58  ;;  %v10882_v15 = vcombine.low %v2405_v5, %v2409_v8  ;;  %v10875_v45 = vcombine.high %v2397_v23, %v2401_v38  ;;  %v2389_v54 = vld [vmem:[#allocation2 + $0x1bd8] sm:$0xff]  ;;  %12499 = vst [vmem:[#allocation60_spill] sm:$0xff] %v12290_v3  ;;  %v12292_v5 = vpop.f32.mrf.mxu0 }
 0x74b   :  { %9129 = vmatprep.subr.bf16.mxu0 %v10763_v56  ;;  %9172 = vmatprep.subr.bf16.mxu1 %v10891_v31  ;;  %v2393_v58 = vld [vmem:[#allocation2 + $0x1bf8] sm:$0xff]  ;;  %12500 = vst [vmem:[#allocation61_spill] sm:$0xff] %v12292_v5 }
 0x74c   :  { %v2517_v56 = vld [vmem:[#allocation2 + $0x1fd8] sm:$0xff]  ;;  %v10867_v59 = vcombine.high %v2389_v54, %v2393_v58  ;;  %v10866_v42 = vcombine.low %v2389_v54, %v2393_v58  ;;  %v12503_v58 = vsub.s32 3, %v12053_v60 }
 0x74d   :  { %v2521_v31 = vld [vmem:[#allocation2 + $0x1ff8] sm:$0xff] }
 0x74e   :  { %9130 = vmatpush1.bf16.msra.mxu0 %v10762_v10  ;;  %9173 = vmatpush1.bf16.msra.mxu1 %v10890_v51  ;;  %v10874_v10 = vcombine.low %v2397_v23, %v2401_v38  ;;  %v10995_v8 = vcombine.high %v2517_v56, %v2521_v31  ;;  %v2381_v51 = vld [vmem:[#allocation2 + $0x1b98] sm:$0xff]  ;;  %v12501_v23 = vsub.s32 1, %v12053_v60 }
 0x74f   :  { %9131 = vmatprep.subr.bf16.mxu0 %v10755_v52  ;;  %9174 = vmatprep.subr.bf16.mxu1 %v10883_v20  ;;  %v2385_v52 = vld [vmem:[#allocation2 + $0x1bb8] sm:$0xff] }
 0x750   :  { %v2509_v20 = vld [vmem:[#allocation2 + $0x1f98] sm:$0xff]  ;;  %v10859_v46 = vcombine.high %v2381_v51, %v2385_v52 }
 0x751   :  { %v2513_v62 = vld [vmem:[#allocation2 + $0x1fb8] sm:$0xff] }
 0x752   :  { %9132 = vmatpush1.bf16.msra.mxu0 %v10754_v24  ;;  %9175 = vmatpush1.bf16.msra.mxu1 %v10882_v15  ;;  %v10994_v24 = vcombine.low %v2517_v56, %v2521_v31  ;;  %v12294_v47 = vld [vmem:[#allocation22] sm:$0xff]  ;;  %v12299_v15 = vpop.f32.mrf.mxu1 }
 0x753   :  { %9133 = vmatprep.subr.bf16.mxu0 %v10747_v41  ;;  %9176 = vmatprep.subr.bf16.mxu1 %v10875_v45  ;;  %v2676_v38 = vrot.slane %v12294_v47, %v12501_v23  ;;  %v12301_v41 = vpop.f32.mrf.mxu0  ;;  %v10987_v45 = vcombine.high %v2509_v20, %v2513_v62  ;;  %v2373_v5 = vld [vmem:[#allocation2 + $0x1b58] sm:$0xff]  ;;  %v2684_v56 = vrot.slane %v12294_v47, %v12503_v58 }
 0x754   :  { %12502 = vst [vmem:[#allocation62_spill] sm:$0xff] %v12301_v41  ;;  %v2377_v3 = vld [vmem:[#allocation2 + $0x1b78] sm:$0xff]  ;;  %v12306_v31 = vpop.f32.mrf.mxu1  ;;  %v10986_v23 = vcombine.low %v2509_v20, %v2513_v62 }
 0x755   :  { %v2505_v54 = vld [vmem:[#allocation2 + $0x1f78] sm:$0xff]  ;;  %12504 = vst [vmem:[#allocation63_spill] sm:$0xff] %v12306_v31  ;;  %v10851_v40 = vcombine.high %v2373_v5, %v2377_v3  ;;  %v8214_v26 = vadd.f32 %v12236_v0, %v2684_v56  ;;  %v12311_v53 = vpop.f32.mrf.mxu0 }
 0x756   :  { %9134 = vmatpush1.bf16.msra.mxu0 %v10746_v11  ;;  %9177 = vmatpush1.bf16.msra.mxu1 %v10874_v10  ;;  %v2501_v11 = vld [vmem:[#allocation2 + $0x1f58] sm:$0xff]  ;;  %v10858_v10 = vcombine.low %v2381_v51, %v2385_v52  ;;  %v12314_v51 = vpop.f32.mrf.mxu1 }
 0x757   :  { %9135 = vmatprep.subr.bf16.mxu0 %v10867_v59  ;;  %9178 = vmatprep.subr.bf16.mxu1 %v10995_v8  ;;  %v7870_v59 = vadd.f32 %v12142_v4, %v2676_v38  ;;  %v7866_v8 = vadd.f32 %v12132_v57, %v2676_v38  ;;  %v10979_v16 = vcombine.high %v2501_v11, %v2505_v54  ;;  %v2369_v58 = vld [vmem:[#allocation2 + $0x1b38] sm:$0xff] }
 0x758   :  { %v2493_v41 = vld [vmem:[#allocation2 + $0x1f18] sm:$0xff]  ;;  %v10850_v4 = vcombine.low %v2373_v5, %v2377_v3  ;;  %v10978_v57 = vcombine.low %v2501_v11, %v2505_v54  ;;  %v10843_v0 = vcombine.high %v2365_v19, %v2369_v58  ;;  %v8257_v20 = vadd.f32 %v12242_v30, %v8214_v26  ;;  %v12325_v11 = vpop.f32.mrf.mxu1 }
 0x759   :  { %v2497_v31 = vld [vmem:[#allocation2 + $0x1f38] sm:$0xff]  ;;  %v7913_v62 = vadd.f32 %v12144_v9, %v7870_v59  ;;  %v7909_v52 = vadd.f32 %v12136_v2, %v7866_v8  ;;  %v10842_v26 = vcombine.low %v2365_v19, %v2369_v58 }
 0x75a   :  { %9136 = vmatpush2.bf16.msra.mxu0 %v10866_v42  ;;  %9179 = vmatpush2.bf16.msra.mxu1 %v10994_v24  ;;  %v8210_v42 = vadd.f32 %v12228_v29, %v2684_v56  ;;  %v12319_v24 = vpop.f32.mrf.mxu0  ;;  %v2357_v38 = vld [vmem:[#allocation2 + $0x1ad8] sm:$0xff]  ;;  %v8300_v5 = vadd.f32 %v12252_v14, %v8257_v20 }
 0x75b   :  { %9137 = vmatprep.subr.bf16.mxu0 %v10859_v46  ;;  %9180 = vmatprep.subr.bf16.mxu1 %v10987_v45  ;;  %v10971_v46 = vcombine.high %v2493_v41, %v2497_v31  ;;  %v2361_v29 = vld [vmem:[#allocation2 + $0x1af8] sm:$0xff]  ;;  %v7956_v45 = vadd.f32 %v12160_v50, %v7913_v62  ;;  %v7952_v9 = vadd.f32 %v12149_v22, %v7909_v52 }
 0x75c   :  { %v2485_v56 = vld [vmem:[#allocation2 + $0x1ed8] sm:$0xff]  ;;  %v12327_v2 = vpop.f32.mrf.mxu0  ;;  %v10835_v30 = vcombine.high %v2357_v38, %v2361_v29  ;;  %v8343_v8 = vadd.f32 %v12260_v44, %v8300_v5 }
 0x75d   :  { %v2489_v3 = vld [vmem:[#allocation2 + $0x1ef8] sm:$0xff] }
 0x75e   :  { %9138 = vmatpush2.bf16.msra.mxu0 %v10858_v10  ;;  %9181 = vmatpush2.bf16.msra.mxu1 %v10986_v23  ;;  %v10963_v54 = vcombine.high %v2485_v56, %v2489_v3  ;;  %v2349_v10 = vld [vmem:[#allocation2 + $0x1a98] sm:$0xff]  ;;  %v7995_v23 = vadd.f32 %v12153_v27, %v7952_v9  ;;  %v12335_v19 = vpop.f32.mrf.mxu0 }
 0x75f   :  { %9139 = vmatprep.subr.bf16.mxu0 %v10851_v40  ;;  %9182 = vmatprep.subr.bf16.mxu1 %v10979_v16  ;;  %v8253_v40 = vadd.f32 %v12234_v18, %v8210_v42  ;;  %v10970_v16 = vcombine.low %v2493_v41, %v2497_v31  ;;  %v2353_v22 = vld [vmem:[#allocation2 + $0x1ab8] sm:$0xff]  ;;  %v7999_v18 = vadd.f32 %v12162_v55, %v7956_v45  ;;  %v12333_v42 = vpop.f32.mrf.mxu1 }
 0x760   :  { %v2477_v59 = vld [vmem:[#allocation2 + $0x1e98] sm:$0xff]  ;;  %v10834_v41 = vcombine.low %v2357_v38, %v2361_v29  ;;  %v10962_v31 = vcombine.low %v2485_v56, %v2489_v3  ;;  %v10827_v58 = vcombine.high %v2349_v10, %v2353_v22  ;;  %v10826_v38 = vcombine.low %v2349_v10, %v2353_v22 }
 0x761   :  { %v8296_v50 = vadd.f32 %v12244_v1, %v8253_v40  ;;  %v2481_v14 = vld [vmem:[#allocation2 + $0x1eb8] sm:$0xff]  ;;  %v8042_v1 = vadd.f32 %v12178_v61, %v7999_v18  ;;  %v12340_v62 = vpop.f32.mrf.mxu1 }
 0x762   :  { %9140 = vmatpush2.bf16.msra.mxu0 %v10850_v4  ;;  %9183 = vmatpush2.bf16.msra.mxu1 %v10978_v57  ;;  %v8386_v4 = vadd.f32 %v12272_v37, %v8343_v8  ;;  %v10955_v27 = vcombine.high %v2477_v59, %v2481_v14  ;;  %v2341_v44 = vld [vmem:[#allocation2 + $0x1a58] sm:$0xff]  ;;  %v10954_v37 = vcombine.low %v2477_v59, %v2481_v14 }
 0x763   :  { %9141 = vmatprep.subr.bf16.mxu0 %v10843_v0  ;;  %9184 = vmatprep.subr.bf16.mxu1 %v10971_v46  ;;  %v8339_v55 = vadd.f32 %v12250_v63, %v8296_v50  ;;  %v2345_v57 = vld [vmem:[#allocation2 + $0x1a78] sm:$0xff]  ;;  %v8038_v0 = vadd.f32 %v12167_v12, %v7995_v23  ;;  %v12344_v46 = vpop.f32.mrf.mxu0  ;;  %v8085_v63 = vadd.f32 %v12180_v6, %v8042_v1  ;;  %v12348_v56 = vpop.f32.mrf.mxu1 }
 0x764   :  { %v2469_v52 = vld [vmem:[#allocation2 + $0x1e58] sm:$0xff]  ;;  %v10819_v29 = vcombine.high %v2341_v44, %v2345_v57  ;;  %v8429_v45 = vadd.f32 %v12278_v35, %v8386_v4  ;;  %v10818_v35 = vcombine.low %v2341_v44, %v2345_v57 }
 0x765   :  { %v2473_v20 = vld [vmem:[#allocation2 + $0x1e78] sm:$0xff]  ;;  %v8382_v61 = vadd.f32 %v12262_v49, %v8339_v55  ;;  %v8081_v49 = vadd.f32 %v12171_v17, %v8038_v0  ;;  %v8128_v40 = vadd.f32 %v12222_v13, %v8085_v63  ;;  %v12358_v22 = vpop.f32.mrf.mxu1 }
 0x766   :  { %9142 = vmatpush2.bf16.msra.mxu0 %v10842_v26  ;;  %9185 = vmatpush2.bf16.msra.mxu1 %v10970_v16  ;;  %v10947_v12 = vcombine.high %v2469_v52, %v2473_v20  ;;  %v2333_v3 = vld [vmem:[#allocation2 + $0x1a18] sm:$0xff]  ;;  %v8472_v16 = vadd.f32 %v12288_v21, %v8429_v45 }
 0x767   :  { %9143 = vmatprep.subr.bf16.mxu0 %v10835_v30  ;;  %9186 = vmatprep.subr.bf16.mxu1 %v10963_v54  ;;  %v2337_v9 = vld [vmem:[#allocation2 + $0x1a38] sm:$0xff]  ;;  %v8425_v6 = vadd.f32 %v12270_v7, %v8382_v61  ;;  %v12354_v30 = vpop.f32.mrf.mxu0  ;;  %v8124_v50 = vadd.f32 %v12185_v28, %v8081_v49  ;;  %v10946_v54 = vcombine.low %v2469_v52, %v2473_v20  ;;  %v12366_v8 = vpop.f32.mrf.mxu1 }
 0x768   :  { %v2461_v5 = vld [vmem:[#allocation2 + $0x1e18] sm:$0xff]  ;;  %v10811_v10 = vcombine.high %v2333_v3, %v2337_v9  ;;  %v8171_v21 = vadd.f32 %v12226_v25, %v8128_v40  ;;  %v8515_v18 = vadd.f32 %v12299_v15, %v8472_v16  ;;  %v10810_v59 = vcombine.low %v2333_v3, %v2337_v9  ;;  %v11428_v3 = vld [vmem:[#allocation24 + $0x68] sm:$0xff]  }
 0x769   :  { %v2465_v26 = vld [vmem:[#allocation2 + $0x1e38] sm:$0xff]  ;;  %v8468_v17 = vadd.f32 %v12280_v36, %v8425_v6  ;;  %v12360_v13 = vpop.f32.mrf.mxu0  ;;  %v8167_v28 = vadd.f32 %v12187_v32, %v8124_v50  ;;  %v2691_v25 = vsub.s32 5, %v12053_v60 }
 0x76a   :  { %9144 = vmatpush2.bf16.msra.mxu0 %v10834_v41  ;;  %9187 = vmatpush2.bf16.msra.mxu1 %v10962_v31  ;;  %v10939_v7 = vcombine.high %v2461_v5, %v2465_v26  ;;  %v10938_v14 = vcombine.low %v2461_v5, %v2465_v26  ;;  %v11420_v23 = vld [vmem:[#allocation24 + $0x78] sm:$0xff]   ;;  %v9214_v31 = vmax.f32 %v8171_v21, 0.0  ;;  %v9216_v15 = vmax.f32 %v8515_v18, 0.0  ;;  %v11424_v0 = vld [vmem:[#allocation24 + $0x70] sm:$0xff]   ;;  %v12507_v5 = vld [vmem:[#allocation48_spill] sm:$0xff] }
 0x76b   :  { %9145 = vmatprep.subr.bf16.mxu0 %v10827_v58  ;;  %9188 = vmatprep.subr.bf16.mxu1 %v10955_v27  ;;  %v8511_v36 = vadd.f32 %v12286_v48, %v8468_v17  ;;  %v12368_v41 = vpop.f32.mrf.mxu0  ;;  %v11421_v1 = vld [vmem:[#allocation24 + $0xf8] sm:$0xff]   ;;  %v12371_v58 = vpop.f32.mrf.mxu1  ;;  %v9206_v55 = vmax.f32 %v8167_v28, 0.0  ;;  %v12505_v48 = vsub.s32 2, %v12053_v60  ;;  %v2692_v20 = vrot.slane %v12294_v47, %v2691_v25  ;;  %v11425_v61 = vld [vmem:[#allocation24 + $0xf0] sm:$0xff]   ;;  %v12511_v25 = vld [vmem:[#allocation52_spill] sm:$0xff] }
 0x76c   :  { %v11422_v32 = vld [vmem:[#allocation24 + $0x38] sm:$0xff]  }
 0x76d   :  { %v11423_v4 = vld [vmem:[#allocation24 + $0xb8] sm:$0xff]   ;;  %v2680_v27 = vrot.slane %v12294_v47, %v12505_v48  ;;  %v9208_v44 = vmax.f32 %v8511_v36, 0.0  ;;  %v12376_v57 = vpop.f32.mrf.mxu0  ;;  %v9222_v52 = vpack.c.bf16 %v9214_v31, %v9206_v55  ;;  %v8558_v45 = vadd.f32 %v12319_v24, %v2692_v20  ;;  %v11430_v24 = vld [vmem:[#allocation24 + $0x28] sm:$0xff]  }
 0x76e   :  { %9146 = vmatpush2.bf16.msra.mxu0 %v10826_v38  ;;  %9189 = vmatpush2.bf16.msra.mxu1 %v10954_v37  ;;  %v12381_v37 = vpop.f32.mrf.mxu1  ;;  %v12508_v50 = vld [vmem:[#allocation47_spill] sm:$0xff]  ;;  %v12512_v55 = vld [vmem:[#allocation50_spill] sm:$0xff] }
 0x76f   :  { %9147 = vmatprep.subr.bf16.mxu0 %v10819_v29  ;;  %9190 = vmatprep.subr.bf16.mxu1 %v10947_v12  ;;  %v8212_v38 = vadd.f32 %v12232_v43, %v2680_v27  ;;  %v9224_v63 = vpack.c.bf16 %v9216_v15, %v9208_v44  ;;  %v11426_v29 = vld [vmem:[#allocation24 + $0x30] sm:$0xff]   ;;  %v8208_v9 = vadd.f32 %v12224_v34, %v2680_v27  ;;  %v8729_v49 = vpop.f32.mrf.mxu0  ;;  %v11431_v34 = vld [vmem:[#allocation24 + $0xa8] sm:$0xff]   ;;  %v11436_v31 = vld [vmem:[#allocation24 + $0x58] sm:$0xff]  }
 0x770   :  { %v11427_v12 = vld [vmem:[#allocation24 + $0xb0] sm:$0xff]   ;;  %v8601_v16 = vadd.f32 %v12333_v42, %v8558_v45  ;;  %v11434_v42 = vld [vmem:[#allocation24 + $0x20] sm:$0xff]  }
 0x771   :  { %v12506_v43 = vld [vmem:[#allocation62_spill] sm:$0xff]  ;;  %v8255_v26 = vadd.f32 %v12507_v5, %v8212_v38  ;;  %v12390_v6 = vpop.f32.mrf.mxu0  ;;  %v12513_v48 = vld [vmem:[#allocation55_spill] sm:$0xff]  ;;  %v12514_v38 = vld [vmem:[#allocation53_spill] sm:$0xff] }
 0x772   :  { %9148 = vmatpush2.bf16.msra.mxu0 %v10818_v35  ;;  %9191 = vmatpush2.bf16.msra.mxu1 %v10946_v54  ;;  %v8554_v40 = vadd.f32 %v12506_v43, %v2692_v20  ;;  %v11432_v35 = vld [vmem:[#allocation24 + $0x60] sm:$0xff]   ;;  %v8251_v54 = vadd.f32 %v12508_v50, %v8208_v9  ;;  %v8644_v18 = vadd.f32 %v12354_v30, %v8601_v16  ;;  %v11439_v20 = vld [vmem:[#allocation24 + $0x98] sm:$0xff]   ;;  %v12518_v50 = vld [vmem:[#allocation57_spill] sm:$0xff] }
 0x773   :  { %9149 = vmatprep.subr.bf16.mxu0 %v10811_v10  ;;  %9192 = vmatprep.subr.bf16.mxu1 %v10939_v7  ;;  %v12509_v10 = vld [vmem:[#allocation51_spill] sm:$0xff] }
 0x774   :  { %v8298_v17 = vadd.f32 %v12509_v10, %v8255_v26  ;;  %v11433_v7 = vld [vmem:[#allocation24 + $0xe0] sm:$0xff]   ;;  %v8597_v21 = vadd.f32 %v12314_v51, %v8554_v40  ;;  %v11437_v51 = vld [vmem:[#allocation24 + $0xd8] sm:$0xff]   ;;  %v8687_v30 = vadd.f32 %v12366_v8, %v8644_v18  ;;  %v11441_v8 = vld [vmem:[#allocation24 + $0xd0] sm:$0xff]  }
 0x775   :  { %v12516_v40 = vld [vmem:[#allocation54_spill] sm:$0xff]  ;;  %v12517_v26 = vld [vmem:[#allocation59_spill] sm:$0xff]  ;;  %v11446_v10 = vld [vmem:[#allocation24 + $0x8] sm:$0xff]  }
 0x776   :  { %9150 = vmatpush2.bf16.msra.mxu0 %v10810_v59  ;;  %9193 = vmatpush2.bf16.msra.mxu1 %v10938_v14  ;;  %v12510_v59 = vld [vmem:[#allocation49_spill] sm:$0xff]  ;;  %v8640_v36 = vadd.f32 %v12335_v19, %v8597_v21  ;;  %v8341_v15 = vadd.f32 %v12511_v25, %v8298_v17  ;;  %v11438_v19 = vld [vmem:[#allocation24 + $0x18] sm:$0xff]   ;;  %v11448_v21 = vld [vmem:[#allocation24 + $0x40] sm:$0xff]  }
 0x777   :  { %11118 = vmatprep.subr.bf16.mxu0 %v11420_v23  ;;  %11140 = vmatprep.subr.bf16.mxu1 %v11421_v1  ;;  %v8294_v28 = vadd.f32 %v12510_v59, %v8251_v54  ;;  %v8811_v23 = vpop.f32.mrf.mxu0  ;;  %v11435_v1 = vld [vmem:[#allocation24 + $0xa0] sm:$0xff]  }
 0x778   :  { %v8384_v27 = vadd.f32 %v12513_v48, %v8341_v15  ;;  %v12519_v18 = vld [vmem:[#allocation60_spill] sm:$0xff]  ;;  %v11452_v15 = vld [vmem:[#allocation24 + $0x178] sm:$0xff]  }
 0x779   :  { %9152 = vmatmul.mubr.bf16.vlgmr.msra.gmra.mxu0 %v12124_v33  ;;  %9195 = vmatmul.mubr.bf16.vlgmr.msra.gmra.mxu1 %v12128_v39  ;;  %v11429_v33 = vld [vmem:[#allocation24 + $0xe8] sm:$0xff]   ;;  %v12388_v39 = vpop.f32.mrf.mxu1  ;;  %v12405_v44 = vpop.f32.mrf.mxu0  ;;  %v11453_v48 = vld [vmem:[#allocation24 + $0x138] sm:$0xff]  }
 0x77a   :  { %11119 = vmatpush3.bf16.msra.mxu0 %v11422_v32  ;;  %9651 = vmatprep.mubr.bf16.mxu0 %v9222_v52  ;;  %v8730_v52 = vadd.f32 %v8729_v49, %v8687_v30  ;;  %v11444_v49 = vld [vmem:[#allocation24 + $0x48] sm:$0xff]   ;;  %v11468_v30 = vld [vmem:[#allocation24 + $0x1f8] sm:$0xff]  }
 0x77b   :  { %11141 = vmatpush3.bf16.msra.mxu1 %v11423_v4  ;;  %9692 = vmatprep.mubr.bf16.mxu1 %v9224_v63  ;;  %v8772_v14 = vpop.f32.mrf.mxu1  ;;  %v8337_v4 = vadd.f32 %v12512_v55, %v8294_v28  ;;  %v8815_v9 = vpop.f32.mrf.mxu0 }
 0x77c   :  { %11120 = vmatprep.subr.bf16.mxu0 %v11424_v0  ;;  %11142 = vmatprep.subr.bf16.mxu1 %v11425_v61  ;;  %v8683_v0 = vadd.f32 %v12348_v56, %v8640_v36  ;;  %v11440_v61 = vld [vmem:[#allocation24 + $0x50] sm:$0xff]   ;;  %v8773_v43 = vadd.f32 %v8772_v14, %v8730_v52  ;;  %v11449_v14 = vld [vmem:[#allocation24 + $0xc0] sm:$0xff]  }
 0x77d   :  { %v12400_v32 = vpop.f32.mrf.mxu1  ;;  %v8380_v63 = vadd.f32 %v12514_v38, %v8337_v4  ;;  %v11443_v56 = vld [vmem:[#allocation24 + $0x90] sm:$0xff]  }
 0x77e   :  { %11121 = vmatpush3.bf16.msra.mxu0 %v11426_v29  ;;  %v8726_v45 = vadd.f32 %v12368_v41, %v8683_v0  ;;  %v12520_v36 = vld [vmem:[#allocation58_spill] sm:$0xff] }
 0x77f   :  { %11143 = vmatpush3.bf16.msra.mxu1 %v11427_v12  ;;  %11122 = vmatprep.subr.bf16.mxu0 %v11428_v3  ;;  %v8854_v29 = vpop.f32.mrf.mxu1  ;;  %v12515_v12 = vld [vmem:[#allocation56_spill] sm:$0xff]  ;;  %v8423_v5 = vadd.f32 %v12516_v40, %v8380_v63  ;;  %v11454_v0 = vld [vmem:[#allocation24 + $0x170] sm:$0xff]  }
 0x780   :  { %11144 = vmatprep.subr.bf16.mxu1 %v11429_v33  ;;  %v8427_v3 = vadd.f32 %v12515_v12, %v8384_v27  ;;  %v11442_v33 = vld [vmem:[#allocation24 + $0x10] sm:$0xff]   ;;  %v8769_v41 = vadd.f32 %v12381_v37, %v8726_v45  ;;  %v11450_v37 = vld [vmem:[#allocation24] sm:$0xff]  }
 0x781   :  { %v12413_v16 = vpop.f32.mrf.mxu1  ;;  %v8466_v54 = vadd.f32 %v12518_v50, %v8423_v5  ;;  %v12521_v63 = vld [vmem:[#allocation46_spill] sm:$0xff]  ;;  %v12522_v45 = vld [vmem:[#allocation61_spill] sm:$0xff]  ;;  %v11458_v5 = vld [vmem:[#allocation24 + $0x160] sm:$0xff]  }
 0x782   :  { %11123 = vmatpush3.bf16.msra.mxu0 %v11430_v24  ;;  %v8470_v24 = vadd.f32 %v12517_v26, %v8427_v3  ;;  %v8812_v17 = vadd.f32 %v8811_v23, %v8769_v41  ;;  %v11451_v23 = vld [vmem:[#allocation24 + $0x80] sm:$0xff]   ;;  %v11456_v3 = vld [vmem:[#allocation24 + $0x168] sm:$0xff]  }
 0x783   :  { %11145 = vmatpush3.bf16.msra.mxu1 %v11431_v34  ;;  %11124 = vmatprep.subr.bf16.mxu0 %v11432_v35  ;;  %v11445_v34 = vld [vmem:[#allocation24 + $0xc8] sm:$0xff]   ;;  %v8816_v35 = vadd.f32 %v8815_v9, %v8773_v43  ;;  %v8858_v28 = vpop.f32.mrf.mxu1  ;;  %v11471_v9 = vld [vmem:[#allocation24 + $0x1b0] sm:$0xff]   ;;  %v11459_v41 = vld [vmem:[#allocation24 + $0x120] sm:$0xff]  }
 0x784   :  { %11146 = vmatprep.subr.bf16.mxu1 %v11433_v7  ;;  %v11447_v7 = vld [vmem:[#allocation24 + $0x88] sm:$0xff]   ;;  %v8513_v59 = vadd.f32 %v12519_v18, %v8470_v24  ;;  %v8855_v25 = vadd.f32 %v8854_v29, %v8812_v17  ;;  %v11470_v29 = vld [vmem:[#allocation24 + $0x1f0] sm:$0xff]   ;;  %v11475_v50 = vld [vmem:[#allocation24 + $0x1a0] sm:$0xff]  }
 0x785   :  { %v11472_v43 = vld [vmem:[#allocation24 + $0x1e8] sm:$0xff]  }
 0x786   :  { %11125 = vmatpush3.bf16.msra.mxu0 %v11434_v42  ;;  %v8859_v42 = vadd.f32 %v8858_v28, %v8816_v35  ;;  %v11473_v26 = vld [vmem:[#allocation24 + $0x1a8] sm:$0xff]   ;;  %v11460_v35 = vld [vmem:[#allocation24 + $0x158] sm:$0xff]  }
 0x787   :  { %11147 = vmatpush3.bf16.msra.mxu1 %v11435_v1  ;;  %11126 = vmatprep.subr.bf16.mxu0 %v11436_v31  ;;  %v8509_v1 = vadd.f32 %v12520_v36, %v8466_v54  ;;  %v2687_v31 = vsub.s32 4, %v12053_v60 }
 0x788   :  { %11148 = vmatprep.subr.bf16.mxu1 %v11437_v51  ;;  %v9215_v51 = vmax.f32 %v8513_v59, 0.0  ;;  %v9218_v55 = vmax.f32 %v8859_v42, 0.0  ;;  %v11465_v59 = vld [vmem:[#allocation24 + $0x108] sm:$0xff]  }
 0x789   :  { %v9207_v4 = vmax.f32 %v8509_v1, 0.0  ;;  %v2688_v27 = vrot.slane %v12294_v47, %v2687_v31  ;;  %v11477_v1 = vld [vmem:[#allocation24 + $0x198] sm:$0xff]   ;;  %v11481_v31 = vld [vmem:[#allocation24 + $0x188] sm:$0xff]  }
 0x78a   :  { %11127 = vmatpush3.bf16.msra.mxu0 %v11438_v19  ;;  %v9210_v19 = vmax.f32 %v8855_v25, 0.0  ;;  %v11483_v25 = vld [vmem:[#allocation24 + $0x180] sm:$0xff]  }
 0x78b   :  { %11149 = vmatpush3.bf16.msra.mxu1 %v11439_v20  ;;  %11128 = vmatprep.subr.bf16.mxu0 %v11440_v61  ;;  %v9223_v52 = vpack.c.bf16 %v9215_v51, %v9207_v4  ;;  %v11469_v20 = vld [vmem:[#allocation24 + $0x1b8] sm:$0xff]   ;;  %v8556_v61 = vadd.f32 %v12311_v53, %v2688_v27  ;;  %v8552_v12 = vadd.f32 %v12522_v45, %v2688_v27  ;;  %v11457_v53 = vld [vmem:[#allocation24 + $0x128] sm:$0xff]  }
 0x78c   :  { %11150 = vmatprep.subr.bf16.mxu1 %v11441_v8  ;;  %v9226_v38 = vpack.c.bf16 %v9218_v55, %v9210_v19  ;;  %v11455_v8 = vld [vmem:[#allocation24 + $0x130] sm:$0xff]  }
 0x78e   :  { %11129 = vmatpush3.bf16.msra.mxu0 %v11442_v33  ;;  %v8599_v33 = vadd.f32 %v12325_v11, %v8556_v61 }
 0x78f   :  { %11151 = vmatpush3.bf16.msra.mxu1 %v11443_v56  ;;  %11130 = vmatprep.subr.bf16.mxu0 %v11444_v49  ;;  %v12523_v56 = vld [vmem:[#allocation63_spill] sm:$0xff] }
 0x790   :  { %11152 = vmatprep.subr.bf16.mxu1 %v11445_v34  ;;  %v8595_v49 = vadd.f32 %v12523_v56, %v8552_v12  ;;  %v8642_v40 = vadd.f32 %v12344_v46, %v8599_v33  ;;  %v11474_v34 = vld [vmem:[#allocation24 + $0x1e0] sm:$0xff]  }
 0x792   :  { %11131 = vmatpush3.bf16.msra.mxu0 %v11446_v10  ;;  %v8638_v24 = vadd.f32 %v12327_v2, %v8595_v49  ;;  %v8685_v11 = vadd.f32 %v12358_v22, %v8642_v40  ;;  %v11461_v10 = vld [vmem:[#allocation24 + $0x118] sm:$0xff]   ;;  %v11462_v2 = vld [vmem:[#allocation24 + $0x150] sm:$0xff]  }
 0x793   :  { %11153 = vmatpush3.bf16.msra.mxu1 %v11447_v7  ;;  %11132 = vmatprep.subr.bf16.mxu0 %v11448_v21  ;;  %v11463_v22 = vld [vmem:[#allocation24 + $0x110] sm:$0xff]  }
 0x794   :  { %11154 = vmatprep.subr.bf16.mxu1 %v11449_v14  ;;  %v8681_v54 = vadd.f32 %v12340_v62, %v8638_v24  ;;  %v8728_v46 = vadd.f32 %v12376_v57, %v8685_v11  ;;  %v11464_v62 = vld [vmem:[#allocation24 + $0x148] sm:$0xff]  }
 0x796   :  { %11133 = vmatpush3.bf16.msra.mxu0 %v11450_v37  ;;  %v8724_v17 = vadd.f32 %v12360_v13, %v8681_v54  ;;  %v8771_v7 = vadd.f32 %v12388_v39, %v8728_v46  ;;  %v11466_v13 = vld [vmem:[#allocation24 + $0x140] sm:$0xff]   ;;  %v11479_v37 = vld [vmem:[#allocation24 + $0x190] sm:$0xff]  }
 0x797   :  { %11155 = vmatpush3.bf16.msra.mxu1 %v11451_v23  ;;  %11162 = vmatprep.subr.bf16.mxu0 %v11452_v15  ;;  %v11467_v39 = vld [vmem:[#allocation24 + $0x100] sm:$0xff]   ;;  %v8895_v23 = vpop.f32.mrf.mxu0  ;;  %v8938_v15 = vpop.f32.mrf.mxu1 }
 0x798   :  { %11184 = vmatprep.subr.bf16.mxu1 %v11468_v30  ;;  %v8767_v21 = vadd.f32 %v12371_v58, %v8724_v17  ;;  %v8814_v18 = vadd.f32 %v12405_v44, %v8771_v7  ;;  %v11476_v44 = vld [vmem:[#allocation24 + $0x1d8] sm:$0xff]  }
 0x799   :  { %9652 = vmatmul.mubr.bf16.vlgmr.msra.gmra.mxu0 %v12521_v63  ;;  %v8897_v51 = vpop.f32.mrf.mxu0  ;;  %v8940_v30 = vpop.f32.mrf.mxu1 }
 0x79a   :  { %9693 = vmatmul.mubr.bf16.vlgmr.msra.gmra.mxu1 %v9223_v52  ;;  %11163 = vmatpush3.bf16.msra.mxu0 %v11453_v48  ;;  %v8810_v57 = vadd.f32 %v12390_v6, %v8767_v21  ;;  %v8857_v28 = vadd.f32 %v12413_v16, %v8814_v18  ;;  %v11478_v6 = vld [vmem:[#allocation24 + $0x1d0] sm:$0xff]   ;;  %v11480_v16 = vld [vmem:[#allocation24 + $0x1c8] sm:$0xff]  }
 0x79b   :  { %9733 = vmatprep.mubr.bf16.mxu0 %v9226_v38  ;;  %11164 = vmatprep.subr.bf16.mxu0 %v11454_v0  ;;  %v8899_v55 = vpop.f32.mrf.mxu0  ;;  %v8942_v4 = vpop.f32.mrf.mxu1  ;;  %v2695_v38 = vsub.s32 6, %v12053_v60 }
 0x79c   :  { %11185 = vmatpush3.bf16.msra.mxu1 %v11469_v20  ;;  %v8853_v14 = vadd.f32 %v12400_v32, %v8810_v57  ;;  %v9217_v42 = vmax.f32 %v8857_v28, 0.0  ;;  %v11482_v32 = vld [vmem:[#allocation24 + $0x1c0] sm:$0xff]   ;;  %v2699_v20 = vsub.s32 7, %v12053_v60 }
 0x79d   :  { %11186 = vmatprep.subr.bf16.mxu1 %v11470_v29  ;;  %v8901_v48 = vpop.f32.mrf.mxu0  ;;  %v8944_v27 = vpop.f32.mrf.mxu1  ;;  %v2696_v45 = vrot.slane %v12294_v47, %v2695_v38 }
 0x79e   :  { %11165 = vmatpush3.bf16.msra.mxu0 %v11455_v8  ;;  %v9209_v36 = vmax.f32 %v8853_v14, 0.0  ;;  %v2700_v29 = vrot.slane %v12294_v47, %v2699_v20 }
 0x79f   :  { %11166 = vmatprep.subr.bf16.mxu0 %v11456_v3  ;;  %v8896_v33 = vadd.f32 %v8895_v23, %v2696_v45 }
 0x7a0   :  { %11187 = vmatpush3.bf16.msra.mxu1 %v11471_v9  ;;  %v9225_v58 = vpack.c.bf16 %v9217_v42, %v9209_v36  ;;  %v8898_v3 = vadd.f32 %v8897_v51, %v2700_v29  ;;  %v8902_v40 = vadd.f32 %v8901_v48, %v2700_v29 }
 0x7a1   :  { %11188 = vmatprep.subr.bf16.mxu1 %v11472_v43 }
 0x7a2   :  { %11167 = vmatpush3.bf16.msra.mxu0 %v11457_v53  ;;  %v8900_v53 = vadd.f32 %v8899_v55, %v2696_v45  ;;  %v8941_v49 = vadd.f32 %v8940_v30, %v8898_v3  ;;  %v8945_v11 = vadd.f32 %v8944_v27, %v8902_v40 }
 0x7a3   :  { %11168 = vmatprep.subr.bf16.mxu0 %v11458_v5  ;;  %v8939_v5 = vadd.f32 %v8938_v15, %v8896_v33 }
 0x7a4   :  { %11189 = vmatpush3.bf16.msra.mxu1 %v11473_v26  ;;  %v8943_v24 = vadd.f32 %v8942_v4, %v8900_v53 }
 0x7a5   :  { %11190 = vmatprep.subr.bf16.mxu1 %v11474_v34 }
 0x7a6   :  { %11169 = vmatpush3.bf16.msra.mxu0 %v11459_v41 }
 0x7a7   :  { %11170 = vmatprep.subr.bf16.mxu0 %v11460_v35 }
 0x7a8   :  { %11191 = vmatpush3.bf16.msra.mxu1 %v11475_v50 }
 0x7a9   :  { %11192 = vmatprep.subr.bf16.mxu1 %v11476_v44 }
 0x7aa   :  { %11171 = vmatpush3.bf16.msra.mxu0 %v11461_v10 }
 0x7ab   :  { %11172 = vmatprep.subr.bf16.mxu0 %v11462_v2 }
 0x7ac   :  { %11193 = vmatpush3.bf16.msra.mxu1 %v11477_v1 }
 0x7ad   :  { %11194 = vmatprep.subr.bf16.mxu1 %v11478_v6 }
 0x7ae   :  { %11173 = vmatpush3.bf16.msra.mxu0 %v11463_v22 }
 0x7af   :  { %11174 = vmatprep.subr.bf16.mxu0 %v11464_v62 }
 0x7b0   :  { %11195 = vmatpush3.bf16.msra.mxu1 %v11479_v37 }
 0x7b1   :  { %11196 = vmatprep.subr.bf16.mxu1 %v11480_v16 }
 0x7b2   :  { %11175 = vmatpush3.bf16.msra.mxu0 %v11465_v59 }
 0x7b3   :  { %11176 = vmatprep.subr.bf16.mxu0 %v11466_v13 }
 0x7b4   :  { %11197 = vmatpush3.bf16.msra.mxu1 %v11481_v31 }
 0x7b5   :  { %11198 = vmatprep.subr.bf16.mxu1 %v11482_v32 }
 0x7b6   :  { %11177 = vmatpush3.bf16.msra.mxu0 %v11467_v39 }
 0x7b8   :  { %11199 = vmatpush3.bf16.msra.mxu1 %v11483_v25 }
 0x7b9   :  { %9734 = vmatmul.mubr.bf16.vlgmr.msra.gmra.mxu0 %v9225_v58  ;;  %v8981_v19 = vpop.f32.mrf.mxu0  ;;  %v9024_v0 = vpop.f32.mrf.mxu1 }
 0x7ba   :  { %v8982_v41 = vadd.f32 %v8981_v19, %v8939_v5 }
 0x7bb   :  { %v8983_v52 = vpop.f32.mrf.mxu0  ;;  %v9026_v61 = vpop.f32.mrf.mxu1 }
 0x7bc   :  { %v8984_v34 = vadd.f32 %v8983_v52, %v8941_v49  ;;  %v9025_v10 = vadd.f32 %v9024_v0, %v8982_v41 }
 0x7bd   :  { %v8985_v63 = vpop.f32.mrf.mxu0  ;;  %v9028_v8 = vpop.f32.mrf.mxu1 }
 0x7be   :  { %v8986_v35 = vadd.f32 %v8985_v63, %v8943_v24  ;;  %v9027_v54 = vadd.f32 %v9026_v61, %v8984_v34 }
 0x7bf   :  { %v8987_v12 = vpop.f32.mrf.mxu0  ;;  %v9030_v9 = vpop.f32.mrf.mxu1 }
 0x7c0   :  { %v8988_v47 = vadd.f32 %v8987_v12, %v8945_v11  ;;  %v9029_v17 = vadd.f32 %v9028_v8, %v8986_v35 }
 0x7c2   :  { %v9031_v21 = vadd.f32 %v9030_v9, %v8988_v47 }
 0x7f9   :  { %v9067_v43 = vpop.f32.mrf.mxu0  ;;  %v9110_v56 = vpop.f32.mrf.mxu1 }
 0x7fa   :  { %v9068_v7 = vadd.f32 %v9067_v43, %v9025_v10 }
 0x7fb   :  { %v9069_v26 = vpop.f32.mrf.mxu0  ;;  %v9112_v60 = vpop.f32.mrf.mxu1 }
 0x7fc   :  { %v9070_v2 = vadd.f32 %v9069_v26, %v9027_v54  ;;  %v9111_v14 = vadd.f32 %v9110_v56, %v9068_v7 }
 0x7fd   :  { %v9071_v50 = vpop.f32.mrf.mxu0  ;;  %v9114_v46 = vpop.f32.mrf.mxu1 }
 0x7fe   :  { %v9072_v18 = vadd.f32 %v9071_v50, %v9029_v17  ;;  %v9113_v59 = vadd.f32 %v9112_v60, %v9070_v2 }
 0x7ff   :  { %v9073_v22 = vpop.f32.mrf.mxu0  ;;  %v9116_v62 = vpop.f32.mrf.mxu1 }
 0x800   :  { %v9074_v28 = vadd.f32 %v9073_v22, %v9031_v21  ;;  %v9115_v42 = vadd.f32 %v9114_v46, %v9072_v18 }
 0x802   :  { %v9117_v6 = vadd.f32 %v9116_v62, %v9074_v28 }
 0x839   :  { %v9153_v57 = vpop.f32.mrf.mxu0  ;;  %v9196_v13 = vpop.f32.mrf.mxu1 }
 0x83a   :  { %v9154_v44 = vadd.f32 %v9153_v57, %v9111_v14 }
 0x83b   :  { %v9155_v39 = vpop.f32.mrf.mxu0  ;;  %v9198_v58 = vpop.f32.mrf.mxu1 }
 0x83c   :  { %v9156_v36 = vadd.f32 %v9155_v39, %v9113_v59  ;;  %v9197_v15 = vadd.f32 %v9196_v13, %v9154_v44 }
 0x83d   :  { %v9157_v1 = vpop.f32.mrf.mxu0  ;;  %v9200_v16 = vpop.f32.mrf.mxu1 }
 0x83e   :  { %v9158_v37 = vadd.f32 %v9157_v1, %v9115_v42  ;;  %v9199_v32 = vadd.f32 %v9198_v58, %v9156_v36  ;;  %v9211_v27 = vmax.f32 %v9197_v15, 0.0 }
 0x83f   :  { %v9159_v31 = vpop.f32.mrf.mxu0  ;;  %v9202_v51 = vpop.f32.mrf.mxu1 }
 0x840   :  { %v9201_v25 = vadd.f32 %v9200_v16, %v9158_v37  ;;  %v9160_v23 = vadd.f32 %v9159_v31, %v9117_v6  ;;  %v9212_v4 = vmax.f32 %v9199_v32, 0.0 }
 0x842   :  { %v9203_v30 = vadd.f32 %v9202_v51, %v9160_v23  ;;  %v9219_v55 = vmax.f32 %v9201_v25, 0.0 }
 0x844   :  { %v9220_v48 = vmax.f32 %v9203_v30, 0.0  ;;  %v9227_v0 = vpack.c.bf16 %v9219_v55, %v9211_v27 }
 0x846   :  { %v9228_v19 = vpack.c.bf16 %v9220_v48, %v9212_v4 }
 0x848   :  { %9774 = vmatprep.mubr.bf16.mxu1 %v9228_v19 }
 0x849   :  { %9775 = vmatmul.mubr.bf16.vlgmr.msra.gmra.mxu1 %v9227_v0 }
 0x84a   :  { %11796 = shalt.err (!%p11793_p9)
}
 0x84b   :  { %9808 = dma.vmem_to_hbm [thread:$0]  %s9803_s4, 256, %s12476_s16, [#allocation29], %s11874_s27, %s11874_s27, %s11875_s28  }
 0x84c   :  { %s11805_s6 = scalar_lea.vmem %s9791_s0, 256  ;;  %p11810_p11 = scmp.lt.s32.totalorder %s9791_s0, %s9791_s0 }
 0x84d   :  { %p11806_p10 = scmp.ne.s32.totalorder %s9791_s0, %s11805_s6  ;;  %p11811_p12 = scmp.lt.s32.totalorder %s11805_s6, %s11805_s6 }
 0x84f   :  { %p11812_p13 = por %p11811_p12, %p11810_p11 }
 0x851   :  { %p11813_p0 = pnand %p11812_p13, %p11806_p10 }
 0x853   :  { %11816 = shalt.err (!%p11813_p0)
}
 0x854   :  { %9796 = dma.vmem_to_hbm [thread:$0]  %s9791_s0, 256, %s12475_s15, [#allocation6], %s11874_s27, %s11874_s27, %s11875_s28   ;;  %v10996_v3 = vld [vmem:[#allocation25] ss:$0 sm:$0xff] }
 0x855   :  { %s11896_s15 = smov [#allocation30]  }
 0x856   :  { %s9814_s16 = sshll.u32 %s11896_s15, 4  ;;  %s9815_s16 = int_to_ptr.vmem [resolvable:$true] %s9814_s16 }
 0x857   :  { %s11825_s1 = scalar_lea.vmem %s9815_s16, 256  ;;  %p11830_p2 = scmp.lt.s32.totalorder %s9815_s16, %s9815_s16 }
 0x858   :  { %p11826_p1 = scmp.ne.s32.totalorder %s9815_s16, %s11825_s1  ;;  %p11831_p3 = scmp.lt.s32.totalorder %s11825_s1, %s11825_s1 }
 0x859   :  { %v11134_v52 = vpop.f32.mrf.mxu0 }
 0x85a   :  { %v11156_v38 = vpop.f32.mrf.mxu1  ;;  %p11832_p4 = por %p11831_p3, %p11830_p2 }
 0x85b   :  { %v11135_v20 = vpop.f32.mrf.mxu0 }
 0x85c   :  { %v11157_v8 = vpop.f32.mrf.mxu1  ;;  %v11136_v12 = vadd.f32 %v11135_v20, %v11134_v52  ;;  %p11833_p5 = pnand %p11832_p4, %p11826_p1 }
 0x85d   :  { %v11137_v61 = vpop.f32.mrf.mxu0  ;;  %v11158_v49 = vadd.f32 %v11157_v8, %v11156_v38 }
 0x85e   :  { %v11159_v9 = vpop.f32.mrf.mxu1  ;;  %v9654_v43 = vadd.f32 %v11136_v12, %v10996_v3 }
 0x85f   :  { %v11138_v63 = vpop.f32.mrf.mxu0 }
 0x860   :  { %v11139_v53 = vadd.f32 %v11138_v63, %v11137_v61  ;;  %v11160_v56 = vpop.f32.mrf.mxu1  ;;  %v9695_v24 = vadd.f32 %v11158_v49, %v9654_v43 }
 0x861   :  { %v11161_v41 = vadd.f32 %v11160_v56, %v11159_v9 }
 0x862   :  { %v9657_v34 = vadd.f32 %v11139_v53, %v10996_v3 }
 0x864   :  { %v9698_v47 = vadd.f32 %v11161_v41, %v9657_v34 }
 0x879   :  { %v11178_v29 = vpop.f32.mrf.mxu0 }
 0x87b   :  { %v11179_v45 = vpop.f32.mrf.mxu0 }
 0x87c   :  { %v11180_v40 = vadd.f32 %v11179_v45, %v11178_v29 }
 0x87d   :  { %v11181_v33 = vpop.f32.mrf.mxu0 }
 0x87e   :  { %v9736_v11 = vadd.f32 %v11180_v40, %v9695_v24 }
 0x87f   :  { %v11182_v5 = vpop.f32.mrf.mxu0 }
 0x880   :  { %v11183_v35 = vadd.f32 %v11182_v5, %v11181_v33 }
 0x882   :  { %v9739_v17 = vadd.f32 %v11183_v35, %v9698_v47 }
 0x909   :  { %v11200_v26 = vpop.f32.mrf.mxu1 }
 0x90b   :  { %v11201_v60 = vpop.f32.mrf.mxu1 }
 0x90c   :  { %v11202_v50 = vadd.f32 %v11201_v60, %v11200_v26 }
 0x90d   :  { %v11203_v54 = vpop.f32.mrf.mxu1 }
 0x90e   :  { %v9777_v46 = vadd.f32 %v11202_v50, %v9736_v11 }
 0x90f   :  { %v11204_v10 = vpop.f32.mrf.mxu1 }
 0x910   :  { %9783 = vst [vmem:[#allocation30] sm:$0xff] %v9777_v46  ;;  %v11205_v2 = vadd.f32 %v11204_v10, %v11203_v54 }
 0x912   :  { %v9780_v7 = vadd.f32 %v11205_v2, %v9739_v17 }
 0x914   :  { %9784 = vst [vmem:[#allocation30 + $0x8] sm:$0xff] %v9780_v7 }
 0x915   :  { %11836 = shalt.err (!%p11833_p5)
}
 0x916   :  { %9820 = dma.vmem_to_hbm [thread:$0]  %s9815_s16, 256, %s12477_s17, [#allocation29], %s11874_s27, %s11874_s27, %s11875_s28  }
 0x917   :  { %11863 = dma.done.wait [#allocation6], 256  }
 0x918   :  { %11864 = vsyncadd [#allocation6], 4294967040 }
 0x919   :  { %11865 = dma.done.wait [#allocation29], 512  }
 0x91a   :  { %11866 = vsyncadd [#allocation29], 4294966784 }
 0x91b   :  { %9830 = vsyncpa [#allocation5], 1 }
 0x91c   :  { %9831 = vsyncpa [#allocation8], 1 }
 0x91d   :  { %9832 = vsyncpa [#allocation11], 1 }
 0x91e   :  { %9833 = vsyncpa [#allocation14], 1 }
 0x91f   :  { %9834 = vsyncpa [#allocation17], 1 }
 0x920   :  { %9835 = vsyncpa [#allocation20], 1 }
 0x921   :  { %9836 = vsyncpa [#allocation23], 1 }
 0x922   :  { %9837 = vsyncpa [#allocation26], 1 }
 0x923   :  { %9838 = vsyncpa [#allocation6], 1 }
 0x924   :  { %9839 = vsyncpa [#allocation29], 1 }
 0x925   :  { %9840 = vsyncmov [#allocation3] }
 0x928   :  { %s9841_s23 = vpop.sfrf %9840 }
 0x929   :  { %p11061_p6 = scmp.ne.s32.totalorder %s9841_s23, 0 }
 0x92b   :  { %9845 = shalt.err (%p11061_p6)  }

</bundles_post_ra>
